<compile_context>
chip_gen: v5e
topology: v5e:2x2
jax: 0.10.0
libtpu: 0.0.40
codegen_flags: <defaults>
</compile_context>

<pallas_src>
import functools

import jax
import jax.numpy as jnp
from jax.experimental import pallas as pl
from jax.experimental.pallas import tpu as pltpu


# ---------------------------------------------------------------------------
# small in-kernel helpers
# ---------------------------------------------------------------------------
def _dot32(a, b):
    """f32 MXU matmul at full (multi-pass) precision for the pinv-sensitive path."""
    return jnp.dot(a, b, preferred_element_type=jnp.float32,
                   precision=jax.lax.Precision.HIGHEST)


def _softmax(s, approx=True):
    s = s - jnp.max(s, axis=-1, keepdims=True)
    e = jnp.exp(s)
    d = jnp.sum(e, axis=-1, keepdims=True)
    if approx:
        # EUP reciprocal: the error is a per-row rescaling of a softmax row, which
        # propagates only multiplicatively (never through the pinv conditioning).
        return e * pl.reciprocal(d, approx=True)
    return e / d


# ---------------------------------------------------------------------------
# Pass 1: LayerNorm + fused QKV projection + per-batch |attn2| sum maxima
# ---------------------------------------------------------------------------
def _ln_qkv_stats_kernel(x_ref, g_ref, b_ref, wqkv_ref, pool_ref,
                         qkv_ref, rmax_ref, cmax_ref, *, heads):
    D = x_ref.shape[2]
    dh = D // heads
    m = pool_ref.shape[0]

    x = x_ref[0].astype(jnp.float32)                       # (n, D)

    # LayerNorm (eps = 1e-5, affine)
    mu = jnp.mean(x, axis=-1, keepdims=True)
    xc = x - mu
    var = jnp.mean(xc * xc, axis=-1, keepdims=True)
    xn = xc * jax.lax.rsqrt(var + 1e-5) * g_ref[...] + b_ref[...]

    # Fused QKV projection (W_q columns pre-scaled by dim_head**-0.5 in the wrapper).
    # One lane-dense (n, 3D) store; q/k/v are recomputed per-head from this in pass 2.
    qkv_ref[0] = _dot32(xn, wqkv_ref[...])

    # Landmark mean pooling for q and k of ALL heads: one lane-dense (m,n)@(n,2D).
    pooled = _dot32(pool_ref[...], qkv_ref[0, :, :2 * D])  # (m, 2D)

    # Per-head |attn2| row/col sums -> per-batch maxima (wrapper takes the global
    # max over batch & heads for the torch.max-style Newton-Schulz init denominator).
    rmax = jnp.zeros((m, 1), jnp.float32)
    cmax = jnp.zeros((1, m), jnp.float32)
    for h in range(heads):
        ql = pooled[:, h * dh:(h + 1) * dh]
        kl = pooled[:, D + h * dh:D + (h + 1) * dh]
        a2 = _softmax(_dot32(ql, kl.T))                    # (m, m)
        ab = jnp.abs(a2)
        rmax = jnp.maximum(rmax, jnp.sum(ab, axis=-1, keepdims=True))
        cmax = jnp.maximum(cmax, jnp.sum(ab, axis=-2, keepdims=True))
    rmax_ref[0] = rmax
    cmax_ref[0] = cmax


# ---------------------------------------------------------------------------
# Pass 2: recompute attn maps, Newton-Schulz pinv, conv residual, projection
# ---------------------------------------------------------------------------
def _nystrom_out_kernel(x_ref, qkv_ref, pool_ref, denom_ref, wlane_ref,
                        wout_ref, bout_ref, out_ref,
                        pooled_ref, vpad_ref, merged_ref, *, heads, pinv_iters):
    n = x_ref.shape[1]
    D = x_ref.shape[2]
    dh = D // heads
    m = pool_ref.shape[0]
    ksz = wlane_ref.shape[0]
    pad = (ksz - 1) // 2

    inv_denom = 1.0 / denom_ref[0]                         # scalar from SMEM

    # --- depthwise residual conv over the sequence, all heads at once ----------
    # pad-and-slice taps over the lane-dense (n, D) v tile: O(n*D) VMEM, plain
    # loads + VPU FMAs (replaces the (heads, n, n) band-matrix matmuls).
    v_all = qkv_ref[0, :, 2 * D:3 * D]                     # (n, D)
    vpad_ref[0:pad, :] = jnp.zeros((pad, D), jnp.float32)
    vpad_ref[pad + n:, :] = jnp.zeros((pad, D), jnp.float32)
    vpad_ref[pad:pad + n, :] = v_all
    conv = jnp.zeros((n, D), jnp.float32)
    for t in range(ksz):
        conv = conv + vpad_ref[t:t + n, :] * wlane_ref[t:t + 1, :]
    merged_ref[...] = conv                                 # init merged head outputs

    # --- landmarks for all heads: one lane-dense matmul (recomputed, not DMA'd) -
    pooled_ref[...] = _dot32(pool_ref[...], qkv_ref[0, :, :2 * D])   # (m, 2D)

    eye = (jax.lax.broadcasted_iota(jnp.int32, (m, m), 0)
           == jax.lax.broadcasted_iota(jnp.int32, (m, m), 1)).astype(jnp.float32)

    for h in range(heads):
        q = qkv_ref[0, :, h * dh:(h + 1) * dh]             # (n, dh), pre-scaled
        k = qkv_ref[0, :, D + h * dh:D + (h + 1) * dh]     # (n, dh)
        vh = qkv_ref[0, :, 2 * D + h * dh:2 * D + (h + 1) * dh]
        ql = pooled_ref[:, h * dh:(h + 1) * dh]            # (m, dh)
        kl = pooled_ref[:, D + h * dh:D + (h + 1) * dh]

        a1 = _softmax(_dot32(q, kl.T))                     # (n, m)
        a2 = _softmax(_dot32(ql, kl.T))                    # (m, m)
        # attn3's normalization feeds the pinv-conditioned path: keep the exact divide.
        a3 = _softmax(_dot32(ql, k.T), approx=False)       # (m, n)

        # Moore-Penrose pinv of attn2 (7th-order Newton-Schulz, as in the
        # nystrom_attention package), f32 throughout.
        z = a2.T * inv_denom
        for _ in range(pinv_iters):
            xz = _dot32(a2, z)
            z = 0.25 * _dot32(
                z, 13.0 * eye - _dot32(xz, 15.0 * eye - _dot32(xz, 7.0 * eye - xz)))

        kv = _dot32(a3, vh)                                # (m, dh)
        oh = _dot32(_dot32(a1, z), kv)                     # (n, dh)
        # accumulate into the lane-dense VMEM scratch (keeps vreg pressure low)
        merged_ref[:, h * dh:(h + 1) * dh] = merged_ref[:, h * dh:(h + 1) * dh] + oh

    # --- merged output projection: single lane-dense bf16 MXU matmul -----------
    proj_in = merged_ref[...].astype(jnp.bfloat16)
    proj = jnp.dot(proj_in, wout_ref[...], preferred_element_type=jnp.float32)
    out_ref[0] = (x_ref[0].astype(jnp.float32) + bout_ref[...] + proj).astype(out_ref.dtype)


# ---------------------------------------------------------------------------
# Wrapper
# ---------------------------------------------------------------------------
def trans_layer_forward(x, params, *, heads=8, pinv_iters=6):
    """Pallas TransLayer forward: x + NystromAttention(LayerNorm(x)). x: (B, n, D)."""
    B, n, D = x.shape
    assert D % heads == 0
    dh = D // heads
    m = D // 2                                             # num_landmarks = dim // 2
    # TODO(synk): the reference front-zero-pads the sequence when n % num_landmarks != 0
    # (and slices out[:, -n:] at the end); that path is not implemented here.
    assert n % m == 0, "sequence length must be a multiple of num_landmarks (= dim // 2)"
    l = n // m

    f32 = jnp.float32
    gamma = params["ln_g"].reshape(1, D).astype(f32)
    beta = params["ln_b"].reshape(1, D).astype(f32)
    # Fold the q-scale (dim_head ** -0.5) into W_q's columns (free, saves in-kernel work).
    qscale = jnp.concatenate([jnp.full((D,), dh ** -0.5, f32), jnp.ones((2 * D,), f32)])
    wqkv = params["wqkv"].astype(f32) * qscale[None, :]    # (D, 3D) = [Wq | Wk | Wv]
    wout = params["wout"].astype(jnp.bfloat16)             # bf16 output projection
    bout = params["bout"].reshape(1, D).astype(f32)
    # Depthwise conv weights broadcast to lanes: wlane[t, h*dh + j] = w_conv[h, t].
    wlane = jnp.repeat(params["w_conv"].astype(f32).T, dh, axis=1)     # (ksz, D)
    ksz = wlane.shape[0]
    pad = (ksz - 1) // 2

    # Landmark mean-pooling as a constant (m, n) matrix (entries 1/l on each group).
    pool = (jnp.arange(m)[:, None] == (jnp.arange(n)[None, :] // l)).astype(f32) / l

    xf = x.astype(f32)

    # ---- pass 1: LayerNorm + QKV + per-batch |attn2| row/col-sum maxima -------
    qkv, rmax, cmax = pl.pallas_call(
        functools.partial(_ln_qkv_stats_kernel, heads=heads),
        out_shape=(
            jax.ShapeDtypeStruct((B, n, 3 * D), f32),
            jax.ShapeDtypeStruct((B, m, 1), f32),
            jax.ShapeDtypeStruct((B, 1, m), f32),
        ),
        grid_spec=pltpu.PrefetchScalarGridSpec(
            num_scalar_prefetch=0,
            grid=(B,),
            in_specs=[
                pl.BlockSpec((1, n, D), lambda b: (b, 0, 0)),        # x
                pl.BlockSpec((1, D), lambda b: (0, 0)),              # ln gamma
                pl.BlockSpec((1, D), lambda b: (0, 0)),              # ln beta
                pl.BlockSpec((D, 3 * D), lambda b: (0, 0)),          # Wqkv (q pre-scaled)
                pl.BlockSpec((m, n), lambda b: (0, 0)),              # pooling matrix
            ],
            out_specs=[
                pl.BlockSpec((1, n, 3 * D), lambda b: (b, 0, 0)),    # qkv (lane-dense)
                pl.BlockSpec((1, m, 1), lambda b: (b, 0, 0)),        # max |a2| row sums
                pl.BlockSpec((1, 1, m), lambda b: (b, 0, 0)),        # max |a2| col sums
            ],
        ),
        compiler_params=pltpu.CompilerParams(dimension_semantics=("parallel",)),
    )(xf, gamma, beta, wqkv, pool)

    # Global (over batch AND heads) Newton-Schulz init denominator, exactly as the
    # reference's torch.max over all elements.  Tiny reduction; stays out of HBM-heavy
    # intermediates (no attn maps / z0 materialized).
    denom = (jnp.max(rmax) * jnp.max(cmax)).reshape(1).astype(f32)

    # ---- pass 2: recompute attn maps from qkv, pinv, conv residual, projection -
    out = pl.pallas_call(
        functools.partial(_nystrom_out_kernel, heads=heads, pinv_iters=pinv_iters),
        out_shape=jax.ShapeDtypeStruct((B, n, D), x.dtype),
        grid_spec=pltpu.PrefetchScalarGridSpec(
            num_scalar_prefetch=0,
            grid=(B,),
            in_specs=[
                pl.BlockSpec((1, n, D), lambda b: (b, 0, 0)),        # x (residual)
                pl.BlockSpec((1, n, 3 * D), lambda b: (b, 0, 0)),    # qkv
                pl.BlockSpec((m, n), lambda b: (0, 0)),              # pooling matrix
                pl.BlockSpec(memory_space=pltpu.MemorySpace.SMEM),   # denom scalar
                pl.BlockSpec((ksz, D), lambda b: (0, 0)),            # conv lane weights
                pl.BlockSpec((D, D), lambda b: (0, 0)),              # Wout (bf16)
                pl.BlockSpec((1, D), lambda b: (0, 0)),              # bout
            ],
            out_specs=pl.BlockSpec((1, n, D), lambda b: (b, 0, 0)),
            scratch_shapes=[
                pltpu.VMEM((m, 2 * D), f32),                         # pooled landmarks
                pltpu.VMEM((n + 2 * pad, D), f32),                   # zero-padded v
                pltpu.VMEM((n, D), f32),                             # merged head outputs
            ],
        ),
        compiler_params=pltpu.CompilerParams(dimension_semantics=("parallel",)),
    )(xf, qkv, pool, denom, wlane, wout, bout)

    # to_out Dropout(p=0.1) is identity in eval mode.
    return out.astype(x.dtype)


# ---------------------------------------------------------------------------
# Synthetic parameters + pure-JAX reference for validation
# ---------------------------------------------------------------------------
def init_params(key, D, heads=8, conv_kernel=33):
    ks = jax.random.split(key, 6)
    f32 = jnp.float32
    return {
        "ln_g": 1.0 + 0.1 * jax.random.normal(ks[0], (D,), f32),
        "ln_b": 0.1 * jax.random.normal(ks[1], (D,), f32),
        "wqkv": jax.random.normal(ks[2], (D, 3 * D), f32) / jnp.sqrt(D).astype(f32),
        "wout": jax.random.normal(ks[3], (D, D), f32) / jnp.sqrt(D).astype(f32),
        "bout": 0.02 * jax.random.normal(ks[4], (D,), f32),
        "w_conv": 0.05 * jax.random.normal(ks[5], (heads, conv_kernel), f32),
    }


def _ref_forward(x, params, *, heads=8, pinv_iters=6):
    """Pure-JAX reference faithful to TransLayer + nystrom_attention (eval mode)."""
    with jax.default_matmul_precision("highest"):
        B, n, D = x.shape
        dh = D // heads
        m = D // 2
        l = n // m

        mu = jnp.mean(x, axis=-1, keepdims=True)
        var = jnp.mean((x - mu) ** 2, axis=-1, keepdims=True)
        xn = (x - mu) / jnp.sqrt(var + 1e-5) * params["ln_g"] + params["ln_b"]

        qkv = xn @ params["wqkv"]
        q, k, v = jnp.split(qkv, 3, axis=-1)
        sh = lambda t: t.reshape(B, n, heads, dh).transpose(0, 2, 1, 3)   # b h n d
        q, k, v = sh(q), sh(k), sh(v)
        q = q * dh ** -0.5

        ql = q.reshape(B, heads, m, l, dh).sum(axis=3) / l
        kl = k.reshape(B, heads, m, l, dh).sum(axis=3) / l

        sm = lambda s: jax.nn.softmax(s, axis=-1)
        a1 = sm(jnp.einsum("bhid,bhjd->bhij", q, kl))
        a2 = sm(jnp.einsum("bhid,bhjd->bhij", ql, kl))
        a3 = sm(jnp.einsum("bhid,bhjd->bhij", ql, k))

        abs2 = jnp.abs(a2)
        z = jnp.swapaxes(a2, -1, -2) / (jnp.max(abs2.sum(-1)) * jnp.max(abs2.sum(-2)))
        eye = jnp.eye(m, dtype=x.dtype)
        for _ in range(pinv_iters):
            xz = a2 @ z
            z = 0.25 * (z @ (13.0 * eye - xz @ (15.0 * eye - xz @ (7.0 * eye - xz))))

        out = (a1 @ z) @ (a3 @ v)                          # (B, h, n, dh)

        w = params["w_conv"]
        ksz = w.shape[1]
        pad = (ksz - 1) // 2
        vp = jnp.pad(v, ((0, 0), (0, 0), (pad, pad), (0, 0)))
        conv = sum(w[None, :, t, None, None] * vp[:, :, t:t + n, :] for t in range(ksz))
        out = out + conv

        out = out.transpose(0, 2, 1, 3).reshape(B, n, D)
        out = out @ params["wout"] + params["bout"]
        return x + out


if __name__ == "__main__":
    # TransLayer default dim=128 -> heads=8, dim_head=16, num_landmarks=64.
    B, n, D, heads = 2, 128, 128, 8

    key = jax.random.PRNGKey(0)
    kx, kp = jax.random.split(key)
    x = jax.random.normal(kx, (B, n, D), jnp.float32)
    params = init_params(kp, D, heads=heads)

    out = jax.block_until_ready(trans_layer_forward(x, params, heads=heads))
    ref = _ref_forward(x, params, heads=heads)

    assert out.shape == (B, n, D)
    err = float(jnp.max(jnp.abs(out - ref)))
    # Tolerance covers the intentional bf16 output projection + EUP approx reciprocal
    # in softmax normalizations; everything feeding the pseudo-inverse stays f32/exact.
    assert jnp.allclose(out, ref, atol=2e-2, rtol=2e-2), (
        f"mismatch vs reference (max abs err {err})")
    print("KERNEL_OK")
</pallas_src>

<mosaic_0001>
module attributes {stable_mosaic.version = 11 : i64} {
  func.func @_ln_qkv_stats_kernel(%arg0: i32, %arg1: memref<1x128x128xf32, #tpu.memory_space<vmem>>, %arg2: memref<1x128xf32, #tpu.memory_space<vmem>>, %arg3: memref<1x128xf32, #tpu.memory_space<vmem>>, %arg4: memref<128x384xf32, #tpu.memory_space<vmem>>, %arg5: memref<64x128xf32, #tpu.memory_space<vmem>>, %arg6: memref<1x128x384xf32, #tpu.memory_space<vmem>>, %arg7: memref<1x64x1xf32, #tpu.memory_space<vmem>>, %arg8: memref<1x1x64xf32, #tpu.memory_space<vmem>>) attributes {dimension_semantics = [#tpu.dimension_semantics<parallel>], iteration_bounds = array<i64: 2>, scalar_prefetch = 0 : i64, scratch_operands = 0 : i64, tpu.core_type = #tpu.core_type<tc>, window_params = [{transform_indices = @transform_0, window_bounds = array<i64: 1, 128, 128>}, {pipeline_mode = #tpu.pipeline_mode<synchronous>, transform_indices = @transform_1, window_bounds = array<i64: 1, 128>}, {pipeline_mode = #tpu.pipeline_mode<synchronous>, transform_indices = @transform_2, window_bounds = array<i64: 1, 128>}, {pipeline_mode = #tpu.pipeline_mode<synchronous>, transform_indices = @transform_3, window_bounds = array<i64: 128, 384>}, {pipeline_mode = #tpu.pipeline_mode<synchronous>, transform_indices = @transform_4, window_bounds = array<i64: 64, 128>}, {transform_indices = @transform_5, window_bounds = array<i64: 1, 128, 384>}, {transform_indices = @transform_6, window_bounds = array<i64: 1, 64, 1>}, {transform_indices = @transform_7, window_bounds = array<i64: 1, 1, 64>}]} {
    %c0 = arith.constant 0 : index
    %c0_0 = arith.constant 0 : index
    %c0_1 = arith.constant 0 : index
    %0 = vector.load %arg1[%c0, %c0_0, %c0_1] : memref<1x128x128xf32, #tpu.memory_space<vmem>>, vector<1x128x128xf32>
    %1 = vector.shape_cast %0 : vector<1x128x128xf32> to vector<128x128xf32>
    %cst = arith.constant dense<0.000000e+00> : vector<128xf32>
    %2 = vector.multi_reduction <add>, %1, %cst [1] : vector<128x128xf32> to vector<128xf32>
    %3 = vector.shape_cast %2 : vector<128xf32> to vector<128x1xf32>
    %cst_2 = arith.constant 1.280000e+02 : f32
    %4 = vector.broadcast %cst_2 : f32 to vector<128x1xf32>
    %5 = arith.divf %3, %4 : vector<128x1xf32>
    %6 = vector.broadcast %5 : vector<128x1xf32> to vector<128x128xf32>
    %7 = arith.subf %1, %6 : vector<128x128xf32>
    %8 = arith.mulf %7, %7 : vector<128x128xf32>
    %cst_3 = arith.constant dense<0.000000e+00> : vector<128xf32>
    %9 = vector.multi_reduction <add>, %8, %cst_3 [1] : vector<128x128xf32> to vector<128xf32>
    %10 = vector.shape_cast %9 : vector<128xf32> to vector<128x1xf32>
    %cst_4 = arith.constant 1.280000e+02 : f32
    %11 = vector.broadcast %cst_4 : f32 to vector<128x1xf32>
    %12 = arith.divf %10, %11 : vector<128x1xf32>
    %cst_5 = arith.constant 9.99999974E-6 : f32
    %13 = vector.broadcast %cst_5 : f32 to vector<128x1xf32>
    %14 = arith.addf %12, %13 : vector<128x1xf32>
    %15 = math.rsqrt %14 : vector<128x1xf32>
    %16 = vector.broadcast %15 : vector<128x1xf32> to vector<128x128xf32>
    %17 = arith.mulf %7, %16 : vector<128x128xf32>
    %c0_6 = arith.constant 0 : index
    %c0_7 = arith.constant 0 : index
    %18 = vector.load %arg2[%c0_6, %c0_7] : memref<1x128xf32, #tpu.memory_space<vmem>>, vector<1x128xf32>
    %19 = vector.broadcast %18 : vector<1x128xf32> to vector<128x128xf32>
    %20 = arith.mulf %17, %19 : vector<128x128xf32>
    %c0_8 = arith.constant 0 : index
    %c0_9 = arith.constant 0 : index
    %21 = vector.load %arg3[%c0_8, %c0_9] : memref<1x128xf32, #tpu.memory_space<vmem>>, vector<1x128xf32>
    %22 = vector.broadcast %21 : vector<1x128xf32> to vector<128x128xf32>
    %23 = arith.addf %20, %22 : vector<128x128xf32>
    %c0_10 = arith.constant 0 : index
    %c0_11 = arith.constant 0 : index
    %24 = vector.load %arg4[%c0_10, %c0_11] : memref<128x384xf32, #tpu.memory_space<vmem>>, vector<128x384xf32>
    %cst_12 = arith.constant dense<0.000000e+00> : vector<128x384xf32>
    %25 = tpu.matmul %23, %24, %cst_12 {dimension_numbers = #tpu.dot_dimension_numbers<[1], [0], [0], [1], [0, 0, 1, 1], [], []>, precision = #tpu.contract_precision<fp32>} : vector<128x128xf32>, vector<128x384xf32>, vector<128x384xf32> -> vector<128x384xf32>
    %c0_13 = arith.constant 0 : index
    %c0_14 = arith.constant 0 : index
    %c0_15 = arith.constant 0 : index
    %26 = vector.load %arg6[%c0_13, %c0_14, %c0_15] : memref<1x128x384xf32, #tpu.memory_space<vmem>>, vector<1x128x384xf32>
    %27 = vector.shape_cast %26 : vector<1x128x384xf32> to vector<128x384xf32>
    %28 = vector.shape_cast %25 : vector<128x384xf32> to vector<1x128x384xf32>
    tpu.vector_store %arg6[%c0_13, %c0_14, %c0_15], %28 {strides = array<i32>} : memref<1x128x384xf32, #tpu.memory_space<vmem>>, vector<1x128x384xf32>,
    %c0_16 = arith.constant 0 : index
    %c0_17 = arith.constant 0 : index
    %29 = vector.load %arg5[%c0_16, %c0_17] : memref<64x128xf32, #tpu.memory_space<vmem>>, vector<64x128xf32>
    %c0_18 = arith.constant 0 : index
    %c0_19 = arith.constant 0 : index
    %c0_20 = arith.constant 0 : index
    %30 = vector.load %arg6[%c0_18, %c0_19, %c0_20] : memref<1x128x384xf32, #tpu.memory_space<vmem>>, vector<1x128x256xf32>
    %31 = vector.shape_cast %30 : vector<1x128x256xf32> to vector<128x256xf32>
    %cst_21 = arith.constant dense<0.000000e+00> : vector<64x256xf32>
    %32 = tpu.matmul %29, %31, %cst_21 {dimension_numbers = #tpu.dot_dimension_numbers<[1], [0], [0], [1], [0, 0, 1, 1], [], []>, precision = #tpu.contract_precision<fp32>} : vector<64x128xf32>, vector<128x256xf32>, vector<64x256xf32> -> vector<64x256xf32>
    %cst_22 = arith.constant 0.000000e+00 : f32
    %33 = vector.broadcast %cst_22 : f32 to vector<64x1xf32>
    %cst_23 = arith.constant 0.000000e+00 : f32
    %34 = vector.broadcast %cst_23 : f32 to vector<1x64xf32>
    %35 = vector.extract_strided_slice %32 {offsets = [0, 0], sizes = [64, 16], strides = [1, 1]} : vector<64x256xf32> to vector<64x16xf32>
    %36 = vector.extract_strided_slice %32 {offsets = [0, 128], sizes = [64, 16], strides = [1, 1]} : vector<64x256xf32> to vector<64x16xf32>
    %37 = tpu.transpose %36, [1, 0] : vector<64x16xf32> -> vector<16x64xf32>
    %cst_24 = arith.constant dense<0.000000e+00> : vector<64x64xf32>
    %38 = tpu.matmul %35, %37, %cst_24 {dimension_numbers = #tpu.dot_dimension_numbers<[1], [0], [0], [1], [0, 0, 1, 1], [], []>, precision = #tpu.contract_precision<fp32>} : vector<64x16xf32>, vector<16x64xf32>, vector<64x64xf32> -> vector<64x64xf32>
    %cst_25 = arith.constant dense<0xFF800000> : vector<64xf32>
    %39 = vector.multi_reduction <maximumf>, %38, %cst_25 [1] : vector<64x64xf32> to vector<64xf32>
    %40 = vector.shape_cast %39 : vector<64xf32> to vector<64x1xf32>
    %41 = vector.broadcast %40 : vector<64x1xf32> to vector<64x64xf32>
    %42 = arith.subf %38, %41 : vector<64x64xf32>
    %43 = math.exp %42 : vector<64x64xf32>
    %cst_26 = arith.constant dense<0.000000e+00> : vector<64xf32>
    %44 = vector.multi_reduction <add>, %43, %cst_26 [1] : vector<64x64xf32> to vector<64xf32>
    %45 = vector.shape_cast %44 : vector<64xf32> to vector<64x1xf32>
    %46 = tpu.reciprocal %45 {approx = true} : vector<64x1xf32> -> vector<64x1xf32>
    %47 = vector.broadcast %46 : vector<64x1xf32> to vector<64x64xf32>
    %48 = arith.mulf %43, %47 : vector<64x64xf32>
    %49 = math.absf %48 : vector<64x64xf32>
    %cst_27 = arith.constant dense<0.000000e+00> : vector<64xf32>
    %50 = vector.multi_reduction <add>, %49, %cst_27 [1] : vector<64x64xf32> to vector<64xf32>
    %51 = vector.shape_cast %50 : vector<64xf32> to vector<64x1xf32>
    %52 = arith.maximumf %33, %51 : vector<64x1xf32>
    %cst_28 = arith.constant dense<0.000000e+00> : vector<64xf32>
    %53 = vector.multi_reduction <add>, %49, %cst_28 [0] : vector<64x64xf32> to vector<64xf32>
    %54 = vector.shape_cast %53 : vector<64xf32> to vector<1x64xf32>
    %55 = arith.maximumf %34, %54 : vector<1x64xf32>
    %56 = vector.extract_strided_slice %32 {offsets = [0, 16], sizes = [64, 16], strides = [1, 1]} : vector<64x256xf32> to vector<64x16xf32>
    %57 = vector.extract_strided_slice %32 {offsets = [0, 144], sizes = [64, 16], strides = [1, 1]} : vector<64x256xf32> to vector<64x16xf32>
    %58 = tpu.transpose %57, [1, 0] : vector<64x16xf32> -> vector<16x64xf32>
    %cst_29 = arith.constant dense<0.000000e+00> : vector<64x64xf32>
    %59 = tpu.matmul %56, %58, %cst_29 {dimension_numbers = #tpu.dot_dimension_numbers<[1], [0], [0], [1], [0, 0, 1, 1], [], []>, precision = #tpu.contract_precision<fp32>} : vector<64x16xf32>, vector<16x64xf32>, vector<64x64xf32> -> vector<64x64xf32>
    %cst_30 = arith.constant dense<0xFF800000> : vector<64xf32>
    %60 = vector.multi_reduction <maximumf>, %59, %cst_30 [1] : vector<64x64xf32> to vector<64xf32>
    %61 = vector.shape_cast %60 : vector<64xf32> to vector<64x1xf32>
    %62 = vector.broadcast %61 : vector<64x1xf32> to vector<64x64xf32>
    %63 = arith.subf %59, %62 : vector<64x64xf32>
    %64 = math.exp %63 : vector<64x64xf32>
    %cst_31 = arith.constant dense<0.000000e+00> : vector<64xf32>
    %65 = vector.multi_reduction <add>, %64, %cst_31 [1] : vector<64x64xf32> to vector<64xf32>
    %66 = vector.shape_cast %65 : vector<64xf32> to vector<64x1xf32>
    %67 = tpu.reciprocal %66 {approx = true} : vector<64x1xf32> -> vector<64x1xf32>
    %68 = vector.broadcast %67 : vector<64x1xf32> to vector<64x64xf32>
    %69 = arith.mulf %64, %68 : vector<64x64xf32>
    %70 = math.absf %69 : vector<64x64xf32>
    %cst_32 = arith.constant dense<0.000000e+00> : vector<64xf32>
    %71 = vector.multi_reduction <add>, %70, %cst_32 [1] : vector<64x64xf32> to vector<64xf32>
    %72 = vector.shape_cast %71 : vector<64xf32> to vector<64x1xf32>
    %73 = arith.maximumf %52, %72 : vector<64x1xf32>
    %cst_33 = arith.constant dense<0.000000e+00> : vector<64xf32>
    %74 = vector.multi_reduction <add>, %70, %cst_33 [0] : vector<64x64xf32> to vector<64xf32>
    %75 = vector.shape_cast %74 : vector<64xf32> to vector<1x64xf32>
    %76 = arith.maximumf %55, %75 : vector<1x64xf32>
    %77 = vector.extract_strided_slice %32 {offsets = [0, 32], sizes = [64, 16], strides = [1, 1]} : vector<64x256xf32> to vector<64x16xf32>
    %78 = vector.extract_strided_slice %32 {offsets = [0, 160], sizes = [64, 16], strides = [1, 1]} : vector<64x256xf32> to vector<64x16xf32>
    %79 = tpu.transpose %78, [1, 0] : vector<64x16xf32> -> vector<16x64xf32>
    %cst_34 = arith.constant dense<0.000000e+00> : vector<64x64xf32>
    %80 = tpu.matmul %77, %79, %cst_34 {dimension_numbers = #tpu.dot_dimension_numbers<[1], [0], [0], [1], [0, 0, 1, 1], [], []>, precision = #tpu.contract_precision<fp32>} : vector<64x16xf32>, vector<16x64xf32>, vector<64x64xf32> -> vector<64x64xf32>
    %cst_35 = arith.constant dense<0xFF800000> : vector<64xf32>
    %81 = vector.multi_reduction <maximumf>, %80, %cst_35 [1] : vector<64x64xf32> to vector<64xf32>
    %82 = vector.shape_cast %81 : vector<64xf32> to vector<64x1xf32>
    %83 = vector.broadcast %82 : vector<64x1xf32> to vector<64x64xf32>
    %84 = arith.subf %80, %83 : vector<64x64xf32>
    %85 = math.exp %84 : vector<64x64xf32>
    %cst_36 = arith.constant dense<0.000000e+00> : vector<64xf32>
    %86 = vector.multi_reduction <add>, %85, %cst_36 [1] : vector<64x64xf32> to vector<64xf32>
    %87 = vector.shape_cast %86 : vector<64xf32> to vector<64x1xf32>
    %88 = tpu.reciprocal %87 {approx = true} : vector<64x1xf32> -> vector<64x1xf32>
    %89 = vector.broadcast %88 : vector<64x1xf32> to vector<64x64xf32>
    %90 = arith.mulf %85, %89 : vector<64x64xf32>
    %91 = math.absf %90 : vector<64x64xf32>
    %cst_37 = arith.constant dense<0.000000e+00> : vector<64xf32>
    %92 = vector.multi_reduction <add>, %91, %cst_37 [1] : vector<64x64xf32> to vector<64xf32>
    %93 = vector.shape_cast %92 : vector<64xf32> to vector<64x1xf32>
    %94 = arith.maximumf %73, %93 : vector<64x1xf32>
    %cst_38 = arith.constant dense<0.000000e+00> : vector<64xf32>
    %95 = vector.multi_reduction <add>, %91, %cst_38 [0] : vector<64x64xf32> to vector<64xf32>
    %96 = vector.shape_cast %95 : vector<64xf32> to vector<1x64xf32>
    %97 = arith.maximumf %76, %96 : vector<1x64xf32>
    %98 = vector.extract_strided_slice %32 {offsets = [0, 48], sizes = [64, 16], strides = [1, 1]} : vector<64x256xf32> to vector<64x16xf32>
    %99 = vector.extract_strided_slice %32 {offsets = [0, 176], sizes = [64, 16], strides = [1, 1]} : vector<64x256xf32> to vector<64x16xf32>
    %100 = tpu.transpose %99, [1, 0] : vector<64x16xf32> -> vector<16x64xf32>
    %cst_39 = arith.constant dense<0.000000e+00> : vector<64x64xf32>
    %101 = tpu.matmul %98, %100, %cst_39 {dimension_numbers = #tpu.dot_dimension_numbers<[1], [0], [0], [1], [0, 0, 1, 1], [], []>, precision = #tpu.contract_precision<fp32>} : vector<64x16xf32>, vector<16x64xf32>, vector<64x64xf32> -> vector<64x64xf32>
    %cst_40 = arith.constant dense<0xFF800000> : vector<64xf32>
    %102 = vector.multi_reduction <maximumf>, %101, %cst_40 [1] : vector<64x64xf32> to vector<64xf32>
    %103 = vector.shape_cast %102 : vector<64xf32> to vector<64x1xf32>
    %104 = vector.broadcast %103 : vector<64x1xf32> to vector<64x64xf32>
    %105 = arith.subf %101, %104 : vector<64x64xf32>
    %106 = math.exp %105 : vector<64x64xf32>
    %cst_41 = arith.constant dense<0.000000e+00> : vector<64xf32>
    %107 = vector.multi_reduction <add>, %106, %cst_41 [1] : vector<64x64xf32> to vector<64xf32>
    %108 = vector.shape_cast %107 : vector<64xf32> to vector<64x1xf32>
    %109 = tpu.reciprocal %108 {approx = true} : vector<64x1xf32> -> vector<64x1xf32>
    %110 = vector.broadcast %109 : vector<64x1xf32> to vector<64x64xf32>
    %111 = arith.mulf %106, %110 : vector<64x64xf32>
    %112 = math.absf %111 : vector<64x64xf32>
    %cst_42 = arith.constant dense<0.000000e+00> : vector<64xf32>
    %113 = vector.multi_reduction <add>, %112, %cst_42 [1] : vector<64x64xf32> to vector<64xf32>
    %114 = vector.shape_cast %113 : vector<64xf32> to vector<64x1xf32>
    %115 = arith.maximumf %94, %114 : vector<64x1xf32>
    %cst_43 = arith.constant dense<0.000000e+00> : vector<64xf32>
    %116 = vector.multi_reduction <add>, %112, %cst_43 [0] : vector<64x64xf32> to vector<64xf32>
    %117 = vector.shape_cast %116 : vector<64xf32> to vector<1x64xf32>
    %118 = arith.maximumf %97, %117 : vector<1x64xf32>
    %119 = vector.extract_strided_slice %32 {offsets = [0, 64], sizes = [64, 16], strides = [1, 1]} : vector<64x256xf32> to vector<64x16xf32>
    %120 = vector.extract_strided_slice %32 {offsets = [0, 192], sizes = [64, 16], strides = [1, 1]} : vector<64x256xf32> to vector<64x16xf32>
    %121 = tpu.transpose %120, [1, 0] : vector<64x16xf32> -> vector<16x64xf32>
    %cst_44 = arith.constant dense<0.000000e+00> : vector<64x64xf32>
    %122 = tpu.matmul %119, %121, %cst_44 {dimension_numbers = #tpu.dot_dimension_numbers<[1], [0], [0], [1], [0, 0, 1, 1], [], []>, precision = #tpu.contract_precision<fp32>} : vector<64x16xf32>, vector<16x64xf32>, vector<64x64xf32> -> vector<64x64xf32>
    %cst_45 = arith.constant dense<0xFF800000> : vector<64xf32>
    %123 = vector.multi_reduction <maximumf>, %122, %cst_45 [1] : vector<64x64xf32> to vector<64xf32>
    %124 = vector.shape_cast %123 : vector<64xf32> to vector<64x1xf32>
    %125 = vector.broadcast %124 : vector<64x1xf32> to vector<64x64xf32>
    %126 = arith.subf %122, %125 : vector<64x64xf32>
    %127 = math.exp %126 : vector<64x64xf32>
    %cst_46 = arith.constant dense<0.000000e+00> : vector<64xf32>
    %128 = vector.multi_reduction <add>, %127, %cst_46 [1] : vector<64x64xf32> to vector<64xf32>
    %129 = vector.shape_cast %128 : vector<64xf32> to vector<64x1xf32>
    %130 = tpu.reciprocal %129 {approx = true} : vector<64x1xf32> -> vector<64x1xf32>
    %131 = vector.broadcast %130 : vector<64x1xf32> to vector<64x64xf32>
    %132 = arith.mulf %127, %131 : vector<64x64xf32>
    %133 = math.absf %132 : vector<64x64xf32>
    %cst_47 = arith.constant dense<0.000000e+00> : vector<64xf32>
    %134 = vector.multi_reduction <add>, %133, %cst_47 [1] : vector<64x64xf32> to vector<64xf32>
    %135 = vector.shape_cast %134 : vector<64xf32> to vector<64x1xf32>
    %136 = arith.maximumf %115, %135 : vector<64x1xf32>
    %cst_48 = arith.constant dense<0.000000e+00> : vector<64xf32>
    %137 = vector.multi_reduction <add>, %133, %cst_48 [0] : vector<64x64xf32> to vector<64xf32>
    %138 = vector.shape_cast %137 : vector<64xf32> to vector<1x64xf32>
    %139 = arith.maximumf %118, %138 : vector<1x64xf32>
    %140 = vector.extract_strided_slice %32 {offsets = [0, 80], sizes = [64, 16], strides = [1, 1]} : vector<64x256xf32> to vector<64x16xf32>
    %141 = vector.extract_strided_slice %32 {offsets = [0, 208], sizes = [64, 16], strides = [1, 1]} : vector<64x256xf32> to vector<64x16xf32>
    %142 = tpu.transpose %141, [1, 0] : vector<64x16xf32> -> vector<16x64xf32>
    %cst_49 = arith.constant dense<0.000000e+00> : vector<64x64xf32>
    %143 = tpu.matmul %140, %142, %cst_49 {dimension_numbers = #tpu.dot_dimension_numbers<[1], [0], [0], [1], [0, 0, 1, 1], [], []>, precision = #tpu.contract_precision<fp32>} : vector<64x16xf32>, vector<16x64xf32>, vector<64x64xf32> -> vector<64x64xf32>
    %cst_50 = arith.constant dense<0xFF800000> : vector<64xf32>
    %144 = vector.multi_reduction <maximumf>, %143, %cst_50 [1] : vector<64x64xf32> to vector<64xf32>
    %145 = vector.shape_cast %144 : vector<64xf32> to vector<64x1xf32>
    %146 = vector.broadcast %145 : vector<64x1xf32> to vector<64x64xf32>
    %147 = arith.subf %143, %146 : vector<64x64xf32>
    %148 = math.exp %147 : vector<64x64xf32>
    %cst_51 = arith.constant dense<0.000000e+00> : vector<64xf32>
    %149 = vector.multi_reduction <add>, %148, %cst_51 [1] : vector<64x64xf32> to vector<64xf32>
    %150 = vector.shape_cast %149 : vector<64xf32> to vector<64x1xf32>
    %151 = tpu.reciprocal %150 {approx = true} : vector<64x1xf32> -> vector<64x1xf32>
    %152 = vector.broadcast %151 : vector<64x1xf32> to vector<64x64xf32>
    %153 = arith.mulf %148, %152 : vector<64x64xf32>
    %154 = math.absf %153 : vector<64x64xf32>
    %cst_52 = arith.constant dense<0.000000e+00> : vector<64xf32>
    %155 = vector.multi_reduction <add>, %154, %cst_52 [1] : vector<64x64xf32> to vector<64xf32>
    %156 = vector.shape_cast %155 : vector<64xf32> to vector<64x1xf32>
    %157 = arith.maximumf %136, %156 : vector<64x1xf32>
    %cst_53 = arith.constant dense<0.000000e+00> : vector<64xf32>
    %158 = vector.multi_reduction <add>, %154, %cst_53 [0] : vector<64x64xf32> to vector<64xf32>
    %159 = vector.shape_cast %158 : vector<64xf32> to vector<1x64xf32>
    %160 = arith.maximumf %139, %159 : vector<1x64xf32>
    %161 = vector.extract_strided_slice %32 {offsets = [0, 96], sizes = [64, 16], strides = [1, 1]} : vector<64x256xf32> to vector<64x16xf32>
    %162 = vector.extract_strided_slice %32 {offsets = [0, 224], sizes = [64, 16], strides = [1, 1]} : vector<64x256xf32> to vector<64x16xf32>
    %163 = tpu.transpose %162, [1, 0] : vector<64x16xf32> -> vector<16x64xf32>
    %cst_54 = arith.constant dense<0.000000e+00> : vector<64x64xf32>
    %164 = tpu.matmul %161, %163, %cst_54 {dimension_numbers = #tpu.dot_dimension_numbers<[1], [0], [0], [1], [0, 0, 1, 1], [], []>, precision = #tpu.contract_precision<fp32>} : vector<64x16xf32>, vector<16x64xf32>, vector<64x64xf32> -> vector<64x64xf32>
    %cst_55 = arith.constant dense<0xFF800000> : vector<64xf32>
    %165 = vector.multi_reduction <maximumf>, %164, %cst_55 [1] : vector<64x64xf32> to vector<64xf32>
    %166 = vector.shape_cast %165 : vector<64xf32> to vector<64x1xf32>
    %167 = vector.broadcast %166 : vector<64x1xf32> to vector<64x64xf32>
    %168 = arith.subf %164, %167 : vector<64x64xf32>
    %169 = math.exp %168 : vector<64x64xf32>
    %cst_56 = arith.constant dense<0.000000e+00> : vector<64xf32>
    %170 = vector.multi_reduction <add>, %169, %cst_56 [1] : vector<64x64xf32> to vector<64xf32>
    %171 = vector.shape_cast %170 : vector<64xf32> to vector<64x1xf32>
    %172 = tpu.reciprocal %171 {approx = true} : vector<64x1xf32> -> vector<64x1xf32>
    %173 = vector.broadcast %172 : vector<64x1xf32> to vector<64x64xf32>
    %174 = arith.mulf %169, %173 : vector<64x64xf32>
    %175 = math.absf %174 : vector<64x64xf32>
    %cst_57 = arith.constant dense<0.000000e+00> : vector<64xf32>
    %176 = vector.multi_reduction <add>, %175, %cst_57 [1] : vector<64x64xf32> to vector<64xf32>
    %177 = vector.shape_cast %176 : vector<64xf32> to vector<64x1xf32>
    %178 = arith.maximumf %157, %177 : vector<64x1xf32>
    %cst_58 = arith.constant dense<0.000000e+00> : vector<64xf32>
    %179 = vector.multi_reduction <add>, %175, %cst_58 [0] : vector<64x64xf32> to vector<64xf32>
    %180 = vector.shape_cast %179 : vector<64xf32> to vector<1x64xf32>
    %181 = arith.maximumf %160, %180 : vector<1x64xf32>
    %182 = vector.extract_strided_slice %32 {offsets = [0, 112], sizes = [64, 16], strides = [1, 1]} : vector<64x256xf32> to vector<64x16xf32>
    %183 = vector.extract_strided_slice %32 {offsets = [0, 240], sizes = [64, 16], strides = [1, 1]} : vector<64x256xf32> to vector<64x16xf32>
    %184 = tpu.transpose %183, [1, 0] : vector<64x16xf32> -> vector<16x64xf32>
    %cst_59 = arith.constant dense<0.000000e+00> : vector<64x64xf32>
    %185 = tpu.matmul %182, %184, %cst_59 {dimension_numbers = #tpu.dot_dimension_numbers<[1], [0], [0], [1], [0, 0, 1, 1], [], []>, precision = #tpu.contract_precision<fp32>} : vector<64x16xf32>, vector<16x64xf32>, vector<64x64xf32> -> vector<64x64xf32>
    %cst_60 = arith.constant dense<0xFF800000> : vector<64xf32>
    %186 = vector.multi_reduction <maximumf>, %185, %cst_60 [1] : vector<64x64xf32> to vector<64xf32>
    %187 = vector.shape_cast %186 : vector<64xf32> to vector<64x1xf32>
    %188 = vector.broadcast %187 : vector<64x1xf32> to vector<64x64xf32>
    %189 = arith.subf %185, %188 : vector<64x64xf32>
    %190 = math.exp %189 : vector<64x64xf32>
    %cst_61 = arith.constant dense<0.000000e+00> : vector<64xf32>
    %191 = vector.multi_reduction <add>, %190, %cst_61 [1] : vector<64x64xf32> to vector<64xf32>
    %192 = vector.shape_cast %191 : vector<64xf32> to vector<64x1xf32>
    %193 = tpu.reciprocal %192 {approx = true} : vector<64x1xf32> -> vector<64x1xf32>
    %194 = vector.broadcast %193 : vector<64x1xf32> to vector<64x64xf32>
    %195 = arith.mulf %190, %194 : vector<64x64xf32>
    %196 = math.absf %195 : vector<64x64xf32>
    %cst_62 = arith.constant dense<0.000000e+00> : vector<64xf32>
    %197 = vector.multi_reduction <add>, %196, %cst_62 [1] : vector<64x64xf32> to vector<64xf32>
    %198 = vector.shape_cast %197 : vector<64xf32> to vector<64x1xf32>
    %199 = arith.maximumf %178, %198 : vector<64x1xf32>
    %cst_63 = arith.constant dense<0.000000e+00> : vector<64xf32>
    %200 = vector.multi_reduction <add>, %196, %cst_63 [0] : vector<64x64xf32> to vector<64xf32>
    %201 = vector.shape_cast %200 : vector<64xf32> to vector<1x64xf32>
    %202 = arith.maximumf %181, %201 : vector<1x64xf32>
    %c0_64 = arith.constant 0 : index
    %c0_65 = arith.constant 0 : index
    %c0_66 = arith.constant 0 : index
    %203 = vector.load %arg7[%c0_64, %c0_65, %c0_66] : memref<1x64x1xf32, #tpu.memory_space<vmem>>, vector<1x64x1xf32>
    %204 = vector.shape_cast %203 : vector<1x64x1xf32> to vector<64x1xf32>
    %205 = vector.shape_cast %199 : vector<64x1xf32> to vector<1x64x1xf32>
    tpu.vector_store %arg7[%c0_64, %c0_65, %c0_66], %205 {strides = array<i32>} : memref<1x64x1xf32, #tpu.memory_space<vmem>>, vector<1x64x1xf32>,
    %c0_67 = arith.constant 0 : index
    %c0_68 = arith.constant 0 : index
    %c0_69 = arith.constant 0 : index
    %206 = vector.load %arg8[%c0_67, %c0_68, %c0_69] : memref<1x1x64xf32, #tpu.memory_space<vmem>>, vector<1x1x64xf32>
    %207 = vector.shape_cast %206 : vector<1x1x64xf32> to vector<1x64xf32>
    %208 = vector.shape_cast %202 : vector<1x64xf32> to vector<1x1x64xf32>
    tpu.vector_store %arg8[%c0_67, %c0_68, %c0_69], %208 {strides = array<i32>} : memref<1x1x64xf32, #tpu.memory_space<vmem>>, vector<1x1x64xf32>,
    return
  }
  func.func @transform_0(%arg0: i32) -> (i32, i32, i32) {
    %c0_i32 = arith.constant 0 : i32
    %c0_i32_0 = arith.constant 0 : i32
    %c0_i32_1 = arith.constant 0 : i32
    return %arg0, %c0_i32, %c0_i32_0 : i32, i32, i32
  }
  func.func @transform_1(%arg0: i32) -> (i32, i32) {
    %c0_i32 = arith.constant 0 : i32
    %c0_i32_0 = arith.constant 0 : i32
    %c0_i32_1 = arith.constant 0 : i32
    return %c0_i32, %c0_i32_0 : i32, i32
  }
  func.func @transform_2(%arg0: i32) -> (i32, i32) {
    %c0_i32 = arith.constant 0 : i32
    %c0_i32_0 = arith.constant 0 : i32
    %c0_i32_1 = arith.constant 0 : i32
    return %c0_i32, %c0_i32_0 : i32, i32
  }
  func.func @transform_3(%arg0: i32) -> (i32, i32) {
    %c0_i32 = arith.constant 0 : i32
    %c0_i32_0 = arith.constant 0 : i32
    %c0_i32_1 = arith.constant 0 : i32
    return %c0_i32, %c0_i32_0 : i32, i32
  }
  func.func @transform_4(%arg0: i32) -> (i32, i32) {
    %c0_i32 = arith.constant 0 : i32
    %c0_i32_0 = arith.constant 0 : i32
    %c0_i32_1 = arith.constant 0 : i32
    return %c0_i32, %c0_i32_0 : i32, i32
  }
  func.func @transform_5(%arg0: i32) -> (i32, i32, i32) {
    %c0_i32 = arith.constant 0 : i32
    %c0_i32_0 = arith.constant 0 : i32
    %c0_i32_1 = arith.constant 0 : i32
    return %arg0, %c0_i32, %c0_i32_0 : i32, i32, i32
  }
  func.func @transform_6(%arg0: i32) -> (i32, i32, i32) {
    %c0_i32 = arith.constant 0 : i32
    %c0_i32_0 = arith.constant 0 : i32
    %c0_i32_1 = arith.constant 0 : i32
    return %arg0, %c0_i32, %c0_i32_0 : i32, i32, i32
  }
  func.func @transform_7(%arg0: i32) -> (i32, i32, i32) {
    %c0_i32 = arith.constant 0 : i32
    %c0_i32_0 = arith.constant 0 : i32
    %c0_i32_1 = arith.constant 0 : i32
    return %arg0, %c0_i32, %c0_i32_0 : i32, i32, i32
  }
}

</mosaic_0001>

<bundles_post_ra>
// kernel: tpu_custom_call.1
= control target key start
LH: loop header
LB: loop body
LE: loop exit
PB: predicated region body
PF: predicated region fallthrough
CT: control target
= control target key end

     0   :  { %s17964_s0 = inlined_call_operand.hbm [shape: f32[2,128,128], index: 0, kind: input, shape index: {}]   ;;  %s17965_s1 = inlined_call_operand.hbm [shape: f32[1,128], index: 1, kind: input, shape index: {}]   ;;  %s17966_s2 = inlined_call_operand.vmem [shape: f32[1,128], index: 2, kind: input, shape index: {}]   ;;  %s17967_s3 = inlined_call_operand.hbm [shape: f32[128,384], index: 3, kind: input, shape index: {}]   ;;  %s17968_s4 = inlined_call_operand.hbm [shape: f32[64,128], index: 4, kind: input, shape index: {}]   ;;  %s17969_s5 = inlined_call_operand.hbm [shape: f32[2,128,384], index: 5, kind: output, shape index: {0}]   ;;  %s17970_s6 = inlined_call_operand.vmem [shape: f32[2,64,1], index: 6, kind: output, shape index: {1}]   ;;  %s17971_s7 = inlined_call_operand.hbm [shape: f32[2,1,64], index: 7, kind: output, shape index: {2}]  }
   0x1   :  { %18330 = sst [smem:[#allocation108_spill]] %s17965_s1 }
   0x2   :  { %13 = vsyncpa [#allocation3], 0 }
   0x3   :  { %15 = vsyncpa [#allocation3 + $0x1], 0 }
   0x4   :  { %16 = vsyncpa [#allocation6], 0 }
   0x5   :  { %17 = vsyncpa [#allocation9], 0 }
   0x6   :  { %18 = vsyncpa [#allocation4], 0 }
   0x7   :  { %20 = vsyncpa [#allocation4 + $0x1], 0 }
   0x8   :  { %21 = vsyncpa [#allocation12], 0 }
   0x9   :  { %23 = vsyncpa [#allocation12 + $0x1], 0  ;;  %s10593_s24 = smov 0   ;;  %s10595_s25 = smov 0  }
   0xa   :  { %s10597_s26 = smov 0   ;;  %s10599_s27 = smov 0  }
   0xb LB: > { %s10614_s28 = sadd.s32 4294967295, %s10534_s27   ;;  %s9895_s29 = sadd.s32 4294967294, %s10534_s27   ;;  %s10534_s27 = sphi %s10599_s27, %s19511_s27   ;;  %s10530_s26 = sphi %s10597_s26, %s19510_s26   ;;  %s10526_s25 = sphi %s10595_s25, %s19509_s25   ;;  %s10522_s24 = sphi %s10593_s24, %s19508_s24  }
   0xc   : > { %p49_p0 = scmp.ne.s32.totalorder %s10526_s25, %s10522_s24  ;;  %p50_p1 = scmp.eq.s32.totalorder %s10614_s28, 0 }
   0xd   : > { %p157_p2 = scmp.eq.s32.totalorder %s10614_s28, 1  ;;  %p163_p3 = scmp.eq.s32.totalorder %s9895_s29, 1 }
   0xe   : > { %p10623_p4 = por %p50_p1, %p49_p0  ;;  %p9896_p5 = scmp.ge.s32.totalorder %s10534_s27, 1 }
   0xf   : > { %p10628_p6 = por %p163_p3, %p49_p0  ;;  %p222_p7 = scmp.lt.s32.totalorder %s10534_s27, 3 }
  0x10   : > { %s18333_s1 = sld [smem:[#allocation108_spill]]  ;;  %s10536_s13 = smov [#allocation5]  }
  0x11   : > { %p10636_p8 = pnand %p9896_p5, %p222_p7  ;;  %s236_s14 = sshll.u32 %s10536_s13, 4  ;;  %s237_s14 = int_to_ptr.vmem [resolvable:$true] %s236_s14 }
  0x12   : > { %s248_s17 = sshll.u32 %s17967_s3, 4  ;;  %s10537_s19 = smov [#allocation7]   ;;  %s249_s17 = int_to_ptr.hbm [resolvable:$true] %s248_s17 }
  0x13   : > { %p9936_p10 = pneg %p10636_p8  ;;  %s250_s20 = sshll.u32 %s10537_s19, 4  ;;  %s251_s20 = int_to_ptr.vmem [resolvable:$true] %s250_s20 }
  0x14   : > { %s10538_s21 = smov 384   ;;  %s10539_s22 = smov 24  }
  0x15   : > { %p10648_p11 = pnand %p9936_p10, %p50_p1  ;;  %s262_s9 = sshll.u32 %s17968_s4, 4  ;;  %s263_s9 = int_to_ptr.hbm [resolvable:$true] %s262_s9 }
  0x16   : > { %s234_s11 = sshll.u32 %s18333_s1, 4  ;;  %s10540_s10 = smov [#allocation8]   ;;  %s235_s11 = int_to_ptr.hbm [resolvable:$true] %s234_s11 }
  0x17   : > { %9939 = dma.hbm_to_vmem [thread:$0]  (!%p10648_p11), %s235_s11, 16, %s237_s14, [#allocation6]  }
  0x18   : > { %9942 = dma.hbm_to_vmem [thread:$0]  (!%p10648_p11), %s249_s17, 6144, %s251_s20, [#allocation6], %s10538_s21, %s10538_s21, %s10539_s22  }
  0x19   : > { %s264_s11 = sshll.u32 %s10540_s10, 4  ;;  %s17972_s13 = smov 128   ;;  %s265_s11 = int_to_ptr.vmem [resolvable:$true] %s264_s11 }
  0x1a   : > { %s17973_s14 = smov 8   ;;  %s10665_s15 = sadd.s32 1, %s10534_s27  }
  0x1b   : > { %9945 = dma.hbm_to_vmem [thread:$0]  (!%p10648_p11), %s263_s9, 1024, %s265_s11, [#allocation9], %s17972_s13, %s17972_s13, %s17973_s14  }
  0x1c   : > { %s33_s16 = ssub.s32 %s10534_s27, %s10665_s15  ;;  %s36_s17 = sadd.s32 1, %s10530_s26 }
  0x1d   : > { %p34_p12 = scmp.eq.s32.totalorder %s33_s16, 0  ;;  %p43_p13 = scmp.ne.s32.totalorder %s10530_s26, %s10526_s25 }
  0x1e   : > { %p44_p0 = scmp.eq.s32.totalorder %s10534_s27, 0  ;;  %p9960_p5 = scmp.lt.s32.totalorder %s10534_s27, 2 }
  0x1f   : > { %s10674_s19 = scalar_select %p34_p12, %s10530_s26, %s36_s17  }
  0x20   : > { %p10678_p3 = por %p157_p2, %p43_p13  ;;  %s278_s18 = sand.u32 1, %s10530_s26  }
  0x21   : > { %s9914_s21 = sshll.u32 %s10534_s27, 7  ;;  %p45_p7 = por %p44_p0, %p43_p13 }
  0x22   : > { %s9901_s22 = sshll.u32 %s278_s18, 7  ;;  %s287_s9 = scalar_lea.hbm %s17964_s0, %s9914_s21 }
  0x23   : > { %s288_s10 = sshll.u32 %s287_s9, 4  ;;  %s282_s11 = scalar_lea.vmem [#allocation2], %s9901_s22  ;;  %s289_s10 = int_to_ptr.hbm [resolvable:$true] %s288_s10 }
  0x24   : > { %s290_s16 = sshll.u32 %s282_s11, 4  ;;  %p10688_p10 = pnand %p9960_p5, %p45_p7  ;;  %s291_s16 = int_to_ptr.vmem [resolvable:$true] %s290_s16 }
  0x25   : > { %s279_s13 = scalar_lea.sflag [#allocation3], %s278_s18  ;;  %s10398_s14 = sshra.s32 %s289_s10, 4  ;;  %s10399_s14 = int_to_ptr.hbm [resolvable:$true] %s10398_s14 }
  0x26   : > { %s10400_s1 = scalar_lea.hbm %s10399_s14, 128  ;;  %p10402_p11 = pneg %p10688_p10 }
  0x27   : > { %p10401_p2 = scmp.ne.s32.totalorder %s10399_s14, %s10400_s1  ;;  %s10405_s22 = scalar_lea.hbm %s17964_s0, 256 }
  0x28   : > { %p10406_p0 = scmp.lt.s32.totalorder %s10399_s14, %s17964_s0  ;;  %p10407_p5 = scmp.lt.s32.totalorder %s10405_s22, %s10400_s1 }
  0x29   : > { %p10403_p12 = pnand %p10402_p11, %p10401_p2 }
  0x2a   : > { %p10408_p7 = por %p10407_p5, %p10406_p0 }
  0x2b   : > { %p10404_p13 = pneg %p10403_p12 }
  0x2d   : > { %p10409_p9 = pnand %p10408_p7, %p10404_p13 }
  0x2f   : > { %10412 = shalt.err (!%p10409_p9)
}
  0x30   : > { %s18338_s18 = smov 8   ;;  %s18339_s11 = smov 128  }
  0x31   : > { %9949 = dma.hbm_to_vmem [thread:$0]  (!%p10688_p10), %s289_s10, 2048, %s291_s16, %s279_s13, %s18339_s11, %s18339_s11, %s18338_s18  }
  0x32   : > { %302 = sbr.rel (%p10636_p8) target bundleno = 2834 (0xb12), region = 40 }
  0x37   : > { %s10708_s21 = sand.u32 1, %s10526_s25  }
  0x38   : > { %s9905_s14 = sshll.u32 %s10708_s21, 7  ;;  %s305_s1 = scalar_lea.sflag [#allocation3], %s10708_s21 }
  0x39   : > { %s10712_s23 = scalar_lea.vmem [#allocation2], %s9905_s14 }
  0x3a   : > { %10501 = dma.done.wait (%p10623_p4), %s305_s1, 2048  }
  0x3b   : > { %10503 = vsyncadd (%p10623_p4), %s305_s1, 4294965248 }
  0x3c   : > { %10505 = dma.done.wait (%p50_p1), [#allocation6], 6160  }
  0x3d   : > { %10507 = vsyncadd (%p50_p1), [#allocation6], 4294961136 }
  0x3e   : > { %10509 = dma.done.wait (%p50_p1), [#allocation9], 1024  }
  0x3f   : > { %10511 = vsyncadd (%p50_p1), [#allocation9], 4294966272  ;;  %v371_v0 = vld [vmem:[%s10712_s23 + $0x10] sm:$0xff]  ;;  %v369_v1 = vld [vmem:[%s10712_s23] sm:$0xff]  ;;  %v10543_v7 = vmov 128.0   ;;  %s9916_s16 = smul.u32 384, %s10708_s21 }
  0x40   : > { %v373_v2 = vld [vmem:[%s10712_s23 + $0x20] sm:$0xff]  ;;  %389 = vadd.xlane.f32.xlu1 %v371_v0  ;;  %385 = vadd.xlane.f32.xlu0 %v369_v1  ;;  %v370_v3 = vld [vmem:[%s10712_s23 + $0x8] sm:$0xff]  ;;  %v372_v4 = vld [vmem:[%s10712_s23 + $0x18] sm:$0xff]  ;;  %10016 = vrcp.f32 %v10543_v7  ;;  %s10544_s22 = smov 112   ;;  %s10545_s29 = smov 96  }
  0x41   : > { %393 = vadd.xlane.f32.xlu2 %v373_v2  ;;  %v374_v5 = vld [vmem:[%s10712_s23 + $0x28] sm:$0xff]  ;;  %v375_v6 = vld [vmem:[%s10712_s23 + $0x30] sm:$0xff]  ;;  %v10754_v31 = vld [vmem:[%s10712_s23 + $0x38] sm:$0xff]  ;;  %s12018_s17 = scalar_lea.vmem [#allocation10], %s9916_s16  ;;  %s10546_s9 = smov 80  }
  0x42   : > { %v10751_v30 = vld [vmem:[%s10712_s23 + $0x48] sm:$0xff]  ;;  %v10779_v42 = vld [vmem:[%s10712_s23 + $0x40] sm:$0xff]  ;;  %v10789_v48 = vld [vmem:[%s10712_s23 + $0x50] sm:$0xff]  ;;  %s10547_s18 = smov 64   ;;  %s10548_s11 = smov 48  }
  0x43   : > { %v797_v35 = vld [vmem:[#allocation7 + $0x168] sm:$0xff]  ;;  %v10794_v50 = vld [vmem:[%s10712_s23 + $0x60] sm:$0xff]  ;;  %v10803_v53 = vld [vmem:[%s10712_s23 + $0x58] sm:$0xff]  ;;  %s10549_s14 = smov 32   ;;  %s10550_s1 = smov 16  }
  0x44   : > { %v10764_v36 = vand.u32 4294901760, %v797_v35  ;;  %v10807_v54 = vld [vmem:[%s10712_s23 + $0x68] sm:$0xff]  ;;  %v794_v55 = vld [vmem:[#allocation7 + $0x150] sm:$0xff]  ;;  %v791_v57 = vld [vmem:[#allocation7 + $0x138] sm:$0xff]  ;;  %s9721_s10 = sshll.u32 %s12018_s17, 4  ;;  %s9722_s10 = int_to_ptr.vmem [resolvable:$true] %s9721_s10 }
  0x45   : > { %v10810_v56 = vand.u32 4294901760, %v794_v55  ;;  %v10815_v59 = vand.u32 4294901760, %v791_v57  ;;  %v788_v60 = vld [vmem:[#allocation7 + $0x120] sm:$0xff] }
  0x46   : > { %v10017_v8 = vpop.eup %10016  ;;  %v10767_v37 = vsub.f32 %v797_v35, %v10764_v36  ;;  %1252 = vmatpush.msra.mxu3 %v10764_v36  ;;  %801 = vmatpush.msra.mxu0 %v10764_v36  ;;  %v10824_v63 = vand.u32 4294901760, %v788_v60 }
  0x47   : > { %v418_v9 = vmul.f32 128.0, %v10017_v8  ;;  %vm422_vm0 = vweird.f32 %v10017_v8  ;;  %v10813_v58 = vsub.f32 %v794_v55, %v10810_v56  ;;  %v10821_v62 = vsub.f32 %v791_v57, %v10815_v59 }
  0x48   : > { %387 = vadd.xlane.f32.xlu0 %v370_v3  ;;  %391 = vadd.xlane.f32.xlu1 %v372_v4  ;;  %v963_v41 = vand.u32 4294901760, %v10767_v37 }
  0x49   : > { %395 = vadd.xlane.f32.xlu2 %v374_v5  ;;  %v419_v10 = vsub.f32 1.0, %v418_v9  ;;  %1124 = vmatpush.msra.mxu2 %v10767_v37  ;;  %v969_v61 = vand.u32 4294901760, %v10813_v58 }
  0x4a   : > { %v964_v43 = vsub.f32 %v10767_v37, %v963_v41  ;;  %1254 = vmatpush.msra.mxu3 %v10810_v56  ;;  %803 = vmatpush.msra.mxu0 %v10810_v56 }
  0x4b   : > { %v420_v11 = vmul.f32 %v10017_v8, %v419_v10  ;;  %1127 = vmatpush.msra.mxu2 %v10813_v58 }
  0x4c   : > { %v965_v46 = vand.u32 4294901760, %v964_v43  ;;  %1256 = vmatpush.msra.mxu3 %v10815_v59  ;;  %805 = vmatpush.msra.mxu0 %v10815_v59 }
  0x4d   : > { %v421_v12 = vadd.f32 %v10017_v8, %v420_v11  ;;  %1130 = vmatpush.msra.mxu2 %v10821_v62  ;;  %v779_v11 = vld [vmem:[#allocation7 + $0xd8] sm:$0xff] }
  0x4e   : > { %966 = vmatpush.msra.mxu1 %v965_v46  ;;  %1258 = vmatpush.msra.mxu3 %v10824_v63 }
  0x4f   : > { %v10733_v13 = vsel %vm422_vm0, %v10017_v8, %v421_v12  ;;  %807 = vmatpush.msra.mxu0 %v10824_v63 }
  0x50   : > { %397 = vadd.xlane.f32.xlu1 %v375_v6 }
  0xb3   : > { %v390_v14 = vpop.xlane.xlu1 %389  ;;  %v386_v15 = vpop.xlane.xlu0 %385 }
  0xb4   : > { %v426_v16 = vmul.f32 %v10733_v13, %v390_v14  ;;  %v424_v17 = vmul.f32 %v10733_v13, %v386_v15  ;;  %v394_v18 = vpop.xlane.xlu2 %393 }
  0xb5   : > { %v428_v40 = vmul.f32 %v10733_v13, %v394_v18  ;;  %v776_v18 = vld [vmem:[#allocation7 + $0xc0] sm:$0xff] }
  0xb6   : > { %v10737_v19 = vsub.f32 %v371_v0, %v426_v16  ;;  %v10739_v20 = vsub.f32 %v369_v1, %v424_v17  ;;  %v785_v0 = vld [vmem:[#allocation7 + $0x108] sm:$0xff]  ;;  %v970_v1 = vsub.f32 %v10813_v58, %v969_v61  ;;  %v10857_v16 = vand.u32 4294901760, %v779_v11 }
  0xb7   : > { %v10785_v44 = vsub.f32 %v373_v2, %v428_v40  ;;  %v975_v2 = vand.u32 4294901760, %v10821_v62 }
  0xb8   : > { %v458_v21 = vmul.f32 %v10737_v19, %v10737_v19  ;;  %v456_v22 = vmul.f32 %v10739_v20, %v10739_v20 }
  0xb9   : > { %v460_v49 = vmul.f32 %v10785_v44, %v10785_v44  ;;  %v976_v7 = vsub.f32 %v10821_v62, %v975_v2 }
  0xba   : > { %476 = vadd.xlane.f32.xlu1 %v458_v21  ;;  %472 = vadd.xlane.f32.xlu0 %v456_v22 }
  0xbb   : > { %v388_v23 = vpop.xlane.xlu0 %387  ;;  %v392_v24 = vpop.xlane.xlu1 %391  ;;  %v977_v12 = vand.u32 4294901760, %v976_v7 }
  0xbc   : > { %v425_v25 = vmul.f32 %v10733_v13, %v388_v23  ;;  %v396_v26 = vpop.xlane.xlu2 %395  ;;  %v427_v29 = vmul.f32 %v10733_v13, %v392_v24  ;;  %v10868_v23 = vsub.f32 %v779_v11, %v10857_v16  ;;  %v10870_v24 = vand.u32 4294901760, %v776_v18 }
  0xbd   : > { %v429_v28 = vmul.f32 %v10733_v13, %v396_v26  ;;  %v773_v26 = vld [vmem:[#allocation7 + $0xa8] sm:$0xff] }
  0xbe   : > { %v10746_v27 = vsub.f32 %v370_v3, %v425_v25  ;;  %v10762_v34 = vsub.f32 %v372_v4, %v427_v29  ;;  %v10833_v3 = vsub.f32 %v788_v60, %v10824_v63  ;;  %v10836_v4 = vand.u32 4294901760, %v785_v0 }
  0xbf   : > { %v10760_v33 = vsub.f32 %v374_v5, %v429_v28  ;;  %v782_v5 = vld [vmem:[#allocation7 + $0xf0] sm:$0xff]  ;;  %v999_v29 = vand.u32 4294901760, %v10868_v23  ;;  %v10879_v35 = vand.u32 4294901760, %v773_v26 }
  0xc0   : > { %v457_v32 = vmul.f32 %v10746_v27, %v10746_v27  ;;  %v459_v39 = vmul.f32 %v10762_v34, %v10762_v34  ;;  %v981_v8 = vand.u32 4294901760, %v10833_v3  ;;  %v10845_v9 = vsub.f32 %v785_v0, %v10836_v4  ;;  %1133 = vmatpush.msra.mxu2 %v10833_v3  ;;  %1260 = vmatpush.msra.mxu3 %v10836_v4 }
  0xc1   : > { %v461_v38 = vmul.f32 %v10760_v33, %v10760_v33  ;;  %v10849_v10 = vand.u32 4294901760, %v782_v5  ;;  %809 = vmatpush.msra.mxu0 %v10836_v4  ;;  %v1000_v40 = vsub.f32 %v10868_v23, %v999_v29 }
  0xc2   : > { %403 = vadd.xlane.f32.xlu1 %v10751_v30  ;;  %399 = vadd.xlane.f32.xlu0 %v10754_v31  ;;  %v982_v14 = vsub.f32 %v10833_v3, %v981_v8  ;;  %v987_v15 = vand.u32 4294901760, %v10845_v9 }
  0xc3   : > { %474 = vadd.xlane.f32.xlu2 %v457_v32  ;;  %v398_v45 = vpop.xlane.xlu1 %397  ;;  %1136 = vmatpush.msra.mxu2 %v10845_v9  ;;  %v10860_v17 = vsub.f32 %v782_v5, %v10849_v10  ;;  %v10877_v32 = vsub.f32 %v776_v18, %v10870_v24 }
  0xc4   : > { %v430_v47 = vmul.f32 %v10733_v13, %v398_v45  ;;  %1262 = vmatpush.msra.mxu3 %v10849_v10  ;;  %811 = vmatpush.msra.mxu0 %v10849_v10  ;;  %v983_v21 = vand.u32 4294901760, %v982_v14  ;;  %v988_v22 = vsub.f32 %v10845_v9, %v987_v15  ;;  %v10892_v45 = vsub.f32 %v773_v26, %v10879_v35 }
  0xc5   : > { %v993_v25 = vand.u32 4294901760, %v10860_v17  ;;  %1139 = vmatpush.msra.mxu2 %v10860_v17  ;;  %v1005_v43 = vand.u32 4294901760, %v10877_v32 }
  0xc6   : > { %v10798_v51 = vsub.f32 %v375_v6, %v430_v47  ;;  %v971_v6 = vand.u32 4294901760, %v970_v1  ;;  %1264 = vmatpush.msra.mxu3 %v10857_v16  ;;  %v989_v28 = vand.u32 4294901760, %v988_v22  ;;  %813 = vmatpush.msra.mxu0 %v10857_v16  ;;  %v1011_v57 = vand.u32 4294901760, %v10892_v45  ;;  %v764_v1 = vld [vmem:[#allocation7 + $0x60] sm:$0xff]  ;;  %v761_v22 = vld [vmem:[#allocation7 + $0x48] sm:$0xff] }
  0xc7   : > { %1142 = vmatpush.msra.mxu2 %v10868_v23  ;;  %v1006_v55 = vsub.f32 %v10877_v32, %v1005_v43  ;;  %v10914_v11 = vand.u32 4294901760, %v764_v1 }
  0xc8   : > { %v462_v52 = vmul.f32 %v10798_v51, %v10798_v51  ;;  %972 = vmatpush.msra.mxu1 %v971_v6  ;;  %1266 = vmatpush.msra.mxu3 %v10870_v24  ;;  %v1012_v6 = vsub.f32 %v10892_v45, %v1011_v57 }
  0xc9   : > { %815 = vmatpush.msra.mxu0 %v10870_v24  ;;  %1145 = vmatpush.msra.mxu2 %v10877_v32  ;;  %v1007_v5 = vand.u32 4294901760, %v1006_v55 }
  0xca   : > { %482 = vadd.xlane.f32.xlu1 %v461_v38  ;;  %478 = vadd.xlane.f32.xlu0 %v459_v39  ;;  %v994_v38 = vsub.f32 %v10860_v17, %v993_v25  ;;  %v770_v39 = vld [vmem:[#allocation7 + $0x90] sm:$0xff]  ;;  %v1013_v14 = vand.u32 4294901760, %v1012_v6 }
  0xcb   : > { %401 = vadd.xlane.f32.xlu2 %v10779_v42  ;;  %978 = vmatpush.msra.mxu1 %v977_v12  ;;  %v10894_v46 = vand.u32 4294901760, %v770_v39 }
  0xcc   : > { %v995_v47 = vand.u32 4294901760, %v994_v38  ;;  %1268 = vmatpush.msra.mxu3 %v10879_v35  ;;  %817 = vmatpush.msra.mxu0 %v10879_v35 }
  0xcd   : > { %984 = vmatpush.msra.mxu1 %v983_v21  ;;  %v10904_v60 = vsub.f32 %v770_v39, %v10894_v46  ;;  %1148 = vmatpush.msra.mxu2 %v10892_v45  ;;  %v10926_v21 = vsub.f32 %v764_v1, %v10914_v11  ;;  %v755_v1 = vld [vmem:[#allocation7 + $0x18] sm:$0xff] }
  0xce   : > { %1270 = vmatpush.msra.mxu3 %v10894_v46  ;;  %819 = vmatpush.msra.mxu0 %v10894_v46 }
  0xcf   : > { %990 = vmatpush.msra.mxu1 %v989_v28  ;;  %v17977_v7 = vand.u32 4294901760, %v10904_v60  ;;  %1151 = vmatpush.msra.mxu2 %v10904_v60  ;;  %v10932_v28 = vand.u32 4294901760, %v761_v22  ;;  %v17975_v39 = vand.u32 4294901760, %v10926_v21 }
  0xd1   : > { %996 = vmatpush.msra.mxu1 %v995_v47  ;;  %v1018_v18 = vsub.f32 %v10904_v60, %v17977_v7  ;;  %v1030_v55 = vsub.f32 %v10926_v21, %v17975_v39 }
  0xd2   : > { %405 = vadd.xlane.f32.xlu0 %v10789_v48  ;;  %409 = vadd.xlane.f32.xlu1 %v10794_v50 }
  0xd3   : > { %480 = vadd.xlane.f32.xlu2 %v460_v49  ;;  %v767_v49 = vld [vmem:[#allocation7 + $0x78] sm:$0xff]  ;;  %v1019_v38 = vand.u32 4294901760, %v1018_v18  ;;  %v10956_v18 = vand.u32 4294901760, %v755_v1 }
  0xd4   : > { %v10908_v0 = vand.u32 4294901760, %v767_v49 }
  0xd6   : > { %v10919_v12 = vsub.f32 %v767_v49, %v10908_v0  ;;  %1272 = vmatpush.msra.mxu3 %v10908_v0  ;;  %821 = vmatpush.msra.mxu0 %v10908_v0  ;;  %v10941_v49 = vsub.f32 %v761_v22, %v10932_v28  ;;  %v1031_v22 = vand.u32 4294901760, %v1030_v55 }
  0xd8   : > { %v17974_v26 = vand.u32 4294901760, %v10919_v12  ;;  %1154 = vmatpush.msra.mxu2 %v10919_v12  ;;  %1274 = vmatpush.msra.mxu3 %v10914_v11  ;;  %v17976_v6 = vand.u32 4294901760, %v10941_v49  ;;  %v18341_v45 = vand.u32 4294901760, %v10919_v12 }
  0xd9   : > { %823 = vmatpush.msra.mxu0 %v10914_v11 }
  0xda   : > { %484 = vadd.xlane.f32.xlu0 %v462_v52  ;;  %v1001_v52 = vand.u32 4294901760, %v1000_v40  ;;  %v758_v40 = vld [vmem:[#allocation7 + $0x30] sm:$0xff]  ;;  %v1024_v47 = vsub.f32 %v10919_v12, %v17974_v26  ;;  %1157 = vmatpush.msra.mxu2 %v10926_v21  ;;  %v752_v26 = vld [vmem:[#allocation7] sm:$0xff] }
  0xdb   : > { %407 = vadd.xlane.f32.xlu2 %v10803_v53  ;;  %1276 = vmatpush.msra.mxu3 %v10932_v28  ;;  %v10968_v39 = vand.u32 4294901760, %v752_v26 }
  0xdc   : > { %1002 = vmatpush.msra.mxu1 %v1001_v52  ;;  %v10944_v52 = vand.u32 4294901760, %v758_v40  ;;  %825 = vmatpush.msra.mxu0 %v10932_v28 }
  0xdd   : > { %1160 = vmatpush.msra.mxu2 %v10941_v49  ;;  %v10977_v7 = vsub.f32 %v752_v26, %v10968_v39 }
  0xde   : > { %1008 = vmatpush.msra.mxu1 %v1007_v5  ;;  %v1025_v5 = vand.u32 4294901760, %v1024_v47  ;;  %1278 = vmatpush.msra.mxu3 %v10944_v52 }
  0xdf   : > { %827 = vmatpush.msra.mxu0 %v10944_v52 }
  0xe0   : > { %1014 = vmatpush.msra.mxu1 %v1013_v14  ;;  %v10953_v14 = vsub.f32 %v758_v40, %v10944_v52  ;;  %v10965_v40 = vsub.f32 %v755_v1, %v10956_v18  ;;  %1280 = vmatpush.msra.mxu3 %v10956_v18 }
  0xe1   : > { %829 = vmatpush.msra.mxu0 %v10956_v18 }
  0xe2   : > { %411 = vadd.xlane.f32.xlu0 %v10807_v54  ;;  %1020 = vmatpush.msra.mxu1 %v1019_v38  ;;  %v1036_v38 = vsub.f32 %v10941_v49, %v17976_v6  ;;  %v17978_v47 = vand.u32 4294901760, %v10953_v14  ;;  %v17979_v6 = vand.u32 4294901760, %v10965_v40 }
  0xe3   : > { %1163 = vmatpush.msra.mxu2 %v10953_v14  ;;  %1282 = vmatpush.msra.mxu3 %v10968_v39 }
  0xe4   : > { %1026 = vmatpush.msra.mxu1 %v1025_v5  ;;  %v1037_v55 = vand.u32 4294901760, %v1036_v38  ;;  %v1042_v5 = vsub.f32 %v10953_v14, %v17978_v47  ;;  %831 = vmatpush.msra.mxu0 %v10968_v39  ;;  %v1053_v38 = vand.u32 4294901760, %v10977_v7 }
  0xe5   : > { %1166 = vmatpush.msra.mxu2 %v10965_v40 }
  0xe6   : > { %1032 = vmatpush.msra.mxu1 %v1031_v22  ;;  %v1043_v1 = vand.u32 4294901760, %v1042_v5  ;;  %v1048_v22 = vsub.f32 %v10965_v40, %v17979_v6  ;;  %1383 = vmatpush.msrb.mxu0 %v963_v41  ;;  %v1054_v47 = vsub.f32 %v10977_v7, %v1053_v38 }
  0xe7   : > { %1169 = vmatpush.msra.mxu2 %v10977_v7 }
  0xe8   : > { %1038 = vmatpush.msra.mxu1 %v1037_v55  ;;  %v1049_v26 = vand.u32 4294901760, %v1048_v22  ;;  %1387 = vmatpush.msrb.mxu0 %v969_v61  ;;  %v1055_v55 = vand.u32 4294901760, %v1054_v47 }
  0xea   : > { %1044 = vmatpush.msra.mxu1 %v1043_v1  ;;  %1391 = vmatpush.msrb.mxu0 %v975_v2 }
  0xec   : > { %1050 = vmatpush.msra.mxu1 %v1049_v26  ;;  %1395 = vmatpush.msrb.mxu0 %v981_v8 }
  0xee   : > { %1056 = vmatpush.msra.mxu1 %v1055_v55  ;;  %1399 = vmatpush.msrb.mxu0 %v987_v15 }
  0xf0   : > { %1510 = vmatpush.msrb.mxu1 %v10764_v36  ;;  %1403 = vmatpush.msrb.mxu0 %v993_v25 }
  0xf2   : > { %1512 = vmatpush.msrb.mxu1 %v10810_v56  ;;  %1407 = vmatpush.msrb.mxu0 %v999_v29 }
  0xf4   : > { %1514 = vmatpush.msrb.mxu1 %v10815_v59  ;;  %1411 = vmatpush.msrb.mxu0 %v1005_v43 }
  0xf6   : > { %1516 = vmatpush.msrb.mxu1 %v10824_v63  ;;  %1415 = vmatpush.msrb.mxu0 %v1011_v57 }
  0xf8   : > { %1518 = vmatpush.msrb.mxu1 %v10836_v4 }
  0xfa   : > { %1520 = vmatpush.msrb.mxu1 %v10849_v10 }
  0xfc   : > { %1522 = vmatpush.msrb.mxu1 %v10857_v16 }
  0xfe   : > { %1524 = vmatpush.msrb.mxu1 %v10870_v24  ;;  %v18342_v24 = vand.u32 4294901760, %v10926_v21 }
 0x100   : > { %1526 = vmatpush.msrb.mxu1 %v10879_v35  ;;  %v18343_v35 = vand.u32 4294901760, %v10941_v49 }
 0x102   : > { %1528 = vmatpush.msrb.mxu1 %v10894_v46  ;;  %v18346_v46 = vand.u32 4294901760, %v10953_v14 }
 0x104   : > { %1530 = vmatpush.msrb.mxu1 %v10908_v0 }
 0x106   : > { %1532 = vmatpush.msrb.mxu1 %v10914_v11 }
 0x108   : > { %1534 = vmatpush.msrb.mxu1 %v10932_v28 }
 0x10a   : > { %1536 = vmatpush.msrb.mxu1 %v10944_v52 }
 0x10c   : > { %1538 = vmatpush.msrb.mxu1 %v10956_v18 }
 0x10e   : > { %1540 = vmatpush.msrb.mxu1 %v10968_v39 }
 0x12d   : > { %v477_v5 = vpop.xlane.xlu1 %476  ;;  %v473_v6 = vpop.xlane.xlu0 %472 }
 0x12e   : > { %v506_v37 = vmul.f32 %v477_v5, %v10733_v13  ;;  %v504_v41 = vmul.f32 %v473_v6, %v10733_v13 }
 0x130   : > { %v522_v1 = vadd.f32 1e-05, %v506_v37  ;;  %v11001_v58 = vadd.f32 1e-05, %v504_v41 }
 0x132   : > { %10018 = vrsqrt.f32 %v522_v1  ;;  %vm562_vm1 = vweird.f32 %v522_v1  ;;  %vm542_vm5 = vweird.f32 %v11001_v58 }
 0x133   : > { %10020 = vrsqrt.f32 %v11001_v58 }
 0x135   : > { %v404_v36 = vpop.xlane.xlu1 %403  ;;  %v400_v61 = vpop.xlane.xlu0 %399 }
 0x136   : > { %v433_v56 = vmul.f32 %v10733_v13, %v404_v36  ;;  %v475_v62 = vpop.xlane.xlu2 %474  ;;  %v431_v2 = vmul.f32 %v10733_v13, %v400_v61  ;;  %v11062_v36 = vld [vmem:[%s10712_s23 + $0x70] sm:$0xff] }
 0x137   : > { %v505_v59 = vmul.f32 %v475_v62, %v10733_v13  ;;  %v11088_v62 = vld [vmem:[%s17966_s2] ss:$0 sm:$0xff] }
 0x138   : > { %v11019_v3 = vpop.eup %10018  ;;  %v11022_v63 = vsub.f32 %v10751_v30, %v433_v56  ;;  %v11025_v8 = vsub.f32 %v10754_v31, %v431_v2  ;;  %v18340_v31 = vand.u32 4294901760, %v10904_v60 }
 0x139   : > { %v10021_v9 = vpop.eup %10020  ;;  %v557_v4 = vmul.f32 %v11019_v3, %v522_v1  ;;  %v11031_v15 = vadd.f32 1e-05, %v505_v59  ;;  %vm563_vm2 = vweird.f32 %v11019_v3  ;;  %v18347_v59 = vand.u32 4294901760, %v10965_v40 }
 0x13a   : > { %v537_v17 = vmul.f32 %v10021_v9, %v11001_v58  ;;  %v465_v23 = vmul.f32 %v11022_v63, %v11022_v63  ;;  %v463_v30 = vmul.f32 %v11025_v8, %v11025_v8  ;;  %1419 = vmatpush.msrb.mxu0 %v18340_v31  ;;  %vm543_vm3 = vweird.f32 %v10021_v9  ;;  %vm11068_vm4 = vmor %vm562_vm1, %vm563_vm2 }
 0x13b   : > { %v558_v10 = vmul.f32 %v11019_v3, %v557_v4  ;;  %10022 = vrsqrt.f32 %v11031_v15  ;;  %vm544_vm6 = vmor %vm542_vm5, %vm543_vm3  ;;  %vm552_vm8 = vweird.f32 %v11031_v15 }
 0x13c   : > { %v538_v25 = vmul.f32 %v10021_v9, %v537_v17  ;;  %490 = vadd.xlane.f32.xlu0 %v465_v23  ;;  %486 = vadd.xlane.f32.xlu2 %v463_v30 }
 0x13d   : > { %v559_v29 = vmul.f32 0.5, %v558_v10  ;;  %v483_v32 = vpop.xlane.xlu1 %482  ;;  %v479_v43 = vpop.xlane.xlu0 %478  ;;  %1423 = vmatpush.msrb.mxu0 %v18341_v45 }
 0x13e   : > { %v539_v57 = vmul.f32 0.5, %v538_v25  ;;  %v509_v16 = vmul.f32 %v483_v32, %v10733_v13  ;;  %v402_v60 = vpop.xlane.xlu2 %401  ;;  %v507_v6 = vmul.f32 %v479_v43, %v10733_v13 }
 0x13f   : > { %v560_v47 = vsub.f32 1.5, %v559_v29  ;;  %v432_v22 = vmul.f32 %v10733_v13, %v402_v60  ;;  %1427 = vmatpush.msrb.mxu0 %v18342_v24 }
 0x140   : > { %v540_v12 = vsub.f32 1.5, %v539_v57  ;;  %v11053_v26 = vadd.f32 1e-05, %v509_v16  ;;  %v11055_v55 = vadd.f32 1e-05, %v507_v6 }
 0x141   : > { %v10023_v5 = vpop.eup %10022  ;;  %v561_v37 = vmul.f32 %v11019_v3, %v560_v47  ;;  %v11059_v41 = vsub.f32 %v10779_v42, %v432_v22  ;;  %1431 = vmatpush.msrb.mxu0 %v18343_v35  ;;  %v11075_v42 = vld [vmem:[#allocation5] ss:$0 sm:$0xff] }
 0x142   : > { %v541_v61 = vmul.f32 %v10021_v9, %v540_v12  ;;  %v547_v56 = vmul.f32 %v10023_v5, %v11031_v15  ;;  %10024 = vrsqrt.f32 %v11053_v26  ;;  %vm553_vm7 = vweird.f32 %v10023_v5 }
 0x143   : > { %10026 = vrsqrt.f32 %v11055_v55  ;;  %1435 = vmatpush.msrb.mxu0 %v18346_v46  ;;  %v464_v58 = vmul.f32 %v11059_v41, %v11059_v41  ;;  %v565_v2 = vsel %vm11068_vm4, %v11019_v3, %v561_v37  ;;  %vm554_vm9 = vmor %vm552_vm8, %vm553_vm7  ;;  %vm572_vm10 = vweird.f32 %v11055_v55 }
 0x144   : > { %v545_v49 = vsel %vm544_vm6, %v10021_v9, %v541_v61  ;;  %v548_v1 = vmul.f32 %v10023_v5, %v547_v56  ;;  %413 = vadd.xlane.f32.xlu2 %v11062_v36  ;;  %v698_v11 = vmul.f32 %v565_v2, %v10737_v19  ;;  %vm592_vm15 = vweird.f32 %v11053_v26 }
 0x145   : > { %v696_v0 = vmul.f32 %v545_v49, %v10739_v20  ;;  %v406_v14 = vpop.xlane.xlu0 %405  ;;  %1439 = vmatpush.msrb.mxu0 %v18347_v59  ;;  %488 = vadd.xlane.f32.xlu1 %v464_v58  ;;  %v410_v31 = vpop.xlane.xlu1 %409 }
 0x146   : > { %v549_v9 = vmul.f32 0.5, %v548_v1  ;;  %v481_v4 = vpop.xlane.xlu2 %480  ;;  %v434_v17 = vmul.f32 %v10733_v13, %v406_v14  ;;  %v718_v43 = vmul.f32 %v11075_v42, %v698_v11 }
 0x147   : > { %v716_v23 = vmul.f32 %v11075_v42, %v696_v0  ;;  %v508_v30 = vmul.f32 %v481_v4, %v10733_v13  ;;  %1443 = vmatpush.msrb.mxu0 %v1053_v38  ;;  %v436_v38 = vmul.f32 %v10733_v13, %v410_v31 }
 0x148   : > { %v11103_v20 = vpop.eup %10024  ;;  %v550_v40 = vsub.f32 1.5, %v549_v9  ;;  %v11107_v3 = vsub.f32 %v10789_v48, %v434_v17  ;;  %v11122_v48 = vld [vmem:[%s10712_s23 + $0x78] sm:$0xff]  ;;  %v738_v37 = vadd.f32 %v11088_v62, %v718_v43  ;;  %s9917_s23 = smul.u32 384, %s10614_s28 }
 0x149   : > { %v10027_v10 = vpop.eup %10026  ;;  %v736_v25 = vadd.f32 %v11088_v62, %v716_v23  ;;  %v587_v29 = vmul.f32 %v11103_v20, %v11053_v26  ;;  %v11112_v28 = vadd.f32 1e-05, %v508_v30  ;;  %vm593_vm0 = vweird.f32 %v11103_v20 }
 0x14a   : > { %v551_v7 = vmul.f32 %v10023_v5, %v550_v40  ;;  %v567_v19 = vmul.f32 %v10027_v10, %v11055_v55  ;;  %v466_v15 = vmul.f32 %v11107_v3, %v11107_v3  ;;  %vm573_vm11 = vweird.f32 %v10027_v10  ;;  %vm11204_vm2 = vmor %vm592_vm15, %vm593_vm0  ;;  %s9720_s13 = scalar_lea.hbm %s17969_s5, %s9917_s23 }
 0x14b   : > { %v11118_v32 = vand.u32 4294901760, %v736_v25  ;;  %10028 = vrsqrt.f32 %v11112_v28  ;;  %v588_v16 = vmul.f32 %v11103_v20, %v587_v29  ;;  %vm574_vm12 = vmor %vm572_vm10, %vm573_vm11  ;;  %v11168_v0 = vand.u32 4294901760, %v738_v37  ;;  %s9723_s16 = sshll.u32 %s9720_s13, 4  ;;  %s9724_s16 = int_to_ptr.hbm [resolvable:$true] %s9723_s16 }
 0x14c   : > { %v555_v45 = vsel %vm554_vm9, %v10023_v5, %v551_v7  ;;  %v568_v52 = vmul.f32 %v10027_v10, %v567_v19  ;;  %492 = vadd.xlane.f32.xlu2 %v466_v15  ;;  %vm582_vm13 = vweird.f32 %v11112_v28 }
 0x14d   : > { %18348 = vst [vmem:[#allocation18_spill] sm:$0xff] %v11118_v32  ;;  %v697_v57 = vmul.f32 %v555_v45, %v10746_v27  ;;  %1058 = vmatmul.f32.vlgmr.msra.gmra.mxu1 %v11118_v32  ;;  %v485_v60 = vpop.xlane.xlu0 %484  ;;  %v11133_v6 = vsub.f32 %v736_v25, %v11118_v32  ;;  %415 = vadd.xlane.f32.xlu1 %v11122_v48  ;;  %v589_v56 = vmul.f32 0.5, %v588_v16 }
 0x14e   : > { %v569_v18 = vmul.f32 0.5, %v568_v52  ;;  %v408_v47 = vpop.xlane.xlu2 %407  ;;  %v510_v22 = vmul.f32 %v485_v60, %v10733_v13  ;;  %v11138_v27 = vsub.f32 %v10794_v50, %v436_v38  ;;  %18352 = vst [vmem:[#allocation22_spill] sm:$0xff] %v11168_v0  ;;  %v11191_v29 = vsub.f32 %v738_v37, %v11168_v0 }
 0x14f   : > { %18349 = vst [vmem:[#allocation19_spill] sm:$0xff] %v11133_v6  ;;  %v717_v24 = vmul.f32 %v11075_v42, %v697_v57  ;;  %v435_v12 = vmul.f32 %v10733_v13, %v408_v47  ;;  %1172 = vmatmul.f32.vlgmr.msra.gmra.mxu2 %v11133_v6  ;;  %v11144_v5 = vand.u32 4294901760, %v11133_v6  ;;  %v590_v9 = vsub.f32 1.5, %v589_v56 }
 0x150   : > { %v570_v35 = vsub.f32 1.5, %v569_v18  ;;  %v11148_v21 = vadd.f32 1e-05, %v510_v22  ;;  %v468_v58 = vmul.f32 %v11138_v27, %v11138_v27  ;;  %18356 = vst [vmem:[#allocation26_spill] sm:$0xff] %v11191_v29  ;;  %v11215_v60 = vand.u32 4294901760, %v11191_v29 }
 0x151   : > { %18350 = vst [vmem:[#allocation20_spill] sm:$0xff] %v11144_v5  ;;  %v10029_v61 = vpop.eup %10028  ;;  %v737_v50 = vadd.f32 %v11088_v62, %v717_v24  ;;  %1286 = vmatmul.f32.vlgmr.msra.gmra.mxu3 %v11144_v5  ;;  %v11156_v46 = vsub.f32 %v10803_v53, %v435_v12  ;;  %v835_v39 = vsub.f32 %v11133_v6, %v11144_v5 }
 0x152   : > { %v571_v49 = vmul.f32 %v10027_v10, %v570_v35  ;;  %v577_v1 = vmul.f32 %v10029_v61, %v11112_v28  ;;  %10030 = vrsqrt.f32 %v11148_v21  ;;  %vm583_vm14 = vweird.f32 %v10029_v61  ;;  %18361 = vst [vmem:[#allocation29_spill] sm:$0xff] %v11215_v60 }
 0x153   : > { %v11164_v2 = vand.u32 4294901760, %v737_v50  ;;  %v467_v55 = vmul.f32 %v11156_v46, %v11156_v46  ;;  %v11170_v59 = vand.u32 4294901760, %v835_v39  ;;  %v591_v7 = vmul.f32 %v11103_v20, %v590_v9  ;;  %vm584_vm1 = vmor %vm582_vm13, %vm583_vm14 }
 0x154   : > { %v575_v53 = vsel %vm574_vm12, %v10027_v10, %v571_v49  ;;  %v578_v14 = vmul.f32 %v10029_v61, %v577_v1  ;;  %vm602_vm3 = vweird.f32 %v11148_v21 }
 0x155   : > { %18351 = vst [vmem:[#allocation21_spill] sm:$0xff] %v11164_v2  ;;  %v699_v4 = vmul.f32 %v575_v53, %v10762_v34  ;;  %494 = vadd.xlane.f32.xlu0 %v467_v55  ;;  %1062 = vmatmul.f32.gmra.mxu1 %v11164_v2  ;;  %v412_v17 = vpop.xlane.xlu0 %411  ;;  %v11175_v23 = vsub.f32 %v737_v50, %v11164_v2 }
 0x156   : > { %18353 = vst [vmem:[#allocation23_spill] sm:$0xff] %v11170_v59  ;;  %v579_v30 = vmul.f32 0.5, %v578_v14  ;;  %496 = vadd.xlane.f32.xlu1 %v468_v58  ;;  %837 = vmatmul.f32.vlgmr.msra.gmra.mxu0 %v11170_v59  ;;  %v437_v31 = vmul.f32 %v10733_v13, %v412_v17  ;;  %v595_v26 = vsel %vm11204_vm2, %v11103_v20, %v591_v7 }
 0x157   : > { %18354 = vst [vmem:[#allocation24_spill] sm:$0xff] %v11175_v23  ;;  %v719_v34 = vmul.f32 %v11075_v42, %v699_v4  ;;  %1177 = vmatmul.f32.gmra.mxu2 %v11175_v23  ;;  %v11185_v11 = vand.u32 4294901760, %v11175_v23  ;;  %v701_v12 = vmul.f32 %v595_v26, %v10760_v33  ;;  %v851_v20 = vsub.f32 %v11191_v29, %v11215_v60 }
 0x158   : > { %v10031_v40 = vpop.eup %10030  ;;  %v580_v10 = vsub.f32 1.5, %v579_v30  ;;  %v11188_v25 = vsub.f32 %v10807_v54, %v437_v31 }
 0x159   : > { %18355 = vst [vmem:[#allocation25_spill] sm:$0xff] %v11185_v11  ;;  %v739_v19 = vadd.f32 %v11088_v62, %v719_v34  ;;  %v597_v38 = vmul.f32 %v10031_v40, %v11148_v21  ;;  %1292 = vmatmul.f32.gmra.mxu3 %v11185_v11  ;;  %v843_v43 = vsub.f32 %v11175_v23, %v11185_v11  ;;  %vm603_vm4 = vweird.f32 %v10031_v40  ;;  %v762_v11 = vld [vmem:[#allocation7 + $0x50] sm:$0xff] }
 0x15a   : > { %v581_v45 = vmul.f32 %v10029_v61, %v580_v10  ;;  %v469_v52 = vmul.f32 %v11188_v25, %v11188_v25  ;;  %vm604_vm5 = vmor %vm602_vm3, %vm603_vm4  ;;  %v11237_v50 = vand.u32 4294901760, %v851_v20  ;;  %v11636_v5 = vand.u32 4294901760, %v762_v11 }
 0x15b   : > { %v598_v15 = vmul.f32 %v10031_v40, %v597_v38  ;;  %v11210_v28 = vand.u32 4294901760, %v843_v43  ;;  %v11212_v57 = vand.u32 4294901760, %v739_v19 }
 0x15c   : > { %v585_v16 = vsel %vm584_vm1, %v10029_v61, %v581_v45  ;;  %498 = vadd.xlane.f32.xlu2 %v469_v52  ;;  %v721_v61 = vmul.f32 %v11075_v42, %v701_v12  ;;  %18364 = vst [vmem:[#allocation32_spill] sm:$0xff] %v11237_v50 }
 0x15d   : > { %18359 = vst [vmem:[#allocation27_spill] sm:$0xff] %v11210_v28  ;;  %v700_v18 = vmul.f32 %v585_v16, %v10785_v44  ;;  %v599_v47 = vmul.f32 0.5, %v598_v15  ;;  %1066 = vmatmul.f32.gmra.mxu1 %v11168_v0  ;;  %v11230_v44 = vsub.f32 %v739_v19, %v11212_v57 }
 0x15e   : > { %18360 = vst [vmem:[#allocation28_spill] sm:$0xff] %v11212_v57  ;;  %845 = vmatmul.f32.gmra.mxu0 %v11210_v28  ;;  %v741_v39 = vadd.f32 %v11088_v62, %v721_v61 }
 0x15f   : > { %v720_v22 = vmul.f32 %v11075_v42, %v700_v18  ;;  %v600_v24 = vsub.f32 1.5, %v599_v47  ;;  %1182 = vmatmul.f32.gmra.mxu2 %v11191_v29  ;;  %18362 = vst [vmem:[#allocation30_spill] sm:$0xff] %v11230_v44  ;;  %v11240_v33 = vand.u32 4294901760, %v11230_v44 }
 0x160   : > { %v11253_v55 = vand.u32 4294901760, %v741_v39 }
 0x161   : > { %v740_v37 = vadd.f32 %v11088_v62, %v720_v22  ;;  %v601_v35 = vmul.f32 %v10031_v40, %v600_v24  ;;  %1298 = vmatmul.f32.gmra.mxu3 %v11215_v60  ;;  %18365 = vst [vmem:[#allocation33_spill] sm:$0xff] %v11240_v33  ;;  %v859_v1 = vsub.f32 %v11230_v44, %v11240_v33 }
 0x162   : > { %18367 = vst [vmem:[#allocation35_spill] sm:$0xff] %v11253_v55  ;;  %v11268_v17 = vsub.f32 %v741_v39, %v11253_v55 }
 0x163   : > { %v11235_v21 = vand.u32 4294901760, %v740_v37  ;;  %v605_v56 = vsel %vm604_vm5, %v10031_v40, %v601_v35  ;;  %v11256_v14 = vand.u32 4294901760, %v859_v1 }
 0x164   : > { %v702_v49 = vmul.f32 %v605_v56, %v10798_v51  ;;  %18370 = vst [vmem:[#allocation38_spill] sm:$0xff] %v11268_v17  ;;  %v11276_v34 = vand.u32 4294901760, %v11268_v17 }
 0x165   : > { %18363 = vst [vmem:[#allocation31_spill] sm:$0xff] %v11235_v21  ;;  %1070 = vmatmul.f32.gmra.mxu1 %v11212_v57  ;;  %v11250_v58 = vsub.f32 %v740_v37, %v11235_v21 }
 0x166   : > { %853 = vmatmul.f32.gmra.mxu0 %v11237_v50  ;;  %v722_v53 = vmul.f32 %v11075_v42, %v702_v49  ;;  %18368 = vst [vmem:[#allocation36_spill] sm:$0xff] %v11256_v14  ;;  %v875_v40 = vsub.f32 %v11268_v17, %v11276_v34 }
 0x167   : > { %1187 = vmatmul.f32.gmra.mxu2 %v11230_v44  ;;  %18366 = vst [vmem:[#allocation34_spill] sm:$0xff] %v11250_v58  ;;  %v11259_v9 = vand.u32 4294901760, %v11250_v58 }
 0x168   : > { %v742_v51 = vadd.f32 %v11088_v62, %v722_v53  ;;  %18373 = vst [vmem:[#allocation41_spill] sm:$0xff] %v11276_v34  ;;  %v11287_v7 = vand.u32 4294901760, %v875_v40 }
 0x169   : > { %1304 = vmatmul.f32.gmra.mxu3 %v11240_v33  ;;  %18369 = vst [vmem:[#allocation37_spill] sm:$0xff] %v11259_v9  ;;  %v867_v4 = vsub.f32 %v11250_v58, %v11259_v9 }
 0x16a   : > { %v11271_v30 = vand.u32 4294901760, %v742_v51  ;;  %18375 = vst [vmem:[#allocation43_spill] sm:$0xff] %v11287_v7 }
 0x16b   : > { %v11273_v31 = vand.u32 4294901760, %v867_v4 }
 0x16c   : > { %18371 = vst [vmem:[#allocation39_spill] sm:$0xff] %v11271_v30  ;;  %v11284_v10 = vsub.f32 %v742_v51, %v11271_v30 }
 0x16d   : > { %1074 = vmatmul.f32.gmra.mxu1 %v11235_v21  ;;  %18372 = vst [vmem:[#allocation40_spill] sm:$0xff] %v11273_v31 }
 0x16e   : > { %861 = vmatmul.f32.gmra.mxu0 %v11256_v14  ;;  %18374 = vst [vmem:[#allocation42_spill] sm:$0xff] %v11284_v10  ;;  %v11290_v19 = vand.u32 4294901760, %v11284_v10 }
 0x16f   : > { %1192 = vmatmul.f32.gmra.mxu2 %v11250_v58  ;;  %v777_v58 = vld [vmem:[#allocation7 + $0xc8] sm:$0xff] }
 0x170   : > { %18376 = vst [vmem:[#allocation44_spill] sm:$0xff] %v11290_v19  ;;  %v883_v38 = vsub.f32 %v11284_v10, %v11290_v19 }
 0x171   : > { %1310 = vmatmul.f32.gmra.mxu3 %v11259_v9 }
 0x172   : > { %v11298_v43 = vand.u32 4294901760, %v883_v38 }
 0x174   : > { %18377 = vst [vmem:[#allocation45_spill] sm:$0xff] %v11298_v43 }
 0x175   : > { %1078 = vmatmul.f32.gmra.mxu1 %v11253_v55 }
 0x176   : > { %869 = vmatmul.f32.gmra.mxu0 %v11273_v31 }
 0x177   : > { %1197 = vmatmul.f32.gmra.mxu2 %v11268_v17 }
 0x179   : > { %1316 = vmatmul.f32.gmra.mxu3 %v11276_v34 }
 0x17d   : > { %1082 = vmatmul.f32.gmra.mxu1 %v11271_v30 }
 0x17e   : > { %877 = vmatmul.f32.gmra.mxu0 %v11287_v7 }
 0x17f   : > { %1202 = vmatmul.f32.gmra.mxu2 %v11284_v10 }
 0x181   : > { %1322 = vmatmul.f32.gmra.mxu3 %v11290_v19 }
 0x186   : > { %885 = vmatmul.f32.gmra.mxu0 %v11298_v43 }
 0x1af   : > { %v487_v54 = vpop.xlane.xlu2 %486  ;;  %v491_v45 = vpop.xlane.xlu0 %490 }
 0x1b0   : > { %v511_v52 = vmul.f32 %v487_v54, %v10733_v13  ;;  %v513_v15 = vmul.f32 %v491_v45, %v10733_v13 }
 0x1b2   : > { %v527_v16 = vadd.f32 1e-05, %v511_v52  ;;  %v529_v26 = vadd.f32 1e-05, %v513_v15 }
 0x1b4   : > { %10032 = vrsqrt.f32 %v527_v16  ;;  %vm632_vm6 = vweird.f32 %v529_v26  ;;  %vm612_vm9 = vweird.f32 %v527_v16 }
 0x1b5   : > { %10034 = vrsqrt.f32 %v529_v26 }
 0x1b7   : > { %v414_v18 = vpop.xlane.xlu2 %413 }
 0x1b8   : > { %v438_v47 = vmul.f32 %v10733_v13, %v414_v18  ;;  %v489_v22 = vpop.xlane.xlu1 %488 }
 0x1b9   : > { %v512_v12 = vmul.f32 %v489_v22, %v10733_v13 }
 0x1ba   : > { %v10033_v24 = vpop.eup %10032  ;;  %v11306_v20 = vsub.f32 %v11062_v36, %v438_v47 }
 0x1bb   : > { %v10035_v37 = vpop.eup %10034  ;;  %v607_v35 = vmul.f32 %v10033_v24, %v527_v16  ;;  %v528_v56 = vadd.f32 1e-05, %v512_v12  ;;  %vm613_vm8 = vweird.f32 %v10033_v24 }
 0x1bc   : > { %v627_v61 = vmul.f32 %v10035_v37, %v529_v26  ;;  %v470_v39 = vmul.f32 %v11306_v20, %v11306_v20  ;;  %vm633_vm7 = vweird.f32 %v10035_v37  ;;  %vm614_vm11 = vmor %vm612_vm9, %vm613_vm8 }
 0x1bd   : > { %v608_v49 = vmul.f32 %v10033_v24, %v607_v35  ;;  %10036 = vrsqrt.f32 %v528_v56  ;;  %vm634_vm10 = vmor %vm632_vm6, %vm633_vm7  ;;  %vm622_vm13 = vweird.f32 %v528_v56 }
 0x1be   : > { %v628_v1 = vmul.f32 %v10035_v37, %v627_v61  ;;  %500 = vadd.xlane.f32.xlu0 %v470_v39 }
 0x1bf   : > { %v609_v53 = vmul.f32 0.5, %v608_v49  ;;  %v493_v36 = vpop.xlane.xlu2 %492 }
 0x1c0   : > { %v629_v51 = vmul.f32 0.5, %v628_v1  ;;  %v416_v40 = vpop.xlane.xlu1 %415  ;;  %v514_v45 = vmul.f32 %v493_v36, %v10733_v13 }
 0x1c1   : > { %v610_v4 = vsub.f32 1.5, %v609_v53  ;;  %v439_v54 = vmul.f32 %v10733_v13, %v416_v40 }
 0x1c2   : > { %v630_v38 = vsub.f32 1.5, %v629_v51  ;;  %v530_v47 = vadd.f32 1e-05, %v514_v45 }
 0x1c3   : > { %v611_v52 = vmul.f32 %v10033_v24, %v610_v4  ;;  %v10037_v15 = vpop.eup %10036  ;;  %v11313_v22 = vsub.f32 %v11122_v48, %v439_v54 }
 0x1c4   : > { %v631_v18 = vmul.f32 %v10035_v37, %v630_v38  ;;  %v617_v12 = vmul.f32 %v10037_v15, %v528_v56  ;;  %10038 = vrsqrt.f32 %v530_v47  ;;  %vm623_vm12 = vweird.f32 %v10037_v15 }
 0x1c5   : > { %v615_v26 = vsel %vm614_vm11, %v10033_v24, %v611_v52  ;;  %v471_v49 = vmul.f32 %v11313_v22, %v11313_v22  ;;  %vm624_vm14 = vmor %vm622_vm13, %vm623_vm12  ;;  %vm642_vm15 = vweird.f32 %v530_v47 }
 0x1c6   : > { %v703_v35 = vmul.f32 %v615_v26, %v11025_v8  ;;  %v635_v61 = vsel %vm634_vm10, %v10035_v37, %v631_v18  ;;  %v618_v39 = vmul.f32 %v10037_v15, %v617_v12 }
 0x1c7   : > { %v705_v53 = vmul.f32 %v635_v61, %v11022_v63  ;;  %502 = vadd.xlane.f32.xlu1 %v471_v49 }
 0x1c8   : > { %v723_v16 = vmul.f32 %v11075_v42, %v703_v35  ;;  %v495_v1 = vpop.xlane.xlu0 %494  ;;  %v619_v51 = vmul.f32 0.5, %v618_v39 }
 0x1c9   : > { %v497_v4 = vpop.xlane.xlu1 %496  ;;  %v515_v48 = vmul.f32 %v495_v1, %v10733_v13  ;;  %v725_v63 = vmul.f32 %v11075_v42, %v705_v53 }
 0x1ca   : > { %v743_v24 = vadd.f32 %v11088_v62, %v723_v16  ;;  %v516_v8 = vmul.f32 %v497_v4, %v10733_v13  ;;  %v620_v37 = vsub.f32 1.5, %v619_v51  ;;  %v10039_v36 = vpop.eup %10038 }
 0x1cb   : > { %v11323_v40 = vadd.f32 1e-05, %v515_v48  ;;  %v637_v52 = vmul.f32 %v10039_v36, %v530_v47  ;;  %v745_v49 = vadd.f32 %v11088_v62, %v725_v63  ;;  %vm643_vm0 = vweird.f32 %v10039_v36 }
 0x1cc   : > { %v11325_v38 = vand.u32 4294901760, %v743_v24  ;;  %v11327_v54 = vadd.f32 1e-05, %v516_v8  ;;  %v621_v45 = vmul.f32 %v10037_v15, %v620_v37  ;;  %vm644_vm1 = vmor %vm642_vm15, %vm643_vm0 }
 0x1cd   : > { %v638_v12 = vmul.f32 %v10039_v36, %v637_v52  ;;  %v798_v52 = vld [vmem:[#allocation7 + $0x170] sm:$0xff]  ;;  %vm652_vm3 = vweird.f32 %v11323_v40 }
 0x1ce   : > { %18378 = vst [vmem:[#allocation46_spill] sm:$0xff] %v11325_v38  ;;  %10040 = vrsqrt.f32 %v11327_v54  ;;  %1086 = vmatmul.f32.gmra.mxu1 %v11325_v38  ;;  %v11333_v18 = vsub.f32 %v743_v24, %v11325_v38  ;;  %v625_v26 = vsel %vm624_vm14, %v10037_v15, %v621_v45  ;;  %v11351_v24 = vand.u32 4294901760, %v745_v49 }
 0x1cf   : > { %10042 = vrsqrt.f32 %v11323_v40  ;;  %v499_v35 = vpop.xlane.xlu2 %498  ;;  %v704_v61 = vmul.f32 %v625_v26, %v11059_v41  ;;  %v639_v16 = vmul.f32 0.5, %v638_v12  ;;  %vm662_vm2 = vweird.f32 %v11327_v54 }
 0x1d0   : > { %18379 = vst [vmem:[#allocation47_spill] sm:$0xff] %v11333_v18  ;;  %v517_v39 = vmul.f32 %v499_v35, %v10733_v13  ;;  %1207 = vmatmul.f32.gmra.mxu2 %v11333_v18  ;;  %v11340_v56 = vand.u32 4294901760, %v11333_v18  ;;  %v11361_v35 = vand.u32 4294901760, %v798_v52 }
 0x1d1   : > { %v724_v15 = vmul.f32 %v11075_v42, %v704_v61  ;;  %v640_v53 = vsub.f32 1.5, %v639_v16  ;;  %18381 = vst [vmem:[#allocation49_spill] sm:$0xff] %v11351_v24 }
 0x1d2   : > { %18380 = vst [vmem:[#allocation48_spill] sm:$0xff] %v11340_v56  ;;  %v11344_v1 = vadd.f32 1e-05, %v517_v39  ;;  %1328 = vmatmul.f32.gmra.mxu3 %v11340_v56  ;;  %v891_v41 = vsub.f32 %v11333_v18, %v11340_v56  ;;  %1607 = vmatpush.msrb.mxu2 %v11361_v35 }
 0x1d3   : > { %v744_v4 = vadd.f32 %v11088_v62, %v724_v15  ;;  %v641_v47 = vmul.f32 %v10039_v36, %v640_v53  ;;  %2058 = vmatpush.msra.mxu1 %v11361_v35 }
 0x1d4   : > { %v10041_v51 = vpop.eup %10040  ;;  %10044 = vrsqrt.f32 %v11344_v1  ;;  %v11354_v37 = vand.u32 4294901760, %v891_v41  ;;  %v11374_v41 = vsub.f32 %v798_v52, %v11361_v35  ;;  %vm672_vm8 = vweird.f32 %v11344_v1 }
 0x1d5   : > { %v10043_v48 = vpop.eup %10042  ;;  %v657_v8 = vmul.f32 %v10041_v51, %v11327_v54  ;;  %v11356_v63 = vand.u32 4294901760, %v744_v4  ;;  %v645_v26 = vsel %vm644_vm1, %v10039_v36, %v641_v47  ;;  %vm663_vm4 = vweird.f32 %v10041_v51 }
 0x1d6   : > { %18382 = vst [vmem:[#allocation50_spill] sm:$0xff] %v11354_v37  ;;  %v647_v45 = vmul.f32 %v10043_v48, %v11323_v40  ;;  %893 = vmatmul.f32.gmra.mxu0 %v11354_v37  ;;  %v706_v61 = vmul.f32 %v645_v26, %v11107_v3  ;;  %v11370_v36 = vsub.f32 %v745_v49, %v11351_v24  ;;  %vm653_vm5 = vweird.f32 %v10043_v48  ;;  %vm11392_vm6 = vmor %vm662_vm2, %vm663_vm4 }
 0x1d7   : > { %18383 = vst [vmem:[#allocation51_spill] sm:$0xff] %v11356_v63  ;;  %v658_v12 = vmul.f32 %v10041_v51, %v657_v8  ;;  %1090 = vmatmul.f32.gmra.mxu1 %v11356_v63  ;;  %v11367_v16 = vsub.f32 %v744_v4, %v11356_v63  ;;  %1930 = vmatpush.msra.mxu0 %v11374_v41  ;;  %vm11401_vm7 = vmor %vm652_vm3, %vm653_vm5  ;;  %vm4422_vm1 = vcmask 130048   ;;  %vm4925_vm2 = vcmask 523264  }
 0x1d8   : > { %v648_v39 = vmul.f32 %v10043_v48, %v647_v45  ;;  %18385 = vst [vmem:[#allocation53_spill] sm:$0xff] %v11370_v36  ;;  %v726_v53 = vmul.f32 %v11075_v42, %v706_v61  ;;  %v17993_v45 = vand.u32 4294901760, %v11374_v41 }
 0x1d9   : > { %18384 = vst [vmem:[#allocation52_spill] sm:$0xff] %v11367_v16  ;;  %v659_v15 = vmul.f32 0.5, %v658_v12  ;;  %1212 = vmatmul.f32.gmra.mxu2 %v11367_v16  ;;  %v11382_v4 = vand.u32 4294901760, %v11367_v16 }
 0x1da   : > { %v11377_v3 = vpop.eup %10044  ;;  %v649_v47 = vmul.f32 0.5, %v648_v39  ;;  %v746_v52 = vadd.f32 %v11088_v62, %v726_v53  ;;  %v1770_v54 = vsub.f32 %v11374_v41, %v17993_v45 }
 0x1db   : > { %18386 = vst [vmem:[#allocation54_spill] sm:$0xff] %v11382_v4  ;;  %v660_v49 = vsub.f32 1.5, %v659_v15  ;;  %v667_v8 = vmul.f32 %v11377_v3, %v11344_v1  ;;  %1334 = vmatmul.f32.gmra.mxu3 %v11382_v4  ;;  %v899_v61 = vsub.f32 %v11367_v16, %v11382_v4  ;;  %v11414_v16 = vand.u32 4294901760, %v11370_v36  ;;  %v792_v1 = vld [vmem:[#allocation7 + $0x140] sm:$0xff] }
 0x1dc   : > { %v650_v12 = vsub.f32 1.5, %v649_v47  ;;  %v11409_v18 = vand.u32 4294901760, %v746_v52  ;;  %v1771_v10 = vand.u32 4294901760, %v1770_v54  ;;  %vm673_vm9 = vweird.f32 %v11377_v3 }
 0x1dd   : > { %v661_v39 = vmul.f32 %v10041_v51, %v660_v49  ;;  %v668_v53 = vmul.f32 %v11377_v3, %v667_v8  ;;  %v11411_v56 = vand.u32 4294901760, %v899_v61  ;;  %18393 = vst [vmem:[#allocation57_spill] sm:$0xff] %v11414_v16  ;;  %v795_v49 = vld [vmem:[#allocation7 + $0x158] sm:$0xff]  ;;  %vm11447_vm10 = vmor %vm672_vm8, %vm673_vm9 }
 0x1de   : > { %18391 = vst [vmem:[#allocation55_spill] sm:$0xff] %v11409_v18  ;;  %v651_v47 = vmul.f32 %v10043_v48, %v650_v12  ;;  %v11418_v19 = vand.u32 4294901760, %v795_v49  ;;  %1772 = vmatpush.msrb.mxu3 %v1771_v10 }
 0x1df   : > { %18392 = vst [vmem:[#allocation56_spill] sm:$0xff] %v11411_v56  ;;  %v665_v40 = vsel %vm11392_vm6, %v10041_v51, %v661_v39  ;;  %v669_v4 = vmul.f32 0.5, %v668_v53  ;;  %901 = vmatmul.f32.gmra.mxu0 %v11411_v56  ;;  %1094 = vmatmul.f32.gmra.mxu1 %v11351_v24  ;;  %v11436_v39 = vsub.f32 %v746_v52, %v11409_v18 }
 0x1e0   : > { %v655_v8 = vsel %vm11401_vm7, %v10043_v48, %v651_v47  ;;  %v708_v12 = vmul.f32 %v665_v40, %v11138_v27  ;;  %1609 = vmatpush.msrb.mxu2 %v11418_v19  ;;  %v11430_v61 = vsub.f32 %v795_v49, %v11418_v19  ;;  %v907_v48 = vsub.f32 %v11370_v36, %v11414_v16 }
 0x1e1   : > { %v707_v26 = vmul.f32 %v655_v8, %v11156_v46  ;;  %v670_v51 = vsub.f32 1.5, %v669_v4  ;;  %1217 = vmatmul.f32.gmra.mxu2 %v11370_v36  ;;  %18394 = vst [vmem:[#allocation58_spill] sm:$0xff] %v11436_v39  ;;  %2060 = vmatpush.msra.mxu1 %v11418_v19  ;;  %v11460_v47 = vand.u32 4294901760, %v11436_v39 }
 0x1e2   : > { %v17992_v10 = vand.u32 4294901760, %v11430_v61  ;;  %1933 = vmatpush.msra.mxu0 %v11430_v61  ;;  %v728_v52 = vmul.f32 %v11075_v42, %v708_v12  ;;  %v11457_v54 = vand.u32 4294901760, %v907_v48  ;;  %v11467_v12 = vand.u32 4294901760, %v792_v1  ;;  %v783_v48 = vld [vmem:[#allocation7 + $0xf8] sm:$0xff] }
 0x1e3   : > { %v727_v27 = vmul.f32 %v11075_v42, %v707_v26  ;;  %v671_v46 = vmul.f32 %v11377_v3, %v670_v51  ;;  %1340 = vmatmul.f32.gmra.mxu3 %v11414_v16  ;;  %18398 = vst [vmem:[#allocation60_spill] sm:$0xff] %v11460_v47  ;;  %v789_v26 = vld [vmem:[#allocation7 + $0x128] sm:$0xff]  ;;  %v786_v51 = vld [vmem:[#allocation7 + $0x110] sm:$0xff]  ;;  %v915_v45 = vsub.f32 %v11436_v39, %v11460_v47 }
 0x1e4   : > { %v1776_v53 = vsub.f32 %v11430_v61, %v17992_v10  ;;  %18397 = vst [vmem:[#allocation59_spill] sm:$0xff] %v11457_v54  ;;  %1611 = vmatpush.msrb.mxu2 %v11467_v12  ;;  %v11474_v10 = vsub.f32 %v792_v1, %v11467_v12  ;;  %v11476_v4 = vand.u32 4294901760, %v789_v26  ;;  %2062 = vmatpush.msra.mxu1 %v11467_v12 }
 0x1e5   : > { %v747_v15 = vadd.f32 %v11088_v62, %v727_v27  ;;  %v675_v40 = vsel %vm11447_vm10, %v11377_v3, %v671_v46  ;;  %v748_v27 = vadd.f32 %v11088_v62, %v728_v52  ;;  %v11478_v3 = vand.u32 4294901760, %v786_v51  ;;  %v780_v46 = vld [vmem:[#allocation7 + $0xe0] sm:$0xff] }
 0x1e6   : > { %v1777_v8 = vand.u32 4294901760, %v1776_v53  ;;  %v709_v53 = vmul.f32 %v675_v40, %v11188_v25  ;;  %1613 = vmatpush.msrb.mxu2 %v11476_v4  ;;  %v11493_v36 = vsub.f32 %v789_v26, %v11476_v4  ;;  %1936 = vmatpush.msra.mxu0 %v11474_v10  ;;  %v11503_v40 = vand.u32 4294901760, %v780_v46 }
 0x1e7   : > { %v11462_v49 = vand.u32 4294901760, %v747_v15  ;;  %909 = vmatmul.f32.gmra.mxu0 %v11457_v54  ;;  %1098 = vmatmul.f32.gmra.mxu1 %v11409_v18  ;;  %v11496_v25 = vsub.f32 %v786_v51, %v11478_v3  ;;  %v11506_v1 = vand.u32 4294901760, %v748_v27 }
 0x1e8   : > { %1778 = vmatpush.msrb.mxu3 %v1777_v8  ;;  %v11487_v8 = vand.u32 4294901760, %v783_v48  ;;  %2064 = vmatpush.msra.mxu1 %v11476_v4  ;;  %v18013_v51 = vand.u32 4294901760, %v11493_v36 }
 0x1e9   : > { %18399 = vst [vmem:[#allocation61_spill] sm:$0xff] %v11462_v49  ;;  %1222 = vmatmul.f32.gmra.mxu2 %v11436_v39  ;;  %v11485_v52 = vsub.f32 %v747_v15, %v11462_v49  ;;  %v18402_v39 = vand.u32 4294901760, %v11474_v10  ;;  %v18012_v16 = vand.u32 4294901760, %v11496_v25  ;;  %1939 = vmatpush.msra.mxu0 %v11493_v36  ;;  %v11547_v29 = vsub.f32 %v748_v27, %v11506_v1 }
 0x1ea   : > { %v11501_v15 = vsub.f32 %v783_v48, %v11487_v8  ;;  %18401 = vst [vmem:[#allocation63_spill] sm:$0xff] %v11506_v1  ;;  %1615 = vmatpush.msrb.mxu2 %v11478_v3  ;;  %v729_v48 = vmul.f32 %v11075_v42, %v709_v53  ;;  %2066 = vmatpush.msra.mxu1 %v11478_v3 }
 0x1eb   : > { %18400 = vst [vmem:[#allocation62_spill] sm:$0xff] %v11485_v52  ;;  %1346 = vmatmul.f32.gmra.mxu3 %v11460_v47  ;;  %v1782_v26 = vsub.f32 %v11474_v10, %v18402_v39  ;;  %v11516_v47 = vand.u32 4294901760, %v915_v45  ;;  %v11519_v17 = vand.u32 4294901760, %v11485_v52  ;;  %v1788_v9 = vsub.f32 %v11493_v36, %v18013_v51  ;;  %1942 = vmatpush.msra.mxu0 %v11496_v25 }
 0x1ec   : > { %v18020_v34 = vand.u32 4294901760, %v11501_v15  ;;  %v1794_v44 = vsub.f32 %v11496_v25, %v18012_v16  ;;  %1617 = vmatpush.msrb.mxu2 %v11487_v8  ;;  %v11537_v45 = vsub.f32 %v780_v46, %v11503_v40  ;;  %v11540_v16 = vand.u32 4294901760, %v777_v58  ;;  %18405 = vst [vmem:[#allocation66_spill] sm:$0xff] %v11547_v29  ;;  %2068 = vmatpush.msra.mxu1 %v11487_v8 }
 0x1ed   : > { %18403 = vst [vmem:[#allocation64_spill] sm:$0xff] %v11516_v47  ;;  %v1783_v39 = vand.u32 4294901760, %v1782_v26  ;;  %v1789_v53 = vand.u32 4294901760, %v1788_v9  ;;  %v749_v51 = vadd.f32 %v11088_v62, %v729_v48  ;;  %v923_v33 = vsub.f32 %v11485_v52, %v11519_v17  ;;  %1945 = vmatpush.msra.mxu0 %v11501_v15 }
 0x1ee   : > { %18404 = vst [vmem:[#allocation65_spill] sm:$0xff] %v11519_v17  ;;  %v1800_v42 = vsub.f32 %v11501_v15, %v18020_v34  ;;  %v1795_v26 = vand.u32 4294901760, %v1794_v44  ;;  %1619 = vmatpush.msrb.mxu2 %v11503_v40  ;;  %v18019_v46 = vand.u32 4294901760, %v11537_v45  ;;  %v11553_v9 = vsub.f32 %v777_v58, %v11540_v16  ;;  %2070 = vmatpush.msra.mxu1 %v11503_v40  ;;  %v771_v34 = vld [vmem:[#allocation7 + $0x98] sm:$0xff] }
 0x1ef   : > { %917 = vmatmul.f32.gmra.mxu0 %v11516_v47  ;;  %1102 = vmatmul.f32.gmra.mxu1 %v11462_v49  ;;  %v11562_v48 = vand.u32 4294901760, %v749_v51  ;;  %v11567_v58 = vand.u32 4294901760, %v11547_v29 }
 0x1f0   : > { %1784 = vmatpush.msrb.mxu3 %v1783_v39  ;;  %v1801_v44 = vand.u32 4294901760, %v1800_v42  ;;  %1621 = vmatpush.msrb.mxu2 %v11540_v16  ;;  %v1806_v62 = vsub.f32 %v11537_v45, %v18019_v46  ;;  %v18018_v27 = vand.u32 4294901760, %v11553_v9  ;;  %v11564_v39 = vand.u32 4294901760, %v923_v33 }
 0x1f1   : > { %1227 = vmatmul.f32.gmra.mxu2 %v11485_v52  ;;  %1948 = vmatpush.msra.mxu0 %v11537_v45  ;;  %18406 = vst [vmem:[#allocation67_spill] sm:$0xff] %v11562_v48 }
 0x1f2   : > { %1790 = vmatpush.msrb.mxu3 %v1789_v53  ;;  %18407 = vst [vmem:[#allocation68_spill] sm:$0xff] %v11564_v39  ;;  %v1807_v42 = vand.u32 4294901760, %v1806_v62  ;;  %v1812_v53 = vsub.f32 %v11553_v9, %v18018_v27  ;;  %2072 = vmatpush.msra.mxu1 %v11540_v16 }
 0x1f3   : > { %1352 = vmatmul.f32.gmra.mxu3 %v11519_v17  ;;  %18408 = vst [vmem:[#allocation69_spill] sm:$0xff] %v11567_v58  ;;  %1951 = vmatpush.msra.mxu0 %v11553_v9  ;;  %v765_v17 = vld [vmem:[#allocation7 + $0x68] sm:$0xff] }
 0x1f4   : > { %1796 = vmatpush.msrb.mxu3 %v1795_v26  ;;  %v1813_v33 = vand.u32 4294901760, %v1812_v53  ;;  %v931_v26 = vsub.f32 %v11547_v29, %v11567_v58  ;;  %v774_v53 = vld [vmem:[#allocation7 + $0xb0] sm:$0xff]  ;;  %v11629_v23 = vand.u32 4294901760, %v765_v17 }
 0x1f6   : > { %1802 = vmatpush.msrb.mxu3 %v1801_v44  ;;  %v11581_v44 = vsub.f32 %v749_v51, %v11562_v48  ;;  %v11584_v62 = vand.u32 4294901760, %v931_v26 }
 0x1f7   : > { %925 = vmatmul.f32.gmra.mxu0 %v11564_v39  ;;  %1106 = vmatmul.f32.gmra.mxu1 %v11506_v1  ;;  %v756_v1 = vld [vmem:[#allocation7 + $0x20] sm:$0xff] }
 0x1f8   : > { %1808 = vmatpush.msrb.mxu3 %v1807_v42  ;;  %18409 = vst [vmem:[#allocation70_spill] sm:$0xff] %v11581_v44  ;;  %v11587_v27 = vand.u32 4294901760, %v11581_v44  ;;  %v11659_v49 = vand.u32 4294901760, %v756_v1 }
 0x1f9   : > { %1232 = vmatmul.f32.gmra.mxu2 %v11547_v29  ;;  %18410 = vst [vmem:[#allocation71_spill] sm:$0xff] %v11584_v62  ;;  %v11606_v29 = vand.u32 4294901760, %v771_v34 }
 0x1fa   : > { %1814 = vmatpush.msrb.mxu3 %v1813_v33  ;;  %18411 = vst [vmem:[#allocation72_spill] sm:$0xff] %v11587_v27  ;;  %v939_v42 = vsub.f32 %v11581_v44, %v11587_v27  ;;  %v11598_v33 = vand.u32 4294901760, %v774_v53 }
 0x1fb   : > { %1358 = vmatmul.f32.gmra.mxu3 %v11567_v58  ;;  %v11614_v52 = vsub.f32 %v771_v34, %v11606_v29 }
 0x1fc   : > { %v11595_v51 = vand.u32 4294901760, %v939_v42  ;;  %1623 = vmatpush.msrb.mxu2 %v11598_v33  ;;  %v11602_v46 = vsub.f32 %v774_v53, %v11598_v33  ;;  %2074 = vmatpush.msra.mxu1 %v11598_v33 }
 0x1fd   : > { %v18048_v60 = vand.u32 4294901760, %v11614_v52 }
 0x1fe   : > { %18412 = vst [vmem:[#allocation73_spill] sm:$0xff] %v11595_v51  ;;  %v18039_v42 = vand.u32 4294901760, %v11602_v46  ;;  %1954 = vmatpush.msra.mxu0 %v11602_v46  ;;  %1625 = vmatpush.msrb.mxu2 %v11606_v29 }
 0x1ff   : > { %933 = vmatmul.f32.gmra.mxu0 %v11584_v62  ;;  %1110 = vmatmul.f32.gmra.mxu1 %v11562_v48 }
 0x200   : > { %2076 = vmatpush.msra.mxu1 %v11606_v29  ;;  %1957 = vmatpush.msra.mxu0 %v11614_v52 }
 0x201   : > { %1237 = vmatmul.f32.gmra.mxu2 %v11581_v44 }
 0x203   : > { %1364 = vmatmul.f32.gmra.mxu3 %v11587_v27  ;;  %v768_v27 = vld [vmem:[#allocation7 + $0x80] sm:$0xff] }
 0x204   : > { %v11616_v53 = vand.u32 4294901760, %v768_v27 }
 0x206   : > { %1627 = vmatpush.msrb.mxu2 %v11616_v53  ;;  %2078 = vmatpush.msra.mxu1 %v11616_v53 }
 0x207   : > { %941 = vmatmul.f32.gmra.mxu0 %v11595_v51 }
 0x208   : > { %1629 = vmatpush.msrb.mxu2 %v11629_v23  ;;  %2080 = vmatpush.msra.mxu1 %v11629_v23 }
 0x20a   : > { %1631 = vmatpush.msrb.mxu2 %v11636_v5  ;;  %2082 = vmatpush.msra.mxu1 %v11636_v5 }
 0x231   : > { %v501_v26 = vpop.xlane.xlu0 %500 }
 0x232   : > { %v518_v44 = vmul.f32 %v501_v26, %v10733_v13  ;;  %v1818_v26 = vsub.f32 %v11602_v46, %v18039_v42  ;;  %v1824_v42 = vsub.f32 %v11614_v52, %v18048_v60  ;;  %v11647_v60 = vsub.f32 %v762_v11, %v11636_v5 }
 0x234   : > { %v11610_v58 = vadd.f32 1e-05, %v518_v44  ;;  %v11626_v44 = vsub.f32 %v768_v27, %v11616_v53  ;;  %v1819_v34 = vand.u32 4294901760, %v1818_v26  ;;  %v11641_v27 = vsub.f32 %v765_v17, %v11629_v23  ;;  %v759_v26 = vld [vmem:[#allocation7 + $0x38] sm:$0xff] }
 0x235   : > { %v1825_v51 = vand.u32 4294901760, %v1824_v42  ;;  %v11649_v62 = vand.u32 4294901760, %v759_v26 }
 0x236   : > { %10046 = vrsqrt.f32 %v11610_v58  ;;  %v18055_v6 = vand.u32 4294901760, %v11626_v44  ;;  %1960 = vmatpush.msra.mxu0 %v11626_v44  ;;  %1820 = vmatpush.msrb.mxu3 %v1819_v34  ;;  %v18413_v18 = vand.u32 4294901760, %v11641_v27  ;;  %vm682_vm12 = vweird.f32 %v11610_v58 }
 0x237   : > { %v11657_v11 = vsub.f32 %v759_v26, %v11649_v62  ;;  %1633 = vmatpush.msrb.mxu2 %v11649_v62  ;;  %2084 = vmatpush.msra.mxu1 %v11649_v62 }
 0x238   : > { %v1830_v48 = vsub.f32 %v11626_v44, %v18055_v6  ;;  %1963 = vmatpush.msra.mxu0 %v11641_v27  ;;  %1826 = vmatpush.msrb.mxu3 %v1825_v51  ;;  %v18068_v6 = vand.u32 4294901760, %v11647_v60  ;;  %v1836_v54 = vsub.f32 %v11641_v27, %v18413_v18 }
 0x239   : > { %v18071_v26 = vand.u32 4294901760, %v11657_v11  ;;  %1635 = vmatpush.msrb.mxu2 %v11659_v49  ;;  %2086 = vmatpush.msra.mxu1 %v11659_v49 }
 0x23a   : > { %v503_v42 = vpop.xlane.xlu1 %502  ;;  %v1831_v39 = vand.u32 4294901760, %v1830_v48  ;;  %v753_v48 = vld [vmem:[#allocation7 + $0x8] sm:$0xff]  ;;  %1966 = vmatpush.msra.mxu0 %v11647_v60  ;;  %v1842_v51 = vsub.f32 %v11647_v60, %v18068_v6  ;;  %v1837_v56 = vand.u32 4294901760, %v1836_v54 }
 0x23b   : > { %v519_v47 = vmul.f32 %v503_v42, %v10733_v13  ;;  %v11673_v24 = vand.u32 4294901760, %v753_v48  ;;  %v11676_v13 = vsub.f32 %v756_v1, %v11659_v49  ;;  %v1848_v6 = vsub.f32 %v11657_v11, %v18071_v26 }
 0x23c   : > { %v10047_v17 = vpop.eup %10046  ;;  %1832 = vmatpush.msrb.mxu3 %v1831_v39  ;;  %1969 = vmatpush.msra.mxu0 %v11657_v11  ;;  %v1843_v39 = vand.u32 4294901760, %v1842_v51  ;;  %v18414_v26 = vand.u32 4294901760, %v11374_v41  ;;  %v11708_v41 = vpop.f32.mrf.mxu1 }
 0x23d   : > { %v677_v34 = vmul.f32 %v10047_v17, %v11610_v58  ;;  %v11679_v42 = vadd.f32 1e-05, %v519_v47  ;;  %v18072_v63 = vand.u32 4294901760, %v11676_v13  ;;  %v11688_v1 = vsub.f32 %v753_v48, %v11673_v24  ;;  %1637 = vmatpush.msrb.mxu2 %v11673_v24  ;;  %2088 = vmatpush.msra.mxu1 %v11673_v24  ;;  %v10306_v58 = vld [vmem:[#allocation5] ss:$0 sm:$0xff] }
 0x23e   : > { %1838 = vmatpush.msrb.mxu3 %v1837_v56  ;;  %v1849_v54 = vand.u32 4294901760, %v1848_v6  ;;  %vm683_vm11 = vweird.f32 %v10047_v17  ;;  %1972 = vmatpush.msra.mxu0 %v11676_v13 }
 0x23f   : > { %v678_v18 = vmul.f32 %v10047_v17, %v677_v34  ;;  %10048 = vrsqrt.f32 %v11679_v42  ;;  %v1854_v47 = vsub.f32 %v11676_v13, %v18072_v63  ;;  %v18073_v51 = vand.u32 4294901760, %v11688_v1  ;;  %2189 = vmatpush.msra.mxu2 %v18414_v26  ;;  %vm684_vm13 = vmor %vm682_vm12, %vm683_vm11 }
 0x240   : > { %1844 = vmatpush.msrb.mxu3 %v1843_v39  ;;  %1975 = vmatpush.msra.mxu0 %v11688_v1  ;;  %v18416_v39 = vand.u32 4294901760, %v11474_v10  ;;  %vm692_vm15 = vweird.f32 %v11679_v42 }
 0x241   : > { %v679_v34 = vmul.f32 0.5, %v678_v18  ;;  %v1855_v56 = vand.u32 4294901760, %v1854_v47  ;;  %v1860_v6 = vsub.f32 %v11688_v1, %v18073_v51  ;;  %v18415_v18 = vand.u32 4294901760, %v11430_v61 }
 0x242   : > { %1850 = vmatpush.msrb.mxu3 %v1849_v54 }
 0x243   : > { %v680_v48 = vsub.f32 1.5, %v679_v34  ;;  %2193 = vmatpush.msra.mxu2 %v18415_v18  ;;  %v1861_v26 = vand.u32 4294901760, %v1860_v6  ;;  %v18418_v6 = vand.u32 4294901760, %v11496_v25  ;;  %v18421_v25 = vand.u32 4294901760, %v11537_v45 }
 0x244   : > { %1856 = vmatpush.msrb.mxu3 %v1855_v56 }
 0x245   : > { %v681_v63 = vmul.f32 %v10047_v17, %v680_v48  ;;  %2197 = vmatpush.msra.mxu2 %v18416_v39  ;;  %v10049_v34 = vpop.eup %10048  ;;  %v18417_v48 = vand.u32 4294901760, %v11493_v36  ;;  %v18419_v36 = vand.u32 4294901760, %v11501_v15  ;;  %v11736_v39 = vpop.f32.mrf.mxu3 }
 0x246   : > { %v687_v61 = vmul.f32 %v10049_v34, %v11679_v42  ;;  %1862 = vmatpush.msrb.mxu3 %v1861_v26  ;;  %vm693_vm14 = vweird.f32 %v10049_v34  ;;  %v11734_v26 = vpop.f32.mrf.mxu1 }
 0x247   : > { %v685_v47 = vsel %vm684_vm13, %v10047_v17, %v681_v63  ;;  %2201 = vmatpush.msra.mxu2 %v18417_v48  ;;  %v10307_v63 = vld [vmem:[%s17966_s2] ss:$0 sm:$0xff]  ;;  %v11725_v17 = vpop.f32.mrf.mxu0  ;;  %vm694_vm0 = vmor %vm692_vm15, %vm693_vm14 }
 0x248   : > { %v710_v51 = vmul.f32 %v685_v47, %v11306_v20  ;;  %v688_v18 = vmul.f32 %v10049_v34, %v687_v61  ;;  %2316 = vmatpush.msra.mxu3 %v11361_v35  ;;  %v18425_v61 = vand.u32 4294901760, %v11602_v46 }
 0x249   : > { %2205 = vmatpush.msra.mxu2 %v18418_v6 }
 0x24a   : > { %v730_v54 = vmul.f32 %v10306_v58, %v710_v51  ;;  %v689_v20 = vmul.f32 0.5, %v688_v18  ;;  %2318 = vmatpush.msra.mxu3 %v11418_v19  ;;  %v11727_v51 = vpop.f32.mrf.mxu2 }
 0x24b   : > { %2209 = vmatpush.msra.mxu2 %v18419_v36 }
 0x24c   : > { %v750_v10 = vadd.f32 %v10307_v63, %v730_v54  ;;  %v690_v35 = vsub.f32 1.5, %v689_v20  ;;  %2320 = vmatpush.msra.mxu3 %v11467_v12  ;;  %v18423_v12 = vand.u32 4294901760, %v11553_v9 }
 0x24d   : > { %2213 = vmatpush.msra.mxu2 %v18421_v25  ;;  %v11777_v18 = vpop.f32.mrf.mxu3 }
 0x24e   : > { %v11729_v56 = vand.u32 4294901760, %v750_v10  ;;  %v691_v19 = vmul.f32 %v10049_v34, %v690_v35  ;;  %2322 = vmatpush.msra.mxu3 %v11476_v4 }
 0x24f   : > { %2217 = vmatpush.msra.mxu2 %v18423_v12  ;;  %v11762_v54 = vpop.f32.mrf.mxu0 }
 0x250   : > { %18420 = vst [vmem:[#allocation74_spill] sm:$0xff] %v11729_v56  ;;  %1114 = vmatmul.f32.gmra.mxu1 %v11729_v56  ;;  %v11741_v15 = vsub.f32 %v750_v10, %v11729_v56  ;;  %v695_v45 = vsel %vm694_vm0, %v10049_v34, %v691_v19  ;;  %2324 = vmatpush.msra.mxu3 %v11478_v3  ;;  %v18426_v34 = vand.u32 4294901760, %v11614_v52  ;;  %v18430_v52 = vand.u32 4294901760, %v11641_v27 }
 0x251   : > { %v711_v42 = vmul.f32 %v695_v45, %v11313_v22  ;;  %2221 = vmatpush.msra.mxu2 %v18425_v61  ;;  %v18428_v22 = vand.u32 4294901760, %v11626_v44  ;;  %v18432_v44 = vand.u32 4294901760, %v11647_v60  ;;  %v18434_v27 = vand.u32 4294901760, %v11657_v11 }
 0x252   : > { %18422 = vst [vmem:[#allocation75_spill] sm:$0xff] %v11741_v15  ;;  %1242 = vmatmul.f32.gmra.mxu2 %v11741_v15  ;;  %v11748_v47 = vand.u32 4294901760, %v11741_v15  ;;  %2326 = vmatpush.msra.mxu3 %v11487_v8  ;;  %v11767_v46 = vpop.f32.mrf.mxu2  ;;  %v11775_v8 = vpop.f32.mrf.mxu1  ;;  %v18435_v60 = vand.u32 4294901760, %v11676_v13 }
 0x253   : > { %v731_v9 = vmul.f32 %v10306_v58, %v711_v42  ;;  %2225 = vmatpush.msra.mxu2 %v18426_v34 }
 0x254   : > { %18424 = vst [vmem:[#allocation76_spill] sm:$0xff] %v11748_v47  ;;  %1370 = vmatmul.f32.gmra.mxu3 %v11748_v47  ;;  %v947_v4 = vsub.f32 %v11741_v15, %v11748_v47  ;;  %v18452_v47 = vld [vmem:[#allocation61_spill] sm:$0xff] }
 0x255   : > { %v751_v3 = vadd.f32 %v10307_v63, %v731_v9  ;;  %2328 = vmatpush.msra.mxu3 %v11503_v40  ;;  %2229 = vmatpush.msra.mxu2 %v18428_v22 }
 0x256   : > { %v11760_v48 = vand.u32 4294901760, %v947_v4 }
 0x257   : > { %v11770_v58 = vand.u32 4294901760, %v751_v3  ;;  %2330 = vmatpush.msra.mxu3 %v11540_v16  ;;  %2233 = vmatpush.msra.mxu2 %v18430_v52 }
 0x258   : > { %18427 = vst [vmem:[#allocation77_spill] sm:$0xff] %v11760_v48  ;;  %949 = vmatmul.f32.gmra.mxu0 %v11760_v48 }
 0x259   : > { %18429 = vst [vmem:[#allocation78_spill] sm:$0xff] %v11770_v58  ;;  %1118 = vmatmul.f32.gmra.mxu1 %v11770_v58  ;;  %v11781_v40 = vsub.f32 %v751_v3, %v11770_v58  ;;  %2332 = vmatpush.msra.mxu3 %v11598_v33  ;;  %v11799_v33 = vpop.f32.mrf.mxu0 }
 0x25a   : > { %2237 = vmatpush.msra.mxu2 %v18432_v44  ;;  %v11803_v10 = vpop.f32.mrf.mxu2  ;;  %v11810_v11 = vpop.f32.mrf.mxu1 }
 0x25b   : > { %18431 = vst [vmem:[#allocation79_spill] sm:$0xff] %v11781_v40  ;;  %1247 = vmatmul.f32.gmra.mxu2 %v11781_v40  ;;  %v11788_v16 = vand.u32 4294901760, %v11781_v40  ;;  %2334 = vmatpush.msra.mxu3 %v11606_v29  ;;  %v18437_v29 = vand.u32 4294901760, %v11688_v1 }
 0x25c   : > { %2241 = vmatpush.msra.mxu2 %v18434_v27 }
 0x25d   : > { %18433 = vst [vmem:[#allocation80_spill] sm:$0xff] %v11788_v16  ;;  %1376 = vmatmul.f32.gmra.mxu3 %v11788_v16  ;;  %v955_v6 = vsub.f32 %v11781_v40, %v11788_v16  ;;  %v18448_v40 = vld [vmem:[#allocation55_spill] sm:$0xff]  ;;  %v18449_v16 = vld [vmem:[#allocation64_spill] sm:$0xff] }
 0x25e   : > { %2336 = vmatpush.msra.mxu3 %v11616_v53  ;;  %2245 = vmatpush.msra.mxu2 %v18435_v60  ;;  %v11812_v53 = vpop.f32.mrf.mxu3 }
 0x25f   : > { %v11801_v63 = vand.u32 4294901760, %v955_v6  ;;  %v18438_v6 = vld [vmem:[#allocation51_spill] sm:$0xff] }
 0x260   : > { %2338 = vmatpush.msra.mxu3 %v11629_v23  ;;  %2249 = vmatpush.msra.mxu2 %v18437_v29  ;;  %v18439_v29 = vld [vmem:[#allocation56_spill] sm:$0xff] }
 0x261   : > { %18436 = vst [vmem:[#allocation81_spill] sm:$0xff] %v11801_v63  ;;  %957 = vmatmul.f32.gmra.mxu0 %v11801_v63  ;;  %1542 = vmatmul.f32.vlgmr.msrb.gmra.mxu1 %v11118_v32  ;;  %v11820_v23 = vpop.f32.mrf.mxu0 }
 0x262   : > { %2340 = vmatpush.msra.mxu3 %v11636_v5  ;;  %v11824_v13 = vpop.f32.mrf.mxu2  ;;  %v11827_v5 = vpop.f32.mrf.mxu1 }
 0x263   : > { %1643 = vmatmul.f32.vlgmr.msrb.gmra.mxu2 %v11170_v59 }
 0x264   : > { %2342 = vmatpush.msra.mxu3 %v11649_v62 }
 0x265   : > { %1864 = vmatmul.f32.vlgmr.msrb.gmra.mxu3 %v11118_v32 }
 0x266   : > { %2344 = vmatpush.msra.mxu3 %v11659_v49  ;;  %v11829_v1 = vpop.f32.mrf.mxu3 }
 0x268   : > { %2346 = vmatpush.msra.mxu3 %v11673_v24 }
 0x269   : > { %1445 = vmatmul.f32.vlgmr.msrb.gmra.mxu0 %v11118_v32  ;;  %1546 = vmatmul.f32.gmra.mxu1 %v11164_v2  ;;  %v11834_v24 = vpop.f32.mrf.mxu0 }
 0x26a   : > { %v11837_v49 = vpop.f32.mrf.mxu2  ;;  %v11840_v62 = vpop.f32.mrf.mxu1 }
 0x26b   : > { %1651 = vmatmul.f32.gmra.mxu2 %v11210_v28 }
 0x26d   : > { %1868 = vmatmul.f32.gmra.mxu3 %v11164_v2 }
 0x26e   : > { %v11842_v20 = vpop.f32.mrf.mxu3 }
 0x271   : > { %1449 = vmatmul.f32.gmra.mxu0 %v11164_v2  ;;  %1550 = vmatmul.f32.gmra.mxu1 %v11168_v0  ;;  %v11847_v36 = vpop.f32.mrf.mxu0 }
 0x272   : > { %v11850_v35 = vpop.f32.mrf.mxu2  ;;  %v11852_v25 = vpop.f32.mrf.mxu1 }
 0x273   : > { %1659 = vmatmul.f32.gmra.mxu2 %v11237_v50 }
 0x275   : > { %1872 = vmatmul.f32.gmra.mxu3 %v11168_v0 }
 0x276   : > { %v11854_v19 = vpop.f32.mrf.mxu3 }
 0x279   : > { %1453 = vmatmul.f32.gmra.mxu0 %v11168_v0  ;;  %1554 = vmatmul.f32.gmra.mxu1 %v11212_v57  ;;  %v11860_v12 = vpop.f32.mrf.mxu0 }
 0x27a   : > { %v11862_v45 = vpop.f32.mrf.mxu2  ;;  %v11864_v42 = vpop.f32.mrf.mxu1 }
 0x27b   : > { %1667 = vmatmul.f32.gmra.mxu2 %v11256_v14  ;;  %v18443_v14 = vld [vmem:[#allocation59_spill] sm:$0xff] }
 0x27d   : > { %1876 = vmatmul.f32.gmra.mxu3 %v11212_v57 }
 0x27e   : > { %v11868_v61 = vpop.f32.mrf.mxu3 }
 0x281   : > { %1457 = vmatmul.f32.gmra.mxu0 %v11212_v57  ;;  %1558 = vmatmul.f32.gmra.mxu1 %v11235_v21  ;;  %v11872_v4 = vpop.f32.mrf.mxu0 }
 0x282   : > { %v11874_v9 = vpop.f32.mrf.mxu2  ;;  %v11878_v34 = vpop.f32.mrf.mxu1 }
 0x283   : > { %1675 = vmatmul.f32.gmra.mxu2 %v11273_v31  ;;  %v18442_v31 = vld [vmem:[#allocation49_spill] sm:$0xff] }
 0x285   : > { %1880 = vmatmul.f32.gmra.mxu3 %v11235_v21 }
 0x286   : > { %v11880_v3 = vpop.f32.mrf.mxu3 }
 0x289   : > { %1461 = vmatmul.f32.gmra.mxu0 %v11235_v21  ;;  %1562 = vmatmul.f32.gmra.mxu1 %v11253_v55  ;;  %v11884_v22 = vpop.f32.mrf.mxu0 }
 0x28a   : > { %v11888_v52 = vpop.f32.mrf.mxu2  ;;  %v11891_v44 = vpop.f32.mrf.mxu1 }
 0x28b   : > { %1683 = vmatmul.f32.gmra.mxu2 %v11287_v7 }
 0x28d   : > { %1884 = vmatmul.f32.gmra.mxu3 %v11253_v55 }
 0x28e   : > { %v11893_v27 = vpop.f32.mrf.mxu3 }
 0x291   : > { %1465 = vmatmul.f32.gmra.mxu0 %v11253_v55  ;;  %1566 = vmatmul.f32.gmra.mxu1 %v11271_v30  ;;  %v11898_v60 = vpop.f32.mrf.mxu0 }
 0x292   : > { %v11904_v7 = vpop.f32.mrf.mxu1 }
 0x293   : > { %1691 = vmatmul.f32.gmra.mxu2 %v11298_v43  ;;  %v11901_v43 = vpop.f32.mrf.mxu2  ;;  %18440 = vst [vmem:[#allocation51_spill] sm:$0xff] %v11904_v7 }
 0x295   : > { %1888 = vmatmul.f32.gmra.mxu3 %v11271_v30 }
 0x299   : > { %1469 = vmatmul.f32.gmra.mxu0 %v11271_v30  ;;  %1570 = vmatmul.f32.gmra.mxu1 %v11325_v38  ;;  %v11911_v50 = vpop.f32.mrf.mxu0 }
 0x29a   : > { %18444 = vst [vmem:[#allocation83_spill] sm:$0xff] %v11911_v50 }
 0x29b   : > { %1699 = vmatmul.f32.gmra.mxu2 %v11354_v37  ;;  %v11906_v37 = vpop.f32.mrf.mxu3  ;;  %v11914_v28 = vpop.f32.mrf.mxu2 }
 0x29c   : > { %18441 = vst [vmem:[#allocation82_spill] sm:$0xff] %v11906_v37 }
 0x29d   : > { %1892 = vmatmul.f32.gmra.mxu3 %v11325_v38  ;;  %18445 = vst [vmem:[#allocation84_spill] sm:$0xff] %v11914_v28 }
 0x2a1   : > { %1473 = vmatmul.f32.gmra.mxu0 %v11325_v38  ;;  %1574 = vmatmul.f32.gmra.mxu1 %v18438_v6  ;;  %v11924_v15 = vpop.f32.mrf.mxu0 }
 0x2a2   : > { %18450 = vst [vmem:[#allocation87_spill] sm:$0xff] %v11924_v15 }
 0x2a3   : > { %1707 = vmatmul.f32.gmra.mxu2 %v18439_v29  ;;  %v11916_v29 = vpop.f32.mrf.mxu1  ;;  %v11918_v59 = vpop.f32.mrf.mxu3 }
 0x2a4   : > { %18446 = vst [vmem:[#allocation85_spill] sm:$0xff] %v11916_v29 }
 0x2a5   : > { %1896 = vmatmul.f32.gmra.mxu3 %v18438_v6  ;;  %18447 = vst [vmem:[#allocation86_spill] sm:$0xff] %v11918_v59  ;;  %v18455_v59 = vld [vmem:[#allocation68_spill] sm:$0xff] }
 0x2a9   : > { %1477 = vmatmul.f32.gmra.mxu0 %v18438_v6  ;;  %1578 = vmatmul.f32.gmra.mxu1 %v18442_v31  ;;  %v11936_v7 = vpop.f32.mrf.mxu0 }
 0x2aa   : > { %18456 = vst [vmem:[#allocation91_spill] sm:$0xff] %v11936_v7  ;;  %v18464_v7 = vld [vmem:[#allocation73_spill] sm:$0xff] }
 0x2ab   : > { %1715 = vmatmul.f32.gmra.mxu2 %v18443_v14  ;;  %v11926_v14 = vpop.f32.mrf.mxu2  ;;  %v11930_v28 = vpop.f32.mrf.mxu1 }
 0x2ac   : > { %18451 = vst [vmem:[#allocation88_spill] sm:$0xff] %v11926_v14  ;;  %v11932_v29 = vpop.f32.mrf.mxu3  ;;  %v18459_v14 = vld [vmem:[#allocation71_spill] sm:$0xff] }
 0x2ad   : > { %1900 = vmatmul.f32.gmra.mxu3 %v18442_v31  ;;  %18453 = vst [vmem:[#allocation89_spill] sm:$0xff] %v11930_v28 }
 0x2ae   : > { %18454 = vst [vmem:[#allocation90_spill] sm:$0xff] %v11932_v29 }
 0x2b1   : > { %1481 = vmatmul.f32.gmra.mxu0 %v18442_v31  ;;  %1582 = vmatmul.f32.gmra.mxu1 %v18448_v40  ;;  %v11950_v28 = vpop.f32.mrf.mxu0 }
 0x2b2   : > { %18463 = vst [vmem:[#allocation95_spill] sm:$0xff] %v11950_v28 }
 0x2b3   : > { %1723 = vmatmul.f32.gmra.mxu2 %v18449_v16  ;;  %v18457_v16 = vld [vmem:[#allocation63_spill] sm:$0xff]  ;;  %v11940_v15 = vpop.f32.mrf.mxu2 }
 0x2b4   : > { %18458 = vst [vmem:[#allocation92_spill] sm:$0xff] %v11940_v15  ;;  %v11945_v50 = vpop.f32.mrf.mxu3 }
 0x2b5   : > { %1904 = vmatmul.f32.gmra.mxu3 %v18448_v40  ;;  %18461 = vst [vmem:[#allocation94_spill] sm:$0xff] %v11945_v50  ;;  %v799_v50 = vld [vmem:[#allocation7 + $0x178] sm:$0xff] }
 0x2b6   : > { %v11961_v28 = vand.u32 4294901760, %v799_v50 }
 0x2b8   : > { %v11965_v31 = vsub.f32 %v799_v50, %v11961_v28  ;;  %2413 = vmatpush.msrb.mxu0 %v11961_v28  ;;  %2864 = vmatpush.msrb.mxu3 %v11961_v28  ;;  %v1060_v50 = vadd.f32 %v11708_v41, %v11725_v17 }
 0x2b9   : > { %1485 = vmatmul.f32.gmra.mxu0 %v18448_v40  ;;  %1586 = vmatmul.f32.gmra.mxu1 %v18452_v47  ;;  %v11943_v40 = vpop.f32.mrf.mxu1 }
 0x2ba   : > { %18460 = vst [vmem:[#allocation93_spill] sm:$0xff] %v11943_v40  ;;  %2736 = vmatpush.msrb.mxu2 %v11965_v31  ;;  %v1174_v17 = vadd.f32 %v11727_v51, %v1060_v50  ;;  %v1064_v51 = vadd.f32 %v11734_v26, %v11762_v54 }
 0x2bb   : > { %1731 = vmatmul.f32.gmra.mxu2 %v18455_v59  ;;  %v18462_v59 = vld [vmem:[#allocation67_spill] sm:$0xff]  ;;  %v11953_v29 = vpop.f32.mrf.mxu2 }
 0x2bc   : > { %18465 = vst [vmem:[#allocation96_spill] sm:$0xff] %v11953_v29  ;;  %v1179_v26 = vadd.f32 %v11767_v46, %v1064_v51  ;;  %v1068_v46 = vadd.f32 %v11775_v8, %v11799_v33 }
 0x2bd   : > { %1908 = vmatmul.f32.gmra.mxu3 %v18452_v47 }
 0x2be   : > { %v1184_v33 = vadd.f32 %v11803_v10, %v1068_v46  ;;  %v1072_v10 = vadd.f32 %v11810_v11, %v11820_v23 }
 0x2c0   : > { %v1189_v23 = vadd.f32 %v11824_v13, %v1072_v10  ;;  %v1076_v13 = vadd.f32 %v11827_v5, %v11834_v24 }
 0x2c1   : > { %1489 = vmatmul.f32.gmra.mxu0 %v18452_v47  ;;  %1590 = vmatmul.f32.gmra.mxu1 %v18457_v16 }
 0x2c2   : > { %v1194_v24 = vadd.f32 %v11837_v49, %v1076_v13 }
 0x2c3   : > { %1739 = vmatmul.f32.gmra.mxu2 %v18459_v14  ;;  %v11956_v14 = vpop.f32.mrf.mxu3 }
 0x2c4   : > { %18466 = vst [vmem:[#allocation97_spill] sm:$0xff] %v11956_v14  ;;  %v1312_v49 = vadd.f32 %v11842_v20, %v1194_v24 }
 0x2c5   : > { %1912 = vmatmul.f32.gmra.mxu3 %v18457_v16 }
 0x2c9   : > { %1493 = vmatmul.f32.gmra.mxu0 %v18457_v16  ;;  %1594 = vmatmul.f32.gmra.mxu1 %v18462_v59 }
 0x2cb   : > { %1747 = vmatmul.f32.gmra.mxu2 %v18464_v7 }
 0x2cd   : > { %v1115_v47 = vpop.f32.mrf.mxu1  ;;  %1916 = vmatmul.f32.gmra.mxu3 %v18462_v59 }
 0x2d1   : > { %1497 = vmatmul.f32.gmra.mxu0 %v18462_v59  ;;  %1598 = vmatmul.f32.gmra.mxu1 %v11729_v56 }
 0x2d3   : > { %1755 = vmatmul.f32.gmra.mxu2 %v11760_v48 }
 0x2d5   : > { %v950_v40 = vpop.f32.mrf.mxu0  ;;  %v1243_v15 = vpop.f32.mrf.mxu2  ;;  %1920 = vmatmul.f32.gmra.mxu3 %v11729_v56 }
 0x2d6   : > { %v1116_v16 = vadd.f32 %v1115_v47, %v950_v40  ;;  %v1119_v7 = vpop.f32.mrf.mxu1  ;;  %v796_v47 = vld [vmem:[#allocation7 + $0x160] sm:$0xff] }
 0x2d7   : > { %v1371_v37 = vpop.f32.mrf.mxu3  ;;  %v11976_v40 = vand.u32 4294901760, %v796_v47 }
 0x2d8   : > { %v1244_v29 = vadd.f32 %v1243_v15, %v1116_v16  ;;  %v18099_v15 = vand.u32 4294901760, %v11965_v31 }
 0x2d9   : > { %1501 = vmatmul.f32.gmra.mxu0 %v11729_v56  ;;  %1602 = vmatmul.f32.gmra.mxu1 %v11770_v58  ;;  %18468 = vst [vmem:[#allocation99_spill] sm:$0xff] %v11976_v40  ;;  %v11985_v48 = vsub.f32 %v796_v47, %v11976_v40 }
 0x2da   : > { %v11969_v14 = vadd.f32 %v1371_v37, %v1244_v29  ;;  %v2576_v37 = vsub.f32 %v11965_v31, %v18099_v15  ;;  %2415 = vmatpush.msrb.mxu0 %v11976_v40  ;;  %2866 = vmatpush.msrb.mxu3 %v11976_v40  ;;  %v18469_v15 = vld [vmem:[#allocation20_spill] sm:$0xff] }
 0x2db   : > { %1763 = vmatmul.f32.gmra.mxu2 %v11801_v63  ;;  %v18101_v40 = vand.u32 4294901760, %v11985_v48 }
 0x2dc   : > { %18467 = vst [vmem:[#allocation98_spill] sm:$0xff] %v11969_v14  ;;  %v2577_v56 = vand.u32 4294901760, %v2576_v37  ;;  %2739 = vmatpush.msrb.mxu2 %v11985_v48 }
 0x2dd   : > { %1924 = vmatmul.f32.gmra.mxu3 %v11770_v58 }
 0x2de   : > { %v958_v16 = vpop.f32.mrf.mxu0  ;;  %v1248_v29 = vpop.f32.mrf.mxu2  ;;  %2578 = vmatpush.msrb.mxu1 %v2577_v56 }
 0x2df   : > { %v1120_v63 = vadd.f32 %v1119_v7, %v958_v16  ;;  %v1543_v14 = vpop.f32.mrf.mxu1  ;;  %v793_v7 = vld [vmem:[#allocation7 + $0x148] sm:$0xff]  ;;  %v1288_v16 = vadd.f32 %v11736_v39, %v1174_v17 }
 0x2e0   : > { %v1377_v41 = vpop.f32.mrf.mxu3  ;;  %v11998_v37 = vand.u32 4294901760, %v793_v7 }
 0x2e1   : > { %v1249_v59 = vadd.f32 %v1248_v29, %v1120_v63  ;;  %1505 = vmatmul.f32.gmra.mxu0 %v11770_v58  ;;  %2092 = vmatmul.f32.vlgmr.msra.gmra.mxu1 %v18469_v15 }
 0x2e2   : > { %v12008_v50 = vsub.f32 %v793_v7, %v11998_v37  ;;  %2417 = vmatpush.msrb.mxu0 %v11998_v37  ;;  %2868 = vmatpush.msrb.mxu3 %v11998_v37 }
 0x2e3   : > { %v11993_v47 = vadd.f32 %v1377_v41, %v1249_v59  ;;  %2251 = vmatmul.f32.vlgmr.msra.gmra.mxu2 %v11118_v32  ;;  %v2582_v59 = vsub.f32 %v11985_v48, %v18101_v40  ;;  %v18470_v40 = vld [vmem:[#allocation19_spill] sm:$0xff] }
 0x2e4   : > { %2742 = vmatpush.msrb.mxu2 %v12008_v50  ;;  %v18104_v7 = vand.u32 4294901760, %v12008_v50 }
 0x2e5   : > { %2348 = vmatmul.f32.vlgmr.msra.gmra.mxu3 %v11118_v32  ;;  %v2583_v41 = vand.u32 4294901760, %v2582_v59  ;;  %v18471_v32 = vld [vmem:[#allocation25_spill] sm:$0xff] }
 0x2e6   : > { %v1446_v56 = vpop.f32.mrf.mxu0  ;;  %v1644_v63 = vpop.f32.mrf.mxu2  ;;  %v2588_v51 = vsub.f32 %v12008_v50, %v18104_v7  ;;  %v18472_v7 = vld [vmem:[#allocation24_spill] sm:$0xff] }
 0x2e7   : > { %v1447_v29 = vadd.f32 %v1446_v56, %v1288_v16  ;;  %v1547_v39 = vpop.f32.mrf.mxu1  ;;  %2584 = vmatpush.msrb.mxu1 %v2583_v41  ;;  %v790_v16 = vld [vmem:[#allocation7 + $0x130] sm:$0xff] }
 0x2e8   : > { %v1865_v17 = vpop.f32.mrf.mxu3  ;;  %v12023_v59 = vand.u32 4294901760, %v790_v16 }
 0x2e9   : > { %v1544_v54 = vadd.f32 %v1543_v14, %v1447_v29  ;;  %v12014_v15 = vadd.f32 %v1865_v17, %v1644_v63  ;;  %1978 = vmatmul.f32.vlgmr.msra.gmra.mxu0 %v18470_v40  ;;  %2098 = vmatmul.f32.gmra.mxu1 %v18471_v32  ;;  %v1294_v14 = vadd.f32 %v11777_v18, %v1179_v26  ;;  %v2589_v17 = vand.u32 4294901760, %v2588_v51  ;;  %v18473_v32 = vld [vmem:[#allocation29_spill] sm:$0xff] }
 0x2ea   : > { %v12033_v29 = vsub.f32 %v790_v16, %v12023_v59  ;;  %2419 = vmatpush.msrb.mxu0 %v12023_v59  ;;  %2870 = vmatpush.msrb.mxu3 %v12023_v59 }
 0x2eb   : > { %3218 = vst [vmem:[%s12018_s17] sm:$0xff] %v1544_v54  ;;  %2255 = vmatmul.f32.gmra.mxu2 %v11164_v2  ;;  %2590 = vmatpush.msrb.mxu1 %v2589_v17 }
 0x2ec   : > { %2745 = vmatpush.msrb.mxu2 %v12033_v29  ;;  %v18105_v16 = vand.u32 4294901760, %v12033_v29 }
 0x2ed   : > { %2352 = vmatmul.f32.gmra.mxu3 %v11164_v2 }
 0x2ee   : > { %v1450_v56 = vpop.f32.mrf.mxu0  ;;  %v1652_v63 = vpop.f32.mrf.mxu2 }
 0x2ef   : > { %v1451_v18 = vadd.f32 %v1450_v56, %v1294_v14  ;;  %v1551_v41 = vpop.f32.mrf.mxu1  ;;  %v787_v14 = vld [vmem:[#allocation7 + $0x118] sm:$0xff]  ;;  %v1300_v56 = vadd.f32 %v11812_v53, %v1184_v33 }
 0x2f0   : > { %v1869_v8 = vpop.f32.mrf.mxu3  ;;  %v12046_v51 = vand.u32 4294901760, %v787_v14 }
 0x2f1   : > { %v1548_v26 = vadd.f32 %v1547_v39, %v1451_v18  ;;  %v12039_v54 = vadd.f32 %v1869_v8, %v1652_v63  ;;  %1983 = vmatmul.f32.gmra.mxu0 %v18472_v7  ;;  %2104 = vmatmul.f32.gmra.mxu1 %v18473_v32  ;;  %v2594_v39 = vsub.f32 %v12033_v29, %v18105_v16  ;;  %v18475_v16 = vld [vmem:[#allocation26_spill] sm:$0xff]  ;;  %v18476_v32 = vld [vmem:[#allocation33_spill] sm:$0xff] }
 0x2f2   : > { %v12056_v18 = vsub.f32 %v787_v14, %v12046_v51  ;;  %2421 = vmatpush.msrb.mxu0 %v12046_v51  ;;  %2872 = vmatpush.msrb.mxu3 %v12046_v51 }
 0x2f3   : > { %3221 = vst [vmem:[%s12018_s17 + $0x18] sm:$0xff] %v1548_v26  ;;  %2259 = vmatmul.f32.gmra.mxu2 %v11168_v0  ;;  %v2595_v8 = vand.u32 4294901760, %v2594_v39 }
 0x2f4   : > { %2748 = vmatpush.msrb.mxu2 %v12056_v18  ;;  %v18106_v14 = vand.u32 4294901760, %v12056_v18 }
 0x2f5   : > { %2356 = vmatmul.f32.gmra.mxu3 %v11168_v0  ;;  %2596 = vmatpush.msrb.mxu1 %v2595_v8 }
 0x2f6   : > { %v1454_v46 = vpop.f32.mrf.mxu0  ;;  %v1660_v63 = vpop.f32.mrf.mxu2 }
 0x2f7   : > { %v1455_v53 = vadd.f32 %v1454_v46, %v1300_v56  ;;  %v1555_v17 = vpop.f32.mrf.mxu1  ;;  %v784_v56 = vld [vmem:[#allocation7 + $0x100] sm:$0xff]  ;;  %v1306_v46 = vadd.f32 %v11829_v1, %v1189_v23 }
 0x2f8   : > { %v1873_v11 = vpop.f32.mrf.mxu3  ;;  %v12069_v39 = vand.u32 4294901760, %v784_v56 }
 0x2f9   : > { %v1552_v33 = vadd.f32 %v1551_v41, %v1455_v53  ;;  %v12062_v26 = vadd.f32 %v1873_v11, %v1660_v63  ;;  %1988 = vmatmul.f32.gmra.mxu0 %v18475_v16  ;;  %2110 = vmatmul.f32.gmra.mxu1 %v18476_v32  ;;  %v2600_v41 = vsub.f32 %v12056_v18, %v18106_v14  ;;  %v18479_v14 = vld [vmem:[#allocation30_spill] sm:$0xff] }
 0x2fa   : > { %v12079_v53 = vsub.f32 %v784_v56, %v12069_v39  ;;  %2423 = vmatpush.msrb.mxu0 %v12069_v39  ;;  %2874 = vmatpush.msrb.mxu3 %v12069_v39  ;;  %v18480_v56 = vld [vmem:[#allocation37_spill] sm:$0xff] }
 0x2fb   : > { %18474 = vst [vmem:[#allocation19_spill] sm:$0xff] %v12062_v26  ;;  %2263 = vmatmul.f32.gmra.mxu2 %v11212_v57  ;;  %v2601_v11 = vand.u32 4294901760, %v2600_v41  ;;  %v781_v41 = vld [vmem:[#allocation7 + $0xe8] sm:$0xff] }
 0x2fc   : > { %3224 = vst [vmem:[%s12018_s17 + $0x30] sm:$0xff] %v1552_v33  ;;  %2751 = vmatpush.msrb.mxu2 %v12079_v53  ;;  %v18493_v26 = vld [vmem:[#allocation54_spill] sm:$0xff] }
 0x2fd   : > { %2360 = vmatmul.f32.gmra.mxu3 %v11212_v57  ;;  %2602 = vmatpush.msrb.mxu1 %v2601_v11 }
 0x2fe   : > { %v1458_v10 = vpop.f32.mrf.mxu0  ;;  %v1668_v63 = vpop.f32.mrf.mxu2 }
 0x2ff   : > { %v1459_v1 = vadd.f32 %v1458_v10, %v1306_v46  ;;  %v1559_v8 = vpop.f32.mrf.mxu1  ;;  %v18107_v46 = vand.u32 4294901760, %v12079_v53  ;;  %v12095_v10 = vand.u32 4294901760, %v781_v41 }
 0x300   : > { %v1877_v5 = vpop.f32.mrf.mxu3 }
 0x301   : > { %v12085_v23 = vadd.f32 %v1555_v17, %v1459_v1  ;;  %v12087_v33 = vadd.f32 %v1877_v5, %v1668_v63  ;;  %1993 = vmatmul.f32.gmra.mxu0 %v18479_v14  ;;  %2116 = vmatmul.f32.gmra.mxu1 %v18480_v56  ;;  %v1080_v17 = vadd.f32 %v11840_v62, %v11847_v36 }
 0x302   : > { %v2606_v13 = vsub.f32 %v12079_v53, %v18107_v46  ;;  %v12105_v11 = vsub.f32 %v781_v41, %v12095_v10  ;;  %2425 = vmatpush.msrb.mxu0 %v12095_v10  ;;  %2876 = vmatpush.msrb.mxu3 %v12095_v10  ;;  %v18484_v41 = vld [vmem:[#allocation41_spill] sm:$0xff] }
 0x303   : > { %18477 = vst [vmem:[#allocation24_spill] sm:$0xff] %v12085_v23  ;;  %2267 = vmatmul.f32.gmra.mxu2 %v11235_v21  ;;  %v1199_v36 = vadd.f32 %v11850_v35, %v1080_v17 }
 0x304   : > { %18478 = vst [vmem:[#allocation26_spill] sm:$0xff] %v12087_v33  ;;  %v2607_v24 = vand.u32 4294901760, %v2606_v13  ;;  %2754 = vmatpush.msrb.mxu2 %v12105_v11  ;;  %v778_v13 = vld [vmem:[#allocation7 + $0xd0] sm:$0xff] }
 0x305   : > { %3227 = vst [vmem:[%s12018_s17 + $0x48] sm:$0xff] %v12085_v23  ;;  %2364 = vmatmul.f32.gmra.mxu3 %v11235_v21  ;;  %v18483_v21 = vld [vmem:[#allocation34_spill] sm:$0xff]  ;;  %v12123_v35 = vand.u32 4294901760, %v778_v13  ;;  %v18488_v33 = vld [vmem:[#allocation44_spill] sm:$0xff] }
 0x306   : > { %v1462_v63 = vpop.f32.mrf.mxu0  ;;  %v1676_v1 = vpop.f32.mrf.mxu2  ;;  %2608 = vmatpush.msrb.mxu1 %v2607_v24 }
 0x307   : > { %v1463_v20 = vadd.f32 %v1462_v63, %v1312_v49  ;;  %v1563_v5 = vpop.f32.mrf.mxu1  ;;  %v18112_v49 = vand.u32 4294901760, %v12105_v11  ;;  %v1084_v63 = vadd.f32 %v11852_v25, %v11860_v12  ;;  %v12131_v24 = vsub.f32 %v778_v13, %v12123_v35  ;;  %2427 = vmatpush.msrb.mxu0 %v12123_v35  ;;  %2878 = vmatpush.msrb.mxu3 %v12123_v35  ;;  %v775_v25 = vld [vmem:[#allocation7 + $0xb8] sm:$0xff] }
 0x308   : > { %v1881_v62 = vpop.f32.mrf.mxu3 }
 0x309   : > { %v12111_v56 = vadd.f32 %v1559_v8, %v1463_v20  ;;  %v12113_v46 = vadd.f32 %v1881_v62, %v1676_v1  ;;  %1998 = vmatmul.f32.gmra.mxu0 %v18483_v21  ;;  %2122 = vmatmul.f32.gmra.mxu1 %v18484_v41  ;;  %v1318_v8 = vadd.f32 %v11854_v19, %v1199_v36  ;;  %v12135_v19 = vand.u32 4294901760, %v775_v25  ;;  %v18487_v21 = vld [vmem:[#allocation38_spill] sm:$0xff] }
 0x30a   : > { %v2612_v17 = vsub.f32 %v12105_v11, %v18112_v49  ;;  %v1204_v36 = vadd.f32 %v11862_v45, %v1084_v63  ;;  %2757 = vmatpush.msrb.mxu2 %v12131_v24  ;;  %v772_v49 = vld [vmem:[#allocation7 + $0xa0] sm:$0xff]  ;;  %v769_v63 = vld [vmem:[#allocation7 + $0x88] sm:$0xff] }
 0x30b   : > { %18481 = vst [vmem:[#allocation100_spill] sm:$0xff] %v12111_v56  ;;  %2271 = vmatmul.f32.gmra.mxu2 %v11253_v55  ;;  %2429 = vmatpush.msrb.mxu0 %v12135_v19  ;;  %v12150_v45 = vand.u32 4294901760, %v772_v49 }
 0x30c   : > { %18482 = vst [vmem:[#allocation101_spill] sm:$0xff] %v12113_v46  ;;  %v2613_v41 = vand.u32 4294901760, %v2612_v17  ;;  %v12147_v17 = vsub.f32 %v775_v25, %v12135_v19  ;;  %2880 = vmatpush.msrb.mxu3 %v12135_v19 }
 0x30d   : > { %3230 = vst [vmem:[%s12018_s17 + $0x60] sm:$0xff] %v12111_v56  ;;  %2368 = vmatmul.f32.gmra.mxu3 %v11253_v55  ;;  %v12167_v25 = vsub.f32 %v772_v49, %v12150_v45  ;;  %2431 = vmatpush.msrb.mxu0 %v12150_v45 }
 0x30e   : > { %v1466_v1 = vpop.f32.mrf.mxu0  ;;  %v1684_v20 = vpop.f32.mrf.mxu2  ;;  %2614 = vmatpush.msrb.mxu1 %v2613_v41  ;;  %v1324_v41 = vadd.f32 %v11868_v61, %v1204_v36  ;;  %2760 = vmatpush.msrb.mxu2 %v12147_v17 }
 0x30f   : > { %v1467_v12 = vadd.f32 %v1466_v1, %v1318_v8  ;;  %v1567_v62 = vpop.f32.mrf.mxu1  ;;  %v18113_v8 = vand.u32 4294901760, %v12131_v24  ;;  %v12160_v1 = vand.u32 4294901760, %v769_v63  ;;  %2882 = vmatpush.msrb.mxu3 %v12150_v45  ;;  %v18119_v49 = vand.u32 4294901760, %v12167_v25 }
 0x310   : > { %v1885_v55 = vpop.f32.mrf.mxu3  ;;  %2763 = vmatpush.msrb.mxu2 %v12167_v25 }
 0x311   : > { %v12139_v46 = vadd.f32 %v1563_v5, %v1467_v12  ;;  %v12141_v13 = vadd.f32 %v1885_v55, %v1684_v20  ;;  %2003 = vmatmul.f32.gmra.mxu0 %v18487_v21  ;;  %2128 = vmatmul.f32.gmra.mxu1 %v18488_v33  ;;  %v2618_v55 = vsub.f32 %v12131_v24, %v18113_v8  ;;  %v18116_v5 = vand.u32 4294901760, %v12147_v17  ;;  %v766_v12 = vld [vmem:[#allocation7 + $0x70] sm:$0xff] }
 0x312   : > { %v1088_v20 = vadd.f32 %v11864_v42, %v11872_v4  ;;  %v12175_v61 = vsub.f32 %v769_v63, %v12160_v1  ;;  %v12177_v36 = vand.u32 4294901760, %v766_v12  ;;  %2433 = vmatpush.msrb.mxu0 %v12160_v1  ;;  %v2630_v14 = vsub.f32 %v12167_v25, %v18119_v49  ;;  %2884 = vmatpush.msrb.mxu3 %v12160_v1 }
 0x313   : > { %18485 = vst [vmem:[#allocation102_spill] sm:$0xff] %v12139_v46  ;;  %2275 = vmatmul.f32.gmra.mxu2 %v11271_v30  ;;  %v2619_v8 = vand.u32 4294901760, %v2618_v55  ;;  %v2624_v33 = vsub.f32 %v12147_v17, %v18116_v5 }
 0x314   : > { %18486 = vst [vmem:[#allocation103_spill] sm:$0xff] %v12141_v13  ;;  %v763_v13 = vld [vmem:[#allocation7 + $0x58] sm:$0xff]  ;;  %v18124_v5 = vand.u32 4294901760, %v12175_v61  ;;  %v12185_v63 = vsub.f32 %v766_v12, %v12177_v36  ;;  %v1209_v23 = vadd.f32 %v11874_v9, %v1088_v20  ;;  %2766 = vmatpush.msrb.mxu2 %v12175_v61  ;;  %v18490_v12 = vld [vmem:[#allocation42_spill] sm:$0xff]  ;;  %v2631_v56 = vand.u32 4294901760, %v2630_v14  ;;  %2435 = vmatpush.msrb.mxu0 %v12177_v36 }
 0x315   : > { %3233 = vst [vmem:[%s12018_s17 + $0x78] sm:$0xff] %v12139_v46  ;;  %2372 = vmatmul.f32.gmra.mxu3 %v11271_v30  ;;  %2620 = vmatpush.msrb.mxu1 %v2619_v8  ;;  %v2625_v21 = vand.u32 4294901760, %v2624_v33  ;;  %v12193_v33 = vand.u32 4294901760, %v763_v13  ;;  %v760_v8 = vld [vmem:[#allocation7 + $0x40] sm:$0xff]  ;;  %v18491_v9 = vld [vmem:[#allocation48_spill] sm:$0xff] }
 0x316   : > { %v1470_v42 = vpop.f32.mrf.mxu0  ;;  %v1692_v4 = vpop.f32.mrf.mxu2  ;;  %v2636_v20 = vsub.f32 %v12175_v61, %v18124_v5  ;;  %v18125_v49 = vand.u32 4294901760, %v12185_v63  ;;  %2886 = vmatpush.msrb.mxu3 %v12177_v36  ;;  %2769 = vmatpush.msrb.mxu2 %v12185_v63 }
 0x317   : > { %v1471_v30 = vadd.f32 %v1470_v42, %v1324_v41  ;;  %v1571_v55 = vpop.f32.mrf.mxu1  ;;  %2626 = vmatpush.msrb.mxu1 %v2625_v21  ;;  %v12206_v57 = vsub.f32 %v763_v13, %v12193_v33  ;;  %v1092_v21 = vadd.f32 %v11878_v34, %v11884_v22  ;;  %2437 = vmatpush.msrb.mxu0 %v12193_v33 }
 0x318   : > { %v1889_v32 = vpop.f32.mrf.mxu3  ;;  %2888 = vmatpush.msrb.mxu3 %v12193_v33 }
 0x319   : > { %v12195_v41 = vadd.f32 %v1567_v62, %v1471_v30  ;;  %v12197_v42 = vadd.f32 %v1889_v32, %v1692_v4  ;;  %2008 = vmatmul.f32.gmra.mxu0 %v18490_v12  ;;  %2134 = vmatmul.f32.gmra.mxu1 %v18491_v9  ;;  %v12209_v30 = vand.u32 4294901760, %v760_v8  ;;  %v757_v32 = vld [vmem:[#allocation7 + $0x28] sm:$0xff]  ;;  %v2637_v62 = vand.u32 4294901760, %v2636_v20  ;;  %v754_v20 = vld [vmem:[#allocation7 + $0x10] sm:$0xff] }
 0x31a   : > { %v2642_v4 = vsub.f32 %v12185_v63, %v18125_v49  ;;  %v12217_v5 = vand.u32 4294901760, %v757_v32  ;;  %2632 = vmatpush.msrb.mxu1 %v2631_v56  ;;  %v18128_v14 = vand.u32 4294901760, %v12206_v57  ;;  %v1330_v9 = vadd.f32 %v11880_v3, %v1209_v23  ;;  %2772 = vmatpush.msrb.mxu2 %v12206_v57 }
 0x31b   : > { %18489 = vst [vmem:[#allocation104_spill] sm:$0xff] %v12197_v42  ;;  %2279 = vmatmul.f32.gmra.mxu2 %v11325_v38  ;;  %v12224_v13 = vsub.f32 %v760_v8, %v12209_v30  ;;  %v12233_v34 = vand.u32 4294901760, %v754_v20  ;;  %2439 = vmatpush.msrb.mxu0 %v12209_v30 }
 0x31c   : > { %3236 = vst [vmem:[%s12018_s17 + $0x90] sm:$0xff] %v12195_v41  ;;  %v2643_v49 = vand.u32 4294901760, %v2642_v4  ;;  %v12230_v42 = vsub.f32 %v757_v32, %v12217_v5  ;;  %2638 = vmatpush.msrb.mxu1 %v2637_v62  ;;  %v2648_v8 = vsub.f32 %v12206_v57, %v18128_v14  ;;  %v1214_v62 = vadd.f32 %v11888_v52, %v1092_v21  ;;  %v18492_v32 = vld [vmem:[#allocation47_spill] sm:$0xff] }
 0x31d   : > { %2376 = vmatmul.f32.gmra.mxu3 %v11325_v38  ;;  %v2653_v12 = vand.u32 4294901760, %v12224_v13  ;;  %v12242_v4 = vsub.f32 %v754_v20, %v12233_v34  ;;  %2441 = vmatpush.msrb.mxu0 %v12217_v5 }
 0x31e   : > { %v1474_v22 = vpop.f32.mrf.mxu0  ;;  %v1700_v56 = vpop.f32.mrf.mxu2  ;;  %2644 = vmatpush.msrb.mxu1 %v2643_v49  ;;  %v2649_v14 = vand.u32 4294901760, %v2648_v8  ;;  %v18494_v46 = vand.u32 4294901760, %v12230_v42  ;;  %2775 = vmatpush.msrb.mxu2 %v12224_v13 }
 0x31f   : > { %v1475_v3 = vadd.f32 %v1474_v22, %v1330_v9  ;;  %v1575_v23 = vpop.f32.mrf.mxu1  ;;  %v2654_v9 = vsub.f32 %v12224_v13, %v2653_v12  ;;  %v2665_v49 = vand.u32 4294901760, %v12242_v4  ;;  %2443 = vmatpush.msrb.mxu0 %v12233_v34  ;;  %2890 = vmatpush.msrb.mxu3 %v12209_v30  ;;  %v18536_v13 = vld [vmem:[#allocation95_spill] sm:$0xff] }
 0x320   : > { %v1893_v38 = vpop.f32.mrf.mxu3  ;;  %v2660_v52 = vsub.f32 %v12230_v42, %v18494_v46  ;;  %2650 = vmatpush.msrb.mxu1 %v2649_v14  ;;  %v1336_v46 = vadd.f32 %v11893_v27, %v1214_v62  ;;  %v1096_v14 = vadd.f32 %v11891_v44, %v11898_v60  ;;  %2778 = vmatpush.msrb.mxu2 %v12230_v42  ;;  %v18498_v62 = vld [vmem:[#allocation52_spill] sm:$0xff] }
 0x321   : > { %v12251_v22 = vadd.f32 %v1571_v55, %v1475_v3  ;;  %v12253_v20 = vadd.f32 %v1893_v38, %v1700_v56  ;;  %2013 = vmatmul.f32.gmra.mxu0 %v18492_v32  ;;  %2140 = vmatmul.f32.gmra.mxu1 %v18493_v26  ;;  %v2655_v21 = vand.u32 4294901760, %v2654_v9  ;;  %v2666_v55 = vsub.f32 %v12242_v4, %v2665_v49 }
 0x322   : > { %v2661_v38 = vand.u32 4294901760, %v2660_v52  ;;  %v18495_v56 = vand.u32 4294901760, %v11965_v31  ;;  %v18496_v3 = vand.u32 4294901760, %v11985_v48  ;;  %2892 = vmatpush.msrb.mxu3 %v12217_v5  ;;  %v1219_v48 = vadd.f32 %v11901_v43, %v1096_v14  ;;  %v18502_v43 = vld [vmem:[#allocation99_spill] sm:$0xff]  ;;  %2781 = vmatpush.msrb.mxu2 %v12242_v4 }
 0x323   : > { %3239 = vst [vmem:[%s12018_s17 + $0xa8] sm:$0xff] %v12251_v22  ;;  %2283 = vmatmul.f32.gmra.mxu2 %v18438_v6  ;;  %2656 = vmatpush.msrb.mxu1 %v2655_v21  ;;  %v2667_v8 = vand.u32 4294901760, %v2666_v55  ;;  %v18501_v55 = vld [vmem:[#allocation49_spill] sm:$0xff] }
 0x324   : > { %2995 = vmatpush.msra.mxu0 %v18495_v56  ;;  %v18497_v56 = vand.u32 4294901760, %v12008_v50  ;;  %v18500_v50 = vand.u32 4294901760, %v12033_v29  ;;  %2894 = vmatpush.msrb.mxu3 %v12233_v34 }
 0x325   : > { %2380 = vmatmul.f32.gmra.mxu3 %v18438_v6  ;;  %2662 = vmatpush.msrb.mxu1 %v2661_v38  ;;  %v18499_v38 = vld [vmem:[#allocation57_spill] sm:$0xff] }
 0x326   : > { %2999 = vmatpush.msra.mxu0 %v18496_v3  ;;  %v1478_v9 = vpop.f32.mrf.mxu0  ;;  %v1708_v52 = vpop.f32.mrf.mxu2  ;;  %v18506_v3 = vld [vmem:[#allocation51_spill] sm:$0xff] }
 0x327   : > { %v1479_v31 = vadd.f32 %v1478_v9, %v1336_v46  ;;  %v1579_v21 = vpop.f32.mrf.mxu1  ;;  %2668 = vmatpush.msrb.mxu1 %v2667_v8  ;;  %v18504_v46 = vld [vmem:[#allocation82_spill] sm:$0xff]  ;;  %v18505_v8 = vld [vmem:[#allocation83_spill] sm:$0xff] }
 0x328   : > { %3003 = vmatpush.msra.mxu0 %v18497_v56  ;;  %v1897_v44 = vpop.f32.mrf.mxu3  ;;  %v1342_v14 = vadd.f32 %v18504_v46, %v1219_v48  ;;  %v1100_v9 = vadd.f32 %v18506_v3, %v18505_v8  ;;  %v18509_v48 = vld [vmem:[#allocation84_spill] sm:$0xff]  ;;  %v18510_v46 = vld [vmem:[#allocation53_spill] sm:$0xff]  ;;  %v18516_v8 = vld [vmem:[#allocation87_spill] sm:$0xff] }
 0x329   : > { %v12283_v27 = vadd.f32 %v1575_v23, %v1479_v31  ;;  %v12285_v60 = vadd.f32 %v1897_v44, %v1708_v52  ;;  %2018 = vmatmul.f32.gmra.mxu0 %v18498_v62  ;;  %2146 = vmatmul.f32.gmra.mxu1 %v18499_v38  ;;  %v18503_v23 = vand.u32 4294901760, %v12056_v18  ;;  %v18507_v52 = vand.u32 4294901760, %v12079_v53  ;;  %v18517_v3 = vld [vmem:[#allocation85_spill] sm:$0xff] }
 0x32a   : > { %3122 = vmatpush.msra.mxu1 %v11961_v28  ;;  %3007 = vmatpush.msra.mxu0 %v18500_v50  ;;  %v18508_v44 = vand.u32 4294901760, %v12105_v11  ;;  %v1224_v50 = vadd.f32 %v18509_v48, %v1100_v9  ;;  %v18512_v53 = vand.u32 4294901760, %v12131_v24  ;;  %v18514_v11 = vand.u32 4294901760, %v12147_v17 }
 0x32b   : > { %3242 = vst [vmem:[%s12018_s17 + $0xc0] sm:$0xff] %v12283_v27  ;;  %2287 = vmatmul.f32.gmra.mxu2 %v18501_v55  ;;  %v1104_v9 = vadd.f32 %v18517_v3, %v18516_v8  ;;  %v18519_v17 = vand.u32 4294901760, %v12175_v61  ;;  %v18525_v61 = vand.u32 4294901760, %v12206_v57  ;;  %v18529_v57 = vand.u32 4294901760, %v12230_v42  ;;  %v18535_v42 = vld [vmem:[#allocation94_spill] sm:$0xff] }
 0x32c   : > { %3124 = vmatpush.msra.mxu1 %v18502_v43  ;;  %3011 = vmatpush.msra.mxu0 %v18503_v23 }
 0x32d   : > { %2384 = vmatmul.f32.gmra.mxu3 %v18501_v55 }
 0x32e   : > { %v1482_v28 = vpop.f32.mrf.mxu0  ;;  %v1716_v29 = vpop.f32.mrf.mxu2  ;;  %3126 = vmatpush.msra.mxu1 %v11998_v37  ;;  %3015 = vmatpush.msra.mxu0 %v18507_v52  ;;  %v18511_v37 = vld [vmem:[#allocation60_spill] sm:$0xff] }
 0x32f   : > { %v1483_v31 = vadd.f32 %v1482_v28, %v1342_v14  ;;  %v1583_v18 = vpop.f32.mrf.mxu1  ;;  %v18518_v28 = vand.u32 4294901760, %v12167_v25  ;;  %v18523_v25 = vand.u32 4294901760, %v12185_v63 }
 0x330   : > { %v1901_v56 = vpop.f32.mrf.mxu3  ;;  %3128 = vmatpush.msra.mxu1 %v12023_v59  ;;  %3019 = vmatpush.msra.mxu0 %v18508_v44  ;;  %v18513_v59 = vld [vmem:[#allocation55_spill] sm:$0xff] }
 0x331   : > { %v12311_v43 = vadd.f32 %v1579_v21, %v1483_v31  ;;  %v12313_v23 = vadd.f32 %v1901_v56, %v1716_v29  ;;  %2023 = vmatmul.f32.gmra.mxu0 %v18510_v46  ;;  %2152 = vmatmul.f32.gmra.mxu1 %v18511_v37  ;;  %v18515_v21 = vld [vmem:[#allocation86_spill] sm:$0xff]  ;;  %v18520_v31 = vld [vmem:[#allocation88_spill] sm:$0xff] }
 0x332   : > { %3130 = vmatpush.msra.mxu1 %v12046_v51  ;;  %3023 = vmatpush.msra.mxu0 %v18512_v53  ;;  %v1348_v14 = vadd.f32 %v18515_v21, %v1224_v50  ;;  %v1229_v56 = vadd.f32 %v18520_v31, %v1104_v9  ;;  %v18521_v50 = vld [vmem:[#allocation58_spill] sm:$0xff]  ;;  %v18528_v21 = vld [vmem:[#allocation89_spill] sm:$0xff]  ;;  %v18530_v9 = vld [vmem:[#allocation92_spill] sm:$0xff] }
 0x333   : > { %3245 = vst [vmem:[%s12018_s17 + $0xd8] sm:$0xff] %v12311_v43  ;;  %2291 = vmatmul.f32.gmra.mxu2 %v18513_v59 }
 0x334   : > { %3132 = vmatpush.msra.mxu1 %v12069_v39  ;;  %3027 = vmatpush.msra.mxu0 %v18514_v11  ;;  %v18527_v11 = vld [vmem:[#allocation91_spill] sm:$0xff] }
 0x335   : > { %2388 = vmatmul.f32.gmra.mxu3 %v18513_v59 }
 0x336   : > { %v1486_v51 = vpop.f32.mrf.mxu0  ;;  %v1724_v24 = vpop.f32.mrf.mxu2  ;;  %3134 = vmatpush.msra.mxu1 %v12095_v10  ;;  %3031 = vmatpush.msra.mxu0 %v18518_v28  ;;  %v18522_v10 = vld [vmem:[#allocation65_spill] sm:$0xff] }
 0x337   : > { %v1487_v29 = vadd.f32 %v1486_v51, %v1348_v14  ;;  %v1587_v39 = vpop.f32.mrf.mxu1  ;;  %v1108_v14 = vadd.f32 %v18528_v21, %v18527_v11  ;;  %v18542_v11 = vld [vmem:[#allocation67_spill] sm:$0xff] }
 0x338   : > { %v1905_v52 = vpop.f32.mrf.mxu3  ;;  %3136 = vmatpush.msra.mxu1 %v12123_v35  ;;  %3035 = vmatpush.msra.mxu0 %v18519_v17  ;;  %v18524_v35 = vld [vmem:[#allocation61_spill] sm:$0xff] }
 0x339   : > { %v12337_v44 = vadd.f32 %v1583_v18, %v1487_v29  ;;  %v12339_v48 = vadd.f32 %v1905_v52, %v1724_v24  ;;  %2028 = vmatmul.f32.gmra.mxu0 %v18521_v50  ;;  %2158 = vmatmul.f32.gmra.mxu1 %v18522_v10  ;;  %v18526_v18 = vld [vmem:[#allocation90_spill] sm:$0xff]  ;;  %v1234_v51 = vadd.f32 %v18530_v9, %v1108_v14  ;;  %v18546_v9 = vld [vmem:[#allocation76_spill] sm:$0xff] }
 0x33a   : > { %3138 = vmatpush.msra.mxu1 %v12135_v19  ;;  %3039 = vmatpush.msra.mxu0 %v18523_v25  ;;  %v1354_v53 = vadd.f32 %v18526_v18, %v1229_v56  ;;  %v18532_v29 = vld [vmem:[#allocation62_spill] sm:$0xff]  ;;  %v18538_v56 = vld [vmem:[#allocation96_spill] sm:$0xff] }
 0x33b   : > { %3248 = vst [vmem:[%s12018_s17 + $0xf0] sm:$0xff] %v12337_v44  ;;  %2295 = vmatmul.f32.gmra.mxu2 %v18524_v35  ;;  %v18540_v18 = vld [vmem:[#allocation66_spill] sm:$0xff] }
 0x33c   : > { %3140 = vmatpush.msra.mxu1 %v12150_v45  ;;  %3043 = vmatpush.msra.mxu0 %v18525_v61 }
 0x33d   : > { %2392 = vmatmul.f32.gmra.mxu3 %v18524_v35 }
 0x33e   : > { %v1490_v19 = vpop.f32.mrf.mxu0  ;;  %v1732_v63 = vpop.f32.mrf.mxu2  ;;  %3142 = vmatpush.msra.mxu1 %v12160_v1  ;;  %3047 = vmatpush.msra.mxu0 %v2653_v12  ;;  %v18533_v1 = vld [vmem:[#allocation69_spill] sm:$0xff]  ;;  %v1360_v12 = vadd.f32 %v18535_v42, %v1234_v51  ;;  %v18547_v51 = vld [vmem:[#allocation74_spill] sm:$0xff] }
 0x33f   : > { %v1491_v8 = vadd.f32 %v1490_v19, %v1354_v53  ;;  %v1591_v45 = vpop.f32.mrf.mxu1  ;;  %v18541_v53 = vld [vmem:[#allocation72_spill] sm:$0xff] }
 0x340   : > { %v1909_v3 = vpop.f32.mrf.mxu3  ;;  %3144 = vmatpush.msra.mxu1 %v12177_v36  ;;  %3051 = vmatpush.msra.mxu0 %v18529_v57  ;;  %v18534_v36 = vld [vmem:[#allocation63_spill] sm:$0xff]  ;;  %v18545_v57 = vld [vmem:[#allocation70_spill] sm:$0xff] }
 0x341   : > { %v12363_v24 = vadd.f32 %v1587_v39, %v1491_v8  ;;  %v12365_v28 = vadd.f32 %v1909_v3, %v1732_v63  ;;  %2033 = vmatmul.f32.gmra.mxu0 %v18532_v29  ;;  %2164 = vmatmul.f32.gmra.mxu1 %v18533_v1  ;;  %v18537_v39 = vld [vmem:[#allocation93_spill] sm:$0xff]  ;;  %v18571_v29 = vld [vmem:[#allocation34_spill] sm:$0xff] }
 0x342   : > { %3146 = vmatpush.msra.mxu1 %v12193_v33  ;;  %3055 = vmatpush.msra.mxu0 %v2665_v49  ;;  %v1112_v52 = vadd.f32 %v18537_v39, %v18536_v13  ;;  %v18548_v13 = vld [vmem:[#allocation98_spill] sm:$0xff] }
 0x343   : > { %18531 = vst [vmem:[#allocation47_spill] sm:$0xff] %v12365_v28  ;;  %2299 = vmatmul.f32.gmra.mxu2 %v18534_v36  ;;  %v18569_v28 = vld [vmem:[#allocation36_spill] sm:$0xff] }
 0x344   : > { %3251 = vst [vmem:[%s12018_s17 + $0x108] sm:$0xff] %v12363_v24  ;;  %3148 = vmatpush.msra.mxu1 %v12209_v30  ;;  %v1239_v25 = vadd.f32 %v18538_v56, %v1112_v52 }
 0x345   : > { %2396 = vmatmul.f32.gmra.mxu3 %v18534_v36 }
 0x346   : > { %v1494_v17 = vpop.f32.mrf.mxu0  ;;  %v1740_v31 = vpop.f32.mrf.mxu2  ;;  %3150 = vmatpush.msra.mxu1 %v12217_v5  ;;  %v18543_v5 = vld [vmem:[#allocation97_spill] sm:$0xff] }
 0x347   : > { %v1495_v33 = vadd.f32 %v1494_v17, %v1360_v12  ;;  %v1595_v4 = vpop.f32.mrf.mxu1  ;;  %v1366_v21 = vadd.f32 %v18543_v5, %v1239_v25 }
 0x348   : > { %v1913_v49 = vpop.f32.mrf.mxu3  ;;  %3152 = vmatpush.msra.mxu1 %v12233_v34 }
 0x349   : > { %v12383_v30 = vadd.f32 %v1591_v45, %v1495_v33  ;;  %v12385_v61 = vadd.f32 %v1913_v49, %v1740_v31  ;;  %2038 = vmatmul.f32.gmra.mxu0 %v18540_v18  ;;  %2170 = vmatmul.f32.gmra.mxu1 %v18541_v53  ;;  %v18551_v49 = vld [vmem:[#allocation80_spill] sm:$0xff] }
 0x34b   : > { %18539 = vst [vmem:[#allocation54_spill] sm:$0xff] %v12385_v61  ;;  %2303 = vmatmul.f32.gmra.mxu2 %v18542_v11 }
 0x34c   : > { %3254 = vst [vmem:[%s12018_s17 + $0x120] sm:$0xff] %v12383_v30 }
 0x34d   : > { %2400 = vmatmul.f32.gmra.mxu3 %v18542_v11  ;;  %v18567_v11 = vld [vmem:[#allocation24_spill] sm:$0xff] }
 0x34e   : > { %v1498_v34 = vpop.f32.mrf.mxu0  ;;  %v1748_v14 = vpop.f32.mrf.mxu2 }
 0x34f   : > { %v1499_v19 = vadd.f32 %v1498_v34, %v1366_v21  ;;  %v1599_v63 = vpop.f32.mrf.mxu1 }
 0x350   : > { %v1917_v8 = vpop.f32.mrf.mxu3 }
 0x351   : > { %v1596_v45 = vadd.f32 %v1595_v4, %v1499_v19  ;;  %v12394_v3 = vadd.f32 %v1917_v8, %v1748_v14  ;;  %2043 = vmatmul.f32.gmra.mxu0 %v18545_v57  ;;  %2176 = vmatmul.f32.gmra.mxu1 %v18546_v9  ;;  %v18550_v4 = vld [vmem:[#allocation75_spill] sm:$0xff]  ;;  %v18566_v57 = vld [vmem:[#allocation33_spill] sm:$0xff] }
 0x352   : > { %v18553_v8 = vld [vmem:[#allocation79_spill] sm:$0xff] }
 0x353   : > { %18544 = vst [vmem:[#allocation52_spill] sm:$0xff] %v12394_v3  ;;  %2307 = vmatmul.f32.gmra.mxu2 %v18547_v51  ;;  %v18562_v3 = vld [vmem:[#allocation32_spill] sm:$0xff] }
 0x354   : > { %3257 = vst [vmem:[%s12018_s17 + $0x138] sm:$0xff] %v1596_v45 }
 0x355   : > { %2404 = vmatmul.f32.gmra.mxu3 %v18547_v51 }
 0x356   : > { %v1502_v42 = vpop.f32.mrf.mxu0  ;;  %v1756_v12 = vpop.f32.mrf.mxu2 }
 0x357   : > { %v1503_v39 = vadd.f32 %v1502_v42, %v18548_v13  ;;  %v1603_v52 = vpop.f32.mrf.mxu1  ;;  %v18554_v42 = vld [vmem:[#allocation18_spill] sm:$0xff] }
 0x358   : > { %v1921_v17 = vpop.f32.mrf.mxu3 }
 0x359   : > { %v1600_v31 = vadd.f32 %v1599_v63, %v1503_v39  ;;  %v12402_v33 = vadd.f32 %v1921_v17, %v1756_v12  ;;  %2048 = vmatmul.f32.gmra.mxu0 %v18550_v4  ;;  %2182 = vmatmul.f32.gmra.mxu1 %v18551_v49  ;;  %v12416_v12 = vand.u32 4294901760, %v1596_v45  ;;  %v18556_v49 = vld [vmem:[#allocation23_spill] sm:$0xff] }
 0x35a   : > { %v18558_v4 = vld [vmem:[#allocation27_spill] sm:$0xff] }
 0x35b   : > { %18549 = vst [vmem:[#allocation57_spill] sm:$0xff] %v12402_v33  ;;  %2311 = vmatmul.f32.gmra.mxu2 %v11770_v58  ;;  %v12409_v5 = vand.u32 4294901760, %v1600_v31  ;;  %v18557_v33 = vld [vmem:[#allocation25_spill] sm:$0xff] }
 0x35c   : > { %3260 = vst [vmem:[%s12018_s17 + $0x150] sm:$0xff] %v1600_v31 }
 0x35d   : > { %2408 = vmatmul.f32.gmra.mxu3 %v11770_v58  ;;  %v12419_v13 = vsub.f32 %v1600_v31, %v12409_v5 }
 0x35e   : > { %v1506_v56 = vpop.f32.mrf.mxu0  ;;  %v1764_v25 = vpop.f32.mrf.mxu2 }
 0x35f   : > { %v1507_v21 = vadd.f32 %v1506_v56, %v11993_v47  ;;  %v2093_v34 = vpop.f32.mrf.mxu1  ;;  %v12426_v47 = vand.u32 4294901760, %v12383_v30  ;;  %v12434_v56 = vsub.f32 %v1596_v45, %v12416_v12 }
 0x360   : > { %v1925_v14 = vpop.f32.mrf.mxu3 }
 0x361   : > { %v1604_v19 = vadd.f32 %v1603_v52, %v1507_v21  ;;  %v12412_v63 = vadd.f32 %v1925_v14, %v1764_v25  ;;  %2053 = vmatmul.f32.gmra.mxu0 %v18553_v8  ;;  %2670 = vmatmul.f32.vlgmr.msrb.gmra.mxu1 %v18554_v42  ;;  %v18555_v52 = vld [vmem:[#allocation20_spill] sm:$0xff]  ;;  %v12439_v21 = vand.u32 4294901760, %v12363_v24  ;;  %v12447_v45 = vsub.f32 %v12383_v30, %v12426_v47 }
 0x363   : > { %18552 = vst [vmem:[#allocation49_spill] sm:$0xff] %v12412_v63  ;;  %2784 = vmatmul.f32.vlgmr.msrb.gmra.mxu2 %v18470_v40  ;;  %v12423_v39 = vand.u32 4294901760, %v1604_v19  ;;  %v3411_v40 = vand.u32 4294901760, %v12419_v13  ;;  %v12460_v30 = vsub.f32 %v12363_v24, %v12439_v21 }
 0x364   : > { %3263 = vst [vmem:[%s12018_s17 + $0x168] sm:$0xff] %v1604_v19 }
 0x365   : > { %2898 = vmatmul.f32.vlgmr.msrb.gmra.mxu3 %v18555_v52  ;;  %3307 = vmatpush.msra.mxu2 %v12423_v39  ;;  %v12431_v17 = vsub.f32 %v1604_v19, %v12423_v39  ;;  %v3412_v58 = vsub.f32 %v12419_v13, %v3411_v40 }
 0x366   : > { %v1979_v31 = vpop.f32.mrf.mxu0  ;;  %v2252_v25 = vpop.f32.mrf.mxu2  ;;  %3800 = vmatpush.msrb.mxu1 %v12423_v39 }
 0x367   : > { %v1980_v14 = vadd.f32 %v1979_v31, %v12014_v15  ;;  %v2099_v52 = vpop.f32.mrf.mxu1  ;;  %3309 = vmatpush.msra.mxu2 %v12409_v5  ;;  %v3405_v19 = vand.u32 4294901760, %v12431_v17  ;;  %v3417_v15 = vand.u32 4294901760, %v12434_v56  ;;  %v12454_v31 = vand.u32 4294901760, %v12337_v44 }
 0x368   : > { %v2349_v42 = vpop.f32.mrf.mxu3  ;;  %3802 = vmatpush.msrb.mxu1 %v12409_v5 }
 0x369   : > { %v2094_v63 = vadd.f32 %v2093_v34, %v1980_v14  ;;  %2449 = vmatmul.f32.vlgmr.msrb.gmra.mxu0 %v18556_v49  ;;  %2674 = vmatmul.f32.gmra.mxu1 %v11164_v2  ;;  %v3406_v8 = vsub.f32 %v12431_v17, %v3405_v19  ;;  %v3423_v14 = vand.u32 4294901760, %v12447_v45  ;;  %v3418_v24 = vsub.f32 %v12434_v56, %v3417_v15 }
 0x36a   : > { %3311 = vmatpush.msra.mxu2 %v12416_v12  ;;  %3705 = vmatpush.msrb.mxu0 %v3405_v19  ;;  %v12467_v19 = vand.u32 4294901760, %v12311_v43 }
 0x36b   : > { %v2253_v34 = vadd.f32 %v2252_v25, %v2094_v63  ;;  %2789 = vmatmul.f32.gmra.mxu2 %v18472_v7  ;;  %3804 = vmatpush.msrb.mxu1 %v12416_v12  ;;  %v3407_v49 = vand.u32 4294901760, %v3406_v8  ;;  %v12474_v7 = vsub.f32 %v12337_v44, %v12454_v31  ;;  %v3413_v25 = vand.u32 4294901760, %v3412_v58 }
 0x36c   : > { %3313 = vmatpush.msra.mxu2 %v12426_v47  ;;  %3709 = vmatpush.msrb.mxu0 %v3411_v40  ;;  %v3429_v40 = vand.u32 4294901760, %v12460_v30  ;;  %v3424_v9 = vsub.f32 %v12447_v45, %v3423_v14  ;;  %v12488_v58 = vsub.f32 %v12311_v43, %v12467_v19 }
 0x36d   : > { %v2350_v2 = vadd.f32 %v2349_v42, %v2253_v34  ;;  %2904 = vmatmul.f32.gmra.mxu3 %v18557_v33  ;;  %3806 = vmatpush.msrb.mxu1 %v12426_v47  ;;  %v12479_v42 = vand.u32 4294901760, %v12283_v27 }
 0x36e   : > { %v1984_v63 = vpop.f32.mrf.mxu0  ;;  %v2256_v8 = vpop.f32.mrf.mxu2  ;;  %3315 = vmatpush.msra.mxu2 %v12439_v21  ;;  %3408 = vmatpush.msra.mxu3 %v3407_v49 }
 0x36f   : > { %3219 = vst [vmem:[%s12018_s17 + $0x8] sm:$0xff] %v2350_v2  ;;  %v1985_v33 = vadd.f32 %v1984_v63, %v12039_v54  ;;  %v2105_v34 = vpop.f32.mrf.mxu1  ;;  %3713 = vmatpush.msrb.mxu0 %v3417_v15  ;;  %3808 = vmatpush.msrb.mxu1 %v12439_v21  ;;  %v3419_v2 = vand.u32 4294901760, %v3418_v24  ;;  %v3435_v54 = vand.u32 4294901760, %v12474_v7  ;;  %v12494_v15 = vand.u32 4294901760, %v12251_v22 }
 0x370   : > { %v2353_v44 = vpop.f32.mrf.mxu3  ;;  %3317 = vmatpush.msra.mxu2 %v12454_v31  ;;  %3414 = vmatpush.msra.mxu3 %v3413_v25  ;;  %v3430_v63 = vsub.f32 %v12460_v30, %v3429_v40  ;;  %v12500_v43 = vsub.f32 %v12283_v27, %v12479_v42  ;;  %v3441_v24 = vand.u32 4294901760, %v12488_v58 }
 0x371   : > { %v2100_v49 = vadd.f32 %v2099_v52, %v1985_v33  ;;  %2457 = vmatmul.f32.gmra.mxu0 %v18558_v4  ;;  %2678 = vmatmul.f32.gmra.mxu1 %v11168_v0  ;;  %v3425_v4 = vand.u32 4294901760, %v3424_v9  ;;  %v18559_v33 = vld [vmem:[#allocation29_spill] sm:$0xff]  ;;  %v3436_v27 = vsub.f32 %v12474_v7, %v3435_v54 }
 0x372   : > { %3717 = vmatpush.msrb.mxu0 %v3423_v14  ;;  %3810 = vmatpush.msrb.mxu1 %v12454_v31  ;;  %v12506_v14 = vand.u32 4294901760, %v12195_v41  ;;  %v3431_v9 = vand.u32 4294901760, %v3430_v63  ;;  %v3442_v51 = vsub.f32 %v12488_v58, %v3441_v24 }
 0x373   : > { %v2257_v52 = vadd.f32 %v2256_v8, %v2100_v49  ;;  %2794 = vmatmul.f32.gmra.mxu2 %v18475_v16  ;;  %3420 = vmatpush.msra.mxu3 %v3419_v2  ;;  %v12513_v16 = vsub.f32 %v12251_v22, %v12494_v15  ;;  %v3447_v49 = vand.u32 4294901760, %v12500_v43  ;;  %v18560_v2 = vld [vmem:[#allocation102_spill] sm:$0xff] }
 0x374   : > { %3319 = vmatpush.msra.mxu2 %v12467_v19  ;;  %3721 = vmatpush.msrb.mxu0 %v3429_v40  ;;  %v12527_v63 = vsub.f32 %v12195_v41, %v12506_v14 }
 0x375   : > { %v2354_v25 = vadd.f32 %v2353_v44, %v2257_v52  ;;  %2910 = vmatmul.f32.gmra.mxu3 %v18559_v33  ;;  %3812 = vmatpush.msrb.mxu1 %v12467_v19  ;;  %v12518_v44 = vand.u32 4294901760, %v18560_v2  ;;  %v18561_v52 = vld [vmem:[#allocation19_spill] sm:$0xff] }
 0x376   : > { %v1989_v8 = vpop.f32.mrf.mxu0  ;;  %v2260_v40 = vpop.f32.mrf.mxu2  ;;  %3321 = vmatpush.msra.mxu2 %v12479_v42  ;;  %3426 = vmatpush.msra.mxu3 %v3425_v4 }
 0x377   : > { %3222 = vst [vmem:[%s12018_s17 + $0x20] sm:$0xff] %v2354_v25  ;;  %v1990_v33 = vadd.f32 %v1989_v8, %v18561_v52  ;;  %v2111_v0 = vpop.f32.mrf.mxu1  ;;  %3725 = vmatpush.msrb.mxu0 %v3435_v54  ;;  %3814 = vmatpush.msrb.mxu1 %v12479_v42  ;;  %v18563_v25 = vld [vmem:[#allocation28_spill] sm:$0xff]  ;;  %v3437_v8 = vand.u32 4294901760, %v3436_v27  ;;  %v3453_v54 = vand.u32 4294901760, %v12513_v16  ;;  %v12539_v41 = vsub.f32 %v18560_v2, %v12518_v44 }
 0x378   : > { %v2357_v22 = vpop.f32.mrf.mxu3  ;;  %3323 = vmatpush.msra.mxu2 %v12494_v15  ;;  %3432 = vmatpush.msra.mxu3 %v3431_v9  ;;  %v18564_v52 = vld [vmem:[#allocation100_spill] sm:$0xff]  ;;  %v3448_v9 = vsub.f32 %v12500_v43, %v3447_v49  ;;  %v3443_v27 = vand.u32 4294901760, %v3442_v51  ;;  %v12548_v2 = vand.u32 4294901760, %v18567_v11 }
 0x379   : > { %v2106_v4 = vadd.f32 %v2105_v34, %v1990_v33  ;;  %2465 = vmatmul.f32.gmra.mxu0 %v18562_v3  ;;  %2682 = vmatmul.f32.gmra.mxu1 %v18563_v25  ;;  %v12533_v53 = vand.u32 4294901760, %v18564_v52  ;;  %v18565_v34 = vld [vmem:[#allocation30_spill] sm:$0xff]  ;;  %v3278_v33 = vld [vmem:[%s12018_s17 + $0x30] sm:$0xff] }
 0x37a   : > { %3729 = vmatpush.msrb.mxu0 %v3441_v24  ;;  %3816 = vmatpush.msrb.mxu1 %v12494_v15  ;;  %v3459_v24 = vand.u32 4294901760, %v12527_v63  ;;  %v12561_v1 = vand.u32 4294901760, %v3278_v33 }
 0x37b   : > { %v2261_v3 = vadd.f32 %v2260_v40, %v2106_v4  ;;  %2799 = vmatmul.f32.gmra.mxu2 %v18565_v34  ;;  %3438 = vmatpush.msra.mxu3 %v3437_v8  ;;  %v3454_v40 = vsub.f32 %v12513_v16, %v3453_v54  ;;  %v12553_v4 = vsub.f32 %v18564_v52, %v12533_v53 }
 0x37c   : > { %3325 = vmatpush.msra.mxu2 %v12506_v14  ;;  %3733 = vmatpush.msrb.mxu0 %v3447_v49  ;;  %v3276_v49 = vld [vmem:[%s12018_s17 + $0x18] sm:$0xff]  ;;  %v3460_v18 = vsub.f32 %v12527_v63, %v3459_v24 }
 0x37d   : > { %v2358_v25 = vadd.f32 %v2357_v22, %v2261_v3  ;;  %2916 = vmatmul.f32.gmra.mxu3 %v18566_v57  ;;  %3818 = vmatpush.msrb.mxu1 %v12506_v14  ;;  %v3449_v22 = vand.u32 4294901760, %v3448_v9  ;;  %v3465_v57 = vand.u32 4294901760, %v12539_v41  ;;  %v18568_v3 = vld [vmem:[#allocation26_spill] sm:$0xff]  ;;  %v12565_v36 = vand.u32 4294901760, %v3276_v49 }
 0x37e   : > { %v1994_v51 = vpop.f32.mrf.mxu0  ;;  %v2264_v8 = vpop.f32.mrf.mxu2  ;;  %3327 = vmatpush.msra.mxu2 %v12518_v44  ;;  %3444 = vmatpush.msra.mxu3 %v3443_v27  ;;  %v3274_v9 = vld [vmem:[%s12018_s17] sm:$0xff] }
 0x37f   : > { %3225 = vst [vmem:[%s12018_s17 + $0x38] sm:$0xff] %v2358_v25  ;;  %v1995_v34 = vadd.f32 %v1994_v51, %v18568_v3  ;;  %v2117_v61 = vpop.f32.mrf.mxu1  ;;  %3737 = vmatpush.msrb.mxu0 %v3453_v54  ;;  %3820 = vmatpush.msrb.mxu1 %v12518_v44  ;;  %v18570_v25 = vld [vmem:[#allocation31_spill] sm:$0xff]  ;;  %v3455_v51 = vand.u32 4294901760, %v3454_v40  ;;  %v3471_v54 = vand.u32 4294901760, %v12553_v4  ;;  %v12573_v3 = vsub.f32 %v18567_v11, %v12548_v2 }
 0x380   : > { %v2361_v52 = vpop.f32.mrf.mxu3  ;;  %3329 = vmatpush.msra.mxu2 %v12533_v53  ;;  %3450 = vmatpush.msra.mxu3 %v3449_v22  ;;  %v3466_v22 = vsub.f32 %v12539_v41, %v3465_v57  ;;  %v3461_v11 = vand.u32 4294901760, %v3460_v18 }
 0x381   : > { %v2112_v27 = vadd.f32 %v2111_v0, %v1995_v34  ;;  %2473 = vmatmul.f32.gmra.mxu0 %v18569_v28  ;;  %2686 = vmatmul.f32.gmra.mxu1 %v18570_v25  ;;  %v12578_v0 = vand.u32 4294901760, %v3274_v9  ;;  %v12581_v28 = vsub.f32 %v3278_v33, %v12561_v1  ;;  %v12591_v34 = vsub.f32 %v3276_v49, %v12565_v36 }
 0x382   : > { %3741 = vmatpush.msrb.mxu0 %v3459_v24  ;;  %3822 = vmatpush.msrb.mxu1 %v12533_v53  ;;  %v18573_v24 = vld [vmem:[#allocation37_spill] sm:$0xff] }
 0x383   : > { %v2265_v10 = vadd.f32 %v2264_v8, %v2112_v27  ;;  %2804 = vmatmul.f32.gmra.mxu2 %v18571_v29  ;;  %3456 = vmatpush.msra.mxu3 %v3455_v51  ;;  %v3477_v8 = vand.u32 4294901760, %v12573_v3  ;;  %v3472_v29 = vsub.f32 %v12553_v4, %v3471_v54  ;;  %v3483_v51 = vand.u32 4294901760, %v12581_v28 }
 0x384   : > { %3331 = vmatpush.msra.mxu2 %v12548_v2  ;;  %3745 = vmatpush.msrb.mxu0 %v3465_v57  ;;  %v3467_v57 = vand.u32 4294901760, %v3466_v22  ;;  %v18576_v22 = vld [vmem:[#allocation35_spill] sm:$0xff] }
 0x385   : > { %v12584_v40 = vadd.f32 %v2361_v52, %v2265_v10  ;;  %2922 = vmatmul.f32.gmra.mxu3 %v18573_v24  ;;  %3824 = vmatpush.msrb.mxu1 %v12548_v2  ;;  %v18574_v10 = vld [vmem:[#allocation101_spill] sm:$0xff]  ;;  %v12600_v24 = vsub.f32 %v3274_v9, %v12578_v0  ;;  %v18577_v9 = vld [vmem:[#allocation38_spill] sm:$0xff] }
 0x386   : > { %v1999_v27 = vpop.f32.mrf.mxu0  ;;  %v2268_v33 = vpop.f32.mrf.mxu2  ;;  %3333 = vmatpush.msra.mxu2 %v12561_v1  ;;  %3462 = vmatpush.msra.mxu3 %v3461_v11  ;;  %v18575_v11 = vld [vmem:[#allocation40_spill] sm:$0xff] }
 0x387   : > { %18572 = vst [vmem:[#allocation99_spill] sm:$0xff] %v12584_v40  ;;  %v2000_v18 = vadd.f32 %v1999_v27, %v18574_v10  ;;  %v2123_v52 = vpop.f32.mrf.mxu1  ;;  %3749 = vmatpush.msrb.mxu0 %v3471_v54  ;;  %3826 = vmatpush.msrb.mxu1 %v12561_v1  ;;  %v3478_v27 = vsub.f32 %v12573_v3, %v3477_v8  ;;  %v3489_v54 = vand.u32 4294901760, %v12591_v34 }
 0x388   : > { %3228 = vst [vmem:[%s12018_s17 + $0x50] sm:$0xff] %v12584_v40  ;;  %v2365_v49 = vpop.f32.mrf.mxu3  ;;  %3335 = vmatpush.msra.mxu2 %v12565_v36  ;;  %3468 = vmatpush.msra.mxu3 %v3467_v57  ;;  %v3473_v40 = vand.u32 4294901760, %v3472_v29  ;;  %v3484_v57 = vsub.f32 %v12581_v28, %v3483_v51 }
 0x389   : > { %v2118_v25 = vadd.f32 %v2117_v61, %v2000_v18  ;;  %2481 = vmatmul.f32.gmra.mxu0 %v18575_v11  ;;  %2690 = vmatmul.f32.gmra.mxu1 %v18576_v22  ;;  %v3495_v61 = vand.u32 4294901760, %v12600_v24  ;;  %v18579_v11 = vld [vmem:[#allocation103_spill] sm:$0xff] }
 0x38a   : > { %3753 = vmatpush.msrb.mxu0 %v3477_v8  ;;  %3828 = vmatpush.msrb.mxu1 %v12565_v36  ;;  %v3479_v8 = vand.u32 4294901760, %v3478_v27  ;;  %v18581_v22 = vld [vmem:[#allocation39_spill] sm:$0xff] }
 0x38b   : > { %v2269_v10 = vadd.f32 %v2268_v33, %v2118_v25  ;;  %2809 = vmatmul.f32.gmra.mxu2 %v18577_v9  ;;  %3474 = vmatpush.msra.mxu3 %v3473_v40  ;;  %v3490_v25 = vsub.f32 %v12591_v34, %v3489_v54  ;;  %v18578_v33 = vld [vmem:[#allocation41_spill] sm:$0xff] }
 0x38c   : > { %3337 = vmatpush.msra.mxu2 %v12578_v0  ;;  %3757 = vmatpush.msrb.mxu0 %v3483_v51 }
 0x38d   : > { %v12612_v29 = vadd.f32 %v2365_v49, %v2269_v10  ;;  %3830 = vmatpush.msrb.mxu1 %v12578_v0  ;;  %2928 = vmatmul.f32.gmra.mxu3 %v18578_v33  ;;  %v3485_v49 = vand.u32 4294901760, %v3484_v57  ;;  %v3496_v10 = vsub.f32 %v12600_v24, %v3495_v61  ;;  %v18580_v33 = vld [vmem:[#allocation43_spill] sm:$0xff]  ;;  %v18582_v57 = vld [vmem:[#allocation42_spill] sm:$0xff] }
 0x38e   : > { %3534 = vmatpush.msrb.mxu2 %v12431_v17  ;;  %3761 = vmatpush.msrb.mxu0 %v3489_v54  ;;  %v2004_v40 = vpop.f32.mrf.mxu0  ;;  %v2272_v18 = vpop.f32.mrf.mxu2  ;;  %v3491_v54 = vand.u32 4294901760, %v3490_v25  ;;  %v18584_v25 = vld [vmem:[#allocation104_spill] sm:$0xff] }
 0x38f   : > { %3231 = vst [vmem:[%s12018_s17 + $0x68] sm:$0xff] %v12612_v29  ;;  %3480 = vmatpush.msra.mxu3 %v3479_v8  ;;  %v2005_v9 = vadd.f32 %v2004_v40, %v18579_v11  ;;  %v2129_v51 = vpop.f32.mrf.mxu1 }
 0x390   : > { %3537 = vmatpush.msrb.mxu2 %v12419_v13  ;;  %3765 = vmatpush.msrb.mxu0 %v3495_v61  ;;  %v2369_v17 = vpop.f32.mrf.mxu3  ;;  %v3497_v13 = vand.u32 4294901760, %v3496_v10  ;;  %v18583_v61 = vld [vmem:[#allocation44_spill] sm:$0xff] }
 0x391   : > { %v2124_v27 = vadd.f32 %v2123_v52, %v2005_v9  ;;  %3486 = vmatpush.msra.mxu3 %v3485_v49  ;;  %2489 = vmatmul.f32.gmra.mxu0 %v18580_v33  ;;  %v18586_v49 = vld [vmem:[#allocation46_spill] sm:$0xff] }
 0x392   : > { %3540 = vmatpush.msrb.mxu2 %v12434_v56  ;;  %2694 = vmatmul.f32.gmra.mxu1 %v18581_v22 }
 0x393   : > { %v2273_v8 = vadd.f32 %v2272_v18, %v2124_v27  ;;  %3492 = vmatpush.msra.mxu3 %v3491_v54  ;;  %2814 = vmatmul.f32.gmra.mxu2 %v18582_v57  ;;  %v18592_v54 = vld [vmem:[#allocation62_spill] sm:$0xff] }
 0x394   : > { %3543 = vmatpush.msrb.mxu2 %v12447_v45 }
 0x395   : > { %v12628_v40 = vadd.f32 %v2369_v17, %v2273_v8  ;;  %3498 = vmatpush.msra.mxu3 %v3497_v13  ;;  %v18593_v8 = vld [vmem:[#allocation65_spill] sm:$0xff]  ;;  %v18594_v13 = vld [vmem:[#allocation47_spill] sm:$0xff] }
 0x396   : > { %3546 = vmatpush.msrb.mxu2 %v12460_v30  ;;  %v2009_v56 = vpop.f32.mrf.mxu0  ;;  %v2276_v52 = vpop.f32.mrf.mxu2  ;;  %2934 = vmatmul.f32.gmra.mxu3 %v18583_v61 }
 0x397   : > { %3622 = vmatpush.msrb.mxu3 %v12423_v39  ;;  %3234 = vst [vmem:[%s12018_s17 + $0x80] sm:$0xff] %v12628_v40  ;;  %v2010_v18 = vadd.f32 %v2009_v56, %v18584_v25  ;;  %v2135_v11 = vpop.f32.mrf.mxu1  ;;  %v18585_v39 = vld [vmem:[#allocation45_spill] sm:$0xff]  ;;  %v18595_v25 = vld [vmem:[#allocation68_spill] sm:$0xff] }
 0x398   : > { %3549 = vmatpush.msrb.mxu2 %v12474_v7  ;;  %v2373_v45 = vpop.f32.mrf.mxu3 }
 0x399   : > { %3624 = vmatpush.msrb.mxu3 %v12409_v5  ;;  %v2130_v9 = vadd.f32 %v2129_v51, %v2010_v18  ;;  %2497 = vmatmul.f32.gmra.mxu0 %v18585_v39 }
 0x39a   : > { %3552 = vmatpush.msrb.mxu2 %v12488_v58  ;;  %2698 = vmatmul.f32.gmra.mxu1 %v18586_v49 }
 0x39b   : > { %3626 = vmatpush.msrb.mxu3 %v12416_v12  ;;  %v2277_v30 = vadd.f32 %v2276_v52, %v2130_v9  ;;  %2819 = vmatmul.f32.gmra.mxu2 %v18492_v32  ;;  %v18587_v12 = vld [vmem:[#allocation48_spill] sm:$0xff] }
 0x39c   : > { %3555 = vmatpush.msrb.mxu2 %v12500_v43 }
 0x39d   : > { %3628 = vmatpush.msrb.mxu3 %v12426_v47  ;;  %v12645_v7 = vadd.f32 %v2373_v45, %v2277_v30  ;;  %v18597_v45 = vld [vmem:[#allocation66_spill] sm:$0xff] }
 0x39e   : > { %3558 = vmatpush.msrb.mxu2 %v12513_v16  ;;  %v2014_v5 = vpop.f32.mrf.mxu0  ;;  %v2280_v58 = vpop.f32.mrf.mxu2  ;;  %2940 = vmatmul.f32.gmra.mxu3 %v18587_v12 }
 0x39f   : > { %3630 = vmatpush.msrb.mxu3 %v12439_v21  ;;  %3237 = vst [vmem:[%s12018_s17 + $0x98] sm:$0xff] %v12645_v7  ;;  %v2015_v51 = vadd.f32 %v2014_v5, %v12253_v20  ;;  %v2141_v10 = vpop.f32.mrf.mxu1  ;;  %v18588_v21 = vld [vmem:[#allocation50_spill] sm:$0xff]  ;;  %v18598_v5 = vld [vmem:[#allocation69_spill] sm:$0xff] }
 0x3a0   : > { %3561 = vmatpush.msrb.mxu2 %v12527_v63  ;;  %v2377_v32 = vpop.f32.mrf.mxu3 }
 0x3a1   : > { %3632 = vmatpush.msrb.mxu3 %v12454_v31  ;;  %v2136_v47 = vadd.f32 %v2135_v11, %v2015_v51  ;;  %2505 = vmatmul.f32.gmra.mxu0 %v18588_v21  ;;  %v18596_v11 = vld [vmem:[#allocation63_spill] sm:$0xff] }
 0x3a2   : > { %3564 = vmatpush.msrb.mxu2 %v12539_v41  ;;  %2702 = vmatmul.f32.gmra.mxu1 %v18438_v6 }
 0x3a3   : > { %3634 = vmatpush.msrb.mxu3 %v12467_v19  ;;  %v2281_v43 = vadd.f32 %v2280_v58, %v2136_v47  ;;  %2824 = vmatmul.f32.gmra.mxu2 %v18498_v62  ;;  %v18599_v58 = vld [vmem:[#allocation54_spill] sm:$0xff]  ;;  %v18600_v47 = vld [vmem:[#allocation71_spill] sm:$0xff] }
 0x3a4   : > { %3567 = vmatpush.msrb.mxu2 %v12553_v4 }
 0x3a5   : > { %3636 = vmatpush.msrb.mxu3 %v12479_v42  ;;  %v12662_v20 = vadd.f32 %v2377_v32, %v2281_v43  ;;  %v18601_v43 = vld [vmem:[#allocation67_spill] sm:$0xff] }
 0x3a6   : > { %3570 = vmatpush.msrb.mxu2 %v12573_v3  ;;  %v2019_v31 = vpop.f32.mrf.mxu0  ;;  %v2284_v16 = vpop.f32.mrf.mxu2  ;;  %2946 = vmatmul.f32.gmra.mxu3 %v18493_v26 }
 0x3a7   : > { %3638 = vmatpush.msrb.mxu3 %v12494_v15  ;;  %3240 = vst [vmem:[%s12018_s17 + $0xb0] sm:$0xff] %v12662_v20  ;;  %v2020_v19 = vadd.f32 %v2019_v31, %v12285_v60  ;;  %v2147_v63 = vpop.f32.mrf.mxu1  ;;  %v18589_v15 = vld [vmem:[#allocation56_spill] sm:$0xff]  ;;  %v18602_v31 = vld [vmem:[#allocation70_spill] sm:$0xff] }
 0x3a8   : > { %3573 = vmatpush.msrb.mxu2 %v12581_v28  ;;  %v2381_v62 = vpop.f32.mrf.mxu3 }
 0x3a9   : > { %3640 = vmatpush.msrb.mxu3 %v12506_v14  ;;  %v2142_v42 = vadd.f32 %v2141_v10, %v2020_v19  ;;  %2513 = vmatmul.f32.gmra.mxu0 %v18589_v15  ;;  %v3266_v19 = vld [vmem:[#allocation8] sm:$0xff]  ;;  %v18604_v15 = vld [vmem:[#allocation52_spill] sm:$0xff] }
 0x3aa   : > { %3576 = vmatpush.msrb.mxu2 %v12591_v34  ;;  %2706 = vmatmul.f32.gmra.mxu1 %v18501_v55 }
 0x3ab   : > { %3642 = vmatpush.msrb.mxu3 %v12518_v44  ;;  %v2285_v41 = vadd.f32 %v2284_v16, %v2142_v42  ;;  %2829 = vmatmul.f32.gmra.mxu2 %v18510_v46  ;;  %v18590_v46 = vld [vmem:[#allocation59_spill] sm:$0xff]  ;;  %v18603_v42 = vld [vmem:[#allocation72_spill] sm:$0xff] }
 0x3ac   : > { %3579 = vmatpush.msrb.mxu2 %v12600_v24 }
 0x3ad   : > { %3644 = vmatpush.msrb.mxu3 %v12533_v53  ;;  %v12679_v26 = vadd.f32 %v2381_v62, %v2285_v41 }
 0x3ae   : > { %v2024_v60 = vpop.f32.mrf.mxu0  ;;  %v2288_v14 = vpop.f32.mrf.mxu2  ;;  %2952 = vmatmul.f32.gmra.mxu3 %v18499_v38 }
 0x3af   : > { %3646 = vmatpush.msrb.mxu3 %v12548_v2  ;;  %3243 = vst [vmem:[%s12018_s17 + $0xc8] sm:$0xff] %v12679_v26  ;;  %v2025_v44 = vadd.f32 %v2024_v60, %v12313_v23  ;;  %v2153_v4 = vpop.f32.mrf.mxu1 }
 0x3b0   : > { %v2385_v3 = vpop.f32.mrf.mxu3 }
 0x3b1   : > { %3648 = vmatpush.msrb.mxu3 %v12561_v1  ;;  %v2148_v53 = vadd.f32 %v2147_v63, %v2025_v44  ;;  %2521 = vmatmul.f32.gmra.mxu0 %v18590_v46  ;;  %v12727_v44 = vand.u32 4294901760, %v3266_v19  ;;  %v18607_v46 = vld [vmem:[#allocation74_spill] sm:$0xff] }
 0x3b2   : > { %2710 = vmatmul.f32.gmra.mxu1 %v18513_v59 }
 0x3b3   : > { %3650 = vmatpush.msrb.mxu3 %v12565_v36  ;;  %v2289_v28 = vadd.f32 %v2288_v14, %v2148_v53  ;;  %2834 = vmatmul.f32.gmra.mxu2 %v18521_v50  ;;  %18605 = vst [vmem:[#allocation82_spill] sm:$0xff] %v12727_v44 }
 0x3b5   : > { %3652 = vmatpush.msrb.mxu3 %v12578_v0  ;;  %v2386_v2 = vadd.f32 %v2385_v3, %v2289_v28  ;;  %v18591_v0 = vld [vmem:[#allocation64_spill] sm:$0xff]  ;;  %v18606_v3 = vld [vmem:[#allocation73_spill] sm:$0xff]  ;;  %v18608_v28 = vld [vmem:[#allocation75_spill] sm:$0xff] }
 0x3b6   : > { %v2029_v38 = vpop.f32.mrf.mxu0  ;;  %v2292_v34 = vpop.f32.mrf.mxu2  ;;  %2958 = vmatmul.f32.gmra.mxu3 %v18511_v37 }
 0x3b7   : > { %3246 = vst [vmem:[%s12018_s17 + $0xe0] sm:$0xff] %v2386_v2  ;;  %v2030_v23 = vadd.f32 %v2029_v38, %v12339_v48  ;;  %v2159_v1 = vpop.f32.mrf.mxu1  ;;  %v12695_v36 = vand.u32 4294901760, %v2386_v2 }
 0x3b8   : > { %v2389_v24 = vpop.f32.mrf.mxu3 }
 0x3b9   : > { %v2154_v17 = vadd.f32 %v2153_v4, %v2030_v23  ;;  %v12698_v27 = vsub.f32 %v2386_v2, %v12695_v36  ;;  %2529 = vmatmul.f32.gmra.mxu0 %v18591_v0  ;;  %v12733_v2 = vsub.f32 %v3266_v19, %v12727_v44  ;;  %v18619_v19 = vld [vmem:[#allocation81_spill] sm:$0xff] }
 0x3ba   : > { %2714 = vmatmul.f32.gmra.mxu1 %v18524_v35 }
 0x3bb   : > { %v2293_v50 = vadd.f32 %v2292_v34, %v2154_v17  ;;  %2839 = vmatmul.f32.gmra.mxu2 %v18592_v54  ;;  %v3267_v34 = vld [vmem:[#allocation8 + $0x8] sm:$0xff]  ;;  %v18610_v17 = vld [vmem:[#allocation57_spill] sm:$0xff] }
 0x3bd   : > { %v12703_v33 = vadd.f32 %v2389_v24, %v2293_v50  ;;  %v18609_v24 = vld [vmem:[#allocation76_spill] sm:$0xff] }
 0x3be   : > { %v2034_v37 = vpop.f32.mrf.mxu0  ;;  %v2296_v48 = vpop.f32.mrf.mxu2  ;;  %2964 = vmatmul.f32.gmra.mxu3 %v18593_v8 }
 0x3bf   : > { %3249 = vst [vmem:[%s12018_s17 + $0xf8] sm:$0xff] %v12703_v33  ;;  %v2035_v57 = vadd.f32 %v2034_v37, %v18594_v13  ;;  %v2165_v56 = vpop.f32.mrf.mxu1  ;;  %v12739_v37 = vand.u32 4294901760, %v12733_v2  ;;  %v18612_v13 = vld [vmem:[#allocation77_spill] sm:$0xff] }
 0x3c0   : > { %v2393_v52 = vpop.f32.mrf.mxu3 }
 0x3c1   : > { %v2160_v61 = vadd.f32 %v2159_v1, %v2035_v57  ;;  %2537 = vmatmul.f32.gmra.mxu0 %v18595_v25 }
 0x3c2   : > { %2718 = vmatmul.f32.gmra.mxu1 %v18596_v11 }
 0x3c3   : > { %v2297_v18 = vadd.f32 %v2296_v48, %v2160_v61  ;;  %2844 = vmatmul.f32.gmra.mxu2 %v18597_v45  ;;  %v12741_v48 = vand.u32 4294901760, %v3267_v34  ;;  %v3341_v61 = vsub.f32 %v12733_v2, %v12739_v37  ;;  %v3268_v45 = vld [vmem:[#allocation8 + $0x10] sm:$0xff] }
 0x3c5   : > { %v12712_v9 = vadd.f32 %v2393_v52, %v2297_v18  ;;  %18611 = vst [vmem:[#allocation83_spill] sm:$0xff] %v12741_v48  ;;  %v18614_v52 = vld [vmem:[#allocation79_spill] sm:$0xff]  ;;  %v12749_v25 = vsub.f32 %v3267_v34, %v12741_v48 }
 0x3c6   : > { %v2039_v39 = vpop.f32.mrf.mxu0  ;;  %v2300_v30 = vpop.f32.mrf.mxu2  ;;  %2970 = vmatmul.f32.gmra.mxu3 %v18598_v5  ;;  %v18615_v5 = vld [vmem:[#allocation80_spill] sm:$0xff] }
 0x3c7   : > { %3252 = vst [vmem:[%s12018_s17 + $0x110] sm:$0xff] %v12712_v9  ;;  %v2040_v12 = vadd.f32 %v2039_v39, %v18599_v58  ;;  %v2171_v51 = vpop.f32.mrf.mxu1  ;;  %v18616_v58 = vld [vmem:[#allocation49_spill] sm:$0xff] }
 0x3c8   : > { %v2397_v10 = vpop.f32.mrf.mxu3 }
 0x3c9   : > { %v2166_v32 = vadd.f32 %v2165_v56, %v2040_v12  ;;  %2545 = vmatmul.f32.gmra.mxu0 %v18600_v47  ;;  %v18613_v56 = vld [vmem:[#allocation78_spill] sm:$0xff]  ;;  %v12757_v47 = vand.u32 4294901760, %v12749_v25 }
 0x3ca   : > { %2722 = vmatmul.f32.gmra.mxu1 %v18601_v43  ;;  %v3277_v43 = vld [vmem:[%s12018_s17 + $0x20] sm:$0xff] }
 0x3cb   : > { %v2301_v21 = vadd.f32 %v2300_v30, %v2166_v32  ;;  %2849 = vmatmul.f32.gmra.mxu2 %v18602_v31  ;;  %v12754_v32 = vand.u32 4294901760, %v3341_v61  ;;  %v18624_v61 = vld [vmem:[#allocation21_spill] sm:$0xff] }
 0x3cd   : > { %v12721_v16 = vadd.f32 %v2397_v10, %v2301_v21  ;;  %18617 = vst [vmem:[#allocation51_spill] sm:$0xff] %v12754_v32  ;;  %v12759_v21 = vand.u32 4294901760, %v3268_v45 }
 0x3ce   : > { %v2044_v63 = vpop.f32.mrf.mxu0  ;;  %v2304_v62 = vpop.f32.mrf.mxu2  ;;  %2976 = vmatmul.f32.gmra.mxu3 %v18603_v42 }
 0x3cf   : > { %3255 = vst [vmem:[%s12018_s17 + $0x128] sm:$0xff] %v12721_v16  ;;  %v2045_v41 = vadd.f32 %v2044_v63, %v18604_v15  ;;  %v2177_v60 = vpop.f32.mrf.mxu1  ;;  %v3349_v15 = vsub.f32 %v12749_v25, %v12757_v47 }
 0x3d0   : > { %v2401_v14 = vpop.f32.mrf.mxu3  ;;  %18618 = vst [vmem:[#allocation84_spill] sm:$0xff] %v12759_v21 }
 0x3d1   : > { %v2172_v4 = vadd.f32 %v2171_v51, %v2045_v41  ;;  %2553 = vmatmul.f32.gmra.mxu0 %v18606_v3  ;;  %v12769_v41 = vsub.f32 %v3268_v45, %v12759_v21 }
 0x3d2   : > { %2726 = vmatmul.f32.gmra.mxu1 %v18607_v46  ;;  %v12978_v46 = vand.u32 4294901760, %v3277_v43 }
 0x3d3   : > { %v2305_v53 = vadd.f32 %v2304_v62, %v2172_v4  ;;  %2854 = vmatmul.f32.gmra.mxu2 %v18608_v28  ;;  %v18620_v62 = vld [vmem:[#allocation18_spill] sm:$0xff] }
 0x3d5   : > { %v2402_v38 = vadd.f32 %v2401_v14, %v2305_v53  ;;  %v3269_v14 = vld [vmem:[#allocation8 + $0x18] sm:$0xff] }
 0x3d6   : > { %v2049_v23 = vpop.f32.mrf.mxu0  ;;  %v2308_v1 = vpop.f32.mrf.mxu2  ;;  %2982 = vmatmul.f32.gmra.mxu3 %v18609_v24 }
 0x3d7   : > { %3258 = vst [vmem:[%s12018_s17 + $0x140] sm:$0xff] %v2402_v38  ;;  %v2050_v0 = vadd.f32 %v2049_v23, %v18610_v17  ;;  %v2183_v50 = vpop.f32.mrf.mxu1  ;;  %v12771_v53 = vand.u32 4294901760, %v2402_v38  ;;  %v12780_v17 = vand.u32 4294901760, %v3349_v15 }
 0x3d8   : > { %v2405_v54 = vpop.f32.mrf.mxu3 }
 0x3d9   : > { %v2178_v8 = vadd.f32 %v2177_v60, %v2050_v0  ;;  %2561 = vmatmul.f32.gmra.mxu0 %v18612_v13  ;;  %18621 = vst [vmem:[#allocation53_spill] sm:$0xff] %v12780_v17  ;;  %v12783_v0 = vand.u32 4294901760, %v12769_v41 }
 0x3da   : > { %2730 = vmatmul.f32.gmra.mxu1 %v18613_v56  ;;  %v3279_v56 = vld [vmem:[%s12018_s17 + $0x38] sm:$0xff] }
 0x3db   : > { %v2309_v57 = vadd.f32 %v2308_v1, %v2178_v8  ;;  %2859 = vmatmul.f32.gmra.mxu2 %v18614_v52 }
 0x3dd   : > { %v2406_v18 = vadd.f32 %v2405_v54, %v2309_v57  ;;  %v12788_v54 = vand.u32 4294901760, %v3269_v14  ;;  %v12797_v57 = vsub.f32 %v2402_v38, %v12771_v53 }
 0x3de   : > { %v2054_v39 = vpop.f32.mrf.mxu0  ;;  %v2312_v30 = vpop.f32.mrf.mxu2  ;;  %2988 = vmatmul.f32.gmra.mxu3 %v18615_v5 }
 0x3df   : > { %3261 = vst [vmem:[%s12018_s17 + $0x158] sm:$0xff] %v2406_v18  ;;  %v2055_v12 = vadd.f32 %v2054_v39, %v18616_v58  ;;  %v2671_v51 = vpop.f32.mrf.mxu1  ;;  %v12763_v42 = vand.u32 4294901760, %v2406_v18  ;;  %v12817_v5 = vsub.f32 %v3269_v14, %v12788_v54 }
 0x3e0   : > { %v2409_v10 = vpop.f32.mrf.mxu3  ;;  %18622 = vst [vmem:[#allocation60_spill] sm:$0xff] %v12788_v54 }
 0x3e1   : > { %v2184_v31 = vadd.f32 %v2183_v50, %v2055_v12  ;;  %2569 = vmatmul.f32.gmra.mxu0 %v18619_v19  ;;  %v12778_v1 = vsub.f32 %v2406_v18, %v12763_v42  ;;  %v12786_v50 = vand.u32 4294901760, %v12721_v16  ;;  %v12804_v18 = vand.u32 4294901760, %v12712_v9  ;;  %18625 = vst [vmem:[#allocation86_spill] sm:$0xff] %v12817_v5  ;;  %v3270_v12 = vld [vmem:[#allocation8 + $0x20] sm:$0xff] }
 0x3e2   : > { %3154 = vmatmul.f32.vlgmr.msra.gmra.mxu1 %v18620_v62 }
 0x3e3   : > { %v2313_v63 = vadd.f32 %v2312_v30, %v2184_v31  ;;  %3343 = vmatmul.f32.vlgmr.msra.gmra.mxu2 %v12754_v32  ;;  %v18143_v39 = vand.u32 4294901760, %v12778_v1  ;;  %v3357_v30 = vsub.f32 %v12769_v41, %v12783_v0  ;;  %v12814_v38 = vsub.f32 %v12721_v16, %v12786_v50 }
 0x3e4   : > { %v12826_v31 = vand.u32 4294901760, %v12703_v33  ;;  %v18142_v16 = vand.u32 4294901760, %v12797_v57 }
 0x3e5   : > { %v2410_v60 = vadd.f32 %v2409_v10, %v2313_v63  ;;  %v3970_v15 = vsub.f32 %v12778_v1, %v18143_v39  ;;  %v12880_v39 = vand.u32 4294901760, %v12662_v20 }
 0x3e6   : > { %v2450_v4 = vpop.f32.mrf.mxu0  ;;  %v2785_v3 = vpop.f32.mrf.mxu2  ;;  %3500 = vmatmul.f32.vlgmr.msra.gmra.mxu3 %v12727_v44 }
 0x3e7   : > { %3264 = vst [vmem:[%s12018_s17 + $0x170] sm:$0xff] %v2410_v60  ;;  %v2672_v28 = vadd.f32 %v2671_v51, %v2450_v4  ;;  %v2675_v34 = vpop.f32.mrf.mxu1  ;;  %v12775_v23 = vand.u32 4294901760, %v2410_v60  ;;  %v12838_v4 = vand.u32 4294901760, %v3357_v30 }
 0x3e8   : > { %v2899_v24 = vpop.f32.mrf.mxu3 }
 0x3e9   : > { %v2786_v8 = vadd.f32 %v2785_v3, %v2672_v28  ;;  %3865 = vmatpush.msra.mxu2 %v12775_v23  ;;  %4180 = vmatpush.msra.mxu1 %v12775_v23  ;;  %v12793_v13 = vsub.f32 %v2410_v60, %v12775_v23  ;;  %v12836_v60 = vsub.f32 %v12712_v9, %v12804_v18  ;;  %v12843_v3 = vand.u32 4294901760, %v12817_v5 }
 0x3ea   : > { %3057 = vmatmul.f32.vlgmr.msra.gmra.mxu0 %v18620_v62  ;;  %3158 = vmatmul.f32.gmra.mxu1 %v18624_v61  ;;  %18626 = vst [vmem:[#allocation87_spill] sm:$0xff] %v12838_v4  ;;  %v18145_v28 = vand.u32 4294901760, %v12814_v38  ;;  %v3976_v9 = vsub.f32 %v12797_v57, %v18142_v16 }
 0x3eb   : > { %v12799_v52 = vadd.f32 %v2899_v24, %v2786_v8  ;;  %3867 = vmatpush.msra.mxu2 %v12763_v42  ;;  %v18144_v45 = vand.u32 4294901760, %v12793_v13  ;;  %4092 = vmatpush.msra.mxu0 %v12793_v13  ;;  %18627 = vst [vmem:[#allocation85_spill] sm:$0xff] %v12843_v3  ;;  %v12856_v8 = vsub.f32 %v12703_v33, %v12826_v31 }
 0x3ec   : > { %3351 = vmatmul.f32.gmra.mxu2 %v12780_v17  ;;  %4182 = vmatpush.msra.mxu1 %v12763_v42  ;;  %v3365_v33 = vsub.f32 %v12817_v5, %v12843_v3  ;;  %v3977_v16 = vand.u32 4294901760, %v3976_v9 }
 0x3ed   : > { %18623 = vst [vmem:[#allocation55_spill] sm:$0xff] %v12799_v52  ;;  %3869 = vmatpush.msra.mxu2 %v12771_v53  ;;  %v3964_v58 = vsub.f32 %v12793_v13, %v18144_v45  ;;  %4095 = vmatpush.msra.mxu0 %v12778_v1  ;;  %v12883_v45 = vand.u32 4294901760, %v12645_v7 }
 0x3ee   : > { %v2458_v51 = vpop.f32.mrf.mxu0  ;;  %v2790_v10 = vpop.f32.mrf.mxu2  ;;  %3504 = vmatmul.f32.gmra.mxu3 %v12741_v48  ;;  %4184 = vmatpush.msra.mxu1 %v12771_v53  ;;  %v12896_v48 = vand.u32 4294901760, %v3365_v33  ;;  %v12912_v33 = vsub.f32 %v12662_v20, %v12880_v39 }
 0x3ef   : > { %v2676_v19 = vadd.f32 %v2675_v34, %v2458_v51  ;;  %v2679_v63 = vpop.f32.mrf.mxu1  ;;  %v3965_v62 = vand.u32 4294901760, %v3964_v58  ;;  %3871 = vmatpush.msra.mxu2 %v12786_v50  ;;  %4098 = vmatpush.msra.mxu0 %v12797_v57  ;;  %v12846_v34 = vand.u32 4294901760, %v3270_v12  ;;  %v18630_v58 = vld [vmem:[#allocation22_spill] sm:$0xff]  ;;  %v3971_v51 = vand.u32 4294901760, %v3970_v15 }
 0x3f0   : > { %v2905_v14 = vpop.f32.mrf.mxu3  ;;  %4186 = vmatpush.msra.mxu1 %v12786_v50  ;;  %v3271_v15 = vld [vmem:[#allocation8 + $0x28] sm:$0xff]  ;;  %18632 = vst [vmem:[#allocation90_spill] sm:$0xff] %v12896_v48 }
 0x3f1   : > { %18628 = vst [vmem:[#allocation88_spill] sm:$0xff] %v12846_v34  ;;  %v2791_v24 = vadd.f32 %v2790_v10, %v2676_v19  ;;  %3966 = vmatpush.msra.mxu3 %v3965_v62  ;;  %3873 = vmatpush.msra.mxu2 %v12804_v18  ;;  %v12863_v10 = vand.u32 4294901760, %v12679_v26  ;;  %v3982_v19 = vsub.f32 %v12814_v38, %v18145_v28 }
 0x3f2   : > { %3061 = vmatmul.f32.gmra.mxu0 %v18624_v61  ;;  %3162 = vmatmul.f32.gmra.mxu1 %v18630_v58  ;;  %v18152_v61 = vand.u32 4294901760, %v12836_v60  ;;  %v12874_v62 = vsub.f32 %v3270_v12, %v12846_v34  ;;  %v12902_v12 = vand.u32 4294901760, %v3271_v15 }
 0x3f3   : > { %v12858_v30 = vadd.f32 %v2905_v14, %v2791_v24  ;;  %4101 = vmatpush.msra.mxu0 %v12814_v38  ;;  %4188 = vmatpush.msra.mxu1 %v12804_v18  ;;  %v12893_v9 = vsub.f32 %v12679_v26, %v12863_v10  ;;  %v18635_v26 = vand.u32 4294901760, %v12856_v8 }
 0x3f4   : > { %3359 = vmatmul.f32.gmra.mxu2 %v12838_v4  ;;  %18631 = vst [vmem:[#allocation61_spill] sm:$0xff] %v12874_v62  ;;  %3972 = vmatpush.msra.mxu3 %v3971_v51  ;;  %v3988_v4 = vsub.f32 %v12836_v60, %v18152_v61 }
 0x3f5   : > { %18629 = vst [vmem:[#allocation58_spill] sm:$0xff] %v12858_v30  ;;  %3875 = vmatpush.msra.mxu2 %v12826_v31  ;;  %4104 = vmatpush.msra.mxu0 %v12836_v60  ;;  %v18154_v30 = vand.u32 4294901760, %v12698_v27  ;;  %v18641_v32 = vand.u32 4294901760, %v12893_v9 }
 0x3f6   : > { %v2466_v14 = vpop.f32.mrf.mxu0  ;;  %v2795_v24 = vpop.f32.mrf.mxu2  ;;  %4190 = vmatpush.msra.mxu1 %v12826_v31  ;;  %3508 = vmatmul.f32.gmra.mxu3 %v12759_v21  ;;  %18634 = vst [vmem:[#allocation89_spill] sm:$0xff] %v12902_v12 }
 0x3f7   : > { %v2680_v28 = vadd.f32 %v2679_v63, %v2466_v14  ;;  %v2683_v51 = vpop.f32.mrf.mxu1  ;;  %3877 = vmatpush.msra.mxu2 %v12695_v36  ;;  %3978 = vmatpush.msra.mxu3 %v3977_v16  ;;  %v3983_v63 = vand.u32 4294901760, %v3982_v19  ;;  %v12900_v14 = vand.u32 4294901760, %v12874_v62  ;;  %v3994_v16 = vsub.f32 %v12856_v8, %v18635_v26 }
 0x3f8   : > { %v2911_v17 = vpop.f32.mrf.mxu3  ;;  %4107 = vmatpush.msra.mxu0 %v12856_v8  ;;  %4192 = vmatpush.msra.mxu1 %v12695_v36  ;;  %v12915_v19 = vand.u32 4294901760, %v12628_v40  ;;  %v4006_v44 = vsub.f32 %v12893_v9, %v18641_v32 }
 0x3f9   : > { %18633 = vst [vmem:[#allocation91_spill] sm:$0xff] %v12900_v14  ;;  %v2796_v21 = vadd.f32 %v2795_v24, %v2680_v28  ;;  %3879 = vmatpush.msra.mxu2 %v12863_v10  ;;  %3984 = vmatpush.msra.mxu3 %v3983_v63  ;;  %v18637_v28 = vld [vmem:[#allocation28_spill] sm:$0xff]  ;;  %v3989_v24 = vand.u32 4294901760, %v3988_v4  ;;  %v3373_v20 = vsub.f32 %v12874_v62, %v12900_v14  ;;  %v3995_v63 = vand.u32 4294901760, %v3994_v16  ;;  %v3275_v62 = vld [vmem:[%s12018_s17 + $0x8] sm:$0xff] }
 0x3fa   : > { %3065 = vmatmul.f32.gmra.mxu0 %v18630_v58  ;;  %3166 = vmatmul.f32.gmra.mxu1 %v18637_v28  ;;  %v12923_v58 = vsub.f32 %v12645_v7, %v12883_v45  ;;  %v3272_v7 = vld [vmem:[#allocation8 + $0x30] sm:$0xff]  ;;  %v12953_v16 = vsub.f32 %v12628_v40, %v12915_v19  ;;  %v18644_v40 = vand.u32 4294901760, %v12912_v33 }
 0x3fb   : > { %v12917_v61 = vadd.f32 %v2911_v17, %v2796_v21  ;;  %4110 = vmatpush.msra.mxu0 %v12698_v27  ;;  %4194 = vmatpush.msra.mxu1 %v12863_v10  ;;  %v4000_v21 = vsub.f32 %v12698_v27, %v18154_v30  ;;  %v12934_v17 = vsub.f32 %v3271_v15, %v12902_v12  ;;  %v18640_v30 = vld [vmem:[#allocation99_spill] sm:$0xff]  ;;  %v12958_v15 = vand.u32 4294901760, %v3373_v20 }
 0x3fc   : > { %3367 = vmatmul.f32.gmra.mxu2 %v12896_v48  ;;  %3990 = vmatpush.msra.mxu3 %v3989_v24  ;;  %v12940_v48 = vand.u32 4294901760, %v12612_v29 }
 0x3fd   : > { %18636 = vst [vmem:[#allocation92_spill] sm:$0xff] %v12917_v61  ;;  %3881 = vmatpush.msra.mxu2 %v12880_v39  ;;  %4113 = vmatpush.msra.mxu0 %v12893_v9  ;;  %v12943_v61 = vand.u32 4294901760, %v18640_v30 }
 0x3fe   : > { %18638 = vst [vmem:[#allocation94_spill] sm:$0xff] %v12934_v17  ;;  %v2474_v4 = vpop.f32.mrf.mxu0  ;;  %v2800_v26 = vpop.f32.mrf.mxu2  ;;  %4196 = vmatpush.msra.mxu1 %v12880_v39  ;;  %3512 = vmatmul.f32.gmra.mxu3 %v12788_v54  ;;  %v12964_v54 = vand.u32 4294901760, %v3272_v7  ;;  %v12974_v20 = vsub.f32 %v12612_v29, %v12940_v48 }
 0x3ff   : > { %18639 = vst [vmem:[#allocation95_spill] sm:$0xff] %v12940_v48  ;;  %v2684_v24 = vadd.f32 %v2683_v51, %v2474_v4  ;;  %v2687_v52 = vpop.f32.mrf.mxu1  ;;  %3883 = vmatpush.msra.mxu2 %v12883_v45  ;;  %3996 = vmatpush.msra.mxu3 %v3995_v63  ;;  %v4001_v51 = vand.u32 4294901760, %v4000_v21  ;;  %v12962_v4 = vand.u32 4294901760, %v12934_v17  ;;  %v4012_v63 = vsub.f32 %v12912_v33, %v18644_v40 }
 0x400   : > { %v2917_v14 = vpop.f32.mrf.mxu3  ;;  %18642 = vst [vmem:[#allocation93_spill] sm:$0xff] %v12958_v15  ;;  %4116 = vmatpush.msra.mxu0 %v12912_v33  ;;  %4198 = vmatpush.msra.mxu1 %v12883_v45  ;;  %v12976_v21 = vand.u32 4294901760, %v3279_v56 }
 0x401   : > { %18643 = vst [vmem:[#allocation96_spill] sm:$0xff] %v12962_v4  ;;  %v2801_v32 = vadd.f32 %v2800_v26, %v2684_v24  ;;  %3885 = vmatpush.msra.mxu2 %v12915_v19  ;;  %4002 = vmatpush.msra.mxu3 %v4001_v51  ;;  %v18646_v24 = vld [vmem:[#allocation31_spill] sm:$0xff]  ;;  %v12986_v51 = vsub.f32 %v18640_v30, %v12943_v61  ;;  %v3273_v30 = vld [vmem:[#allocation8 + $0x38] sm:$0xff] }
 0x402   : > { %3069 = vmatmul.f32.gmra.mxu0 %v18637_v28  ;;  %3170 = vmatmul.f32.gmra.mxu1 %v18646_v24  ;;  %v4007_v28 = vand.u32 4294901760, %v4006_v44  ;;  %v3381_v29 = vsub.f32 %v12934_v17, %v12962_v4  ;;  %v12998_v44 = vsub.f32 %v3272_v7, %v12964_v54  ;;  %v13004_v4 = vsub.f32 %v3279_v56, %v12976_v21  ;;  %v18654_v56 = vld [vmem:[#allocation35_spill] sm:$0xff] }
 0x403   : > { %v12980_v26 = vadd.f32 %v2917_v14, %v2801_v32  ;;  %4119 = vmatpush.msra.mxu0 %v12923_v58  ;;  %4200 = vmatpush.msra.mxu1 %v12915_v19  ;;  %v18647_v14 = vand.u32 4294901760, %v12923_v58  ;;  %v13006_v17 = vand.u32 4294901760, %v3275_v62 }
 0x404   : > { %3375 = vmatmul.f32.gmra.mxu2 %v12958_v15  ;;  %18648 = vst [vmem:[#allocation98_spill] sm:$0xff] %v12998_v44  ;;  %4008 = vmatpush.msra.mxu3 %v4007_v28  ;;  %v4013_v15 = vand.u32 4294901760, %v4012_v63  ;;  %v18649_v28 = vand.u32 4294901760, %v12953_v16 }
 0x405   : > { %18645 = vst [vmem:[#allocation97_spill] sm:$0xff] %v12980_v26  ;;  %v4018_v32 = vsub.f32 %v12923_v58, %v18647_v14  ;;  %3887 = vmatpush.msra.mxu2 %v12940_v48  ;;  %4122 = vmatpush.msra.mxu0 %v12953_v16  ;;  %v13019_v14 = vand.u32 4294901760, %v3381_v29  ;;  %v13033_v29 = vsub.f32 %v3275_v62, %v13006_v17 }
 0x406   : > { %v2482_v40 = vpop.f32.mrf.mxu0  ;;  %v2805_v26 = vpop.f32.mrf.mxu2  ;;  %4202 = vmatpush.msra.mxu1 %v12940_v48  ;;  %3516 = vmatmul.f32.gmra.mxu3 %v12846_v34  ;;  %v4024_v3 = vsub.f32 %v12953_v16, %v18649_v28  ;;  %v13015_v48 = vsub.f32 %v3277_v43, %v12978_v46  ;;  %v18652_v43 = vand.u32 4294901760, %v12974_v20 }
 0x407   : > { %v2688_v7 = vadd.f32 %v2687_v52, %v2482_v40  ;;  %v2691_v11 = vpop.f32.mrf.mxu1  ;;  %3889 = vmatpush.msra.mxu2 %v12943_v61  ;;  %4014 = vmatpush.msra.mxu3 %v4013_v15  ;;  %18650 = vst [vmem:[#allocation20_spill] sm:$0xff] %v13019_v14  ;;  %v4019_v34 = vand.u32 4294901760, %v4018_v32  ;;  %v13022_v52 = vand.u32 4294901760, %v12998_v44  ;;  %v13024_v40 = vand.u32 4294901760, %v3273_v30 }
 0x408   : > { %v2923_v63 = vpop.f32.mrf.mxu3  ;;  %4125 = vmatpush.msra.mxu0 %v12974_v20  ;;  %4204 = vmatpush.msra.mxu1 %v12943_v61  ;;  %v4030_v15 = vsub.f32 %v12974_v20, %v18652_v43  ;;  %v18179_v32 = vand.u32 4294901760, %v13004_v4 }
 0x409   : > { %18651 = vst [vmem:[#allocation23_spill] sm:$0xff] %v13022_v52  ;;  %v2806_v5 = vadd.f32 %v2805_v26, %v2688_v7  ;;  %3891 = vmatpush.msra.mxu2 %v12976_v21  ;;  %4020 = vmatpush.msra.mxu3 %v4019_v34  ;;  %v4025_v26 = vand.u32 4294901760, %v4024_v3  ;;  %v18655_v34 = vand.u32 4294901760, %v12986_v51 }
 0x40a   : > { %3073 = vmatmul.f32.gmra.mxu0 %v18646_v24  ;;  %3174 = vmatmul.f32.gmra.mxu1 %v18654_v56  ;;  %v3389_v24 = vsub.f32 %v12998_v44, %v13022_v52  ;;  %v4042_v43 = vsub.f32 %v13004_v4, %v18179_v32 }
 0x40b   : > { %v13036_v28 = vadd.f32 %v2923_v63, %v2806_v5  ;;  %4128 = vmatpush.msra.mxu0 %v12986_v51  ;;  %4206 = vmatpush.msra.mxu1 %v12976_v21  ;;  %v4036_v62 = vsub.f32 %v12986_v51, %v18655_v34  ;;  %v13049_v5 = vsub.f32 %v3273_v30, %v13024_v40  ;;  %v4031_v63 = vand.u32 4294901760, %v4030_v15 }
 0x40c   : > { %3383 = vmatmul.f32.gmra.mxu2 %v13019_v14  ;;  %4026 = vmatpush.msra.mxu3 %v4025_v26  ;;  %v18656_v26 = vand.u32 4294901760, %v13015_v48  ;;  %v13064_v52 = vand.u32 4294901760, %v3389_v24  ;;  %v4043_v44 = vand.u32 4294901760, %v4042_v43 }
 0x40d   : > { %18653 = vst [vmem:[#allocation25_spill] sm:$0xff] %v13036_v28  ;;  %3893 = vmatpush.msra.mxu2 %v12978_v46  ;;  %4131 = vmatpush.msra.mxu0 %v13004_v4  ;;  %v4037_v15 = vand.u32 4294901760, %v4036_v62  ;;  %v13067_v32 = vand.u32 4294901760, %v13049_v5 }
 0x40e   : > { %4208 = vmatpush.msra.mxu1 %v12978_v46  ;;  %v2810_v3 = vpop.f32.mrf.mxu2  ;;  %3520 = vmatmul.f32.gmra.mxu3 %v12902_v12  ;;  %v2490_v7 = vpop.f32.mrf.mxu0  ;;  %v4048_v14 = vsub.f32 %v13015_v48, %v18656_v26  ;;  %v18657_v26 = vand.u32 4294901760, %v13033_v29 }
 0x40f   : > { %v2695_v30 = vpop.f32.mrf.mxu1  ;;  %3895 = vmatpush.msra.mxu2 %v13006_v17  ;;  %v2692_v28 = vadd.f32 %v2691_v11, %v2490_v7  ;;  %4032 = vmatpush.msra.mxu3 %v4031_v63 }
 0x410   : > { %4134 = vmatpush.msra.mxu0 %v13015_v48  ;;  %4210 = vmatpush.msra.mxu1 %v13006_v17  ;;  %v2929_v34 = vpop.f32.mrf.mxu3  ;;  %v4054_v11 = vsub.f32 %v13033_v29, %v18657_v26  ;;  %v4049_v62 = vand.u32 4294901760, %v4048_v14 }
 0x411   : > { %v2811_v12 = vadd.f32 %v2810_v3, %v2692_v28  ;;  %4038 = vmatpush.msra.mxu3 %v4037_v15  ;;  %v3397_v28 = vsub.f32 %v13049_v5, %v13067_v32 }
 0x412   : > { %3077 = vmatmul.f32.gmra.mxu0 %v18654_v56  ;;  %3178 = vmatmul.f32.gmra.mxu1 %v18581_v22  ;;  %v4055_v56 = vand.u32 4294901760, %v4054_v11 }
 0x413   : > { %4137 = vmatpush.msra.mxu0 %v13033_v29  ;;  %v13076_v7 = vadd.f32 %v2929_v34, %v2811_v12  ;;  %4044 = vmatpush.msra.mxu3 %v4043_v44  ;;  %v13082_v15 = vand.u32 4294901760, %v3397_v28 }
 0x414   : > { %3391 = vmatmul.f32.gmra.mxu2 %v13064_v52 }
 0x415   : > { %4050 = vmatpush.msra.mxu3 %v4049_v62 }
 0x416   : > { %3524 = vmatmul.f32.gmra.mxu3 %v12964_v54  ;;  %v2498_v24 = vpop.f32.mrf.mxu0  ;;  %v2815_v3 = vpop.f32.mrf.mxu2 }
 0x417   : > { %v2696_v63 = vadd.f32 %v2695_v30, %v2498_v24  ;;  %v2699_v43 = vpop.f32.mrf.mxu1  ;;  %4056 = vmatpush.msra.mxu3 %v4055_v56  ;;  %v18659_v24 = vand.u32 4294901760, %v12778_v1  ;;  %v18661_v1 = vand.u32 4294901760, %v12814_v38 }
 0x419   : > { %v2816_v12 = vadd.f32 %v2815_v3, %v2696_v63  ;;  %v2935_v34 = vpop.f32.mrf.mxu3 }
 0x41a   : > { %3081 = vmatmul.f32.gmra.mxu0 %v18581_v22  ;;  %3182 = vmatmul.f32.gmra.mxu1 %v18586_v49  ;;  %v18658_v22 = vand.u32 4294901760, %v12793_v13 }
 0x41b   : > { %v13086_v44 = vadd.f32 %v2935_v34, %v2816_v12  ;;  %v18660_v12 = vand.u32 4294901760, %v12797_v57 }
 0x41c   : > { %3399 = vmatmul.f32.gmra.mxu2 %v13082_v15 }
 0x41e   : > { %3528 = vmatmul.f32.gmra.mxu3 %v13024_v40  ;;  %v2506_v14 = vpop.f32.mrf.mxu0  ;;  %v2820_v26 = vpop.f32.mrf.mxu2 }
 0x41f   : > { %v2700_v11 = vadd.f32 %v2699_v43, %v2506_v14  ;;  %v2703_v30 = vpop.f32.mrf.mxu1 }
 0x421   : > { %v2821_v62 = vadd.f32 %v2820_v26, %v2700_v11  ;;  %v2941_v56 = vpop.f32.mrf.mxu3 }
 0x422   : > { %3085 = vmatmul.f32.gmra.mxu0 %v18586_v49  ;;  %3186 = vmatmul.f32.gmra.mxu1 %v18438_v6 }
 0x423   : > { %v13092_v28 = vadd.f32 %v2941_v56, %v2821_v62  ;;  %v18672_v56 = vld [vmem:[#allocation95_spill] sm:$0xff] }
 0x424   : > { %3582 = vmatmul.f32.vlgmr.msrb.gmra.mxu2 %v12733_v2 }
 0x425   : > { %4263 = vmatpush.msrb.mxu2 %v18658_v22 }
 0x426   : > { %3656 = vmatmul.f32.vlgmr.msrb.gmra.mxu3 %v12739_v37  ;;  %v2514_v3 = vpop.f32.mrf.mxu0  ;;  %v2825_v63 = vpop.f32.mrf.mxu2 }
 0x427   : > { %4267 = vmatpush.msrb.mxu2 %v18659_v24  ;;  %4358 = vmatpush.msrb.mxu3 %v12775_v23  ;;  %v2704_v43 = vadd.f32 %v2703_v30, %v2514_v3  ;;  %v2707_v49 = vpop.f32.mrf.mxu1  ;;  %v18662_v23 = vand.u32 4294901760, %v12836_v60 }
 0x429   : > { %4271 = vmatpush.msrb.mxu2 %v18660_v12  ;;  %v2826_v34 = vadd.f32 %v2825_v63, %v2704_v43  ;;  %4360 = vmatpush.msrb.mxu3 %v12763_v42  ;;  %v2947_v14 = vpop.f32.mrf.mxu3  ;;  %v18676_v43 = vld [vmem:[#allocation63_spill] sm:$0xff] }
 0x42a   : > { %3089 = vmatmul.f32.gmra.mxu0 %v18438_v6  ;;  %3190 = vmatmul.f32.gmra.mxu1 %v18501_v55  ;;  %v18663_v6 = vand.u32 4294901760, %v12856_v8 }
 0x42b   : > { %4275 = vmatpush.msrb.mxu2 %v18661_v1  ;;  %v13108_v13 = vadd.f32 %v2947_v14, %v2826_v34  ;;  %4362 = vmatpush.msrb.mxu3 %v12771_v53  ;;  %v18664_v53 = vand.u32 4294901760, %v12698_v27  ;;  %v18666_v27 = vand.u32 4294901760, %v12912_v33 }
 0x42c   : > { %3587 = vmatmul.f32.gmra.mxu2 %v12749_v25 }
 0x42d   : > { %4279 = vmatpush.msrb.mxu2 %v18662_v23  ;;  %4364 = vmatpush.msrb.mxu3 %v12786_v50  ;;  %v18665_v50 = vand.u32 4294901760, %v12893_v9 }
 0x42e   : > { %3662 = vmatmul.f32.gmra.mxu3 %v12757_v47  ;;  %v2522_v42 = vpop.f32.mrf.mxu0  ;;  %v2830_v57 = vpop.f32.mrf.mxu2 }
 0x42f   : > { %4283 = vmatpush.msrb.mxu2 %v18663_v6  ;;  %4366 = vmatpush.msrb.mxu3 %v12804_v18  ;;  %v2708_v38 = vadd.f32 %v2707_v49, %v2522_v42  ;;  %v2711_v26 = vpop.f32.mrf.mxu1  ;;  %v18681_v6 = vld [vmem:[#allocation94_spill] sm:$0xff] }
 0x431   : > { %4287 = vmatpush.msrb.mxu2 %v18664_v53  ;;  %v2831_v11 = vadd.f32 %v2830_v57, %v2708_v38  ;;  %4368 = vmatpush.msrb.mxu3 %v12826_v31  ;;  %v2953_v60 = vpop.f32.mrf.mxu3 }
 0x432   : > { %3093 = vmatmul.f32.gmra.mxu0 %v18501_v55  ;;  %3194 = vmatmul.f32.gmra.mxu1 %v18513_v59  ;;  %v18667_v55 = vand.u32 4294901760, %v12923_v58 }
 0x433   : > { %4291 = vmatpush.msrb.mxu2 %v18665_v50  ;;  %v13126_v8 = vadd.f32 %v2953_v60, %v2831_v11  ;;  %4370 = vmatpush.msrb.mxu3 %v12695_v36  ;;  %v18668_v36 = vand.u32 4294901760, %v12953_v16  ;;  %v18671_v16 = vand.u32 4294901760, %v12986_v51  ;;  %v18683_v11 = vld [vmem:[#allocation74_spill] sm:$0xff] }
 0x434   : > { %3592 = vmatmul.f32.gmra.mxu2 %v12769_v41  ;;  %v18684_v50 = vld [vmem:[#allocation98_spill] sm:$0xff] }
 0x435   : > { %4295 = vmatpush.msrb.mxu2 %v18666_v27  ;;  %4372 = vmatpush.msrb.mxu3 %v12863_v10  ;;  %v18669_v10 = vand.u32 4294901760, %v12974_v20  ;;  %v18685_v27 = vld [vmem:[#allocation23_spill] sm:$0xff] }
 0x436   : > { %3668 = vmatmul.f32.gmra.mxu3 %v12783_v0  ;;  %v2530_v18 = vpop.f32.mrf.mxu0  ;;  %v2835_v31 = vpop.f32.mrf.mxu2 }
 0x437   : > { %4299 = vmatpush.msrb.mxu2 %v18667_v55  ;;  %4374 = vmatpush.msrb.mxu3 %v12880_v39  ;;  %v2712_v9 = vadd.f32 %v2711_v26, %v2530_v18  ;;  %v2715_v30 = vpop.f32.mrf.mxu1  ;;  %v18670_v39 = vld [vmem:[#allocation86_spill] sm:$0xff] }
 0x439   : > { %4303 = vmatpush.msrb.mxu2 %v18668_v36  ;;  %v2836_v62 = vadd.f32 %v2835_v31, %v2712_v9  ;;  %4376 = vmatpush.msrb.mxu3 %v12883_v45  ;;  %v2959_v33 = vpop.f32.mrf.mxu3  ;;  %v18673_v45 = vld [vmem:[#allocation85_spill] sm:$0xff] }
 0x43a   : > { %3097 = vmatmul.f32.gmra.mxu0 %v18513_v59  ;;  %3198 = vmatmul.f32.gmra.mxu1 %v18524_v35  ;;  %v18674_v59 = vand.u32 4294901760, %v13004_v4  ;;  %v18677_v4 = vand.u32 4294901760, %v13033_v29  ;;  %v18680_v29 = vld [vmem:[#allocation67_spill] sm:$0xff] }
 0x43b   : > { %4307 = vmatpush.msrb.mxu2 %v18669_v10  ;;  %v13144_v58 = vadd.f32 %v2959_v33, %v2836_v62  ;;  %4378 = vmatpush.msrb.mxu3 %v12915_v19  ;;  %v18675_v19 = vand.u32 4294901760, %v13015_v48  ;;  %v18679_v48 = vld [vmem:[#allocation91_spill] sm:$0xff]  ;;  %v18686_v62 = vld [vmem:[#allocation78_spill] sm:$0xff] }
 0x43c   : > { %3597 = vmatmul.f32.gmra.mxu2 %v18670_v39 }
 0x43d   : > { %4311 = vmatpush.msrb.mxu2 %v18671_v16  ;;  %4380 = vmatpush.msrb.mxu3 %v18672_v56 }
 0x43e   : > { %3674 = vmatmul.f32.gmra.mxu3 %v18673_v45  ;;  %v2538_v22 = vpop.f32.mrf.mxu0  ;;  %v2840_v24 = vpop.f32.mrf.mxu2 }
 0x43f   : > { %4315 = vmatpush.msrb.mxu2 %v18674_v59  ;;  %4382 = vmatpush.msrb.mxu3 %v12943_v61  ;;  %v2716_v20 = vadd.f32 %v2715_v30, %v2538_v22  ;;  %v2719_v3 = vpop.f32.mrf.mxu1  ;;  %v18678_v61 = vld [vmem:[#allocation61_spill] sm:$0xff] }
 0x441   : > { %4319 = vmatpush.msrb.mxu2 %v18675_v19  ;;  %v2841_v63 = vadd.f32 %v2840_v24, %v2716_v20  ;;  %4384 = vmatpush.msrb.mxu3 %v12976_v21  ;;  %v2965_v51 = vpop.f32.mrf.mxu3  ;;  %v18687_v20 = vld [vmem:[#allocation82_spill] sm:$0xff]  ;;  %v18688_v19 = vld [vmem:[#allocation51_spill] sm:$0xff] }
 0x442   : > { %3101 = vmatmul.f32.gmra.mxu0 %v18524_v35  ;;  %3202 = vmatmul.f32.gmra.mxu1 %v18676_v43 }
 0x443   : > { %4323 = vmatpush.msrb.mxu2 %v18677_v4  ;;  %v13162_v49 = vadd.f32 %v2965_v51, %v2841_v63  ;;  %4386 = vmatpush.msrb.mxu3 %v12978_v46  ;;  %v18682_v46 = vld [vmem:[#allocation96_spill] sm:$0xff] }
 0x444   : > { %3602 = vmatmul.f32.gmra.mxu2 %v18678_v61 }
 0x445   : > { %4388 = vmatpush.msrb.mxu3 %v13006_v17 }
 0x446   : > { %3680 = vmatmul.f32.gmra.mxu3 %v18679_v48  ;;  %v2546_v12 = vpop.f32.mrf.mxu0  ;;  %v2845_v21 = vpop.f32.mrf.mxu2 }
 0x447   : > { %v2720_v34 = vadd.f32 %v2719_v3, %v2546_v12  ;;  %v2723_v14 = vpop.f32.mrf.mxu1 }
 0x449   : > { %v2846_v35 = vadd.f32 %v2845_v21, %v2720_v34  ;;  %v2971_v1 = vpop.f32.mrf.mxu3 }
 0x44a   : > { %3105 = vmatmul.f32.gmra.mxu0 %v18676_v43  ;;  %3206 = vmatmul.f32.gmra.mxu1 %v18680_v29  ;;  %v18689_v43 = vld [vmem:[#allocation55_spill] sm:$0xff] }
 0x44b   : > { %v13170_v23 = vadd.f32 %v2971_v1, %v2846_v35  ;;  %v18690_v35 = vld [vmem:[#allocation83_spill] sm:$0xff]  ;;  %v18691_v1 = vld [vmem:[#allocation53_spill] sm:$0xff] }
 0x44c   : > { %3607 = vmatmul.f32.gmra.mxu2 %v18681_v6 }
 0x44e   : > { %3686 = vmatmul.f32.gmra.mxu3 %v18682_v46  ;;  %v2554_v42 = vpop.f32.mrf.mxu0  ;;  %v2850_v17 = vpop.f32.mrf.mxu2 }
 0x44f   : > { %v2724_v57 = vadd.f32 %v2723_v14, %v2554_v42  ;;  %v2727_v38 = vpop.f32.mrf.mxu1 }
 0x451   : > { %v2851_v26 = vadd.f32 %v2850_v17, %v2724_v57  ;;  %v2977_v53 = vpop.f32.mrf.mxu3  ;;  %v18692_v17 = vld [vmem:[#allocation58_spill] sm:$0xff] }
 0x452   : > { %3109 = vmatmul.f32.gmra.mxu0 %v18680_v29  ;;  %3210 = vmatmul.f32.gmra.mxu1 %v18683_v11 }
 0x453   : > { %v13176_v60 = vadd.f32 %v2977_v53, %v2851_v26 }
 0x454   : > { %3612 = vmatmul.f32.gmra.mxu2 %v18684_v50 }
 0x456   : > { %3692 = vmatmul.f32.gmra.mxu3 %v18685_v27  ;;  %v2562_v55 = vpop.f32.mrf.mxu0  ;;  %v2855_v18 = vpop.f32.mrf.mxu2 }
 0x457   : > { %v2728_v31 = vadd.f32 %v2727_v38, %v2562_v55  ;;  %v2731_v9 = vpop.f32.mrf.mxu1  ;;  %v18693_v55 = vld [vmem:[#allocation84_spill] sm:$0xff] }
 0x459   : > { %v2856_v30 = vadd.f32 %v2855_v18, %v2728_v31  ;;  %v2983_v36 = vpop.f32.mrf.mxu3  ;;  %v18694_v18 = vld [vmem:[#allocation87_spill] sm:$0xff] }
 0x45a   : > { %3113 = vmatmul.f32.gmra.mxu0 %v18683_v11  ;;  %3214 = vmatmul.f32.gmra.mxu1 %v18686_v62 }
 0x45b   : > { %v13182_v33 = vadd.f32 %v2983_v36, %v2856_v30  ;;  %v18695_v30 = vld [vmem:[#allocation92_spill] sm:$0xff] }
 0x45c   : > { %3617 = vmatmul.f32.gmra.mxu2 %v13049_v5 }
 0x45e   : > { %3698 = vmatmul.f32.gmra.mxu3 %v13067_v32  ;;  %v2570_v10 = vpop.f32.mrf.mxu0  ;;  %v2860_v16 = vpop.f32.mrf.mxu2 }
 0x45f   : > { %v2732_v56 = vadd.f32 %v2731_v9, %v2570_v10  ;;  %v3155_v59 = vpop.f32.mrf.mxu1 }
 0x461   : > { %v2861_v22 = vadd.f32 %v2860_v16, %v2732_v56  ;;  %v2989_v24 = vpop.f32.mrf.mxu3 }
 0x462   : > { %3117 = vmatmul.f32.gmra.mxu0 %v18686_v62  ;;  %3832 = vmatmul.f32.vlgmr.msrb.gmra.mxu1 %v18687_v20 }
 0x463   : > { %v13188_v3 = vadd.f32 %v2989_v24, %v2861_v22  ;;  %v18698_v22 = vld [vmem:[#allocation90_spill] sm:$0xff] }
 0x464   : > { %3901 = vmatmul.f32.vlgmr.msra.gmra.mxu2 %v18688_v19 }
 0x466   : > { %v3344_v51 = vpop.f32.mrf.mxu2  ;;  %4058 = vmatmul.f32.vlgmr.msra.gmra.mxu3 %v18687_v20 }
 0x467   : > { %v3058_v63 = vpop.f32.mrf.mxu0  ;;  %v3159_v12 = vpop.f32.mrf.mxu1 }
 0x468   : > { %v3059_v4 = vadd.f32 %v3058_v63, %v18689_v43  ;;  %v18699_v63 = vld [vmem:[#allocation97_spill] sm:$0xff] }
 0x469   : > { %v3501_v34 = vpop.f32.mrf.mxu3 }
 0x46a   : > { %v3156_v21 = vadd.f32 %v3155_v59, %v3059_v4  ;;  %3767 = vmatmul.f32.vlgmr.msrb.gmra.mxu0 %v18687_v20  ;;  %v13194_v14 = vadd.f32 %v3501_v34, %v3344_v51  ;;  %3836 = vmatmul.f32.gmra.mxu1 %v18690_v35  ;;  %v18697_v59 = vld [vmem:[#allocation60_spill] sm:$0xff] }
 0x46b   : > { %v18701_v34 = vld [vmem:[#allocation88_spill] sm:$0xff] }
 0x46c   : > { %3220 = vst [vmem:[%s12018_s17 + $0x10] sm:$0xff] %v3156_v21  ;;  %3909 = vmatmul.f32.gmra.mxu2 %v18691_v1  ;;  %v18702_v1 = vld [vmem:[#allocation93_spill] sm:$0xff] }
 0x46e   : > { %4062 = vmatmul.f32.gmra.mxu3 %v18690_v35 }
 0x46f   : > { %v3062_v29 = vpop.f32.mrf.mxu0  ;;  %v3352_v42 = vpop.f32.mrf.mxu2 }
 0x470   : > { %v3063_v57 = vadd.f32 %v3062_v29, %v18692_v17  ;;  %v3163_v38 = vpop.f32.mrf.mxu1  ;;  %v18703_v17 = vld [vmem:[#allocation25_spill] sm:$0xff] }
 0x471   : > { %v3505_v53 = vpop.f32.mrf.mxu3 }
 0x472   : > { %v3160_v26 = vadd.f32 %v3159_v12, %v3063_v57  ;;  %3771 = vmatmul.f32.gmra.mxu0 %v18690_v35  ;;  %v13202_v11 = vadd.f32 %v3505_v53, %v3352_v42  ;;  %3840 = vmatmul.f32.gmra.mxu1 %v18693_v55 }
 0x474   : > { %3223 = vst [vmem:[%s12018_s17 + $0x28] sm:$0xff] %v3160_v26  ;;  %3917 = vmatmul.f32.gmra.mxu2 %v18694_v18 }
 0x476   : > { %4066 = vmatmul.f32.gmra.mxu3 %v18693_v55 }
 0x477   : > { %v3066_v31 = vpop.f32.mrf.mxu0  ;;  %v3360_v9 = vpop.f32.mrf.mxu2 }
 0x478   : > { %v3067_v36 = vadd.f32 %v3066_v31, %v18695_v30  ;;  %v3167_v62 = vpop.f32.mrf.mxu1  ;;  %v18704_v31 = vld [vmem:[#allocation89_spill] sm:$0xff] }
 0x479   : > { %v3509_v16 = vpop.f32.mrf.mxu3 }
 0x47a   : > { %v3164_v10 = vadd.f32 %v3163_v38, %v3067_v36  ;;  %3775 = vmatmul.f32.gmra.mxu0 %v18693_v55  ;;  %v13210_v56 = vadd.f32 %v3509_v16, %v3360_v9  ;;  %3844 = vmatmul.f32.gmra.mxu1 %v18697_v59  ;;  %v18705_v9 = vld [vmem:[#allocation20_spill] sm:$0xff] }
 0x47c   : > { %18696 = vst [vmem:[#allocation27_spill] sm:$0xff] %v13210_v56  ;;  %3925 = vmatmul.f32.gmra.mxu2 %v18698_v22 }
 0x47d   : > { %3226 = vst [vmem:[%s12018_s17 + $0x40] sm:$0xff] %v3164_v10 }
 0x47e   : > { %4070 = vmatmul.f32.gmra.mxu3 %v18697_v59 }
 0x47f   : > { %v3070_v24 = vpop.f32.mrf.mxu0  ;;  %v3368_v19 = vpop.f32.mrf.mxu2 }
 0x480   : > { %v3071_v51 = vadd.f32 %v3070_v24, %v18699_v63  ;;  %v3171_v43 = vpop.f32.mrf.mxu1 }
 0x481   : > { %v3513_v12 = vpop.f32.mrf.mxu3 }
 0x482   : > { %v3168_v4 = vadd.f32 %v3167_v62, %v3071_v51  ;;  %3779 = vmatmul.f32.gmra.mxu0 %v18697_v59  ;;  %v13218_v21 = vadd.f32 %v3513_v12, %v3368_v19  ;;  %3848 = vmatmul.f32.gmra.mxu1 %v18701_v34 }
 0x484   : > { %18700 = vst [vmem:[#allocation29_spill] sm:$0xff] %v13218_v21  ;;  %3933 = vmatmul.f32.gmra.mxu2 %v18702_v1 }
 0x485   : > { %3229 = vst [vmem:[%s12018_s17 + $0x58] sm:$0xff] %v3168_v4 }
 0x486   : > { %4074 = vmatmul.f32.gmra.mxu3 %v18701_v34 }
 0x487   : > { %v3074_v29 = vpop.f32.mrf.mxu0  ;;  %v3376_v42 = vpop.f32.mrf.mxu2 }
 0x488   : > { %v3075_v57 = vadd.f32 %v3074_v29, %v18703_v17  ;;  %v3175_v38 = vpop.f32.mrf.mxu1 }
 0x489   : > { %v3517_v53 = vpop.f32.mrf.mxu3 }
 0x48a   : > { %v3172_v26 = vadd.f32 %v3171_v43, %v3075_v57  ;;  %3783 = vmatmul.f32.gmra.mxu0 %v18701_v34  ;;  %v13226_v18 = vadd.f32 %v3517_v53, %v3376_v42  ;;  %3852 = vmatmul.f32.gmra.mxu1 %v18704_v31 }
 0x48c   : > { %3232 = vst [vmem:[%s12018_s17 + $0x70] sm:$0xff] %v3172_v26  ;;  %3941 = vmatmul.f32.gmra.mxu2 %v18705_v9 }
 0x48e   : > { %4078 = vmatmul.f32.gmra.mxu3 %v18704_v31 }
 0x48f   : > { %v3078_v30 = vpop.f32.mrf.mxu0  ;;  %v3384_v36 = vpop.f32.mrf.mxu2 }
 0x490   : > { %v3079_v62 = vadd.f32 %v3078_v30, %v13076_v7  ;;  %v3179_v10 = vpop.f32.mrf.mxu1 }
 0x491   : > { %v3521_v22 = vpop.f32.mrf.mxu3 }
 0x492   : > { %v3176_v16 = vadd.f32 %v3175_v38, %v3079_v62  ;;  %3787 = vmatmul.f32.gmra.mxu0 %v18704_v31  ;;  %v13234_v24 = vadd.f32 %v3521_v22, %v3384_v36  ;;  %3856 = vmatmul.f32.gmra.mxu1 %v12964_v54 }
 0x494   : > { %18706 = vst [vmem:[#allocation102_spill] sm:$0xff] %v13234_v24  ;;  %3949 = vmatmul.f32.gmra.mxu2 %v13064_v52 }
 0x495   : > { %3235 = vst [vmem:[%s12018_s17 + $0x88] sm:$0xff] %v3176_v16 }
 0x496   : > { %4082 = vmatmul.f32.gmra.mxu3 %v12964_v54 }
 0x497   : > { %v3082_v19 = vpop.f32.mrf.mxu0  ;;  %v3392_v63 = vpop.f32.mrf.mxu2 }
 0x498   : > { %v3083_v51 = vadd.f32 %v3082_v19, %v13086_v44  ;;  %v3183_v7 = vpop.f32.mrf.mxu1 }
 0x499   : > { %v3525_v4 = vpop.f32.mrf.mxu3 }
 0x49a   : > { %v3180_v43 = vadd.f32 %v3179_v10, %v3083_v51  ;;  %3791 = vmatmul.f32.gmra.mxu0 %v12964_v54  ;;  %v13242_v12 = vadd.f32 %v3525_v4, %v3392_v63  ;;  %3860 = vmatmul.f32.gmra.mxu1 %v13024_v40 }
 0x49c   : > { %18707 = vst [vmem:[#allocation19_spill] sm:$0xff] %v13242_v12  ;;  %3957 = vmatmul.f32.gmra.mxu2 %v13082_v15 }
 0x49d   : > { %3238 = vst [vmem:[%s12018_s17 + $0xa0] sm:$0xff] %v3180_v43 }
 0x49e   : > { %4086 = vmatmul.f32.gmra.mxu3 %v13024_v40 }
 0x49f   : > { %v3086_v52 = vpop.f32.mrf.mxu0  ;;  %v3400_v1 = vpop.f32.mrf.mxu2 }
 0x4a0   : > { %v3087_v29 = vadd.f32 %v3086_v52, %v13092_v28  ;;  %v3187_v44 = vpop.f32.mrf.mxu1 }
 0x4a1   : > { %v3529_v17 = vpop.f32.mrf.mxu3 }
 0x4a2   : > { %v3184_v42 = vadd.f32 %v3183_v7, %v3087_v29  ;;  %3795 = vmatmul.f32.gmra.mxu0 %v13024_v40  ;;  %v13250_v57 = vadd.f32 %v3529_v17, %v3400_v1  ;;  %4214 = vmatmul.f32.vlgmr.msra.gmra.mxu1 %v12739_v37 }
 0x4a4   : > { %18708 = vst [vmem:[#allocation32_spill] sm:$0xff] %v13250_v57  ;;  %4325 = vmatmul.f32.vlgmr.msrb.gmra.mxu2 %v18687_v20 }
 0x4a5   : > { %3241 = vst [vmem:[%s12018_s17 + $0xb8] sm:$0xff] %v3184_v42 }
 0x4a6   : > { %4390 = vmatmul.f32.vlgmr.msrb.gmra.mxu3 %v18687_v20 }
 0x4a7   : > { %v3090_v15 = vpop.f32.mrf.mxu0  ;;  %v13255_v38 = vpop.f32.mrf.mxu2 }
 0x4a8   : > { %v3091_v28 = vadd.f32 %v3090_v15, %v13108_v13  ;;  %v3191_v26 = vpop.f32.mrf.mxu1 }
 0x4a9   : > { %v13259_v9 = vpop.f32.mrf.mxu3 }
 0x4aa   : > { %v3188_v53 = vadd.f32 %v3187_v44, %v3091_v28  ;;  %4140 = vmatmul.f32.vlgmr.msra.gmra.mxu0 %v12733_v2  ;;  %4220 = vmatmul.f32.gmra.mxu1 %v12757_v47 }
 0x4ac   : > { %3244 = vst [vmem:[%s12018_s17 + $0xd0] sm:$0xff] %v3188_v53  ;;  %4329 = vmatmul.f32.gmra.mxu2 %v18690_v35 }
 0x4ae   : > { %4394 = vmatmul.f32.gmra.mxu3 %v18690_v35 }
 0x4af   : > { %v3094_v37 = vpop.f32.mrf.mxu0  ;;  %v13265_v30 = vpop.f32.mrf.mxu2 }
 0x4b0   : > { %v3095_v20 = vadd.f32 %v3094_v37, %v13126_v8  ;;  %v3195_v13 = vpop.f32.mrf.mxu1 }
 0x4b1   : > { %v13269_v62 = vpop.f32.mrf.mxu3 }
 0x4b2   : > { %v3192_v36 = vadd.f32 %v3191_v26, %v3095_v20  ;;  %4145 = vmatmul.f32.gmra.mxu0 %v12749_v25  ;;  %4226 = vmatmul.f32.gmra.mxu1 %v12783_v0 }
 0x4b4   : > { %3247 = vst [vmem:[%s12018_s17 + $0xe8] sm:$0xff] %v3192_v36  ;;  %4333 = vmatmul.f32.gmra.mxu2 %v18693_v55 }
 0x4b6   : > { %4398 = vmatmul.f32.gmra.mxu3 %v18693_v55 }
 0x4b7   : > { %v3098_v2 = vpop.f32.mrf.mxu0  ;;  %v13275_v47 = vpop.f32.mrf.mxu2 }
 0x4b8   : > { %18709 = vst [vmem:[#allocation100_spill] sm:$0xff] %v13275_v47  ;;  %v3099_v35 = vadd.f32 %v3098_v2, %v13144_v58  ;;  %v3199_v8 = vpop.f32.mrf.mxu1 }
 0x4b9   : > { %v13279_v16 = vpop.f32.mrf.mxu3 }
 0x4ba   : > { %v3196_v10 = vadd.f32 %v3195_v13, %v3099_v35  ;;  %18710 = vst [vmem:[#allocation30_spill] sm:$0xff] %v13279_v16  ;;  %4150 = vmatmul.f32.gmra.mxu0 %v12769_v41  ;;  %4232 = vmatmul.f32.gmra.mxu1 %v18673_v45 }
 0x4bc   : > { %3250 = vst [vmem:[%s12018_s17 + $0x100] sm:$0xff] %v3196_v10  ;;  %4337 = vmatmul.f32.gmra.mxu2 %v18697_v59 }
 0x4be   : > { %4402 = vmatmul.f32.gmra.mxu3 %v18697_v59 }
 0x4bf   : > { %v3102_v25 = vpop.f32.mrf.mxu0  ;;  %v13285_v0 = vpop.f32.mrf.mxu2 }
 0x4c0   : > { %18711 = vst [vmem:[#allocation33_spill] sm:$0xff] %v13285_v0  ;;  %v3103_v55 = vadd.f32 %v3102_v25, %v13162_v49  ;;  %v3203_v58 = vpop.f32.mrf.mxu1 }
 0x4c1   : > { %v13289_v19 = vpop.f32.mrf.mxu3 }
 0x4c2   : > { %v3200_v22 = vadd.f32 %v3199_v8, %v3103_v55  ;;  %18712 = vst [vmem:[#allocation24_spill] sm:$0xff] %v13289_v19  ;;  %4155 = vmatmul.f32.gmra.mxu0 %v18670_v39  ;;  %4238 = vmatmul.f32.gmra.mxu1 %v18679_v48 }
 0x4c4   : > { %3253 = vst [vmem:[%s12018_s17 + $0x118] sm:$0xff] %v3200_v22  ;;  %4341 = vmatmul.f32.gmra.mxu2 %v18701_v34 }
 0x4c6   : > { %4406 = vmatmul.f32.gmra.mxu3 %v18701_v34 }
 0x4c7   : > { %v3106_v41 = vpop.f32.mrf.mxu0  ;;  %v13295_v45 = vpop.f32.mrf.mxu2 }
 0x4c8   : > { %v3107_v59 = vadd.f32 %v3106_v41, %v13170_v23  ;;  %v3207_v49 = vpop.f32.mrf.mxu1 }
 0x4c9   : > { %v13299_v51 = vpop.f32.mrf.mxu3 }
 0x4ca   : > { %v3204_v63 = vadd.f32 %v3203_v58, %v3107_v59  ;;  %4160 = vmatmul.f32.gmra.mxu0 %v18678_v61  ;;  %4244 = vmatmul.f32.gmra.mxu1 %v18682_v46 }
 0x4cc   : > { %3256 = vst [vmem:[%s12018_s17 + $0x130] sm:$0xff] %v3204_v63  ;;  %4345 = vmatmul.f32.gmra.mxu2 %v18704_v31 }
 0x4ce   : > { %4410 = vmatmul.f32.gmra.mxu3 %v18704_v31 }
 0x4cf   : > { %v3110_v39 = vpop.f32.mrf.mxu0  ;;  %v13305_v48 = vpop.f32.mrf.mxu2 }
 0x4d0   : > { %18713 = vst [vmem:[#allocation26_spill] sm:$0xff] %v13305_v48  ;;  %v3111_v34 = vadd.f32 %v3110_v39, %v13176_v60  ;;  %v3211_v23 = vpop.f32.mrf.mxu1 }
 0x4d1   : > { %v13309_v43 = vpop.f32.mrf.mxu3 }
 0x4d2   : > { %v3208_v7 = vadd.f32 %v3207_v49, %v3111_v34  ;;  %18714 = vst [vmem:[#allocation36_spill] sm:$0xff] %v13309_v43  ;;  %4165 = vmatmul.f32.gmra.mxu0 %v18681_v6  ;;  %4250 = vmatmul.f32.gmra.mxu1 %v18685_v27 }
 0x4d4   : > { %3259 = vst [vmem:[%s12018_s17 + $0x148] sm:$0xff] %v3208_v7  ;;  %4349 = vmatmul.f32.gmra.mxu2 %v12964_v54 }
 0x4d6   : > { %4414 = vmatmul.f32.gmra.mxu3 %v12964_v54 }
 0x4d7   : > { %v3114_v61 = vpop.f32.mrf.mxu0  ;;  %v13315_v46 = vpop.f32.mrf.mxu2 }
 0x4d8   : > { %18715 = vst [vmem:[#allocation34_spill] sm:$0xff] %v13315_v46  ;;  %v3115_v31 = vadd.f32 %v3114_v61, %v13182_v33  ;;  %v3215_v60 = vpop.f32.mrf.mxu1 }
 0x4d9   : > { %v13319_v52 = vpop.f32.mrf.mxu3 }
 0x4da   : > { %v3212_v4 = vadd.f32 %v3211_v23, %v3115_v31  ;;  %18716 = vst [vmem:[#allocation37_spill] sm:$0xff] %v13319_v52  ;;  %4170 = vmatmul.f32.gmra.mxu0 %v18684_v50  ;;  %4256 = vmatmul.f32.gmra.mxu1 %v13067_v32 }
 0x4dc   : > { %3262 = vst [vmem:[%s12018_s17 + $0x160] sm:$0xff] %v3212_v4  ;;  %4353 = vmatmul.f32.gmra.mxu2 %v13024_v40 }
 0x4de   : > { %4418 = vmatmul.f32.gmra.mxu3 %v13024_v40 }
 0x4df   : > { %v3118_v6 = vpop.f32.mrf.mxu0  ;;  %v13325_v27 = vpop.f32.mrf.mxu2 }
 0x4e0   : > { %18717 = vst [vmem:[#allocation101_spill] sm:$0xff] %v13325_v27  ;;  %v3119_v54 = vadd.f32 %v3118_v6, %v13188_v3  ;;  %v13329_v33 = vpop.f32.mrf.mxu1 }
 0x4e1   : > { %18718 = vst [vmem:[#allocation40_spill] sm:$0xff] %v13329_v33  ;;  %v13331_v29 = vpop.f32.mrf.mxu3 }
 0x4e2   : > { %v3216_v1 = vadd.f32 %v3215_v60, %v3119_v54  ;;  %18719 = vst [vmem:[#allocation38_spill] sm:$0xff] %v13331_v29  ;;  %4175 = vmatmul.f32.gmra.mxu0 %v13049_v5 }
 0x4e4   : > { %3265 = vst [vmem:[%s12018_s17 + $0x178] sm:$0xff] %v3216_v1  ;;  %s10448_s17 = scalar_lea.hbm %s17969_s5, 768 }
 0x4e7   : > { %v13335_v50 = vpop.f32.mrf.mxu0  ;;  %v13337_v32 = vpop.f32.mrf.mxu2 }
 0x4e8   : > { %18720 = vst [vmem:[#allocation41_spill] sm:$0xff] %v13335_v50  ;;  %v13339_v44 = vpop.f32.mrf.mxu1 }
 0x4e9   : > { %v13341_v42 = vpop.f32.mrf.mxu3 }
 0x4ef   : > { %v13343_v17 = vpop.f32.mrf.mxu0  ;;  %v3910_v40 = vpop.f32.mrf.mxu2 }
 0x4f0   : > { %v13345_v3 = vpop.f32.mrf.mxu1 }
 0x4f1   : > { %18721 = vst [vmem:[#allocation103_spill] sm:$0xff] %v13345_v3  ;;  %v4063_v15 = vpop.f32.mrf.mxu3 }
 0x4f2   : > { %v4064_v24 = vadd.f32 %v4063_v15, %v3910_v40 }
 0x4f7   : > { %v13347_v28 = vpop.f32.mrf.mxu0  ;;  %v13349_v26 = vpop.f32.mrf.mxu2 }
 0x4f8   : > { %18722 = vst [vmem:[#allocation43_spill] sm:$0xff] %v13347_v28  ;;  %v13351_v5 = vpop.f32.mrf.mxu1 }
 0x4f9   : > { %18723 = vst [vmem:[#allocation39_spill] sm:$0xff] %v13351_v5  ;;  %v13353_v53 = vpop.f32.mrf.mxu3 }
 0x4ff   : > { %v13355_v37 = vpop.f32.mrf.mxu0  ;;  %v3926_v20 = vpop.f32.mrf.mxu2 }
 0x500   : > { %18724 = vst [vmem:[#allocation42_spill] sm:$0xff] %v13355_v37  ;;  %v13357_v13 = vpop.f32.mrf.mxu1 }
 0x501   : > { %18725 = vst [vmem:[#allocation44_spill] sm:$0xff] %v13357_v13  ;;  %v4071_v36 = vpop.f32.mrf.mxu3 }
 0x507   : > { %v13359_v2 = vpop.f32.mrf.mxu0  ;;  %v3934_v35 = vpop.f32.mrf.mxu2 }
 0x508   : > { %18726 = vst [vmem:[#allocation104_spill] sm:$0xff] %v13359_v2  ;;  %v13361_v8 = vpop.f32.mrf.mxu1  ;;  %v4072_v2 = vadd.f32 %v4071_v36, %v3926_v20 }
 0x509   : > { %18727 = vst [vmem:[#allocation45_spill] sm:$0xff] %v13361_v8  ;;  %v4075_v10 = vpop.f32.mrf.mxu3 }
 0x50a   : > { %v4076_v47 = vadd.f32 %v4075_v10, %v3934_v35  ;;  %v3584_v35 = vadd.f32 %v13255_v38, %v13194_v14 }
 0x50f   : > { %v13363_v25 = vpop.f32.mrf.mxu0  ;;  %v3942_v55 = vpop.f32.mrf.mxu2 }
 0x510   : > { %18728 = vst [vmem:[#allocation46_spill] sm:$0xff] %v13363_v25  ;;  %v13365_v58 = vpop.f32.mrf.mxu1 }
 0x511   : > { %18729 = vst [vmem:[#allocation48_spill] sm:$0xff] %v13365_v58  ;;  %v4079_v22 = vpop.f32.mrf.mxu3 }
 0x517   : > { %v13367_v41 = vpop.f32.mrf.mxu0  ;;  %v3950_v59 = vpop.f32.mrf.mxu2 }
 0x518   : > { %18730 = vst [vmem:[#allocation50_spill] sm:$0xff] %v13367_v41  ;;  %v13369_v49 = vpop.f32.mrf.mxu1 }
 0x519   : > { %18731 = vst [vmem:[#allocation56_spill] sm:$0xff] %v13369_v49  ;;  %v4083_v63 = vpop.f32.mrf.mxu3  ;;  %v4080_v49 = vadd.f32 %v4079_v22, %v3942_v55 }
 0x51f   : > { %v13371_v39 = vpop.f32.mrf.mxu0  ;;  %v3958_v34 = vpop.f32.mrf.mxu2 }
 0x520   : > { %18732 = vst [vmem:[#allocation59_spill] sm:$0xff] %v13371_v39  ;;  %v13373_v23 = vpop.f32.mrf.mxu1 }
 0x521   : > { %v4087_v7 = vpop.f32.mrf.mxu3 }
 0x527   : > { %v4141_v61 = vpop.f32.mrf.mxu0  ;;  %v13375_v31 = vpop.f32.mrf.mxu2 }
 0x528   : > { %v4221_v60 = vpop.f32.mrf.mxu1 }
 0x529   : > { %v13377_v4 = vpop.f32.mrf.mxu3 }
 0x52a   : > { %18733 = vst [vmem:[#allocation64_spill] sm:$0xff] %v13377_v4  ;;  %v4084_v4 = vadd.f32 %v4083_v63, %v3950_v59  ;;  %v18736_v59 = vld [vmem:[#allocation27_spill] sm:$0xff]  ;;  %v18738_v63 = vld [vmem:[#allocation104_spill] sm:$0xff] }
 0x52f   : > { %v4146_v6 = vpop.f32.mrf.mxu0  ;;  %v4330_v54 = vpop.f32.mrf.mxu2 }
 0x530   : > { %v13379_v1 = vpop.f32.mrf.mxu1  ;;  %v4147_v28 = vadd.f32 %v4146_v6, %v4064_v24 }
 0x531   : > { %v4395_v58 = vpop.f32.mrf.mxu3 }
 0x537   : > { %v4151_v41 = vpop.f32.mrf.mxu0  ;;  %v13381_v52 = vpop.f32.mrf.mxu2 }
 0x538   : > { %v4233_v5 = vpop.f32.mrf.mxu1 }
 0x539   : > { %v13383_v46 = vpop.f32.mrf.mxu3 }
 0x53a   : > { %18734 = vst [vmem:[#allocation62_spill] sm:$0xff] %v13383_v46  ;;  %v4222_v46 = vadd.f32 %v4221_v60, %v4147_v28  ;;  %v4088_v28 = vadd.f32 %v4087_v7, %v3958_v34  ;;  %v18740_v7 = vld [vmem:[#allocation101_spill] sm:$0xff] }
 0x53c   : > { %v4331_v40 = vadd.f32 %v4330_v54, %v4222_v46 }
 0x53e   : > { %v13393_v20 = vadd.f32 %v4395_v58, %v4331_v40 }
 0x53f   : > { %v4156_v12 = vpop.f32.mrf.mxu0  ;;  %v4338_v37 = vpop.f32.mrf.mxu2 }
 0x540   : > { %v4239_v19 = vpop.f32.mrf.mxu1 }
 0x541   : > { %v4403_v8 = vpop.f32.mrf.mxu3  ;;  %v18742_v60 = vld [vmem:[#allocation62_spill] sm:$0xff] }
 0x547   : > { %v4161_v0 = vpop.f32.mrf.mxu0  ;;  %v4342_v21 = vpop.f32.mrf.mxu2 }
 0x548   : > { %v4245_v43 = vpop.f32.mrf.mxu1  ;;  %v4162_v24 = vadd.f32 %v4161_v0, %v4076_v47 }
 0x549   : > { %v4407_v25 = vpop.f32.mrf.mxu3 }
 0x54f   : > { %v4166_v3 = vpop.f32.mrf.mxu0  ;;  %v4346_v48 = vpop.f32.mrf.mxu2 }
 0x550   : > { %v4167_v39 = vadd.f32 %v4166_v3, %v4080_v49  ;;  %v4251_v16 = vpop.f32.mrf.mxu1  ;;  %v4157_v3 = vadd.f32 %v4156_v12, %v4072_v2  ;;  %v4060_v12 = vadd.f32 %v13341_v42, %v13337_v32  ;;  %v18737_v49 = vld [vmem:[#allocation100_spill] sm:$0xff] }
 0x551   : > { %v4411_v29 = vpop.f32.mrf.mxu3 }
 0x552   : > { %v4246_v33 = vadd.f32 %v4245_v43, %v4167_v39 }
 0x554   : > { %v4347_v13 = vadd.f32 %v4346_v48, %v4246_v33  ;;  %v3589_v33 = vadd.f32 %v13265_v30, %v13202_v11  ;;  %v4142_v30 = vadd.f32 %v4141_v61, %v4060_v12  ;;  %v18741_v61 = vld [vmem:[#allocation41_spill] sm:$0xff]  ;;  %v18747_v12 = vld [vmem:[#allocation40_spill] sm:$0xff] }
 0x556   : > { %v13385_v50 = vadd.f32 %v4411_v29, %v4347_v13  ;;  %v4068_v29 = vadd.f32 %v13353_v53, %v13349_v26  ;;  %v4240_v13 = vadd.f32 %v4239_v19, %v4162_v24  ;;  %v3664_v11 = vadd.f32 %v13269_v62, %v3589_v33  ;;  %v18743_v24 = vld [vmem:[#allocation64_spill] sm:$0xff] }
 0x557   : > { %v4171_v27 = vpop.f32.mrf.mxu0  ;;  %v4350_v57 = vpop.f32.mrf.mxu2  ;;  %v3604_v62 = vadd.f32 %v13295_v45, %v13226_v18  ;;  %v4216_v10 = vadd.f32 %v13373_v23, %v4142_v30  ;;  %v18739_v23 = vld [vmem:[#allocation32_spill] sm:$0xff] }
 0x558   : > { %v4172_v56 = vadd.f32 %v4171_v27, %v4084_v4  ;;  %5094 = vrot.lane.b32.xlu1 %v13385_v50, %s10544_s22  ;;  %v4234_v27 = vadd.f32 %v4233_v5, %v4157_v3  ;;  %v4343_v46 = vadd.f32 %v4342_v21, %v4240_v13  ;;  %v3773_v42 = vadd.f32 %v13343_v17, %v3664_v11  ;;  %v18745_v33 = vld [vmem:[#allocation44_spill] sm:$0xff] }
 0x559   : > { %v4415_v15 = vpop.f32.mrf.mxu3  ;;  %v4463_v17 = vsel %vm4422_vm1, %v13385_v50, 0  ;;  %v3682_v38 = vadd.f32 %v13299_v51, %v3604_v62  ;;  %v3594_v51 = vadd.f32 %v18737_v49, %v18736_v59  ;;  %v18754_v59 = vld [vmem:[#allocation36_spill] sm:$0xff] }
 0x55a   : > { %v4252_v43 = vadd.f32 %v4251_v16, %v4172_v56  ;;  %v4257_v56 = vpop.f32.mrf.mxu1  ;;  %v4152_v16 = vadd.f32 %v4151_v41, %v4068_v29  ;;  %v4339_v19 = vadd.f32 %v4338_v37, %v4234_v27  ;;  %v13417_v55 = vadd.f32 %v4407_v25, %v4343_v46  ;;  %v18746_v27 = vld [vmem:[#allocation38_spill] sm:$0xff] }
 0x55b   : > { %v13424_v22 = vadd.f32 %v13339_v44, %v3773_v42  ;;  %v4327_v25 = vadd.f32 %v13375_v31, %v4216_v10  ;;  %v3785_v39 = vadd.f32 %v18738_v63, %v3682_v38  ;;  %v18750_v42 = vld [vmem:[#allocation102_spill] sm:$0xff] }
 0x55c   : > { %v4351_v48 = vadd.f32 %v4350_v57, %v4252_v43  ;;  %v4228_v53 = vadd.f32 %v13379_v1, %v4152_v16  ;;  %v13415_v21 = vadd.f32 %v4403_v8, %v4339_v19  ;;  %v3658_v8 = vadd.f32 %v13259_v9, %v3584_v35  ;;  %v18748_v19 = vld [vmem:[#allocation43_spill] sm:$0xff] }
 0x55d   : > { %v4460_v41 = vsel %vm4422_vm1, %v13417_v55, 0  ;;  %v3619_v9 = vadd.f32 %v18740_v7, %v18739_v23  ;;  %v13472_v43 = vadd.f32 %v18743_v24, %v4327_v25  ;;  %v13476_v29 = vadd.f32 %v18745_v33, %v3785_v39  ;;  %v18757_v24 = vld [vmem:[#allocation33_spill] sm:$0xff] }
 0x55e   : > { %v13395_v36 = vadd.f32 %v4415_v15, %v4351_v48  ;;  %v4335_v14 = vadd.f32 %v13381_v52, %v4228_v53  ;;  %v13441_v52 = vand.u32 4294901760, %v4463_v17  ;;  %v3769_v31 = vadd.f32 %v18741_v61, %v3658_v8  ;;  %v18744_v15 = vld [vmem:[#allocation30_spill] sm:$0xff]  ;;  %v18753_v8 = vld [vmem:[#allocation56_spill] sm:$0xff] }
 0x55f   : > { %v4176_v47 = vpop.f32.mrf.mxu0  ;;  %v4354_v0 = vpop.f32.mrf.mxu2  ;;  %v4457_v6 = vsel %vm4422_vm1, %v13415_v21, 0  ;;  %v13468_v40 = vand.u32 4294901760, %v4460_v41  ;;  %v3670_v48 = vadd.f32 %v18744_v15, %v3594_v51  ;;  %v3700_v13 = vadd.f32 %v18746_v27, %v3619_v9  ;;  %v18755_v61 = vld [vmem:[#allocation46_spill] sm:$0xff] }
 0x560   : > { %v4177_v57 = vadd.f32 %v4176_v47, %v4088_v28  ;;  %5096 = vrot.lane.b32.xlu0 %v13395_v36, %s10544_s22  ;;  %5086 = vrot.lane.b32.xlu1 %v13393_v20, %s10544_s22  ;;  %v4466_v32 = vsel %vm4422_vm1, %v13395_v36, 0  ;;  %v13459_v4 = vadd.f32 %v18742_v60, %v4335_v14  ;;  %v13466_v1 = vsub.f32 %v4463_v17, %v13441_v52 }
 0x561   : > { %v4419_v5 = vpop.f32.mrf.mxu3  ;;  %v13413_v37 = vand.u32 4294901760, %v4466_v32  ;;  %v13485_v47 = vadd.f32 %v18747_v12, %v3769_v31  ;;  %v13502_v30 = vsub.f32 %v4460_v41, %v13468_v40  ;;  %v3777_v46 = vadd.f32 %v18748_v19, %v3670_v48  ;;  %v18759_v19 = vld [vmem:[#allocation24_spill] sm:$0xff] }
 0x562   : > { %v4258_v26 = vadd.f32 %v4257_v56, %v4177_v57  ;;  %v13491_v56 = vand.u32 4294901760, %v4457_v6  ;;  %v4454_v16 = vsel %vm4422_vm1, %v13459_v4, 0  ;;  %v4451_v41 = vsel %vm4422_vm1, %v13393_v20, 0 }
 0x563   : > { %v13439_v44 = vsub.f32 %v4466_v32, %v13413_v37  ;;  %v4424_v35 = vsel %vm4422_vm1, %v13485_v47, 0  ;;  %v4588_v14 = vand.u32 4294901760, %v13502_v30  ;;  %v13550_v9 = vand.u32 4294901760, %v4451_v41 }
 0x564   : > { %v4355_v2 = vadd.f32 %v4354_v0, %v4258_v26  ;;  %v4582_v0 = vand.u32 4294901760, %v13466_v1  ;;  %v18749_v26 = vld [vmem:[#allocation59_spill] sm:$0xff]  ;;  %v13520_v17 = vsub.f32 %v4457_v6, %v13491_v56  ;;  %v13536_v51 = vand.u32 4294901760, %v4424_v35  ;;  %v18756_v6 = vld [vmem:[#allocation29_spill] sm:$0xff] }
 0x565   : > { %v4576_v3 = vand.u32 4294901760, %v13439_v44  ;;  %v3797_v32 = vadd.f32 %v18749_v26, %v3700_v13  ;;  %v4589_v39 = vsub.f32 %v13502_v30, %v4588_v14  ;;  %v4448_v60 = vsel %vm4422_vm1, %v13472_v43, 0 }
 0x566   : > { %v13419_v58 = vadd.f32 %v4419_v5, %v4355_v2  ;;  %v18751_v5 = vld [vmem:[#allocation26_spill] sm:$0xff]  ;;  %v13511_v2 = vand.u32 4294901760, %v4454_v16  ;;  %v4583_v10 = vsub.f32 %v13466_v1, %v4582_v0  ;;  %v4594_v7 = vand.u32 4294901760, %v13520_v17 }
 0x567   : > { %v4577_v11 = vsub.f32 %v13439_v44, %v4576_v3  ;;  %v3609_v53 = vadd.f32 %v18751_v5, %v18750_v42  ;;  %v13527_v25 = vadd.f32 %v18753_v8, %v3797_v32  ;;  %v3599_v15 = vadd.f32 %v18757_v24, %v18756_v6 }
 0x568   : > { %18735 = vst [vmem:[#allocation65_spill] sm:$0xff] %v13419_v58  ;;  %5090 = vrot.lane.b32.xlu0 %v13415_v21, %s10544_s22  ;;  %5098 = vrot.lane.b32.xlu2 %v13419_v58, %s10544_s22  ;;  %v4469_v18 = vsel %vm4422_vm1, %v13419_v58, 0  ;;  %v4584_v63 = vand.u32 4294901760, %v4583_v10  ;;  %v13546_v23 = vsub.f32 %v4454_v16, %v13511_v2  ;;  %v4590_v48 = vand.u32 4294901760, %v4589_v39 }
 0x569   : > { %5070 = vrot.lane.b32.xlu1 %v13424_v22, %s10544_s22  ;;  %v13436_v45 = vand.u32 4294901760, %v4469_v18  ;;  %v4578_v62 = vand.u32 4294901760, %v4577_v11  ;;  %v3688_v49 = vadd.f32 %v18754_v59, %v3609_v53  ;;  %v4595_v33 = vsub.f32 %v13520_v17, %v4594_v7  ;;  %v18761_v59 = vld [vmem:[#allocation19_spill] sm:$0xff] }
 0x56a   : > { %v4496_v27 = vsub.f32 %v4424_v35, %v13536_v51  ;;  %v13566_v13 = vsub.f32 %v4451_v41, %v13550_v9  ;;  %v13568_v12 = vand.u32 4294901760, %v4448_v60  ;;  %v4427_v16 = vsel %vm4422_vm1, %v13424_v22, 0 }
 0x56b   : > { %4480 = vmatpush.xpose.msrb.mxu0 %v13436_v45  ;;  %4731 = vmatpush.xpose.msra.mxu3 %v13436_v45  ;;  %v13453_v34 = vsub.f32 %v4469_v18, %v13436_v45  ;;  %v18752_v18 = vld [vmem:[#allocation103_spill] sm:$0xff]  ;;  %v3789_v31 = vadd.f32 %v18755_v61, %v3688_v49  ;;  %v4596_v26 = vand.u32 4294901760, %v4595_v33  ;;  %v13587_v5 = vand.u32 4294901760, %v4427_v16  ;;  %v18762_v49 = vld [vmem:[#allocation34_spill] sm:$0xff]  ;;  %v18764_v33 = vld [vmem:[#allocation37_spill] sm:$0xff] }
 0x56c   : > { %v13524_v38 = vadd.f32 %v18752_v18, %v3777_v46  ;;  %v3676_v46 = vadd.f32 %v18759_v19, %v3599_v15  ;;  %v4497_v42 = vand.u32 4294901760, %v4496_v27  ;;  %v13591_v53 = vsub.f32 %v4448_v60, %v13568_v12  ;;  %v18763_v60 = vld [vmem:[#allocation39_spill] sm:$0xff] }
 0x56d   : > { %4659 = vmatpush.xpose.msra.mxu2 %v13453_v34  ;;  %v4570_v54 = vand.u32 4294901760, %v13453_v34  ;;  %v4606_v35 = vand.u32 4294901760, %v13566_v13  ;;  %v4504_v41 = vsub.f32 %v4427_v16, %v13587_v5 }
 0x56e   : > { %v4498_v8 = vsub.f32 %v4496_v27, %v4497_v42  ;;  %v4612_v61 = vand.u32 4294901760, %v13591_v53 }
 0x56f   : > { %4482 = vmatpush.xpose.msrb.mxu0 %v13413_v37  ;;  %4733 = vmatpush.xpose.msra.mxu3 %v13413_v37  ;;  %v4571_v28 = vsub.f32 %v13453_v34, %v4570_v54  ;;  %v4607_v39 = vsub.f32 %v13566_v13, %v4606_v35  ;;  %v4505_v15 = vand.u32 4294901760, %v4504_v41 }
 0x570   : > { %5084 = vrot.lane.b32.xlu0 %v13472_v43, %s10544_s22  ;;  %5092 = vrot.lane.b32.xlu2 %v13417_v55, %s10544_s22  ;;  %v4499_v24 = vand.u32 4294901760, %v4498_v8 }
 0x571   : > { %5076 = vrot.lane.b32.xlu1 %v13476_v29, %s10544_s22  ;;  %4662 = vmatpush.xpose.msra.mxu2 %v13439_v44  ;;  %v4572_v57 = vand.u32 4294901760, %v4571_v28  ;;  %v4600_v28 = vand.u32 4294901760, %v13546_v23  ;;  %v4608_v34 = vand.u32 4294901760, %v4607_v39 }
 0x573   : > { %4484 = vmatpush.xpose.msrb.mxu0 %v13441_v52  ;;  %4573 = vmatpush.xpose.msrb.mxu1 %v4572_v57  ;;  %v18758_v57 = vld [vmem:[#allocation45_spill] sm:$0xff]  ;;  %v4601_v32 = vsub.f32 %v13546_v23, %v4600_v28 }
 0x574   : > { %4735 = vmatpush.xpose.msra.mxu3 %v13441_v52  ;;  %v13573_v11 = vadd.f32 %v18758_v57, %v3789_v31  ;;  %v4430_v31 = vsel %vm4422_vm1, %v13524_v38, 0  ;;  %v18765_v57 = vld [vmem:[#allocation50_spill] sm:$0xff] }
 0x575   : > { %4665 = vmatpush.xpose.msra.mxu2 %v13466_v1  ;;  %v4602_v18 = vand.u32 4294901760, %v4601_v32 }
 0x577   : > { %4486 = vmatpush.xpose.msrb.mxu0 %v13468_v40  ;;  %4579 = vmatpush.xpose.msrb.mxu1 %v4578_v62  ;;  %v18760_v62 = vld [vmem:[#allocation42_spill] sm:$0xff] }
 0x578   : > { %4737 = vmatpush.xpose.msra.mxu3 %v13468_v40  ;;  %5088 = vrot.lane.b32.xlu2 %v13459_v4, %s10544_s22  ;;  %v3781_v10 = vadd.f32 %v18760_v62, %v3676_v46  ;;  %v4506_v46 = vsub.f32 %v4504_v41, %v4505_v15 }
 0x579   : > { %5072 = vrot.lane.b32.xlu0 %v13524_v38, %s10544_s22  ;;  %5082 = vrot.lane.b32.xlu1 %v13527_v25, %s10544_s22 }
 0x57a   : > { %4668 = vmatpush.xpose.msra.mxu2 %v13502_v30  ;;  %v13608_v6 = vadd.f32 %v18763_v60, %v3781_v10  ;;  %v18766_v10 = vld [vmem:[#allocation48_spill] sm:$0xff]  ;;  %v4507_v44 = vand.u32 4294901760, %v4506_v46 }
 0x57b   : > { %4488 = vmatpush.xpose.msrb.mxu0 %v13491_v56  ;;  %4585 = vmatpush.xpose.msrb.mxu1 %v4584_v63  ;;  %v3614_v63 = vadd.f32 %v18762_v49, %v18761_v59 }
 0x57c   : > { %4739 = vmatpush.xpose.msra.mxu3 %v13491_v56  ;;  %v4433_v62 = vsel %vm4422_vm1, %v13608_v6, 0 }
 0x57d   : > { %v3694_v16 = vadd.f32 %v18764_v33, %v3614_v63 }
 0x57e   : > { %4671 = vmatpush.xpose.msra.mxu2 %v13520_v17  ;;  %v4439_v17 = vsel %vm4422_vm1, %v13573_v11, 0 }
 0x57f   : > { %4490 = vmatpush.xpose.msrb.mxu0 %v13511_v2  ;;  %4591 = vmatpush.xpose.msrb.mxu1 %v4590_v48  ;;  %v13618_v48 = vand.u32 4294901760, %v4430_v31  ;;  %v3793_v19 = vadd.f32 %v18765_v57, %v3694_v16 }
 0x580   : > { %4741 = vmatpush.xpose.msra.mxu3 %v13511_v2  ;;  %5068 = vrot.lane.b32.xlu2 %v13485_v47, %s10544_s22 }
 0x581   : > { %5078 = vrot.lane.b32.xlu0 %v13573_v11, %s10544_s22  ;;  %5754 = vrot.lane.b32.xlu1 %v13385_v50, %s10545_s29 }
 0x582   : > { %4674 = vmatpush.xpose.msra.mxu2 %v13546_v23 }
 0x583   : > { %4492 = vmatpush.xpose.msrb.mxu0 %v13550_v9  ;;  %4597 = vmatpush.xpose.msrb.mxu1 %v4596_v26  ;;  %v4512_v26 = vsub.f32 %v4430_v31, %v13618_v48 }
 0x584   : > { %4743 = vmatpush.xpose.msra.mxu3 %v13550_v9 }
 0x586   : > { %4677 = vmatpush.xpose.msra.mxu2 %v13566_v13 }
 0x587   : > { %4494 = vmatpush.xpose.msrb.mxu0 %v13568_v12  ;;  %4603 = vmatpush.xpose.msrb.mxu1 %v4602_v18  ;;  %v13634_v18 = vadd.f32 %v18766_v10, %v3793_v19 }
 0x588   : > { %4745 = vmatpush.xpose.msra.mxu3 %v13568_v12  ;;  %5074 = vrot.lane.b32.xlu2 %v13608_v6, %s10544_s22 }
 0x589   : > { %5752 = vrot.lane.b32.xlu0 %v13417_v55, %s10545_s29  ;;  %6416 = vrot.lane.b32.xlu1 %v13395_v36, %s10546_s9  ;;  %v4442_v13 = vsel %vm4422_vm1, %v13634_v18, 0 }
 0x58a   : > { %4680 = vmatpush.xpose.msra.mxu2 %v13591_v53  ;;  %4500 = vmatmul.f32.vlgmr.msrb.gmra.mxu0 %v4499_v24 }
 0x58b   : > { %4806 = vmatpush.xpose.msra.mxu0 %v4570_v54  ;;  %v4613_v54 = vsub.f32 %v13591_v53, %v4612_v61  ;;  %4749 = vmatmul.f32.vlgmr.msra.gmra.mxu3 %v4497_v42  ;;  %v4445_v53 = vsel %vm4422_vm1, %v13527_v25, 0 }
 0x58c   : > { %4609 = vmatpush.xpose.msrb.mxu1 %v4608_v34  ;;  %v13706_v63 = vand.u32 4294901760, %v4445_v53 }
 0x58d   : > { %4683 = vmatmul.f32.vlgmr.msra.gmra.mxu2 %v4496_v27  ;;  %v4614_v32 = vand.u32 4294901760, %v4613_v54  ;;  %v13641_v27 = vand.u32 4294901760, %v4433_v62 }
 0x58e   : > { %v4552_v39 = vsub.f32 %v4445_v53, %v13706_v63 }
 0x58f   : > { %4810 = vmatpush.xpose.msra.mxu0 %v4576_v3  ;;  %v4513_v3 = vand.u32 4294901760, %v4512_v26  ;;  %v4520_v1 = vsub.f32 %v4433_v62, %v13641_v27 }
 0x590   : > { %4615 = vmatpush.xpose.msrb.mxu1 %v4614_v32  ;;  %5080 = vrot.lane.b32.xlu2 %v13634_v18, %s10544_s22  ;;  %v4553_v31 = vand.u32 4294901760, %v4552_v39  ;;  %s9700_s22 = scalar_lea.sflag [#allocation4], %s10708_s21 }
 0x591   : > { %5758 = vrot.lane.b32.xlu0 %v13419_v58, %s10545_s29  ;;  %5740 = vrot.lane.b32.xlu1 %v13634_v18, %s10545_s29  ;;  %v4521_v30 = vand.u32 4294901760, %v4520_v1 }
 0x592   : > { %4508 = vmatmul.f32.gmra.mxu0 %v4507_v44  ;;  %v4554_v60 = vsub.f32 %v4552_v39, %v4553_v31 }
 0x593   : > { %4814 = vmatpush.xpose.msra.mxu0 %v4582_v0  ;;  %4617 = vmatmul.f32.vlgmr.msrb.gmra.mxu1 %v13536_v51  ;;  %v4436_v0 = vsel %vm4422_vm1, %v13476_v29, 0 }
 0x594   : > { %4877 = vmatpush.xpose.msra.mxu1 %v13436_v45  ;;  %4755 = vmatmul.f32.gmra.mxu3 %v4505_v15  ;;  %v4514_v45 = vsub.f32 %v4512_v26, %v4513_v3  ;;  %v4555_v24 = vand.u32 4294901760, %v4554_v60 }
 0x595   : > { %4688 = vmatmul.f32.gmra.mxu2 %v4504_v41  ;;  %v13693_v41 = vand.u32 4294901760, %v4442_v13 }
 0x596   : > { %v4515_v42 = vand.u32 4294901760, %v4514_v45 }
 0x597   : > { %4818 = vmatpush.xpose.msra.mxu0 %v4588_v14  ;;  %v13659_v14 = vand.u32 4294901760, %v4436_v0 }
 0x598   : > { %4879 = vmatpush.xpose.msra.mxu1 %v13413_v37  ;;  %5756 = vrot.lane.b32.xlu2 %v13395_v36, %s10545_s29  ;;  %v4522_v37 = vsub.f32 %v4520_v1, %v4521_v30 }
 0x599   : > { %5748 = vrot.lane.b32.xlu0 %v13459_v4, %s10545_s29  ;;  %5742 = vrot.lane.b32.xlu1 %v13527_v25, %s10545_s29 }
 0x59a   : > { %4516 = vmatmul.f32.gmra.mxu0 %v4515_v42 }
 0x59b   : > { %4822 = vmatpush.xpose.msra.mxu0 %v4594_v7  ;;  %4621 = vmatmul.f32.gmra.mxu1 %v13587_v5  ;;  %v4523_v7 = vand.u32 4294901760, %v4522_v37 }
 0x59c   : > { %4881 = vmatpush.xpose.msra.mxu1 %v13441_v52  ;;  %4761 = vmatmul.f32.gmra.mxu3 %v4513_v3  ;;  %v4528_v52 = vsub.f32 %v4436_v0, %v13659_v14 }
 0x59d   : > { %4693 = vmatmul.f32.gmra.mxu2 %v4512_v26 }
 0x59e   : > { %v4529_v23 = vand.u32 4294901760, %v4528_v52 }
 0x59f   : > { %4826 = vmatpush.xpose.msra.mxu0 %v4600_v28  ;;  %v13677_v28 = vand.u32 4294901760, %v4439_v17 }
 0x5a0   : > { %4883 = vmatpush.xpose.msra.mxu1 %v13468_v40  ;;  %5750 = vrot.lane.b32.xlu2 %v13415_v21, %s10545_s29  ;;  %v4530_v40 = vsub.f32 %v4528_v52, %v4529_v23 }
 0x5a1   : > { %5744 = vrot.lane.b32.xlu0 %v13472_v43, %s10545_s29  ;;  %6404 = vrot.lane.b32.xlu1 %v13472_v43, %s10546_s9 }
 0x5a2   : > { %4524 = vmatmul.f32.gmra.mxu0 %v4523_v7 }
 0x5a3   : > { %4830 = vmatpush.xpose.msra.mxu0 %v4606_v35  ;;  %4625 = vmatmul.f32.gmra.mxu1 %v13618_v48  ;;  %v4531_v35 = vand.u32 4294901760, %v4530_v40 }
 0x5a4   : > { %4885 = vmatpush.xpose.msra.mxu1 %v13491_v56  ;;  %4767 = vmatmul.f32.gmra.mxu3 %v4521_v30  ;;  %v4536_v56 = vsub.f32 %v4439_v17, %v13677_v28 }
 0x5a5   : > { %4698 = vmatmul.f32.gmra.mxu2 %v4520_v1 }
 0x5a6   : > { %v4537_v8 = vand.u32 4294901760, %v4536_v56 }
 0x5a7   : > { %4834 = vmatpush.xpose.msra.mxu0 %v4612_v61 }
 0x5a8   : > { %4887 = vmatpush.xpose.msra.mxu1 %v13511_v2  ;;  %5746 = vrot.lane.b32.xlu2 %v13393_v20, %s10545_s29  ;;  %v4538_v2 = vsub.f32 %v4536_v56, %v4537_v8 }
 0x5a9   : > { %5730 = vrot.lane.b32.xlu0 %v13424_v22, %s10545_s29  ;;  %6390 = vrot.lane.b32.xlu1 %v13424_v22, %s10546_s9 }
 0x5aa   : > { %4532 = vmatmul.f32.gmra.mxu0 %v4531_v35  ;;  %v4539_v59 = vand.u32 4294901760, %v4538_v2 }
 0x5ab   : > { %4629 = vmatmul.f32.gmra.mxu1 %v13641_v27 }
 0x5ac   : > { %4889 = vmatpush.xpose.msra.mxu1 %v13550_v9  ;;  %4773 = vmatmul.f32.gmra.mxu3 %v4529_v23  ;;  %v4544_v9 = vsub.f32 %v4442_v13, %v13693_v41 }
 0x5ad   : > { %4703 = vmatmul.f32.gmra.mxu2 %v4528_v52 }
 0x5ae   : > { %v4545_v49 = vand.u32 4294901760, %v4544_v9 }
 0x5b0   : > { %4891 = vmatpush.xpose.msra.mxu1 %v13568_v12  ;;  %5728 = vrot.lane.b32.xlu2 %v13485_v47, %s10545_s29  ;;  %v4546_v12 = vsub.f32 %v4544_v9, %v4545_v49 }
 0x5b1   : > { %5734 = vrot.lane.b32.xlu0 %v13608_v6, %s10545_s29  ;;  %6396 = vrot.lane.b32.xlu1 %v13476_v29, %s10546_s9 }
 0x5b2   : > { %4540 = vmatmul.f32.gmra.mxu0 %v4539_v59  ;;  %v4547_v61 = vand.u32 4294901760, %v4546_v12 }
 0x5b3   : > { %4633 = vmatmul.f32.gmra.mxu1 %v13659_v14 }
 0x5b4   : > { %4779 = vmatmul.f32.gmra.mxu3 %v4537_v8 }
 0x5b5   : > { %4708 = vmatmul.f32.gmra.mxu2 %v4536_v56 }
 0x5b8   : > { %5732 = vrot.lane.b32.xlu2 %v13524_v38, %s10545_s29 }
 0x5b9   : > { %5736 = vrot.lane.b32.xlu0 %v13476_v29, %s10545_s29  ;;  %6400 = vrot.lane.b32.xlu1 %v13634_v18, %s10546_s9 }
 0x5ba   : > { %4548 = vmatmul.f32.gmra.mxu0 %v4547_v61 }
 0x5bb   : > { %4637 = vmatmul.f32.gmra.mxu1 %v13677_v28 }
 0x5bc   : > { %4785 = vmatmul.f32.gmra.mxu3 %v4545_v49 }
 0x5bd   : > { %4713 = vmatmul.f32.gmra.mxu2 %v4544_v9 }
 0x5c0   : > { %6408 = vrot.lane.b32.xlu2 %v13459_v4, %s10546_s9 }
 0x5c1   : > { %5738 = vrot.lane.b32.xlu0 %v13573_v11, %s10545_s29  ;;  %7076 = vrot.lane.b32.xlu1 %v13395_v36, %s10547_s18  ;;  %s10442_s29 = sshra.s32 %s9724_s16, 4  ;;  %s10443_s29 = int_to_ptr.hbm [resolvable:$true] %s10442_s29 }
 0x5c2   : > { %v5099_v15 = vpop.permute.xlu2 %5098  ;;  %4556 = vmatmul.f32.gmra.mxu0 %v4555_v24  ;;  %p10449_p9 = scmp.lt.s32.totalorder %s10443_s29, %s17969_s5 }
 0x5c3   : > { %v5130_v33 = vsel %vm4422_vm1, %v5099_v15, 0  ;;  %4641 = vmatmul.f32.gmra.mxu1 %v13693_v41 }
 0x5c4   : > { %v13729_v16 = vand.u32 4294901760, %v5130_v33  ;;  %4791 = vmatmul.f32.gmra.mxu3 %v4553_v31 }
 0x5c5   : > { %4718 = vmatmul.f32.gmra.mxu2 %v4552_v39 }
 0x5c6   : > { %v13732_v34 = vsub.f32 %v5130_v33, %v13729_v16  ;;  %5141 = vmatpush.xpose.msrb.mxu2 %v13729_v16  ;;  %5392 = vmatpush.xpose.msrb.mxu1 %v13729_v16 }
 0x5c8   : > { %v5231_v54 = vand.u32 4294901760, %v13732_v34  ;;  %5320 = vmatpush.xpose.msrb.mxu0 %v13732_v34  ;;  %6394 = vrot.lane.b32.xlu2 %v13608_v6, %s10546_s9 }
 0x5c9   : > { %6414 = vrot.lane.b32.xlu0 %v13385_v50, %s10546_s9  ;;  %7068 = vrot.lane.b32.xlu1 %v13459_v4, %s10547_s18 }
 0x5ca   : > { %v5232_v57 = vsub.f32 %v13732_v34, %v5231_v54  ;;  %v5095_v19 = vpop.permute.xlu1 %5094  ;;  %v5093_v46 = vpop.permute.xlu2 %5092  ;;  %4836 = vmatmul.f32.vlgmr.msra.gmra.mxu0 %v13536_v51 }
 0x5cb   : > { %4645 = vmatmul.f32.gmra.mxu1 %v13706_v63  ;;  %v5126_v32 = vsel %vm4422_vm1, %v5095_v19, 0  ;;  %v5124_v10 = vsel %vm4422_vm1, %v5093_v46, 0 }
 0x5cc   : > { %v5233_v26 = vand.u32 4294901760, %v5232_v57  ;;  %v13750_v62 = vand.u32 4294901760, %v5126_v32  ;;  %v13767_v30 = vand.u32 4294901760, %v5124_v10 }
 0x5ce   : > { %5234 = vmatpush.xpose.msrb.mxu3 %v5233_v26  ;;  %v13765_v42 = vsub.f32 %v5126_v32, %v13750_v62 }
 0x5d0   : > { %6398 = vrot.lane.b32.xlu2 %v13573_v11, %s10546_s9  ;;  %v5243_v17 = vand.u32 4294901760, %v13765_v42 }
 0x5d1   : > { %6418 = vrot.lane.b32.xlu0 %v13419_v58, %s10546_s9  ;;  %7064 = vrot.lane.b32.xlu1 %v13472_v43, %s10547_s18 }
 0x5d2   : > { %v5097_v44 = vpop.permute.xlu0 %5096  ;;  %v5087_v3 = vpop.permute.xlu1 %5086  ;;  %4840 = vmatmul.f32.gmra.mxu0 %v13587_v5  ;;  %v5244_v9 = vsub.f32 %v13765_v42, %v5243_v17 }
 0x5d3   : > { %v5128_v45 = vsel %vm4422_vm1, %v5097_v44, 0  ;;  %v5089_v1 = vpop.permute.xlu2 %5088  ;;  %4893 = vmatmul.f32.vlgmr.msra.gmra.mxu1 %v13536_v51  ;;  %v13777_v51 = vsub.f32 %v5124_v10, %v13767_v30  ;;  %v5118_v59 = vsel %vm4422_vm1, %v5087_v3, 0 }
 0x5d4   : > { %v13762_v0 = vand.u32 4294901760, %v5128_v45  ;;  %v5120_v40 = vsel %vm4422_vm1, %v5089_v1, 0  ;;  %v13811_v39 = vand.u32 4294901760, %v5118_v59  ;;  %v5245_v31 = vand.u32 4294901760, %v5244_v9 }
 0x5d5   : > { %v5249_v53 = vand.u32 4294901760, %v13777_v51  ;;  %v13803_v49 = vand.u32 4294901760, %v5120_v40 }
 0x5d6   : > { %v13770_v37 = vsub.f32 %v5128_v45, %v13762_v0  ;;  %5143 = vmatpush.xpose.msrb.mxu2 %v13762_v0  ;;  %5394 = vmatpush.xpose.msrb.mxu1 %v13762_v0  ;;  %v13838_v26 = vsub.f32 %v5118_v59, %v13811_v39 }
 0x5d7   : > { %v5250_v60 = vsub.f32 %v13777_v51, %v5249_v53  ;;  %v13822_v24 = vsub.f32 %v5120_v40, %v13803_v49 }
 0x5d8   : > { %5323 = vmatpush.xpose.msrb.mxu0 %v13770_v37  ;;  %v5237_v52 = vand.u32 4294901760, %v13770_v37  ;;  %6402 = vrot.lane.b32.xlu2 %v13527_v25, %s10546_s9 }
 0x5d9   : > { %6412 = vrot.lane.b32.xlu0 %v13417_v55, %s10546_s9  ;;  %7050 = vrot.lane.b32.xlu1 %v13424_v22, %s10547_s18  ;;  %v5251_v10 = vand.u32 4294901760, %v5250_v60 }
 0x5da   : > { %v5091_v7 = vpop.permute.xlu0 %5090  ;;  %v5238_v23 = vsub.f32 %v13770_v37, %v5237_v52  ;;  %5145 = vmatpush.xpose.msrb.mxu2 %v13750_v62  ;;  %4844 = vmatmul.f32.gmra.mxu0 %v13618_v48 }
 0x5db   : > { %v5122_v56 = vsel %vm4422_vm1, %v5091_v7, 0  ;;  %v5071_v13 = vpop.permute.xlu1 %5070  ;;  %v5069_v35 = vpop.permute.xlu2 %5068  ;;  %4897 = vmatmul.f32.gmra.mxu1 %v13587_v5 }
 0x5dc   : > { %v13793_v8 = vand.u32 4294901760, %v5122_v56  ;;  %5326 = vmatpush.xpose.msrb.mxu0 %v13765_v42  ;;  %v5239_v2 = vand.u32 4294901760, %v5238_v23  ;;  %5396 = vmatpush.xpose.msrb.mxu1 %v13750_v62  ;;  %v5100_v5 = vsel %vm4422_vm1, %v5069_v35, 0  ;;  %v5102_v44 = vsel %vm4422_vm1, %v5071_v13, 0 }
 0x5dd   : > { %v13813_v61 = vand.u32 4294901760, %v5100_v5  ;;  %v13853_v1 = vand.u32 4294901760, %v5102_v44  ;;  %v5267_v13 = vand.u32 4294901760, %v13838_v26 }
 0x5de   : > { %v13806_v12 = vsub.f32 %v5122_v56, %v13793_v8  ;;  %5240 = vmatpush.xpose.msrb.mxu3 %v5239_v2  ;;  %5147 = vmatpush.xpose.msrb.mxu2 %v13767_v30 }
 0x5df   : > { %v13841_v32 = vsub.f32 %v5100_v5, %v13813_v61  ;;  %v13878_v59 = vsub.f32 %v5102_v44, %v13853_v1 }
 0x5e0   : > { %5329 = vmatpush.xpose.msrb.mxu0 %v13777_v51  ;;  %5398 = vmatpush.xpose.msrb.mxu1 %v13767_v30  ;;  %v5255_v33 = vand.u32 4294901760, %v13806_v12 }
 0x5e1   : > { %6410 = vrot.lane.b32.xlu0 %v13415_v21, %s10546_s9  ;;  %7074 = vrot.lane.b32.xlu2 %v13385_v50, %s10547_s18  ;;  %v5158_v7 = vand.u32 4294901760, %v13841_v32 }
 0x5e2   : > { %7054 = vrot.lane.b32.xlu1 %v13608_v6, %s10547_s18  ;;  %v5085_v15 = vpop.permute.xlu0 %5084  ;;  %5149 = vmatpush.xpose.msrb.mxu2 %v13793_v8  ;;  %v5256_v45 = vsub.f32 %v13806_v12, %v5255_v33 }
 0x5e3   : > { %v5116_v57 = vsel %vm4422_vm1, %v5085_v15, 0  ;;  %5246 = vmatpush.xpose.msrb.mxu3 %v5245_v31  ;;  %v13831_v19 = vpop.permute.xlu1 %5076  ;;  %v13833_v46 = vpop.permute.xlu2 %5074  ;;  %4848 = vmatmul.f32.gmra.mxu0 %v13641_v27  ;;  %v5159_v5 = vsub.f32 %v13841_v32, %v5158_v7  ;;  %v5268_v15 = vsub.f32 %v13838_v26, %v5267_v13 }
 0x5e4   : > { %4901 = vmatmul.f32.gmra.mxu1 %v13618_v48  ;;  %5332 = vmatpush.xpose.msrb.mxu0 %v13806_v12  ;;  %v13846_v3 = vand.u32 4294901760, %v5116_v57  ;;  %v5261_v48 = vand.u32 4294901760, %v13822_v24  ;;  %v5257_v40 = vand.u32 4294901760, %v5256_v45 }
 0x5e5   : > { %5400 = vmatpush.xpose.msrb.mxu1 %v13793_v8  ;;  %v5269_v45 = vand.u32 4294901760, %v5268_v15 }
 0x5e6   : > { %5151 = vmatpush.xpose.msrb.mxu2 %v13803_v49  ;;  %v13860_v23 = vsub.f32 %v5116_v57, %v13846_v3  ;;  %v5262_v56 = vsub.f32 %v13822_v24, %v5261_v48 }
 0x5e7   : > { %5252 = vmatpush.xpose.msrb.mxu3 %v5251_v10  ;;  %v5160_v10 = vand.u32 4294901760, %v5159_v5 }
 0x5e8   : > { %5335 = vmatpush.xpose.msrb.mxu0 %v13822_v24  ;;  %v5263_v60 = vand.u32 4294901760, %v5262_v56  ;;  %v5273_v57 = vand.u32 4294901760, %v13860_v23 }
 0x5e9   : > { %5402 = vmatpush.xpose.msrb.mxu1 %v13803_v49  ;;  %6406 = vrot.lane.b32.xlu0 %v13393_v20, %s10546_s9 }
 0x5ea   : > { %7736 = vrot.lane.b32.xlu2 %v13395_v36, %s10548_s11  ;;  %7056 = vrot.lane.b32.xlu1 %v13476_v29, %s10547_s18  ;;  %v5274_v34 = vsub.f32 %v13860_v23, %v5273_v57 }
 0x5eb   : > { %5153 = vmatpush.xpose.msrb.mxu2 %v13811_v39  ;;  %v5073_v35 = vpop.permute.xlu0 %5072  ;;  %v13872_v2 = vpop.permute.xlu1 %5082  ;;  %5258 = vmatpush.xpose.msrb.mxu3 %v5257_v40 }
 0x5ec   : > { %v13874_v9 = vpop.permute.xlu2 %5080  ;;  %4852 = vmatmul.f32.gmra.mxu0 %v13659_v14  ;;  %v5104_v31 = vsel %vm4422_vm1, %v5073_v35, 0  ;;  %4905 = vmatmul.f32.gmra.mxu1 %v13641_v27  ;;  %v18189_v27 = vand.u32 4294901760, %v13878_v59  ;;  %v5275_v15 = vand.u32 4294901760, %v5274_v34 }
 0x5ed   : > { %5404 = vmatpush.xpose.msrb.mxu1 %v13811_v39  ;;  %5338 = vmatpush.xpose.msrb.mxu0 %v13838_v26  ;;  %v13894_v44 = vand.u32 4294901760, %v5104_v31 }
 0x5ee   : > { %v5167_v5 = vsub.f32 %v13878_v59, %v18189_v27 }
 0x5ef   : > { %5155 = vmatpush.xpose.msrb.mxu2 %v13846_v3  ;;  %5264 = vmatpush.xpose.msrb.mxu3 %v5263_v60  ;;  %v13910_v35 = vsub.f32 %v5104_v31, %v13894_v44  ;;  %v5106_v60 = vsel %vm4422_vm1, %v13833_v46, 0  ;;  %v5108_v31 = vsel %vm4422_vm1, %v13831_v19, 0 }
 0x5f0   : > { %v5168_v37 = vand.u32 4294901760, %v5167_v5 }
 0x5f1   : > { %5406 = vmatpush.xpose.msrb.mxu1 %v13846_v3  ;;  %6388 = vrot.lane.b32.xlu0 %v13485_v47, %s10546_s9 }
 0x5f2   : > { %5341 = vmatpush.xpose.msrb.mxu0 %v13860_v23  ;;  %7060 = vrot.lane.b32.xlu2 %v13634_v18, %s10547_s18 }
 0x5f3   : > { %5467 = vmatpush.xpose.msra.mxu2 %v5231_v54  ;;  %7058 = vrot.lane.b32.xlu1 %v13573_v11, %s10547_s18  ;;  %v5079_v54 = vpop.permute.xlu0 %5078  ;;  %v5755_v40 = vpop.permute.xlu1 %5754 }
 0x5f4   : > { %5161 = vmatmul.f32.vlgmr.msrb.gmra.mxu2 %v5160_v10  ;;  %5270 = vmatpush.xpose.msrb.mxu3 %v5269_v45  ;;  %v5757_v56 = vpop.permute.xlu2 %5756  ;;  %v13920_v10 = vand.u32 4294901760, %v5106_v60  ;;  %v5786_v5 = vsel %vm4422_vm1, %v5755_v40, 0  ;;  %v5110_v24 = vsel %vm4422_vm1, %v5079_v54, 0 }
 0x5f5   : > { %4856 = vmatmul.f32.gmra.mxu0 %v13677_v28  ;;  %4909 = vmatmul.f32.gmra.mxu1 %v13659_v14  ;;  %v14005_v54 = vand.u32 4294901760, %v5110_v24 }
 0x5f7   : > { %5471 = vmatpush.xpose.msra.mxu2 %v5237_v52  ;;  %v18188_v52 = vand.u32 4294901760, %v13910_v35 }
 0x5f8   : > { %5276 = vmatpush.xpose.msrb.mxu3 %v5275_v15 }
 0x5f9   : > { %6392 = vrot.lane.b32.xlu0 %v13524_v38, %s10546_s9  ;;  %v5175_v46 = vsub.f32 %v13910_v35, %v18188_v52  ;;  %s10444_s9 = scalar_lea.hbm %s10443_s29, 384 }
 0x5fa   : > { %7062 = vrot.lane.b32.xlu2 %v13527_v25, %s10547_s18  ;;  %p10445_p1 = scmp.ne.s32.totalorder %s10443_s29, %s10444_s9  ;;  %p10450_p10 = scmp.lt.s32.totalorder %s10448_s17, %s10444_s9 }
 0x5fb   : > { %5475 = vmatpush.xpose.msra.mxu2 %v5243_v17  ;;  %7734 = vrot.lane.b32.xlu1 %v13385_v50, %s10548_s11  ;;  %v5753_v14 = vpop.permute.xlu0 %5752  ;;  %v13935_v17 = vpop.permute.xlu1 %6416  ;;  %v5176_v45 = vand.u32 4294901760, %v5175_v46 }
 0x5fc   : > { %5538 = vmatpush.xpose.msra.mxu3 %v13729_v16  ;;  %5169 = vmatmul.f32.gmra.mxu2 %v5168_v37  ;;  %v13933_v42 = vpop.permute.xlu2 %5750  ;;  %v13939_v16 = vsub.f32 %v5106_v60, %v13920_v10  ;;  %v13995_v37 = vand.u32 4294901760, %v5786_v5  ;;  %v5784_v46 = vsel %vm4422_vm1, %v5753_v14, 0  ;;  %p10446_p4 = pnand %p10445_p1, %p10678_p3  ;;  %p10451_p2 = por %p10450_p10, %p10449_p9 }
 0x5fd   : > { %5278 = vmatmul.f32.vlgmr.msrb.gmra.mxu3 %v13813_v61  ;;  %4860 = vmatmul.f32.gmra.mxu0 %v13693_v41 }
 0x5fe   : > { %4913 = vmatmul.f32.gmra.mxu1 %v13677_v28  ;;  %v18185_v51 = vand.u32 4294901760, %v13939_v16  ;;  %v13959_v28 = vand.u32 4294901760, %v5108_v31  ;;  %p10447_p8 = pneg %p10446_p4 }
 0x5ff   : > { %5479 = vmatpush.xpose.msra.mxu2 %v5249_v53  ;;  %v5788_v53 = vsel %vm4422_vm1, %v5757_v56, 0 }
 0x600   : > { %5540 = vmatpush.xpose.msra.mxu3 %v13762_v0  ;;  %v13970_v19 = vand.u32 4294901760, %v5788_v53  ;;  %v5183_v56 = vsub.f32 %v13939_v16, %v18185_v51  ;;  %v13983_v60 = vsub.f32 %v5108_v31, %v13959_v28  ;;  %p10452_p11 = pnand %p10451_p2, %p10447_p8 }
 0x601   : > { %7078 = vrot.lane.b32.xlu0 %v13419_v58, %s10547_s18 }
 0x602   : > { %7724 = vrot.lane.b32.xlu2 %v13472_v43, %s10548_s11  ;;  %v18184_v26 = vand.u32 4294901760, %v13983_v60 }
 0x603   : > { %5483 = vmatpush.xpose.msra.mxu2 %v5255_v33  ;;  %7738 = vrot.lane.b32.xlu1 %v13419_v58, %s10548_s11  ;;  %v5759_v0 = vpop.permute.xlu0 %5758  ;;  %v13967_v33 = vpop.permute.xlu1 %5740 }
 0x604   : > { %5542 = vmatpush.xpose.msra.mxu3 %v13750_v62  ;;  %5177 = vmatmul.f32.gmra.mxu2 %v5176_v45  ;;  %v5790_v62 = vsel %vm4422_vm1, %v5759_v0, 0  ;;  %v13965_v12 = vpop.permute.xlu2 %5746  ;;  %v14019_v45 = vsub.f32 %v5786_v5, %v13995_v37  ;;  %v14034_v5 = vsub.f32 %v5110_v24, %v14005_v54  ;;  %v5191_v23 = vsub.f32 %v13983_v60, %v18184_v26 }
 0x605   : > { %5282 = vmatmul.f32.gmra.mxu3 %v13853_v1  ;;  %4864 = vmatmul.f32.gmra.mxu0 %v13706_v63  ;;  %v13972_v34 = vand.u32 4294901760, %v5790_v62 }
 0x606   : > { %4917 = vmatmul.f32.gmra.mxu1 %v13693_v41  ;;  %v5184_v41 = vand.u32 4294901760, %v5183_v56  ;;  %v5192_v51 = vand.u32 4294901760, %v5191_v23 }
 0x607   : > { %5487 = vmatpush.xpose.msra.mxu2 %v5261_v48  ;;  %v13986_v15 = vsub.f32 %v5790_v62, %v13972_v34  ;;  %5801 = vmatpush.xpose.msra.mxu0 %v13972_v34  ;;  %v13990_v48 = vpop.f32.mrf.mxu0  ;;  %v14027_v62 = vand.u32 4294901760, %v5784_v46 }
 0x608   : > { %5544 = vmatpush.xpose.msra.mxu3 %v13767_v30  ;;  %18767 = vst [vmem:[#allocation47_spill] sm:$0xff] %v13990_v48  ;;  %v13993_v30 = vsub.f32 %v5788_v53, %v13970_v19 }
 0x609   : > { %v18187_v40 = vand.u32 4294901760, %v13986_v15  ;;  %7072 = vrot.lane.b32.xlu0 %v13417_v55, %s10547_s18  ;;  %v18791_v58 = vand.u32 4294901760, %v13986_v15 }
 0x60a   : > { %7710 = vrot.lane.b32.xlu2 %v13424_v22, %s10548_s11  ;;  %v18186_v0 = vand.u32 4294901760, %v13993_v30 }
 0x60b   : > { %5491 = vmatpush.xpose.msra.mxu2 %v5267_v13  ;;  %v5892_v31 = vsub.f32 %v13986_v15, %v18187_v40  ;;  %7732 = vrot.lane.b32.xlu1 %v13417_v55, %s10548_s11  ;;  %v14015_v13 = vpop.permute.xlu1 %5742 }
 0x60c   : > { %5546 = vmatpush.xpose.msra.mxu3 %v13793_v8  ;;  %5185 = vmatmul.f32.gmra.mxu2 %v5184_v41  ;;  %v5749_v8 = vpop.permute.xlu0 %5748  ;;  %v14021_v14 = vpop.permute.xlu2 %5728  ;;  %v5782_v41 = vsel %vm4422_vm1, %v13933_v42, 0  ;;  %v5898_v42 = vsub.f32 %v13993_v30, %v18186_v0 }
 0x60d   : > { %5286 = vmatmul.f32.gmra.mxu3 %v13894_v44  ;;  %5344 = vmatmul.f32.vlgmr.msrb.gmra.mxu0 %v13841_v32  ;;  %v5893_v53 = vand.u32 4294901760, %v5892_v31  ;;  %v18190_v31 = vand.u32 4294901760, %v14019_v45  ;;  %v14058_v26 = vand.u32 4294901760, %v5782_v41 }
 0x60e   : > { %5803 = vmatpush.xpose.msra.mxu0 %v13970_v19  ;;  %4921 = vmatmul.f32.gmra.mxu1 %v13706_v63  ;;  %v14031_v56 = vpop.f32.mrf.mxu3 }
 0x60f   : > { %5495 = vmatpush.xpose.msra.mxu2 %v5273_v57  ;;  %18768 = vst [vmem:[#allocation68_spill] sm:$0xff] %v14031_v56  ;;  %5894 = vmatpush.xpose.msra.mxu1 %v5893_v53  ;;  %v14042_v57 = vpop.f32.mrf.mxu0  ;;  %v14056_v53 = vsub.f32 %v5784_v46, %v14027_v62  ;;  %v5904_v52 = vsub.f32 %v14019_v45, %v18190_v31 }
 0x610   : > { %5548 = vmatpush.xpose.msra.mxu3 %v13803_v49  ;;  %18769 = vst [vmem:[#allocation66_spill] sm:$0xff] %v14042_v57  ;;  %v14044_v63 = vpop.f32.mrf.mxu1  ;;  %v5112_v49 = vsel %vm4422_vm1, %v13874_v9, 0  ;;  %v14049_v24 = vpop.f32.mrf.mxu2  ;;  %v5780_v9 = vsel %vm4422_vm1, %v5749_v8, 0  ;;  %v5899_v8 = vand.u32 4294901760, %v5898_v42  ;;  %v14080_v23 = vsub.f32 %v5782_v41, %v14058_v26 }
 0x611   : > { %18770 = vst [vmem:[#allocation69_spill] sm:$0xff] %v14044_v63  ;;  %7070 = vrot.lane.b32.xlu0 %v13415_v21, %s10547_s18  ;;  %v14069_v40 = vand.u32 4294901760, %v5112_v49  ;;  %v14082_v27 = vand.u32 4294901760, %v5780_v9  ;;  %v18773_v41 = vand.u32 4294901760, %v14034_v5 }
 0x612   : > { %5805 = vmatpush.xpose.msra.mxu0 %v13995_v37  ;;  %18771 = vst [vmem:[#allocation54_spill] sm:$0xff] %v14049_v24  ;;  %7716 = vrot.lane.b32.xlu2 %v13476_v29, %s10548_s11  ;;  %v18191_v57 = vand.u32 4294901760, %v14080_v23 }
 0x613   : > { %5980 = vmatpush.xpose.msrb.mxu2 %v13986_v15  ;;  %7728 = vrot.lane.b32.xlu1 %v13459_v4, %s10548_s11  ;;  %v5199_v56 = vsub.f32 %v14034_v5, %v18773_v41  ;;  %v14099_v32 = vsub.f32 %v5112_v49, %v14069_v40  ;;  %v14114_v41 = vsub.f32 %v5780_v9, %v14082_v27  ;;  %v18777_v49 = vand.u32 4294901760, %v14056_v53 }
 0x614   : > { %5550 = vmatpush.xpose.msra.mxu3 %v13811_v39  ;;  %v5745_v0 = vpop.permute.xlu0 %5744  ;;  %v14073_v39 = vpop.permute.xlu1 %6404  ;;  %5193 = vmatmul.f32.gmra.mxu2 %v5192_v51  ;;  %v5778_v51 = vsel %vm4422_vm1, %v13965_v12, 0 }
 0x615   : > { %5290 = vmatmul.f32.gmra.mxu3 %v13920_v10  ;;  %5349 = vmatmul.f32.gmra.mxu0 %v13878_v59  ;;  %v14090_v42 = vpop.permute.xlu2 %5732  ;;  %v18783_v24 = vand.u32 4294901760, %v14099_v32 }
 0x616   : > { %5410 = vmatmul.f32.vlgmr.msrb.gmra.mxu1 %v5158_v7  ;;  %5807 = vmatpush.xpose.msra.mxu0 %v14027_v62 }
 0x617   : > { %5983 = vmatpush.xpose.msrb.mxu2 %v13993_v30  ;;  %5900 = vmatpush.xpose.msra.mxu1 %v5899_v8  ;;  %v14093_v31 = vpop.f32.mrf.mxu3  ;;  %v14103_v7 = vpop.f32.mrf.mxu0  ;;  %v5905_v8 = vand.u32 4294901760, %v5904_v52  ;;  %v5207_v63 = vsub.f32 %v14099_v32, %v18783_v24 }
 0x618   : > { %5552 = vmatpush.xpose.msra.mxu3 %v13846_v3  ;;  %18772 = vst [vmem:[#allocation71_spill] sm:$0xff] %v14093_v31  ;;  %v14105_v12 = vpop.f32.mrf.mxu1  ;;  %v5114_v3 = vsel %vm4422_vm1, %v13872_v2, 0  ;;  %v14109_v46 = vpop.f32.mrf.mxu2  ;;  %v14111_v31 = vand.u32 4294901760, %v5778_v51  ;;  %v5200_v2 = vand.u32 4294901760, %v5199_v56 }
 0x619   : > { %18774 = vst [vmem:[#allocation70_spill] sm:$0xff] %v14103_v7  ;;  %7066 = vrot.lane.b32.xlu0 %v13393_v20, %s10547_s18  ;;  %v14127_v9 = vand.u32 4294901760, %v5114_v3 }
 0x61a   : > { %18775 = vst [vmem:[#allocation72_spill] sm:$0xff] %v14105_v12  ;;  %5809 = vmatpush.xpose.msra.mxu0 %v14058_v26  ;;  %v5910_v12 = vsub.f32 %v14056_v53, %v18777_v49  ;;  %7720 = vrot.lane.b32.xlu2 %v13634_v18, %s10548_s11  ;;  %v14138_v56 = vsub.f32 %v5778_v51, %v14111_v31  ;;  %v18779_v49 = vand.u32 4294901760, %v13878_v59 }
 0x61b   : > { %5986 = vmatpush.xpose.msrb.mxu2 %v14019_v45  ;;  %18776 = vst [vmem:[#allocation52_spill] sm:$0xff] %v14109_v46  ;;  %5906 = vmatpush.xpose.msra.mxu1 %v5905_v8  ;;  %v5776_v46 = vsel %vm4422_vm1, %v5745_v0, 0  ;;  %v5916_v8 = vsub.f32 %v14080_v23, %v18191_v57 }
 0x61c   : > { %6052 = vmatpush.xpose.msrb.mxu3 %v13972_v34  ;;  %v14125_v52 = vpop.permute.xlu0 %5730  ;;  %7726 = vrot.lane.b32.xlu1 %v13393_v20, %s10548_s11  ;;  %v14133_v7 = vpop.permute.xlu1 %6390  ;;  %v5911_v0 = vand.u32 4294901760, %v5910_v12 }
 0x61d   : > { %18778 = vst [vmem:[#allocation73_spill] sm:$0xff] %v14133_v7  ;;  %5201 = vmatmul.f32.gmra.mxu2 %v5200_v2  ;;  %5294 = vmatmul.f32.gmra.mxu3 %v13959_v28  ;;  %v14146_v7 = vand.u32 4294901760, %v5776_v46  ;;  %v14154_v2 = vsub.f32 %v5114_v3, %v14127_v9  ;;  %v14164_v59 = vpop.permute.xlu2 %6408  ;;  %v18785_v3 = vand.u32 4294901760, %v14114_v41 }
 0x61e   : > { %5354 = vmatmul.f32.gmra.mxu0 %v13910_v35  ;;  %5416 = vmatmul.f32.gmra.mxu1 %v18779_v49 }
 0x61f   : > { %5989 = vmatpush.xpose.msrb.mxu2 %v14056_v53  ;;  %5811 = vmatpush.xpose.msra.mxu0 %v14082_v27  ;;  %v14151_v51 = vpop.f32.mrf.mxu3  ;;  %v14157_v12 = vpop.f32.mrf.mxu0 }
 0x620   : > { %6054 = vmatpush.xpose.msrb.mxu3 %v13970_v19  ;;  %18780 = vst [vmem:[#allocation75_spill] sm:$0xff] %v14151_v51  ;;  %5912 = vmatpush.xpose.msra.mxu1 %v5911_v0  ;;  %v14159_v57 = vpop.f32.mrf.mxu1  ;;  %v14167_v49 = vpop.f32.mrf.mxu2  ;;  %v5917_v51 = vand.u32 4294901760, %v5916_v8  ;;  %v5922_v0 = vsub.f32 %v14114_v41, %v18785_v3  ;;  %v5208_v8 = vand.u32 4294901760, %v5207_v63  ;;  %v18787_v63 = vand.u32 4294901760, %v13910_v35 }
 0x621   : > { %18781 = vst [vmem:[#allocation76_spill] sm:$0xff] %v14157_v12  ;;  %7048 = vrot.lane.b32.xlu0 %v13485_v47, %s10547_s18  ;;  %v18192_v12 = vand.u32 4294901760, %v14138_v56 }
 0x622   : > { %18782 = vst [vmem:[#allocation57_spill] sm:$0xff] %v14159_v57  ;;  %v14176_v57 = vsub.f32 %v5776_v46, %v14146_v7  ;;  %8396 = vrot.lane.b32.xlu2 %v13395_v36, %s10549_s14  ;;  %v5923_v46 = vand.u32 4294901760, %v5922_v0  ;;  %v18790_v0 = vand.u32 4294901760, %v14154_v2 }
 0x623   : > { %5992 = vmatpush.xpose.msrb.mxu2 %v14080_v23  ;;  %18784 = vst [vmem:[#allocation77_spill] sm:$0xff] %v14167_v49  ;;  %5813 = vmatpush.xpose.msra.mxu0 %v14111_v31 }
 0x624   : > { %6056 = vmatpush.xpose.msrb.mxu3 %v13995_v37  ;;  %v14181_v24 = vpop.permute.xlu0 %5734  ;;  %5918 = vmatpush.xpose.msra.mxu1 %v5917_v51  ;;  %v14185_v49 = vpop.permute.xlu1 %6396  ;;  %v5928_v51 = vsub.f32 %v14138_v56, %v18192_v12  ;;  %v5215_v12 = vsub.f32 %v14154_v2, %v18790_v0  ;;  %v18793_v15 = vand.u32 4294901760, %v14176_v57 }
 0x625   : > { %7708 = vrot.lane.b32.xlu1 %v13485_v47, %s10548_s11  ;;  %18786 = vst [vmem:[#allocation79_spill] sm:$0xff] %v14185_v49  ;;  %5209 = vmatmul.f32.gmra.mxu2 %v5208_v8 }
 0x626   : > { %5298 = vmatmul.f32.gmra.mxu3 %v14005_v54  ;;  %5359 = vmatmul.f32.gmra.mxu0 %v13939_v16  ;;  %v5216_v0 = vand.u32 4294901760, %v5215_v12 }
 0x627   : > { %5995 = vmatpush.xpose.msrb.mxu2 %v14114_v41  ;;  %5422 = vmatmul.f32.gmra.mxu1 %v18787_v63  ;;  %v14197_v49 = vpop.f32.mrf.mxu3  ;;  %v14201_v8 = vpop.f32.mrf.mxu0  ;;  %v5929_v63 = vand.u32 4294901760, %v5928_v51 }
 0x628   : > { %6058 = vmatpush.xpose.msrb.mxu3 %v14027_v62  ;;  %18788 = vst [vmem:[#allocation80_spill] sm:$0xff] %v14197_v49  ;;  %5815 = vmatpush.xpose.msra.mxu0 %v14146_v7  ;;  %v14203_v48 = vpop.f32.mrf.mxu1  ;;  %v14211_v35 = vpop.f32.mrf.mxu2  ;;  %v18795_v49 = vand.u32 4294901760, %v13993_v30  ;;  %v18799_v30 = vand.u32 4294901760, %v14019_v45 }
 0x629   : > { %5924 = vmatpush.xpose.msra.mxu1 %v5923_v46  ;;  %18789 = vst [vmem:[#allocation49_spill] sm:$0xff] %v14201_v8  ;;  %7052 = vrot.lane.b32.xlu0 %v13524_v38, %s10547_s18  ;;  %v14216_v46 = vpop.permute.xlu2 %6394 }
 0x62a   : > { %18792 = vst [vmem:[#allocation81_spill] sm:$0xff] %v14216_v46  ;;  %8388 = vrot.lane.b32.xlu2 %v13459_v4, %s10549_s14  ;;  %v18797_v46 = vand.u32 4294901760, %v13939_v16 }
 0x62b   : > { %5998 = vmatpush.xpose.msrb.mxu2 %v14138_v56 }
 0x62c   : > { %6127 = vmatpush.xpose.msrb.mxu0 %v18791_v58  ;;  %6060 = vmatpush.xpose.msrb.mxu3 %v14058_v26  ;;  %v14220_v3 = vpop.permute.xlu0 %5736  ;;  %v5934_v58 = vsub.f32 %v14176_v57, %v18793_v15  ;;  %v14227_v51 = vpop.permute.xlu1 %6400 }
 0x62d   : > { %5930 = vmatpush.xpose.msra.mxu1 %v5929_v63  ;;  %7714 = vrot.lane.b32.xlu1 %v13608_v6, %s10548_s11  ;;  %18794 = vst [vmem:[#allocation18_spill] sm:$0xff] %v14227_v51 }
 0x62e   : > { %5217 = vmatmul.f32.gmra.mxu2 %v5216_v0  ;;  %5302 = vmatmul.f32.gmra.mxu3 %v14069_v40  ;;  %v5935_v15 = vand.u32 4294901760, %v5934_v58  ;;  %v18802_v58 = vand.u32 4294901760, %v14056_v53 }
 0x62f   : > { %6001 = vmatpush.xpose.msrb.mxu2 %v14176_v57  ;;  %5364 = vmatmul.f32.gmra.mxu0 %v13983_v60  ;;  %v14235_v63 = vpop.f32.mrf.mxu3  ;;  %v4541_v12 = vpop.f32.mrf.mxu0 }
 0x630   : > { %6131 = vmatpush.xpose.msrb.mxu0 %v18795_v49  ;;  %6062 = vmatpush.xpose.msrb.mxu3 %v14082_v27  ;;  %18796 = vst [vmem:[#allocation21_spill] sm:$0xff] %v14235_v63  ;;  %v14239_v51 = vpop.f32.mrf.mxu1  ;;  %v14243_v49 = vpop.f32.mrf.mxu2 }
 0x631   : > { %5428 = vmatmul.f32.gmra.mxu1 %v18797_v46  ;;  %18798 = vst [vmem:[#allocation22_spill] sm:$0xff] %v14239_v51  ;;  %7730 = vrot.lane.b32.xlu0 %v13415_v21, %s10548_s11  ;;  %v14257_v45 = vpop.permute.xlu2 %6398 }
 0x632   : > { %5936 = vmatpush.xpose.msra.mxu1 %v5935_v15  ;;  %18800 = vst [vmem:[#allocation28_spill] sm:$0xff] %v14243_v49  ;;  %8384 = vrot.lane.b32.xlu2 %v13472_v43, %s10549_s14  ;;  %v18816_v49 = vand.u32 4294901760, %v14154_v2 }
 0x633   : > { %18801 = vst [vmem:[#allocation99_spill] sm:$0xff] %v14257_v45 }
 0x634   : > { %6135 = vmatpush.xpose.msrb.mxu0 %v18799_v30  ;;  %6064 = vmatpush.xpose.msrb.mxu3 %v14111_v31  ;;  %v14251_v16 = vpop.permute.xlu0 %5738  ;;  %v14255_v46 = vpop.permute.xlu1 %7076  ;;  %v18804_v30 = vand.u32 4294901760, %v14080_v23 }
 0x635   : > { %7718 = vrot.lane.b32.xlu1 %v13573_v11, %s10548_s11 }
 0x636   : > { %6198 = vmatpush.xpose.msrb.mxu1 %v13972_v34  ;;  %5306 = vmatmul.f32.gmra.mxu3 %v14127_v9  ;;  %v18803_v34 = vand.u32 4294901760, %v13983_v60 }
 0x637   : > { %5497 = vmatmul.f32.vlgmr.msra.gmra.mxu2 %v13813_v61  ;;  %5369 = vmatmul.f32.gmra.mxu0 %v14034_v5  ;;  %v4549_v0 = vpop.f32.mrf.mxu0  ;;  %v4780_v53 = vpop.f32.mrf.mxu3 }
 0x638   : > { %6139 = vmatpush.xpose.msrb.mxu0 %v18802_v58  ;;  %6066 = vmatpush.xpose.msrb.mxu3 %v14146_v7  ;;  %v4638_v15 = vpop.f32.mrf.mxu1  ;;  %v4709_v45 = vpop.f32.mrf.mxu2 }
 0x639   : > { %5434 = vmatmul.f32.gmra.mxu1 %v18803_v34  ;;  %v4639_v58 = vadd.f32 %v4638_v15, %v4541_v12  ;;  %7712 = vrot.lane.b32.xlu0 %v13524_v38, %s10548_s11  ;;  %v18805_v34 = vand.u32 4294901760, %v14114_v41  ;;  %v18808_v15 = vand.u32 4294901760, %v14034_v5 }
 0x63a   : > { %6200 = vmatpush.xpose.msrb.mxu1 %v13970_v19  ;;  %v5760_v19 = vsel %vm4422_vm1, %v14021_v14, 0  ;;  %8370 = vrot.lane.b32.xlu2 %v13424_v22, %s10549_s14 }
 0x63b   : > { %v4710_v63 = vadd.f32 %v4709_v45, %v4639_v58  ;;  %v14281_v12 = vand.u32 4294901760, %v5760_v19  ;;  %v6448_v45 = vsel %vm4422_vm1, %v13935_v17, 0  ;;  %v5762_v17 = vsel %vm4422_vm1, %v14125_v52, 0 }
 0x63c   : > { %6143 = vmatpush.xpose.msrb.mxu0 %v18804_v30  ;;  %v6415_v60 = vpop.permute.xlu0 %6414  ;;  %v14279_v23 = vpop.permute.xlu1 %7068 }
 0x63d   : > { %7722 = vrot.lane.b32.xlu1 %v13527_v25, %s10548_s11  ;;  %v14285_v14 = vadd.f32 %v4780_v53, %v4710_v63  ;;  %v14298_v63 = vsub.f32 %v5760_v19, %v14281_v12  ;;  %v6446_v52 = vsel %vm4422_vm1, %v6415_v60, 0 }
 0x63e   : > { %6202 = vmatpush.xpose.msrb.mxu1 %v13995_v37  ;;  %v14288_v37 = vpop.permute.xlu2 %6402  ;;  %5554 = vmatmul.f32.vlgmr.msra.gmra.mxu3 %v13813_v61  ;;  %v14303_v61 = vand.u32 4294901760, %v6448_v45 }
 0x63f   : > { %18806 = vst [vmem:[#allocation31_spill] sm:$0xff] %v14285_v14  ;;  %5501 = vmatmul.f32.gmra.mxu2 %v13853_v1  ;;  %5374 = vmatmul.f32.gmra.mxu0 %v14099_v32  ;;  %v4557_v41 = vpop.f32.mrf.mxu0 }
 0x640   : > { %6147 = vmatpush.xpose.msrb.mxu0 %v18805_v34  ;;  %18807 = vst [vmem:[#allocation35_spill] sm:$0xff] %v14288_v37  ;;  %v4642_v30 = vpop.f32.mrf.mxu1  ;;  %v4714_v58 = vpop.f32.mrf.mxu2 }
 0x641   : > { %5440 = vmatmul.f32.gmra.mxu1 %v18808_v15  ;;  %v4643_v53 = vadd.f32 %v4642_v30, %v4549_v0  ;;  %v4786_v34 = vpop.f32.mrf.mxu3  ;;  %8394 = vrot.lane.b32.xlu0 %v13385_v50, %s10549_s14  ;;  %v18195_v0 = vand.u32 4294901760, %v14298_v63  ;;  %v18810_v15 = vand.u32 4294901760, %v14176_v57  ;;  %v14335_v57 = vand.u32 4294901760, %v6446_v52 }
 0x642   : > { %6204 = vmatpush.xpose.msrb.mxu1 %v14027_v62  ;;  %v18809_v62 = vand.u32 4294901760, %v14138_v56  ;;  %8374 = vrot.lane.b32.xlu2 %v13608_v6, %s10549_s14 }
 0x643   : > { %v4715_v5 = vadd.f32 %v4714_v58, %v4643_v53  ;;  %v14328_v58 = vsub.f32 %v6448_v45, %v14303_v61  ;;  %v5819_v45 = vsub.f32 %v14298_v63, %v18195_v0 }
 0x644   : > { %6151 = vmatpush.xpose.msrb.mxu0 %v18809_v62  ;;  %v6419_v19 = vpop.permute.xlu0 %6418  ;;  %v14322_v62 = vand.u32 4294901760, %v5762_v17 }
 0x645   : > { %8390 = vrot.lane.b32.xlu1 %v13415_v21, %s10549_s14  ;;  %v6450_v56 = vsel %vm4422_vm1, %v6419_v19, 0  ;;  %v14325_v53 = vadd.f32 %v4786_v34, %v4715_v5  ;;  %v18812_v19 = vand.u32 4294901760, %v14099_v32 }
 0x646   : > { %6206 = vmatpush.xpose.msrb.mxu1 %v14058_v26  ;;  %v14314_v26 = vpop.permute.xlu1 %7064  ;;  %v14320_v30 = vand.u32 4294901760, %v6450_v56  ;;  %5558 = vmatmul.f32.gmra.mxu3 %v13853_v1  ;;  %v14345_v5 = vpop.permute.xlu2 %7074 }
 0x647   : > { %18811 = vst [vmem:[#allocation86_spill] sm:$0xff] %v14325_v53  ;;  %5505 = vmatmul.f32.gmra.mxu2 %v13894_v44  ;;  %5379 = vmatmul.f32.gmra.mxu0 %v14154_v2  ;;  %v14340_v34 = vpop.f32.mrf.mxu0 }
 0x648   : > { %6155 = vmatpush.xpose.msrb.mxu0 %v18810_v15  ;;  %v14333_v60 = vsub.f32 %v6450_v56, %v14320_v30  ;;  %6461 = vmatpush.xpose.msra.mxu2 %v14320_v30  ;;  %v14350_v15 = vsub.f32 %v5762_v17, %v14322_v62  ;;  %v4719_v32 = vpop.f32.mrf.mxu2 }
 0x649   : > { %5446 = vmatmul.f32.gmra.mxu1 %v18812_v19  ;;  %v5764_v19 = vsel %vm4422_vm1, %v14090_v42, 0  ;;  %8392 = vrot.lane.b32.xlu0 %v13417_v55, %s10549_s14 }
 0x64a   : > { %6208 = vmatpush.xpose.msrb.mxu1 %v14082_v27  ;;  %v4646_v27 = vpop.f32.mrf.mxu1  ;;  %v18196_v1 = vand.u32 4294901760, %v14333_v60  ;;  %8376 = vrot.lane.b32.xlu2 %v13476_v29, %s10549_s14  ;;  %v14374_v53 = vand.u32 4294901760, %v5764_v19 }
 0x64b   : > { %v4647_v56 = vadd.f32 %v4646_v27, %v4557_v41 }
 0x64c   : > { %v6552_v0 = vsub.f32 %v14333_v60, %v18196_v1  ;;  %v6413_v41 = vpop.permute.xlu0 %6412  ;;  %6463 = vmatpush.xpose.msra.mxu2 %v14303_v61 }
 0x64d   : > { %v4720_v37 = vadd.f32 %v4719_v32, %v4647_v56  ;;  %8386 = vrot.lane.b32.xlu1 %v13393_v20, %s10549_s14  ;;  %v6444_v42 = vsel %vm4422_vm1, %v6413_v41, 0  ;;  %v5820_v56 = vand.u32 4294901760, %v5819_v45  ;;  %v4792_v32 = vpop.f32.mrf.mxu3  ;;  %v18815_v45 = vand.u32 4294901760, %v14328_v58 }
 0x64e   : > { %6210 = vmatpush.xpose.msrb.mxu1 %v14111_v31  ;;  %v14364_v31 = vsub.f32 %v6446_v52, %v14335_v57  ;;  %v14369_v27 = vpop.permute.xlu1 %7050  ;;  %v14371_v1 = vand.u32 4294901760, %v6444_v42  ;;  %v6553_v17 = vand.u32 4294901760, %v6552_v0  ;;  %v18197_v52 = vand.u32 4294901760, %v14350_v15  ;;  %5562 = vmatmul.f32.gmra.mxu3 %v13894_v44 }
 0x64f   : > { %18813 = vst [vmem:[#allocation95_spill] sm:$0xff] %v14369_v27  ;;  %v14378_v14 = vadd.f32 %v4792_v32, %v4720_v37  ;;  %5509 = vmatmul.f32.gmra.mxu2 %v13920_v10  ;;  %v6558_v41 = vsub.f32 %v14328_v58, %v18815_v45  ;;  %5821 = vmatmul.f32.vlgmr.msra.gmra.mxu0 %v5820_v56  ;;  %v6440_v44 = vsel %vm4422_vm1, %v14164_v59, 0  ;;  %v14407_v56 = vpop.permute.xlu2 %7736 }
 0x650   : > { %v14386_v27 = vsub.f32 %v6444_v42, %v14371_v1  ;;  %v18198_v37 = vand.u32 4294901760, %v14364_v31  ;;  %6640 = vmatpush.xpose.msra.mxu0 %v14333_v60  ;;  %6465 = vmatpush.xpose.msra.mxu2 %v14335_v57  ;;  %v14400_v42 = vsub.f32 %v5764_v19, %v14374_v53  ;;  %v5827_v2 = vsub.f32 %v14350_v15, %v18197_v52 }
 0x651   : > { %18814 = vst [vmem:[#allocation85_spill] sm:$0xff] %v14378_v14  ;;  %5452 = vmatmul.f32.gmra.mxu1 %v18816_v49  ;;  %6554 = vmatpush.xpose.msra.mxu3 %v6553_v17  ;;  %v5766_v49 = vsel %vm4422_vm1, %v14181_v24, 0  ;;  %v6559_v19 = vand.u32 4294901760, %v6558_v41  ;;  %v14413_v32 = vand.u32 4294901760, %v6440_v44 }
 0x652   : > { %6212 = vmatpush.xpose.msrb.mxu1 %v14146_v7  ;;  %v14390_v7 = vpop.f32.mrf.mxu0  ;;  %v14392_v0 = vpop.f32.mrf.mxu1  ;;  %18818 = vst [vmem:[#allocation61_spill] sm:$0xff] %v14407_v56  ;;  %8378 = vrot.lane.b32.xlu0 %v13573_v11, %s10549_s14  ;;  %v6564_v24 = vsub.f32 %v14364_v31, %v18198_v37  ;;  %v14428_v41 = vand.u32 4294901760, %v5766_v49  ;;  %v5828_v56 = vand.u32 4294901760, %v5827_v2  ;;  %v18821_v2 = vand.u32 4294901760, %v14386_v27 }
 0x653   : > { %18817 = vst [vmem:[#allocation63_spill] sm:$0xff] %v14390_v7  ;;  %9056 = vrot.lane.b32.xlu2 %v13395_v36, %s10550_s1  ;;  %v14437_v52 = vsub.f32 %v6440_v44, %v14413_v32 }
 0x654   : > { %v6411_v59 = vpop.permute.xlu0 %6410  ;;  %6643 = vmatpush.xpose.msra.mxu0 %v14328_v58  ;;  %6467 = vmatpush.xpose.msra.mxu2 %v14371_v1 }
 0x655   : > { %8368 = vrot.lane.b32.xlu1 %v13485_v47, %s10549_s14  ;;  %v6442_v17 = vsel %vm4422_vm1, %v6411_v59, 0  ;;  %6560 = vmatpush.xpose.msra.mxu3 %v6559_v19  ;;  %v6570_v19 = vsub.f32 %v14386_v27, %v18821_v2  ;;  %v6436_v59 = vsel %vm4422_vm1, %v14073_v39, 0  ;;  %v5768_v39 = vsel %vm4422_vm1, %v14220_v3, 0 }
 0x656   : > { %v14418_v45 = vpop.permute.xlu1 %7054  ;;  %v14425_v36 = vand.u32 4294901760, %v6442_v17  ;;  %5566 = vmatmul.f32.gmra.mxu3 %v13920_v10 }
 0x657   : > { %18819 = vst [vmem:[#allocation91_spill] sm:$0xff] %v14418_v45  ;;  %5513 = vmatmul.f32.gmra.mxu2 %v13959_v28  ;;  %5829 = vmatmul.f32.gmra.mxu0 %v5828_v56  ;;  %v6565_v45 = vand.u32 4294901760, %v6564_v24  ;;  %v14453_v56 = vsub.f32 %v5766_v49, %v14428_v41  ;;  %v14474_v7 = vpop.permute.xlu2 %7060 }
 0x658   : > { %v14434_v37 = vsub.f32 %v6442_v17, %v14425_v36  ;;  %6646 = vmatpush.xpose.msra.mxu0 %v14364_v31  ;;  %6469 = vmatpush.xpose.msra.mxu2 %v14425_v36  ;;  %v18823_v17 = vand.u32 4294901760, %v14400_v42  ;;  %18824 = vst [vmem:[#allocation96_spill] sm:$0xff] %v14474_v7 }
 0x659   : > { %5938 = vmatmul.f32.vlgmr.msra.gmra.mxu1 %v14281_v12  ;;  %6566 = vmatpush.xpose.msra.mxu3 %v6565_v45 }
 0x65a   : > { %v14440_v14 = vpop.f32.mrf.mxu0  ;;  %6712 = vmatpush.xpose.msra.mxu1 %v14320_v30  ;;  %v14449_v10 = vpop.f32.mrf.mxu1  ;;  %v18199_v44 = vand.u32 4294901760, %v14434_v37  ;;  %v5835_v24 = vsub.f32 %v14400_v42, %v18823_v17  ;;  %8380 = vrot.lane.b32.xlu0 %v13634_v18, %s10549_s14  ;;  %v6571_v17 = vand.u32 4294901760, %v6570_v19  ;;  %v18200_v19 = vand.u32 4294901760, %v14453_v56 }
 0x65b   : > { %18820 = vst [vmem:[#allocation67_spill] sm:$0xff] %v14440_v14  ;;  %9054 = vrot.lane.b32.xlu2 %v13385_v50, %s10550_s1 }
 0x65c   : > { %18822 = vst [vmem:[#allocation94_spill] sm:$0xff] %v14449_v10  ;;  %v6407_v2 = vpop.permute.xlu0 %6406  ;;  %v6576_v49 = vsub.f32 %v14434_v37, %v18199_v44  ;;  %v14468_v10 = vand.u32 4294901760, %v6436_v59  ;;  %6649 = vmatpush.xpose.msra.mxu0 %v14386_v27  ;;  %v14482_v44 = vand.u32 4294901760, %v5768_v39  ;;  %v5836_v8 = vand.u32 4294901760, %v5835_v24  ;;  %6471 = vmatpush.xpose.msra.mxu2 %v14413_v32 }
 0x65d   : > { %8372 = vrot.lane.b32.xlu1 %v13524_v38, %s10549_s14  ;;  %v6438_v45 = vsel %vm4422_vm1, %v6407_v2, 0  ;;  %6572 = vmatpush.xpose.msra.mxu3 %v6571_v17  ;;  %v18826_v24 = vand.u32 4294901760, %v14437_v52 }
 0x65e   : > { %6714 = vmatpush.xpose.msra.mxu1 %v14303_v61  ;;  %v14478_v50 = vand.u32 4294901760, %v6438_v45  ;;  %v14480_v51 = vpop.permute.xlu1 %7056  ;;  %v6577_v2 = vand.u32 4294901760, %v6576_v49  ;;  %5570 = vmatmul.f32.gmra.mxu3 %v13959_v28  ;;  %v14492_v7 = vsub.f32 %v6436_v59, %v14468_v10  ;;  %v14506_v59 = vsub.f32 %v5768_v39, %v14482_v44 }
 0x65f   : > { %18825 = vst [vmem:[#allocation74_spill] sm:$0xff] %v14480_v51  ;;  %5517 = vmatmul.f32.gmra.mxu2 %v14005_v54  ;;  %5837 = vmatmul.f32.gmra.mxu0 %v5836_v8  ;;  %v6582_v17 = vsub.f32 %v14437_v52, %v18826_v24  ;;  %v5843_v8 = vsub.f32 %v14453_v56, %v18200_v19  ;;  %v5770_v24 = vsel %vm4422_vm1, %v14251_v16, 0  ;;  %v14534_v14 = vpop.permute.xlu2 %7062 }
 0x660   : > { %v14489_v3 = vsub.f32 %v6438_v45, %v14478_v50  ;;  %6652 = vmatpush.xpose.msra.mxu0 %v14434_v37  ;;  %6473 = vmatpush.xpose.msra.mxu2 %v14478_v50  ;;  %v18203_v19 = vand.u32 4294901760, %v14492_v7  ;;  %18831 = vst [vmem:[#allocation82_spill] sm:$0xff] %v14534_v14 }
 0x661   : > { %5942 = vmatmul.f32.gmra.mxu1 %v14322_v62  ;;  %6578 = vmatpush.xpose.msra.mxu3 %v6577_v2  ;;  %v6583_v2 = vand.u32 4294901760, %v6582_v17 }
 0x662   : > { %6716 = vmatpush.xpose.msra.mxu1 %v14335_v57  ;;  %v14500_v49 = vpop.f32.mrf.mxu0  ;;  %v14502_v28 = vpop.f32.mrf.mxu1  ;;  %8382 = vrot.lane.b32.xlu0 %v13527_v25, %s10549_s14  ;;  %v18829_v39 = vand.u32 4294901760, %v14489_v3 }
 0x663   : > { %18827 = vst [vmem:[#allocation98_spill] sm:$0xff] %v14500_v49  ;;  %9052 = vrot.lane.b32.xlu2 %v13417_v55, %s10550_s1  ;;  %v14530_v49 = vand.u32 4294901760, %v5770_v24  ;;  %v5844_v55 = vand.u32 4294901760, %v5843_v8 }
 0x664   : > { %18828 = vst [vmem:[#allocation23_spill] sm:$0xff] %v14502_v28  ;;  %v14518_v45 = vpop.permute.xlu0 %6388  ;;  %v6588_v51 = vsub.f32 %v14489_v3, %v18829_v39  ;;  %6655 = vmatpush.xpose.msra.mxu0 %v14437_v52  ;;  %6475 = vmatpush.xpose.msra.mxu2 %v14468_v10  ;;  %v18201_v39 = vand.u32 4294901760, %v14506_v59 }
 0x665   : > { %9048 = vrot.lane.b32.xlu1 %v13459_v4, %s10550_s1  ;;  %6584 = vmatpush.xpose.msra.mxu3 %v6583_v2  ;;  %v6594_v4 = vsub.f32 %v14492_v7, %v18203_v19  ;;  %v14547_v17 = vsub.f32 %v5770_v24, %v14530_v49  ;;  %v5772_v2 = vsel %vm4422_vm1, %v13967_v33, 0 }
 0x666   : > { %6718 = vmatpush.xpose.msra.mxu1 %v14371_v1  ;;  %v14528_v16 = vpop.permute.xlu1 %7058  ;;  %v6589_v28 = vand.u32 4294901760, %v6588_v51  ;;  %5574 = vmatmul.f32.gmra.mxu3 %v14005_v54  ;;  %v5851_v54 = vsub.f32 %v14506_v59, %v18201_v39 }
 0x667   : > { %18830 = vst [vmem:[#allocation78_spill] sm:$0xff] %v14528_v16  ;;  %5521 = vmatmul.f32.gmra.mxu2 %v14069_v40  ;;  %5845 = vmatmul.f32.gmra.mxu0 %v5844_v55 }
 0x668   : > { %6658 = vmatpush.xpose.msra.mxu0 %v14489_v3  ;;  %v5852_v39 = vand.u32 4294901760, %v5851_v54 }
 0x669   : > { %5946 = vmatmul.f32.gmra.mxu1 %v14374_v53  ;;  %6590 = vmatpush.xpose.msra.mxu3 %v6589_v28  ;;  %v6595_v28 = vand.u32 4294901760, %v6594_v4 }
 0x66a   : > { %6720 = vmatpush.xpose.msra.mxu1 %v14425_v36  ;;  %v14544_v51 = vpop.f32.mrf.mxu0  ;;  %v14552_v8 = vpop.f32.mrf.mxu1  ;;  %9044 = vrot.lane.b32.xlu0 %v13472_v43, %s10550_s1  ;;  %v18202_v43 = vand.u32 4294901760, %v14547_v17 }
 0x66b   : > { %9050 = vrot.lane.b32.xlu2 %v13415_v21, %s10550_s1  ;;  %v14569_v21 = vand.u32 4294901760, %v5772_v2 }
 0x66c   : > { %v14562_v24 = vpop.permute.xlu0 %6392  ;;  %6661 = vmatpush.xpose.msra.mxu0 %v14492_v7  ;;  %v5859_v4 = vsub.f32 %v14547_v17, %v18202_v43 }
 0x66d   : > { %9034 = vrot.lane.b32.xlu1 %v13608_v6, %s10550_s1  ;;  %6596 = vmatpush.xpose.msra.mxu3 %v6595_v28  ;;  %v14574_v6 = vpop.permute.xlu2 %7724  ;;  %v14583_v54 = vsub.f32 %v5772_v2, %v14569_v21 }
 0x66e   : > { %6722 = vmatpush.xpose.msra.mxu1 %v14413_v32  ;;  %v14566_v55 = vpop.permute.xlu1 %7734  ;;  %5578 = vmatmul.f32.gmra.mxu3 %v14069_v40  ;;  %18833 = vst [vmem:[#allocation55_spill] sm:$0xff] %v14574_v6  ;;  %v5774_v40 = vsel %vm4422_vm1, %v14015_v13, 0  ;;  %v5860_v43 = vand.u32 4294901760, %v5859_v4 }
 0x66f   : > { %18832 = vst [vmem:[#allocation51_spill] sm:$0xff] %v14566_v55  ;;  %5525 = vmatmul.f32.gmra.mxu2 %v14127_v9  ;;  %5853 = vmatmul.f32.gmra.mxu0 %v5852_v39  ;;  %v14598_v19 = vand.u32 4294901760, %v5774_v40 }
 0x671   : > { %5950 = vmatmul.f32.gmra.mxu1 %v14428_v41  ;;  %18834 = vst [vmem:[#allocation83_spill] sm:$0xff] %v14598_v19  ;;  %v14611_v4 = vsub.f32 %v5774_v40, %v14598_v19 }
 0x672   : > { %6724 = vmatpush.xpose.msra.mxu1 %v14478_v50  ;;  %v14577_v33 = vpop.f32.mrf.mxu0  ;;  %v14585_v28 = vpop.f32.mrf.mxu1  ;;  %9030 = vrot.lane.b32.xlu0 %v13424_v22, %s10550_s1  ;;  %v18835_v22 = vand.u32 4294901760, %v14333_v60 }
 0x673   : > { %9046 = vrot.lane.b32.xlu2 %v13393_v20, %s10550_s1  ;;  %v18204_v20 = vand.u32 4294901760, %v14583_v54 }
 0x674   : > { %v7079_v39 = vpop.permute.xlu0 %7078 }
 0x675   : > { %9038 = vrot.lane.b32.xlu1 %v13573_v11, %s10550_s1  ;;  %v14613_v14 = vpop.permute.xlu2 %7710  ;;  %v5867_v60 = vsub.f32 %v14583_v54, %v18204_v20  ;;  %v18840_v20 = vand.u32 4294901760, %v14364_v31  ;;  %v7110_v31 = vsel %vm4422_vm1, %v7079_v39, 0  ;;  %v18847_v39 = vand.u32 4294901760, %v14434_v37 }
 0x676   : > { %6726 = vmatpush.xpose.msra.mxu1 %v14468_v10  ;;  %5582 = vmatmul.f32.gmra.mxu3 %v14127_v9  ;;  %v14605_v13 = vpop.permute.xlu1 %7738  ;;  %18837 = vst [vmem:[#allocation58_spill] sm:$0xff] %v14613_v14  ;;  %v18839_v14 = vand.u32 4294901760, %v14298_v63 }
 0x677   : > { %v14596_v2 = vpop.f32.mrf.mxu2  ;;  %6004 = vmatmul.f32.vlgmr.msrb.gmra.mxu2 %v14298_v63  ;;  %18836 = vst [vmem:[#allocation53_spill] sm:$0xff] %v14605_v13  ;;  %5861 = vmatmul.f32.gmra.mxu0 %v5860_v43  ;;  %v18838_v43 = vand.u32 4294901760, %v14328_v58  ;;  %v18842_v63 = vand.u32 4294901760, %v14386_v27 }
 0x678   : > { %6787 = vmatpush.xpose.msrb.mxu2 %v18835_v22 }
 0x679   : > { %5954 = vmatmul.f32.gmra.mxu1 %v14482_v44 }
 0x67a   : > { %v14608_v11 = vpop.f32.mrf.mxu0  ;;  %9036 = vrot.lane.b32.xlu0 %v13476_v29, %s10550_s1  ;;  %v5868_v29 = vand.u32 4294901760, %v5867_v60 }
 0x67b   : > { %v14615_v9 = vpop.f32.mrf.mxu1  ;;  %9028 = vrot.lane.b32.xlu2 %v13485_v47, %s10550_s1  ;;  %v18205_v47 = vand.u32 4294901760, %v14611_v4 }
 0x67c   : > { %6791 = vmatpush.xpose.msrb.mxu2 %v18838_v43  ;;  %v7073_v40 = vpop.permute.xlu0 %7072 }
 0x67d   : > { %9042 = vrot.lane.b32.xlu1 %v13527_v25, %s10550_s1 }
 0x67e   : > { %6070 = vmatmul.f32.vlgmr.msrb.gmra.mxu3 %v18839_v14  ;;  %v14640_v58 = vpop.permute.xlu1 %7732  ;;  %v5875_v14 = vsub.f32 %v14611_v4, %v18205_v47 }
 0x67f   : > { %v5170_v22 = vpop.f32.mrf.mxu2  ;;  %6009 = vmatmul.f32.gmra.mxu2 %v14350_v15  ;;  %6858 = vmatpush.xpose.msrb.mxu3 %v14320_v30  ;;  %18841 = vst [vmem:[#allocation84_spill] sm:$0xff] %v14640_v58  ;;  %v14654_v30 = vpop.permute.xlu2 %7716 }
 0x680   : > { %v14631_v16 = vpop.f32.mrf.mxu3  ;;  %6795 = vmatpush.xpose.msrb.mxu2 %v18840_v20  ;;  %5869 = vmatmul.f32.gmra.mxu0 %v5868_v29  ;;  %18843 = vst [vmem:[#allocation87_spill] sm:$0xff] %v14654_v30  ;;  %v18844_v20 = vld [vmem:[#allocation65_spill] sm:$0xff]  ;;  %v5876_v29 = vand.u32 4294901760, %v5875_v14 }
 0x681   : > { %5958 = vmatmul.f32.gmra.mxu1 %v14530_v49 }
 0x682   : > { %v14638_v25 = vpop.f32.mrf.mxu0  ;;  %9040 = vrot.lane.b32.xlu0 %v13634_v18, %s10550_s1 }
 0x683   : > { %v14642_v43 = vpop.f32.mrf.mxu1  ;;  %9032 = vrot.lane.b32.xlu2 %v13524_v38, %s10550_s1  ;;  %6860 = vmatpush.xpose.msrb.mxu3 %v14303_v61  ;;  %v18846_v38 = vand.u32 4294901760, %v14350_v15  ;;  %v7108_v61 = vsel %vm4422_vm1, %v14255_v46, 0 }
 0x684   : > { %6799 = vmatpush.xpose.msrb.mxu2 %v18842_v63  ;;  %v7071_v60 = vpop.permute.xlu0 %7070  ;;  %v14666_v63 = vand.u32 4294901760, %v7110_v31 }
 0x685   : > { %8398 = vrot.lane.b32.xlu1 %v18844_v20, %s10549_s14  ;;  %v7102_v30 = vsel %vm4422_vm1, %v7071_v60, 0 }
 0x686   : > { %6076 = vmatmul.f32.gmra.mxu3 %v18846_v38  ;;  %v14676_v38 = vand.u32 4294901760, %v7108_v61  ;;  %v14683_v46 = vsub.f32 %v7110_v31, %v14666_v63  ;;  %v14685_v37 = vpop.permute.xlu1 %7728  ;;  %v18852_v31 = vand.u32 4294901760, %v14400_v42 }
 0x687   : > { %v14659_v18 = vpop.f32.mrf.mxu2  ;;  %6014 = vmatmul.f32.gmra.mxu2 %v14400_v42  ;;  %6862 = vmatpush.xpose.msrb.mxu3 %v14335_v57  ;;  %18848 = vst [vmem:[#allocation60_spill] sm:$0xff] %v14685_v37  ;;  %v18849_v57 = vand.u32 4294901760, %v14437_v52 }
 0x688   : > { %18845 = vst [vmem:[#allocation92_spill] sm:$0xff] %v14659_v18  ;;  %v5283_v27 = vpop.f32.mrf.mxu3  ;;  %6803 = vmatpush.xpose.msrb.mxu2 %v18847_v39  ;;  %5877 = vmatmul.f32.gmra.mxu0 %v5876_v29  ;;  %v14697_v39 = vpop.permute.xlu2 %7720 }
 0x689   : > { %v14671_v47 = vadd.f32 %v5283_v27, %v5170_v22  ;;  %5962 = vmatmul.f32.gmra.mxu1 %v14569_v21  ;;  %v7106_v22 = vsel %vm4422_vm1, %v14345_v5, 0  ;;  %v14695_v27 = vsub.f32 %v7108_v61, %v14676_v38  ;;  %18851 = vst [vmem:[#allocation97_spill] sm:$0xff] %v14697_v39  ;;  %v18854_v5 = vand.u32 4294901760, %v14489_v3 }
 0x68a   : > { %v14674_v15 = vpop.f32.mrf.mxu0  ;;  %v14704_v52 = vand.u32 4294901760, %v7106_v22  ;;  %v7104_v61 = vsel %vm4422_vm1, %v7073_v40, 0  ;;  %v18857_v39 = vand.u32 4294901760, %v14492_v7 }
 0x68b   : > { %v14678_v14 = vpop.f32.mrf.mxu1  ;;  %9058 = vrot.lane.b32.xlu2 %v18844_v20, %s10550_s1  ;;  %6864 = vmatpush.xpose.msrb.mxu3 %v14371_v1  ;;  %v18861_v7 = vand.u32 4294901760, %v14695_v27 }
 0x68c   : > { %6807 = vmatpush.xpose.msrb.mxu2 %v18849_v57  ;;  %v7067_v57 = vpop.permute.xlu0 %7066  ;;  %v14720_v3 = vsub.f32 %v7106_v22, %v14704_v52  ;;  %v7100_v22 = vsel %vm4422_vm1, %v14279_v23, 0 }
 0x68e   : > { %6082 = vmatmul.f32.gmra.mxu3 %v18852_v31  ;;  %v14731_v6 = vpop.permute.xlu1 %7726 }
 0x68f   : > { %v14692_v29 = vpop.f32.mrf.mxu2  ;;  %6019 = vmatmul.f32.gmra.mxu2 %v14453_v56  ;;  %6866 = vmatpush.xpose.msrb.mxu3 %v14425_v36  ;;  %v18855_v36 = vand.u32 4294901760, %v14683_v46  ;;  %18858 = vst [vmem:[#allocation25_spill] sm:$0xff] %v14731_v6 }
 0x690   : > { %18850 = vst [vmem:[#allocation90_spill] sm:$0xff] %v14692_v29  ;;  %v14702_v20 = vpop.f32.mrf.mxu3  ;;  %6811 = vmatpush.xpose.msrb.mxu2 %v18854_v5  ;;  %6157 = vmatmul.f32.vlgmr.msrb.gmra.mxu0 %v14281_v12  ;;  %v14725_v5 = vand.u32 4294901760, %v7104_v61  ;;  %v14751_v58 = vpop.permute.xlu2 %8396 }
 0x691   : > { %18853 = vst [vmem:[#allocation88_spill] sm:$0xff] %v14702_v20  ;;  %5966 = vmatmul.f32.gmra.mxu1 %v14598_v19  ;;  %7121 = vmatpush.xpose.msrb.mxu0 %v14666_v63  ;;  %v7212_v40 = vsub.f32 %v14683_v46, %v18855_v36  ;;  %v18859_v36 = vand.u32 4294901760, %v14453_v56  ;;  %v18863_v56 = vld [vmem:[#allocation47_spill] sm:$0xff]  ;;  %v18880_v20 = vld [vmem:[#allocation68_spill] sm:$0xff] }
 0x692   : > { %v14714_v42 = vpop.f32.mrf.mxu0  ;;  %18856 = vst [vmem:[#allocation93_spill] sm:$0xff] %v14725_v5  ;;  %v14745_v60 = vsub.f32 %v7104_v61, %v14725_v5  ;;  %v18864_v61 = vld [vmem:[#allocation69_spill] sm:$0xff] }
 0x693   : > { %v14716_v31 = vpop.f32.mrf.mxu1  ;;  %6868 = vmatpush.xpose.msrb.mxu3 %v14413_v32  ;;  %v7218_v32 = vsub.f32 %v14695_v27, %v18861_v7  ;;  %v7213_v6 = vand.u32 4294901760, %v7212_v40  ;;  %18862 = vst [vmem:[#allocation20_spill] sm:$0xff] %v14751_v58  ;;  %v14758_v7 = vand.u32 4294901760, %v7100_v22 }
 0x694   : > { %6815 = vmatpush.xpose.msrb.mxu2 %v18857_v39  ;;  %v14747_v39 = vand.u32 4294901760, %v7102_v30  ;;  %v14760_v55 = vpop.permute.xlu0 %7048 }
 0x695   : > { %7123 = vmatpush.xpose.msrb.mxu0 %v14676_v38  ;;  %18865 = vst [vmem:[#allocation27_spill] sm:$0xff] %v14758_v7  ;;  %v7219_v37 = vand.u32 4294901760, %v7218_v32  ;;  %v18872_v32 = vand.u32 4294901760, %v14506_v59 }
 0x696   : > { %6088 = vmatmul.f32.gmra.mxu3 %v18859_v36  ;;  %v4619_v36 = vadd.f32 %v18864_v61, %v18863_v56  ;;  %18866 = vst [vmem:[#allocation100_spill] sm:$0xff] %v14760_v55  ;;  %v14765_v40 = vsub.f32 %v7102_v30, %v14747_v39  ;;  %v7098_v61 = vsel %vm4422_vm1, %v7067_v57, 0  ;;  %v18869_v55 = vld [vmem:[#allocation54_spill] sm:$0xff] }
 0x697   : > { %6024 = vmatmul.f32.gmra.mxu2 %v14506_v59  ;;  %6870 = vmatpush.xpose.msrb.mxu3 %v14478_v50  ;;  %v5194_v23 = vpop.f32.mrf.mxu2  ;;  %v18870_v30 = vld [vmem:[#allocation70_spill] sm:$0xff]  ;;  %v14787_v56 = vpop.permute.xlu1 %7708 }
 0x698   : > { %v14739_v1 = vpop.f32.mrf.mxu3  ;;  %6161 = vmatmul.f32.gmra.mxu0 %v14322_v62  ;;  %v4685_v13 = vadd.f32 %v18869_v55, %v4619_v36  ;;  %18873 = vst [vmem:[#allocation32_spill] sm:$0xff] %v14787_v56  ;;  %v18875_v36 = vld [vmem:[#allocation66_spill] sm:$0xff] }
 0x699   : > { %18860 = vst [vmem:[#allocation89_spill] sm:$0xff] %v14739_v1  ;;  %6214 = vmatmul.f32.vlgmr.msrb.gmra.mxu1 %v14281_v12  ;;  %7125 = vmatpush.xpose.msrb.mxu0 %v14704_v52  ;;  %v18868_v12 = vand.u32 4294901760, %v14720_v3  ;;  %v18871_v1 = vld [vmem:[#allocation57_spill] sm:$0xff] }
 0x69a   : > { %7214 = vmatpush.xpose.msrb.mxu1 %v7213_v6  ;;  %v4627_v29 = vadd.f32 %v18871_v1, %v18870_v30  ;;  %v18876_v30 = vld [vmem:[#allocation72_spill] sm:$0xff]  ;;  %v18878_v1 = vld [vmem:[#allocation77_spill] sm:$0xff]  ;;  %v4751_v18 = vadd.f32 %v18880_v20, %v4685_v13 }
 0x69b   : > { %v14762_v50 = vpop.f32.mrf.mxu0  ;;  %6872 = vmatpush.xpose.msrb.mxu3 %v14468_v10  ;;  %v14768_v58 = vpop.f32.mrf.mxu1  ;;  %v7224_v6 = vsub.f32 %v14720_v3, %v18868_v12  ;;  %v14780_v10 = vsub.f32 %v7100_v22, %v14758_v7  ;;  %v14785_v12 = vand.u32 4294901760, %v7098_v61  ;;  %v7096_v22 = vsel %vm4422_vm1, %v14314_v26, 0  ;;  %v18885_v20 = vld [vmem:[#allocation52_spill] sm:$0xff] }
 0x69c   : > { %18867 = vst [vmem:[#allocation104_spill] sm:$0xff] %v14762_v50  ;;  %v4695_v56 = vadd.f32 %v18878_v1, %v4627_v29  ;;  %v18883_v29 = vand.u32 4294901760, %v14765_v40  ;;  %v14825_v13 = vpop.permute.xlu0 %7052 }
 0x69d   : > { %7127 = vmatpush.xpose.msrb.mxu0 %v14725_v5  ;;  %v7225_v57 = vand.u32 4294901760, %v7224_v6  ;;  %v6420_v6 = vsel %vm4422_vm1, %v14518_v45, 0  ;;  %v18879_v5 = vld [vmem:[#allocation76_spill] sm:$0xff]  ;;  %v14814_v45 = vsub.f32 %v7098_v61, %v14785_v12  ;;  %18884 = vst [vmem:[#allocation64_spill] sm:$0xff] %v14825_v13 }
 0x69e   : > { %7220 = vmatpush.xpose.msrb.mxu1 %v7219_v37  ;;  %6094 = vmatmul.f32.gmra.mxu3 %v18872_v32  ;;  %v18874_v37 = vand.u32 4294901760, %v14745_v60  ;;  %v4623_v32 = vadd.f32 %v18876_v30, %v18875_v36  ;;  %v4631_v26 = vadd.f32 %v14203_v48, %v18879_v5  ;;  %v14811_v36 = vand.u32 4294901760, %v7096_v22 }
 0x69f   : > { %6029 = vmatmul.f32.gmra.mxu2 %v14547_v17  ;;  %v7236_v48 = vsub.f32 %v14765_v40, %v18883_v29  ;;  %v14823_v5 = vand.u32 4294901760, %v6420_v6  ;;  %v18888_v29 = vand.u32 4294901760, %v14780_v10 }
 0x6a0   : > { %v5202_v50 = vpop.f32.mrf.mxu2  ;;  %v7230_v55 = vsub.f32 %v14745_v60, %v18874_v37  ;;  %6165 = vmatmul.f32.gmra.mxu0 %v14374_v53  ;;  %v5295_v59 = vpop.f32.mrf.mxu3  ;;  %v4690_v1 = vadd.f32 %v18885_v20, %v4623_v32  ;;  %v4700_v61 = vadd.f32 %v14211_v35, %v4631_v26  ;;  %v14839_v32 = vsub.f32 %v7096_v22, %v14811_v36  ;;  %v18889_v26 = vld [vmem:[#allocation67_spill] sm:$0xff]  ;;  %v18890_v22 = vld [vmem:[#allocation73_spill] sm:$0xff] }
 0x6a1   : > { %6218 = vmatmul.f32.gmra.mxu1 %v14322_v62  ;;  %7129 = vmatpush.xpose.msrb.mxu0 %v14747_v39  ;;  %v14802_v37 = vadd.f32 %v5295_v59, %v5194_v23  ;;  %v14808_v62 = vpop.permute.xlu2 %8388  ;;  %v4838_v59 = vadd.f32 %v14340_v34, %v4751_v18  ;;  %v7237_v18 = vand.u32 4294901760, %v7236_v48  ;;  %v6422_v20 = vsel %vm4422_vm1, %v18890_v22, 0  ;;  %v18897_v35 = vld [vmem:[#allocation23_spill] sm:$0xff] }
 0x6a2   : > { %7226 = vmatpush.xpose.msrb.mxu1 %v7225_v57  ;;  %18881 = vst [vmem:[#allocation41_spill] sm:$0xff] %v14808_v62  ;;  %v7231_v30 = vand.u32 4294901760, %v7230_v55  ;;  %v18886_v55 = vld [vmem:[#allocation75_spill] sm:$0xff]  ;;  %v18887_v62 = vand.u32 4294901760, %v14547_v17  ;;  %v18898_v22 = vand.u32 4294901760, %v14814_v45 }
 0x6a3   : > { %18877 = vst [vmem:[#allocation101_spill] sm:$0xff] %v14802_v37  ;;  %v14816_v57 = vpop.f32.mrf.mxu0  ;;  %v4763_v19 = vadd.f32 %v18886_v55, %v4695_v56  ;;  %v7242_v37 = vsub.f32 %v14780_v10, %v18888_v29  ;;  %v14842_v34 = vadd.f32 %v14392_v0, %v4838_v59  ;;  %v14853_v0 = vpop.permute.xlu1 %7714  ;;  %v18895_v55 = vld [vmem:[#allocation71_spill] sm:$0xff] }
 0x6a4   : > { %18882 = vst [vmem:[#allocation62_spill] sm:$0xff] %v14816_v57  ;;  %v14818_v23 = vpop.f32.mrf.mxu1  ;;  %v4757_v29 = vadd.f32 %v18895_v55, %v4690_v1  ;;  %v18899_v1 = vld [vmem:[#allocation63_spill] sm:$0xff]  ;;  %v18902_v55 = vld [vmem:[#allocation28_spill] sm:$0xff] }
 0x6a5   : > { %7131 = vmatpush.xpose.msrb.mxu0 %v14758_v7  ;;  %v4846_v56 = vadd.f32 %v18889_v26, %v4763_v19  ;;  %18891 = vst [vmem:[#allocation30_spill] sm:$0xff] %v14853_v0  ;;  %v18893_v19 = vld [vmem:[#allocation49_spill] sm:$0xff]  ;;  %v18896_v26 = vld [vmem:[#allocation80_spill] sm:$0xff]  ;;  %v7243_v57 = vand.u32 4294901760, %v7242_v37  ;;  %v7248_v0 = vsub.f32 %v14814_v45, %v18898_v22  ;;  %v18903_v22 = vld [vmem:[#allocation94_spill] sm:$0xff] }
 0x6a6   : > { %7232 = vmatpush.xpose.msrb.mxu1 %v7231_v30  ;;  %6100 = vmatmul.f32.gmra.mxu3 %v18887_v62  ;;  %v14847_v30 = vsub.f32 %v6420_v6, %v14823_v5  ;;  %v18894_v6 = vld [vmem:[#allocation22_spill] sm:$0xff] }
 0x6a7   : > { %6034 = vmatmul.f32.gmra.mxu2 %v14583_v54  ;;  %v4635_v59 = vadd.f32 %v18894_v6, %v18893_v19  ;;  %v14863_v13 = vadd.f32 %v18897_v35, %v4846_v56  ;;  %v4842_v19 = vadd.f32 %v18899_v1, %v4757_v29  ;;  %v18901_v56 = vld [vmem:[#allocation98_spill] sm:$0xff]  ;;  %v18904_v29 = vand.u32 4294901760, %v14583_v54 }
 0x6a8   : > { %6169 = vmatmul.f32.gmra.mxu0 %v14428_v41  ;;  %v5210_v17 = vpop.f32.mrf.mxu2  ;;  %v7249_v1 = vand.u32 4294901760, %v7248_v0  ;;  %v6424_v0 = vsel %vm4422_vm1, %v14562_v24, 0 }
 0x6a9   : > { %6222 = vmatmul.f32.gmra.mxu1 %v14374_v53  ;;  %v5299_v62 = vpop.f32.mrf.mxu3  ;;  %7133 = vmatpush.xpose.msrb.mxu0 %v14785_v12  ;;  %v4769_v53 = vadd.f32 %v18896_v26, %v4700_v61  ;;  %v18212_v61 = vand.u32 4294901760, %v14847_v30  ;;  %v14877_v35 = vpop.permute.xlu2 %8384  ;;  %v4705_v26 = vadd.f32 %v18902_v55, %v4635_v59 }
 0x6aa   : > { %7238 = vmatpush.xpose.msrb.mxu1 %v7237_v18  ;;  %v14856_v48 = vadd.f32 %v5299_v62, %v5202_v50  ;;  %v4926_v50 = vsel %vm4925_vm2, %v14842_v34, -inf  ;;  %v14873_v62 = vand.u32 4294901760, %v6422_v20  ;;  %18900 = vst [vmem:[#allocation38_spill] sm:$0xff] %v14877_v35  ;;  %v14885_v18 = vadd.f32 %v18903_v22, %v4842_v19  ;;  %v18907_v22 = vld [vmem:[#allocation21_spill] sm:$0xff] }
 0x6ab   : > { %v4850_v6 = vadd.f32 %v18901_v56, %v4769_v53  ;;  %v6479_v54 = vsub.f32 %v14847_v30, %v18212_v61  ;;  %v18906_v56 = vld [vmem:[#allocation31_spill] sm:$0xff]  ;;  %v14925_v61 = vand.u32 4294901760, %v6424_v0 }
 0x6ac   : > { %18892 = vst [vmem:[#allocation44_spill] sm:$0xff] %v14856_v48  ;;  %v14865_v7 = vpop.f32.mrf.mxu0  ;;  %4927 = vmax.xlane.f32.xlu0 %v4926_v50  ;;  %v14887_v48 = vpop.permute.xlu0 %7730  ;;  %v4932_v50 = vsel %vm4925_vm2, %v14863_v13, -inf  ;;  %v14901_v19 = vsub.f32 %v6422_v20, %v14873_v62  ;;  %v4858_v55 = vadd.f32 %v14577_v33, %v18906_v56  ;;  %v4775_v20 = vadd.f32 %v18907_v22, %v4705_v26 }
 0x6ad   : > { %7135 = vmatpush.xpose.msrb.mxu0 %v14811_v36  ;;  %v14895_v53 = vadd.f32 %v14552_v8, %v4850_v6  ;;  %v4929_v33 = vsel %vm4925_vm2, %v14885_v18, -inf  ;;  %v6480_v24 = vand.u32 4294901760, %v6479_v54 }
 0x6ae   : > { %v14879_v37 = vpop.f32.mrf.mxu1  ;;  %7244 = vmatpush.xpose.msrb.mxu1 %v7243_v57  ;;  %6106 = vmatmul.f32.gmra.mxu3 %v18904_v29  ;;  %v18905_v57 = vand.u32 4294901760, %v14839_v32  ;;  %v14914_v29 = vadd.f32 %v14615_v9, %v4858_v55  ;;  %v18909_v55 = vld [vmem:[#allocation86_spill] sm:$0xff] }
 0x6af   : > { %6039 = vmatmul.f32.gmra.mxu2 %v14611_v4  ;;  %4933 = vmax.xlane.f32.xlu1 %v4932_v50 }
 0x6b0   : > { %v7254_v59 = vsub.f32 %v14839_v32, %v18905_v57  ;;  %6173 = vmatmul.f32.gmra.mxu0 %v14482_v44  ;;  %v14920_v57 = vpop.permute.xlu1 %7718  ;;  %v4941_v54 = vsel %vm4925_vm2, %v14914_v29, -inf }
 0x6b1   : > { %6226 = vmatmul.f32.gmra.mxu1 %v14428_v41  ;;  %v5218_v8 = vpop.f32.mrf.mxu2  ;;  %v5303_v6 = vpop.f32.mrf.mxu3  ;;  %18908 = vst [vmem:[#allocation40_spill] sm:$0xff] %v14920_v57  ;;  %v4935_v41 = vsel %vm4925_vm2, %v14895_v53, -inf  ;;  %v18926_v57 = vld [vmem:[#allocation93_spill] sm:$0xff] }
 0x6b2   : > { %7250 = vmatpush.xpose.msrb.mxu1 %v7249_v1  ;;  %v14916_v50 = vadd.f32 %v5303_v6, %v5210_v17  ;;  %v7255_v56 = vand.u32 4294901760, %v7254_v59  ;;  %v4854_v1 = vadd.f32 %v14544_v51, %v4775_v20  ;;  %v18213_v17 = vand.u32 4294901760, %v14901_v19  ;;  %v14937_v22 = vpop.permute.xlu2 %8370 }
 0x6b3   : > { %v4862_v6 = vadd.f32 %v14608_v11, %v18909_v55  ;;  %18910 = vst [vmem:[#allocation43_spill] sm:$0xff] %v14937_v22  ;;  %v18911_v51 = vand.u32 4294901760, %v14611_v4  ;;  %v14948_v11 = vsub.f32 %v6424_v0, %v14925_v61 }
 0x6b4   : > { %4930 = vmax.xlane.f32.xlu2 %v4929_v33  ;;  %v14927_v26 = vpop.f32.mrf.mxu0  ;;  %4936 = vmax.xlane.f32.xlu0 %v4935_v41  ;;  %v14935_v59 = vadd.f32 %v14585_v28, %v4854_v1  ;;  %v14950_v28 = vpop.permute.xlu0 %7712  ;;  %v6487_v4 = vsub.f32 %v14901_v19, %v18213_v17  ;;  %v18913_v33 = vld [vmem:[#allocation81_spill] sm:$0xff]  ;;  %v5280_v17 = vadd.f32 %v14631_v16, %v14596_v2  ;;  %v18917_v2 = vld [vmem:[#allocation79_spill] sm:$0xff] }
 0x6b5   : > { %v14944_v20 = vadd.f32 %v14642_v43, %v4862_v6  ;;  %18912 = vst [vmem:[#allocation59_spill] sm:$0xff] %v14950_v28  ;;  %v6426_v43 = vsel %vm4422_vm1, %v18913_v33, 0  ;;  %v18927_v28 = vld [vmem:[#allocation104_spill] sm:$0xff] }
 0x6b6   : > { %v14929_v9 = vpop.f32.mrf.mxu1  ;;  %7256 = vmatpush.xpose.msrb.mxu1 %v7255_v56  ;;  %6112 = vmatmul.f32.gmra.mxu3 %v18911_v51  ;;  %v4938_v0 = vsel %vm4925_vm2, %v14935_v59, -inf  ;;  %v14966_v1 = vand.u32 4294901760, %v6426_v43  ;;  %v6488_v51 = vand.u32 4294901760, %v6487_v4  ;;  %v5346_v4 = vadd.f32 %v14674_v15, %v5280_v17 }
 0x6b7   : > { %6481 = vmatmul.f32.vlgmr.msra.gmra.mxu2 %v6480_v24  ;;  %4942 = vmax.xlane.f32.xlu1 %v4941_v54  ;;  %v18914_v54 = vld [vmem:[#allocation85_spill] sm:$0xff] }
 0x6b8   : > { %7300 = vmatpush.xpose.msra.mxu2 %v14683_v46  ;;  %6177 = vmatmul.f32.gmra.mxu0 %v14530_v49  ;;  %v4866_v33 = vadd.f32 %v14638_v25, %v18914_v54  ;;  %v14988_v25 = vsub.f32 %v6426_v43, %v14966_v1 }
 0x6b9   : > { %6230 = vmatmul.f32.gmra.mxu1 %v14482_v44  ;;  %v5307_v56 = vpop.f32.mrf.mxu3  ;;  %v4944_v44 = vsel %vm4925_vm2, %v14944_v20, -inf }
 0x6ba   : > { %v5498_v41 = vpop.f32.mrf.mxu2  ;;  %v14959_v24 = vadd.f32 %v5307_v56, %v5218_v8  ;;  %v18214_v8 = vand.u32 4294901760, %v14948_v11  ;;  %v5351_v56 = vadd.f32 %v14714_v42, %v14671_v47  ;;  %v14983_v22 = vadd.f32 %v14678_v14, %v4866_v33  ;;  %v14991_v42 = vpop.permute.xlu2 %8374 }
 0x6bb   : > { %18916 = vst [vmem:[#allocation26_spill] sm:$0xff] %v14991_v42  ;;  %v6428_v14 = vsel %vm4422_vm1, %v18917_v2, 0  ;;  %v18215_v17 = vand.u32 4294901760, %v14988_v25 }
 0x6bc   : > { %7303 = vmatpush.xpose.msra.mxu2 %v14695_v27  ;;  %4939 = vmax.xlane.f32.xlu2 %v4938_v0  ;;  %v14968_v55 = vpop.f32.mrf.mxu0  ;;  %v14977_v0 = vpop.permute.xlu1 %7722  ;;  %v5418_v47 = vadd.f32 %v14768_v58, %v5351_v56  ;;  %v6495_v16 = vsub.f32 %v14948_v11, %v18214_v8  ;;  %v5412_v58 = vadd.f32 %v14716_v31, %v5346_v4  ;;  %v15008_v33 = vand.u32 4294901760, %v6428_v14  ;;  %v18921_v8 = vld [vmem:[#allocation83_spill] sm:$0xff] }
 0x6bd   : > { %4945 = vmax.xlane.f32.xlu0 %v4944_v44  ;;  %18915 = vst [vmem:[#allocation102_spill] sm:$0xff] %v14977_v0  ;;  %v15002_v54 = vpop.permute.xlu0 %8394 }
 0x6be   : > { %v14970_v6 = vpop.f32.mrf.mxu1  ;;  %6598 = vmatmul.f32.vlgmr.msra.gmra.mxu3 %v14823_v5  ;;  %18918 = vst [vmem:[#allocation103_spill] sm:$0xff] %v15002_v54  ;;  %v6496_v15 = vand.u32 4294901760, %v6495_v16  ;;  %v5499_v31 = vadd.f32 %v5498_v41, %v5412_v58  ;;  %v15021_v4 = vsub.f32 %v6428_v14, %v15008_v33  ;;  %v6503_v41 = vsub.f32 %v14988_v25, %v18215_v17  ;;  %v18922_v16 = vld [vmem:[#allocation99_spill] sm:$0xff] }
 0x6bf   : > { %6489 = vmatmul.f32.gmra.mxu2 %v6488_v51  ;;  %7372 = vmatpush.xpose.msra.mxu3 %v14666_v63 }
 0x6c0   : > { %7306 = vmatpush.xpose.msra.mxu2 %v14720_v3  ;;  %6181 = vmatmul.f32.gmra.mxu0 %v14569_v21 }
 0x6c1   : > { %6234 = vmatmul.f32.gmra.mxu1 %v14530_v49  ;;  %v5555_v43 = vpop.f32.mrf.mxu3  ;;  %v4947_v49 = vsel %vm4925_vm2, %v14983_v22, -inf }
 0x6c2   : > { %v5502_v44 = vpop.f32.mrf.mxu2  ;;  %v15036_v0 = vpop.permute.xlu2 %8376 }
 0x6c3   : > { %v5503_v51 = vadd.f32 %v5502_v44, %v5418_v47  ;;  %7374 = vmatpush.xpose.msra.mxu3 %v14676_v38  ;;  %v15016_v47 = vadd.f32 %v5555_v43, %v5499_v31  ;;  %v6430_v43 = vsel %vm4422_vm1, %v18922_v16, 0  ;;  %v18924_v31 = vld [vmem:[#allocation88_spill] sm:$0xff]  ;;  %18925 = vst [vmem:[#allocation46_spill] sm:$0xff] %v15036_v0 }
 0x6c4   : > { %7309 = vmatpush.xpose.msra.mxu2 %v14745_v60  ;;  %v15010_v56 = vpop.f32.mrf.mxu0  ;;  %4948 = vmax.xlane.f32.xlu2 %v4947_v49  ;;  %v15023_v44 = vpop.permute.xlu1 %8390  ;;  %v15042_v17 = vand.u32 4294901760, %v6430_v43 }
 0x6c5   : > { %18919 = vst [vmem:[#allocation56_spill] sm:$0xff] %v15016_v47 }
 0x6c6   : > { %v15012_v2 = vpop.f32.mrf.mxu1  ;;  %6602 = vmatmul.f32.gmra.mxu3 %v14873_v62  ;;  %18920 = vst [vmem:[#allocation36_spill] sm:$0xff] %v15023_v44 }
 0x6c7   : > { %6497 = vmatmul.f32.gmra.mxu2 %v6496_v15  ;;  %7376 = vmatpush.xpose.msra.mxu3 %v14704_v52  ;;  %v18923_v15 = vld [vmem:[#allocation92_spill] sm:$0xff] }
 0x6c8   : > { %7312 = vmatpush.xpose.msra.mxu2 %v14765_v40  ;;  %6185 = vmatmul.f32.gmra.mxu0 %v18921_v8  ;;  %v5288_v42 = vadd.f32 %v18924_v31, %v18923_v15  ;;  %v6504_v15 = vand.u32 4294901760, %v6503_v41  ;;  %v15051_v31 = vpop.permute.xlu0 %8392 }
 0x6c9   : > { %6238 = vmatmul.f32.gmra.mxu1 %v14569_v21  ;;  %v5559_v49 = vpop.f32.mrf.mxu3  ;;  %v5586_v21 = vsel %vm4925_vm2, %v15016_v47, -inf  ;;  %18929 = vst [vmem:[#allocation33_spill] sm:$0xff] %v15051_v31  ;;  %v18932_v47 = vld [vmem:[#allocation90_spill] sm:$0xff] }
 0x6ca   : > { %v5506_v58 = vpop.f32.mrf.mxu2  ;;  %v15034_v14 = vadd.f32 %v5559_v49, %v5503_v51  ;;  %v5356_v16 = vadd.f32 %v18927_v28, %v5288_v42  ;;  %v18217_v51 = vand.u32 4294901760, %v15021_v4  ;;  %v15057_v28 = vsub.f32 %v6430_v43, %v15042_v17  ;;  %v18930_v42 = vld [vmem:[#allocation18_spill] sm:$0xff]  ;;  %v18933_v43 = vld [vmem:[#allocation89_spill] sm:$0xff] }
 0x6cb   : > { %7378 = vmatpush.xpose.msra.mxu3 %v18926_v57  ;;  %v6432_v41 = vsel %vm4422_vm1, %v18930_v42, 0  ;;  %v5292_v31 = vadd.f32 %v18933_v43, %v18932_v47 }
 0x6cc   : > { %7315 = vmatpush.xpose.msra.mxu2 %v14780_v10  ;;  %v15047_v44 = vpop.f32.mrf.mxu0  ;;  %5587 = vmax.xlane.f32.xlu2 %v5586_v21  ;;  %v5424_v49 = vadd.f32 %v14818_v23, %v5356_v16  ;;  %v6511_v23 = vsub.f32 %v15021_v4, %v18217_v51  ;;  %v18931_v16 = vand.u32 4294901760, %v14683_v46  ;;  %v15072_v42 = vand.u32 4294901760, %v6432_v41 }
 0x6cd   : > { %18928 = vst [vmem:[#allocation29_spill] sm:$0xff] %v15047_v44 }
 0x6ce   : > { %v15045_v35 = vpop.f32.mrf.mxu1  ;;  %6606 = vmatmul.f32.gmra.mxu3 %v14925_v61  ;;  %v5507_v21 = vadd.f32 %v5506_v58, %v5424_v49  ;;  %v15074_v58 = vpop.permute.xlu1 %8386  ;;  %v18937_v49 = vld [vmem:[#allocation62_spill] sm:$0xff]  ;;  %v6512_v47 = vand.u32 4294901760, %v6511_v23 }
 0x6cf   : > { %6505 = vmatmul.f32.gmra.mxu2 %v6504_v15  ;;  %7380 = vmatpush.xpose.msra.mxu3 %v14747_v39  ;;  %18935 = vst [vmem:[#allocation24_spill] sm:$0xff] %v15074_v58  ;;  %v5361_v51 = vadd.f32 %v18937_v49, %v5292_v31  ;;  %v15089_v58 = vpop.permute.xlu2 %9056  ;;  %v15094_v31 = vsub.f32 %v6432_v41, %v15072_v42 }
 0x6d0   : > { %7318 = vmatpush.xpose.msra.mxu2 %v14814_v45  ;;  %6664 = vmatmul.f32.vlgmr.msra.gmra.mxu0 %v14847_v30  ;;  %18941 = vst [vmem:[#allocation34_spill] sm:$0xff] %v15089_v58  ;;  %v15096_v49 = vpop.permute.xlu0 %8378 }
 0x6d1   : > { %6242 = vmatmul.f32.gmra.mxu1 %v18921_v8  ;;  %7447 = vmatpush.xpose.msra.mxu0 %v18931_v16  ;;  %v5563_v0 = vpop.f32.mrf.mxu3  ;;  %v18936_v8 = vld [vmem:[#allocation27_spill] sm:$0xff]  ;;  %v5430_v43 = vadd.f32 %v14879_v37, %v5361_v51  ;;  %18942 = vst [vmem:[#allocation39_spill] sm:$0xff] %v15096_v49 }
 0x6d2   : > { %v5510_v15 = vpop.f32.mrf.mxu2  ;;  %v15070_v54 = vadd.f32 %v5563_v0, %v5507_v21  ;;  %v18218_v0 = vand.u32 4294901760, %v15057_v28  ;;  %v18940_v21 = vand.u32 4294901760, %v14695_v27  ;;  %v18943_v27 = vand.u32 4294901760, %v14847_v30  ;;  %v18944_v51 = vld [vmem:[#allocation35_spill] sm:$0xff] }
 0x6d3   : > { %7382 = vmatpush.xpose.msra.mxu3 %v18936_v8  ;;  %v5511_v23 = vadd.f32 %v5510_v15, %v5430_v43 }
 0x6d4   : > { %18934 = vst [vmem:[#allocation45_spill] sm:$0xff] %v15070_v54  ;;  %7321 = vmatpush.xpose.msra.mxu2 %v14839_v32  ;;  %v15079_v44 = vpop.f32.mrf.mxu0  ;;  %v5592_v16 = vsel %vm4925_vm2, %v15070_v54, -inf  ;;  %v6519_v37 = vsub.f32 %v15057_v28, %v18218_v0 }
 0x6d5   : > { %18938 = vst [vmem:[#allocation42_spill] sm:$0xff] %v15079_v44  ;;  %7451 = vmatpush.xpose.msra.mxu0 %v18940_v21  ;;  %5593 = vmax.xlane.f32.xlu0 %v5592_v16  ;;  %v6434_v16 = vsel %vm4422_vm1, %v18944_v51, 0 }
 0x6d6   : > { %v15081_v46 = vpop.f32.mrf.mxu1  ;;  %6610 = vmatmul.f32.gmra.mxu3 %v14966_v1  ;;  %v15114_v30 = vand.u32 4294901760, %v6434_v16 }
 0x6d7   : > { %18939 = vst [vmem:[#allocation19_spill] sm:$0xff] %v15081_v46  ;;  %6513 = vmatmul.f32.gmra.mxu2 %v6512_v47  ;;  %7384 = vmatpush.xpose.msra.mxu3 %v14785_v12  ;;  %v18945_v47 = vand.u32 4294901760, %v14720_v3  ;;  %v6520_v3 = vand.u32 4294901760, %v6519_v37  ;;  %v15132_v0 = vpop.permute.xlu2 %9054  ;;  %v18952_v37 = vand.u32 4294901760, %v14901_v19 }
 0x6d8   : > { %6669 = vmatmul.f32.gmra.mxu0 %v14901_v19  ;;  %18951 = vst [vmem:[#allocation47_spill] sm:$0xff] %v15132_v0 }
 0x6d9   : > { %6730 = vmatmul.f32.vlgmr.msra.gmra.mxu1 %v18943_v27  ;;  %7455 = vmatpush.xpose.msra.mxu0 %v18945_v47  ;;  %v5567_v15 = vpop.f32.mrf.mxu3  ;;  %v18219_v47 = vand.u32 4294901760, %v15094_v31 }
 0x6da   : > { %7518 = vmatpush.xpose.msra.mxu1 %v14666_v63  ;;  %v15109_v41 = vpop.f32.mrf.mxu2  ;;  %v15111_v21 = vadd.f32 %v5567_v15, %v5511_v23  ;;  %v18949_v63 = vand.u32 4294901760, %v14745_v60  ;;  %v15126_v23 = vpop.permute.xlu1 %8368  ;;  %v15130_v15 = vsub.f32 %v6434_v16, %v15114_v30  ;;  %v18953_v60 = vand.u32 4294901760, %v14765_v40 }
 0x6db   : > { %7386 = vmatpush.xpose.msra.mxu3 %v14811_v36  ;;  %18950 = vst [vmem:[#allocation65_spill] sm:$0xff] %v15126_v23  ;;  %v18959_v40 = vand.u32 4294901760, %v14948_v11 }
 0x6dc   : > { %18946 = vst [vmem:[#allocation37_spill] sm:$0xff] %v15111_v21  ;;  %v15116_v43 = vpop.f32.mrf.mxu0  ;;  %v5595_v51 = vsel %vm4925_vm2, %v15111_v21, -inf }
 0x6dd   : > { %18947 = vst [vmem:[#allocation50_spill] sm:$0xff] %v15116_v43  ;;  %7459 = vmatpush.xpose.msra.mxu0 %v18949_v63  ;;  %5596 = vmax.xlane.f32.xlu0 %v5595_v51 }
 0x6de   : > { %v15118_v27 = vpop.f32.mrf.mxu1  ;;  %7520 = vmatpush.xpose.msra.mxu1 %v14676_v38  ;;  %6614 = vmatmul.f32.gmra.mxu3 %v15008_v33  ;;  %v6527_v38 = vsub.f32 %v15094_v31, %v18219_v47  ;;  %v18957_v47 = vand.u32 4294901760, %v14780_v10 }
 0x6df   : > { %18948 = vst [vmem:[#allocation48_spill] sm:$0xff] %v15118_v27  ;;  %6521 = vmatmul.f32.gmra.mxu2 %v6520_v3  ;;  %v15147_v3 = vpop.permute.xlu0 %8380 }
 0x6e0   : > { %6674 = vmatmul.f32.gmra.mxu0 %v14948_v11  ;;  %18954 = vst [vmem:[#allocation69_spill] sm:$0xff] %v15147_v3  ;;  %v6528_v19 = vand.u32 4294901760, %v6527_v38  ;;  %v15175_v3 = vpop.permute.xlu2 %9052 }
 0x6e1   : > { %6736 = vmatmul.f32.gmra.mxu1 %v18952_v37  ;;  %7463 = vmatpush.xpose.msra.mxu0 %v18953_v60  ;;  %v15145_v16 = vpop.f32.mrf.mxu3  ;;  %v18220_v37 = vand.u32 4294901760, %v15130_v15  ;;  %v18960_v60 = vand.u32 4294901760, %v14814_v45  ;;  %18963 = vst [vmem:[#allocation72_spill] sm:$0xff] %v15175_v3  ;;  %v18966_v45 = vand.u32 4294901760, %v14839_v32 }
 0x6e2   : > { %7522 = vmatpush.xpose.msra.mxu1 %v14704_v52  ;;  %v15143_v51 = vpop.f32.mrf.mxu2  ;;  %v15158_v52 = vpop.permute.xlu1 %8372 }
 0x6e3   : > { %18958 = vst [vmem:[#allocation57_spill] sm:$0xff] %v15158_v52  ;;  %v6535_v38 = vsub.f32 %v15130_v15, %v18220_v37 }
 0x6e4   : > { %v15149_v63 = vpop.f32.mrf.mxu0 }
 0x6e5   : > { %18955 = vst [vmem:[#allocation54_spill] sm:$0xff] %v15149_v63  ;;  %7467 = vmatpush.xpose.msra.mxu0 %v18957_v47  ;;  %v18962_v47 = vld [vmem:[#allocation53_spill] sm:$0xff]  ;;  %v6536_v52 = vand.u32 4294901760, %v6535_v38 }
 0x6e6   : > { %v15151_v49 = vpop.f32.mrf.mxu1  ;;  %7524 = vmatpush.xpose.msra.mxu1 %v18926_v57  ;;  %6618 = vmatmul.f32.gmra.mxu3 %v15042_v17 }
 0x6e7   : > { %18956 = vst [vmem:[#allocation70_spill] sm:$0xff] %v15151_v49  ;;  %6529 = vmatmul.f32.gmra.mxu2 %v6528_v19  ;;  %v7770_v19 = vsel %vm4422_vm1, %v18962_v47, 0  ;;  %v15188_v23 = vpop.permute.xlu0 %8382  ;;  %v18969_v47 = vand.u32 4294901760, %v14988_v25 }
 0x6e8   : > { %6679 = vmatmul.f32.gmra.mxu0 %v14988_v25  ;;  %v15181_v37 = vand.u32 4294901760, %v7770_v19  ;;  %18968 = vst [vmem:[#allocation68_spill] sm:$0xff] %v15188_v23  ;;  %v15219_v21 = vpop.permute.xlu2 %9050 }
 0x6e9   : > { %6742 = vmatmul.f32.gmra.mxu1 %v18959_v40  ;;  %7471 = vmatpush.xpose.msra.mxu0 %v18960_v60  ;;  %v15171_v57 = vpop.f32.mrf.mxu3  ;;  %18975 = vst [vmem:[#allocation49_spill] sm:$0xff] %v15219_v21 }
 0x6ea   : > { %7526 = vmatpush.xpose.msra.mxu1 %v14747_v39  ;;  %v15169_v10 = vpop.f32.mrf.mxu2  ;;  %v18967_v39 = vld [vmem:[#allocation61_spill] sm:$0xff]  ;;  %v15197_v32 = vsub.f32 %v7770_v19, %v15181_v37  ;;  %v15206_v23 = vpop.permute.xlu1 %9048  ;;  %v18978_v19 = vand.u32 4294901760, %v15021_v4 }
 0x6eb   : > { %18961 = vst [vmem:[#allocation66_spill] sm:$0xff] %v15169_v10  ;;  %v7768_v60 = vsel %vm4422_vm1, %v18967_v39, 0  ;;  %v18971_v39 = vld [vmem:[#allocation51_spill] sm:$0xff] }
 0x6ec   : > { %v15177_v11 = vpop.f32.mrf.mxu0  ;;  %v15194_v38 = vand.u32 4294901760, %v7768_v60  ;;  %18972 = vst [vmem:[#allocation75_spill] sm:$0xff] %v15206_v23  ;;  %v18979_v21 = vand.u32 4294901760, %v15197_v32 }
 0x6ed   : > { %18964 = vst [vmem:[#allocation77_spill] sm:$0xff] %v15177_v11  ;;  %7475 = vmatpush.xpose.msra.mxu0 %v18966_v45 }
 0x6ee   : > { %v15179_v40 = vpop.f32.mrf.mxu1  ;;  %7528 = vmatpush.xpose.msra.mxu1 %v18936_v8  ;;  %6622 = vmatmul.f32.gmra.mxu3 %v15072_v42  ;;  %v15211_v25 = vsub.f32 %v7768_v60, %v15194_v38  ;;  %v7872_v0 = vsub.f32 %v15197_v32, %v18979_v21 }
 0x6ef   : > { %18965 = vst [vmem:[#allocation76_spill] sm:$0xff] %v15179_v40  ;;  %6537 = vmatmul.f32.gmra.mxu2 %v6536_v52  ;;  %v7766_v52 = vsel %vm4422_vm1, %v18971_v39, 0  ;;  %v18976_v39 = vld [vmem:[#allocation84_spill] sm:$0xff]  ;;  %v15226_v60 = vpop.permute.xlu0 %9044 }
 0x6f0   : > { %6684 = vmatmul.f32.gmra.mxu0 %v15021_v4  ;;  %v7764_v23 = vsel %vm4422_vm1, %v18976_v39, 0  ;;  %18977 = vst [vmem:[#allocation22_spill] sm:$0xff] %v15226_v60  ;;  %v18223_v54 = vand.u32 4294901760, %v15211_v25  ;;  %v18982_v60 = vld [vmem:[#allocation100_spill] sm:$0xff]  ;;  %v7762_v4 = vsel %vm4422_vm1, %v14887_v48, 0  ;;  %v7873_v40 = vand.u32 4294901760, %v7872_v0  ;;  %v15271_v0 = vpop.permute.xlu2 %9046 }
 0x6f1   : > { %6748 = vmatmul.f32.gmra.mxu1 %v18969_v47  ;;  %v15202_v45 = vpop.f32.mrf.mxu3  ;;  %v15213_v47 = vand.u32 4294901760, %v7766_v52  ;;  %v7080_v11 = vsel %vm4422_vm1, %v18982_v60, 0  ;;  %18989 = vst [vmem:[#allocation31_spill] sm:$0xff] %v15271_v0 }
 0x6f2   : > { %7530 = vmatpush.xpose.msra.mxu1 %v14785_v12  ;;  %v15200_v8 = vpop.f32.mrf.mxu2  ;;  %18970 = vst [vmem:[#allocation52_spill] sm:$0xff] %v15202_v45  ;;  %v7878_v63 = vsub.f32 %v15211_v25, %v18223_v54  ;;  %v15264_v27 = vand.u32 4294901760, %v7080_v11 }
 0x6f4   : > { %v15208_v3 = vpop.f32.mrf.mxu0  ;;  %18987 = vst [vmem:[#allocation28_spill] sm:$0xff] %v15264_v27  ;;  %v7879_v45 = vand.u32 4294901760, %v7878_v63 }
 0x6f5   : > { %18973 = vst [vmem:[#allocation67_spill] sm:$0xff] %v15208_v3 }
 0x6f6   : > { %7532 = vmatpush.xpose.msra.mxu1 %v14811_v36  ;;  %v15217_v12 = vpop.f32.mrf.mxu1  ;;  %6626 = vmatmul.f32.gmra.mxu3 %v15114_v30  ;;  %v15232_v36 = vsub.f32 %v7766_v52, %v15213_v47  ;;  %v15249_v52 = vpop.permute.xlu1 %9034 }
 0x6f7   : > { %18974 = vst [vmem:[#allocation73_spill] sm:$0xff] %v15217_v12  ;;  %6817 = vmatmul.f32.vlgmr.msrb.gmra.mxu2 %v14823_v5  ;;  %v15242_v12 = vand.u32 4294901760, %v7764_v23 }
 0x6f8   : > { %7781 = vmatpush.xpose.msrb.mxu2 %v15181_v37  ;;  %6689 = vmatmul.f32.gmra.mxu0 %v15057_v28  ;;  %18983 = vst [vmem:[#allocation23_spill] sm:$0xff] %v15249_v52  ;;  %v15266_v52 = vand.u32 4294901760, %v7762_v4 }
 0x6f9   : > { %6754 = vmatmul.f32.gmra.mxu1 %v18978_v19  ;;  %v15237_v58 = vpop.f32.mrf.mxu3  ;;  %v15260_v60 = vsub.f32 %v7764_v23, %v15242_v12  ;;  %v18990_v23 = vld [vmem:[#allocation95_spill] sm:$0xff] }
 0x6fa   : > { %18980 = vst [vmem:[#allocation71_spill] sm:$0xff] %v15237_v58  ;;  %v15239_v39 = vpop.f32.mrf.mxu2  ;;  %v7082_v54 = vsel %vm4422_vm1, %v18990_v23, 0  ;;  %v15291_v0 = vsub.f32 %v7762_v4, %v15266_v52  ;;  %v15293_v23 = vpop.permute.xlu0 %9030 }
 0x6fb   : > { %18981 = vst [vmem:[#allocation80_spill] sm:$0xff] %v15239_v39  ;;  %v18986_v39 = vld [vmem:[#allocation60_spill] sm:$0xff] }
 0x6fc   : > { %7783 = vmatpush.xpose.msrb.mxu2 %v15194_v38  ;;  %v7760_v48 = vsel %vm4422_vm1, %v18986_v39, 0  ;;  %18988 = vst [vmem:[#allocation94_spill] sm:$0xff] %v15266_v52  ;;  %v18991_v39 = vand.u32 4294901760, %v15057_v28  ;;  %v19008_v43 = vand.u32 4294901760, %v15291_v0 }
 0x6fd   : > { %v15251_v19 = vpop.f32.mrf.mxu0  ;;  %v15276_v3 = vand.u32 4294901760, %v7760_v48  ;;  %18995 = vst [vmem:[#allocation81_spill] sm:$0xff] %v15293_v23 }
 0x6fe   : > { %18984 = vst [vmem:[#allocation63_spill] sm:$0xff] %v15251_v19  ;;  %v15253_v21 = vpop.f32.mrf.mxu1  ;;  %6874 = vmatmul.f32.vlgmr.msrb.gmra.mxu3 %v14823_v5  ;;  %v18994_v5 = vand.u32 4294901760, %v15232_v36  ;;  %v15313_v10 = vpop.permute.xlu1 %9038 }
 0x6ff   : > { %18985 = vst [vmem:[#allocation98_spill] sm:$0xff] %v15253_v21  ;;  %6821 = vmatmul.f32.gmra.mxu2 %v14873_v62  ;;  %7874 = vmatpush.xpose.msrb.mxu3 %v7873_v40  ;;  %v15288_v40 = vsub.f32 %v7080_v11, %v15264_v27  ;;  %v15304_v46 = vsub.f32 %v7760_v48, %v15276_v3 }
 0x700   : > { %7785 = vmatpush.xpose.msrb.mxu2 %v15213_v47  ;;  %6694 = vmatmul.f32.gmra.mxu0 %v15094_v31  ;;  %v7884_v44 = vsub.f32 %v15232_v36, %v18994_v5  ;;  %v18998_v5 = vld [vmem:[#allocation55_spill] sm:$0xff]  ;;  %19001 = vst [vmem:[#allocation99_spill] sm:$0xff] %v15313_v10  ;;  %v19003_v10 = vand.u32 4294901760, %v15094_v31  ;;  %v7896_v31 = vsub.f32 %v15291_v0, %v19008_v43 }
 0x701   : > { %6760 = vmatmul.f32.gmra.mxu1 %v18991_v39  ;;  %v15282_v21 = vpop.f32.mrf.mxu3  ;;  %v18996_v39 = vld [vmem:[#allocation25_spill] sm:$0xff]  ;;  %v7756_v11 = vsel %vm4422_vm1, %v18998_v5, 0 }
 0x702   : > { %v15280_v19 = vpop.f32.mrf.mxu2  ;;  %18993 = vst [vmem:[#allocation86_spill] sm:$0xff] %v15282_v21  ;;  %v15299_v21 = vand.u32 4294901760, %v7082_v54  ;;  %v7885_v63 = vand.u32 4294901760, %v7884_v44  ;;  %v15349_v48 = vpop.permute.xlu0 %9036 }
 0x703   : > { %18992 = vst [vmem:[#allocation21_spill] sm:$0xff] %v15280_v19  ;;  %v7758_v19 = vsel %vm4422_vm1, %v18996_v39, 0  ;;  %7880 = vmatpush.xpose.msrb.mxu3 %v7879_v45  ;;  %v19002_v45 = vand.u32 4294901760, %v15260_v60  ;;  %v15326_v39 = vand.u32 4294901760, %v7756_v11 }
 0x704   : > { %7787 = vmatpush.xpose.msrb.mxu2 %v15242_v12  ;;  %18997 = vst [vmem:[#allocation85_spill] sm:$0xff] %v15299_v21  ;;  %v15310_v28 = vand.u32 4294901760, %v7758_v19  ;;  %v15324_v44 = vsub.f32 %v7082_v54, %v15299_v21  ;;  %v15341_v54 = vpop.permute.xlu2 %9028 }
 0x705   : > { %v15306_v4 = vpop.f32.mrf.mxu0  ;;  %v7890_v5 = vsub.f32 %v15260_v60, %v19002_v45  ;;  %19007 = vst [vmem:[#allocation93_spill] sm:$0xff] %v15341_v54 }
 0x706   : > { %18999 = vst [vmem:[#allocation79_spill] sm:$0xff] %v15306_v4  ;;  %v15308_v23 = vpop.f32.mrf.mxu1  ;;  %6878 = vmatmul.f32.gmra.mxu3 %v14873_v62  ;;  %v15336_v62 = vsub.f32 %v7758_v19, %v15310_v28  ;;  %v15352_v19 = vsub.f32 %v7756_v11, %v15326_v39  ;;  %v15368_v11 = vpop.permute.xlu1 %9042 }
 0x707   : > { %19000 = vst [vmem:[#allocation83_spill] sm:$0xff] %v15308_v23  ;;  %6825 = vmatmul.f32.gmra.mxu2 %v14925_v61  ;;  %7886 = vmatpush.xpose.msrb.mxu3 %v7885_v63  ;;  %v19006_v63 = vand.u32 4294901760, %v15288_v40  ;;  %v7891_v49 = vand.u32 4294901760, %v7890_v5  ;;  %v19013_v5 = vand.u32 4294901760, %v15304_v46 }
 0x708   : > { %7789 = vmatpush.xpose.msrb.mxu2 %v15266_v52  ;;  %6699 = vmatmul.f32.gmra.mxu0 %v15130_v15  ;;  %19010 = vst [vmem:[#allocation104_spill] sm:$0xff] %v15349_v48  ;;  %v7897_v48 = vand.u32 4294901760, %v7896_v31 }
 0x709   : > { %6766 = vmatmul.f32.gmra.mxu1 %v19003_v10  ;;  %v15332_v45 = vpop.f32.mrf.mxu3  ;;  %v7139_v23 = vsub.f32 %v15288_v40, %v19006_v63  ;;  %v19009_v10 = vld [vmem:[#allocation64_spill] sm:$0xff]  ;;  %v7902_v54 = vsub.f32 %v15304_v46, %v19013_v5  ;;  %19015 = vst [vmem:[#allocation27_spill] sm:$0xff] %v15368_v11 }
 0x70a   : > { %v15330_v4 = vpop.f32.mrf.mxu2  ;;  %19005 = vst [vmem:[#allocation88_spill] sm:$0xff] %v15332_v45 }
 0x70b   : > { %19004 = vst [vmem:[#allocation92_spill] sm:$0xff] %v15330_v4  ;;  %v7084_v4 = vsel %vm4422_vm1, %v19009_v10, 0  ;;  %7892 = vmatpush.xpose.msrb.mxu3 %v7891_v49  ;;  %v7140_v58 = vand.u32 4294901760, %v7139_v23  ;;  %v19017_v23 = vand.u32 4294901760, %v15130_v15  ;;  %v18224_v15 = vand.u32 4294901760, %v15352_v19 }
 0x70c   : > { %7791 = vmatpush.xpose.msrb.mxu2 %v15276_v3  ;;  %v15362_v10 = vand.u32 4294901760, %v7084_v4 }
 0x70d   : > { %v15356_v63 = vpop.f32.mrf.mxu0 }
 0x70e   : > { %v15354_v45 = vpop.f32.mrf.mxu1  ;;  %19012 = vst [vmem:[#allocation90_spill] sm:$0xff] %v15356_v63  ;;  %6882 = vmatmul.f32.gmra.mxu3 %v14925_v61  ;;  %v19020_v61 = vand.u32 4294901760, %v15324_v44  ;;  %v15383_v11 = vsub.f32 %v7084_v4, %v15362_v10 }
 0x70f   : > { %19011 = vst [vmem:[#allocation18_spill] sm:$0xff] %v15354_v45  ;;  %6829 = vmatmul.f32.gmra.mxu2 %v14966_v1  ;;  %7898 = vmatpush.xpose.msrb.mxu3 %v7897_v48  ;;  %v19016_v45 = vld [vmem:[#allocation91_spill] sm:$0xff]  ;;  %v19021_v48 = vand.u32 4294901760, %v15336_v62 }
 0x710   : > { %19014 = vst [vmem:[#allocation89_spill] sm:$0xff] %v15362_v10  ;;  %7793 = vmatpush.xpose.msrb.mxu2 %v15310_v28  ;;  %7141 = vmatmul.f32.vlgmr.msrb.gmra.mxu0 %v7140_v58  ;;  %v7086_v5 = vsel %vm4422_vm1, %v19016_v45, 0  ;;  %v7147_v49 = vsub.f32 %v15324_v44, %v19020_v61  ;;  %v7903_v58 = vand.u32 4294901760, %v7902_v54 }
 0x711   : > { %6772 = vmatmul.f32.gmra.mxu1 %v19017_v23  ;;  %7960 = vmatpush.xpose.msrb.mxu0 %v15197_v32  ;;  %v15377_v31 = vpop.f32.mrf.mxu3  ;;  %v7908_v45 = vsub.f32 %v15336_v62, %v19021_v48  ;;  %v15390_v23 = vpop.permute.xlu2 %9032  ;;  %v7914_v48 = vsub.f32 %v15352_v19, %v18224_v15 }
 0x712   : > { %v15375_v43 = vpop.f32.mrf.mxu2  ;;  %19019 = vst [vmem:[#allocation35_spill] sm:$0xff] %v15377_v31  ;;  %v7148_v63 = vand.u32 4294901760, %v7147_v49  ;;  %v15416_v15 = vpop.permute.xlu1 %8398 }
 0x713   : > { %19018 = vst [vmem:[#allocation62_spill] sm:$0xff] %v15375_v43  ;;  %7904 = vmatpush.xpose.msrb.mxu3 %v7903_v58  ;;  %v15392_v43 = vand.u32 4294901760, %v7086_v5  ;;  %v7909_v54 = vand.u32 4294901760, %v7908_v45  ;;  %v7915_v31 = vand.u32 4294901760, %v7914_v48 }
 0x714   : > { %7795 = vmatpush.xpose.msrb.mxu2 %v15326_v39  ;;  %19022 = vst [vmem:[#allocation53_spill] sm:$0xff] %v15390_v23  ;;  %v15404_v23 = vpop.permute.xlu0 %9040 }
 0x715   : > { %7963 = vmatpush.xpose.msrb.mxu0 %v15211_v25  ;;  %v15395_v61 = vpop.f32.mrf.mxu0  ;;  %19025 = vst [vmem:[#allocation84_spill] sm:$0xff] %v15404_v23  ;;  %v15414_v49 = vsub.f32 %v7086_v5, %v15392_v43 }
 0x716   : > { %19023 = vst [vmem:[#allocation61_spill] sm:$0xff] %v15395_v61  ;;  %v15397_v4 = vpop.f32.mrf.mxu1  ;;  %6886 = vmatmul.f32.gmra.mxu3 %v14966_v1  ;;  %v19028_v1 = vand.u32 4294901760, %v15383_v11 }
 0x717   : > { %19024 = vst [vmem:[#allocation51_spill] sm:$0xff] %v15397_v4  ;;  %6833 = vmatmul.f32.gmra.mxu2 %v15008_v33  ;;  %7910 = vmatpush.xpose.msrb.mxu3 %v7909_v54  ;;  %v19029_v54 = vld [vmem:[#allocation74_spill] sm:$0xff] }
 0x718   : > { %7149 = vmatmul.f32.gmra.mxu0 %v7148_v63  ;;  %v7155_v63 = vsub.f32 %v15383_v11, %v19028_v1  ;;  %v7088_v23 = vsel %vm4422_vm1, %v19029_v54, 0 }
 0x719   : > { %7258 = vmatmul.f32.vlgmr.msrb.gmra.mxu1 %v15264_v27  ;;  %7966 = vmatpush.xpose.msrb.mxu0 %v15232_v36  ;;  %v15411_v45 = vpop.f32.mrf.mxu3  ;;  %v15429_v5 = vand.u32 4294901760, %v7088_v23  ;;  %v15431_v27 = vpop.permute.xlu2 %9058 }
 0x71a   : > { %v15409_v58 = vpop.f32.mrf.mxu2  ;;  %19027 = vst [vmem:[#allocation60_spill] sm:$0xff] %v15411_v45  ;;  %8032 = vmatpush.xpose.msrb.mxu1 %v15181_v37  ;;  %v7156_v48 = vand.u32 4294901760, %v7155_v63  ;;  %v19035_v63 = vld [vmem:[#allocation78_spill] sm:$0xff] }
 0x71b   : > { %19026 = vst [vmem:[#allocation100_spill] sm:$0xff] %v15409_v58  ;;  %7916 = vmatpush.xpose.msrb.mxu3 %v7915_v31  ;;  %v15445_v4 = vsub.f32 %v7088_v23, %v15429_v5  ;;  %v7090_v1 = vsel %vm4422_vm1, %v19035_v63, 0 }
 0x71c   : > { %19031 = vst [vmem:[#allocation25_spill] sm:$0xff] %v15431_v27 }
 0x71d   : > { %7969 = vmatpush.xpose.msrb.mxu0 %v15260_v60  ;;  %v15425_v58 = vpop.f32.mrf.mxu0  ;;  %19034 = vst [vmem:[#allocation91_spill] sm:$0xff] %v15445_v4 }
 0x71e   : > { %v15427_v45 = vpop.f32.mrf.mxu1  ;;  %8034 = vmatpush.xpose.msrb.mxu1 %v15194_v38  ;;  %6890 = vmatmul.f32.gmra.mxu3 %v15008_v33 }
 0x71f   : > { %19030 = vst [vmem:[#allocation95_spill] sm:$0xff] %v15427_v45  ;;  %6837 = vmatmul.f32.gmra.mxu2 %v15042_v17  ;;  %v4928_v31 = vpop.xlane.xlu0 %4927 }
 0x720   : > { %7157 = vmatmul.f32.gmra.mxu0 %v7156_v48  ;;  %v4950_v54 = vsub.f32 %v14842_v34, %v4928_v31  ;;  %v19036_v34 = vand.u32 4294901760, %v15414_v49 }
 0x721   : > { %7262 = vmatmul.f32.gmra.mxu1 %v15299_v21  ;;  %7972 = vmatpush.xpose.msrb.mxu0 %v15291_v0  ;;  %v15442_v27 = vpop.f32.mrf.mxu3 }
 0x722   : > { %v15440_v45 = vpop.f32.mrf.mxu2  ;;  %19033 = vst [vmem:[#allocation64_spill] sm:$0xff] %v15442_v27  ;;  %8036 = vmatpush.xpose.msrb.mxu1 %v15213_v47  ;;  %v4934_v33 = vpop.xlane.xlu1 %4933  ;;  %v4958_v48 = vmul.f32 1.442695, %v4950_v54  ;;  %v7163_v31 = vsub.f32 %v15414_v49, %v19036_v34  ;;  %v18232_v34 = vand.u32 4294901760, %v15445_v4 }
 0x723   : > { %19032 = vst [vmem:[#allocation55_spill] sm:$0xff] %v15440_v45  ;;  %v4952_v21 = vsub.f32 %v14863_v13, %v4934_v33  ;;  %v15454_v45 = vand.u32 4294901760, %v7090_v1 }
 0x724   : > { %10050 = vpow2.f32 %v4958_v48  ;;  %v7164_v54 = vand.u32 4294901760, %v7163_v31 }
 0x725   : > { %v4962_v27 = vmul.f32 1.442695, %v4952_v21  ;;  %7975 = vmatpush.xpose.msrb.mxu0 %v15304_v46  ;;  %v15457_v23 = vpop.f32.mrf.mxu0  ;;  %v15467_v33 = vsub.f32 %v7090_v1, %v15454_v45  ;;  %v7171_v1 = vsub.f32 %v15445_v4, %v18232_v34 }
 0x726   : > { %19037 = vst [vmem:[#allocation74_spill] sm:$0xff] %v15457_v23  ;;  %v15459_v61 = vpop.f32.mrf.mxu1  ;;  %8038 = vmatpush.xpose.msrb.mxu1 %v15242_v12  ;;  %6894 = vmatmul.f32.gmra.mxu3 %v15042_v17 }
 0x727   : > { %6841 = vmatmul.f32.gmra.mxu2 %v15072_v42  ;;  %v4931_v63 = vpop.xlane.xlu2 %4930  ;;  %10052 = vpow2.f32 %v4962_v27  ;;  %v4937_v13 = vpop.xlane.xlu0 %4936  ;;  %v19041_v27 = vld [vmem:[#allocation96_spill] sm:$0xff] }
 0x728   : > { %7165 = vmatmul.f32.gmra.mxu0 %v7164_v54  ;;  %v4953_v21 = vsub.f32 %v14895_v53, %v4937_v13  ;;  %v7092_v17 = vsel %vm4422_vm1, %v19041_v27, 0  ;;  %v4951_v53 = vsub.f32 %v14885_v18, %v4931_v63  ;;  %v19043_v27 = vld [vmem:[#allocation101_spill] sm:$0xff] }
 0x729   : > { %7266 = vmatmul.f32.gmra.mxu1 %v15362_v10  ;;  %7978 = vmatpush.xpose.msrb.mxu0 %v15336_v62  ;;  %v15473_v31 = vpop.f32.mrf.mxu3 }
 0x72a   : > { %v15471_v48 = vpop.f32.mrf.mxu2  ;;  %19039 = vst [vmem:[#allocation105_spill] sm:$0xff] %v15473_v31  ;;  %v15475_v23 = vpop.eup %10050  ;;  %8040 = vmatpush.xpose.msrb.mxu1 %v15266_v52  ;;  %v4964_v54 = vmul.f32 1.442695, %v4953_v21  ;;  %v15488_v31 = vand.u32 4294901760, %v7092_v17  ;;  %v5366_v52 = vadd.f32 %v14865_v7, %v19043_v27  ;;  %v4960_v34 = vmul.f32 1.442695, %v4951_v53 }
 0x72b   : > { %19038 = vst [vmem:[#allocation78_spill] sm:$0xff] %v15471_v48  ;;  %v4974_v13 = vsel %vm4925_vm2, %v15475_v23, 0.0  ;;  %v4943_v10 = vpop.xlane.xlu1 %4942 }
 0x72c   : > { %19040 = vst [vmem:[#allocation106_spill] sm:$0xff] %v15475_v23  ;;  %10054 = vpow2.f32 %v4964_v54  ;;  %4975 = vadd.xlane.f32.xlu1 %v4974_v13  ;;  %v7172_v54 = vand.u32 4294901760, %v7171_v1  ;;  %v5436_v7 = vadd.f32 %v14929_v9, %v5366_v52  ;;  %v4955_v27 = vsub.f32 %v14914_v29, %v4943_v10  ;;  %v19047_v1 = vld [vmem:[#allocation82_spill] sm:$0xff] }
 0x72d   : > { %v15486_v48 = vpop.eup %10052  ;;  %7981 = vmatpush.xpose.msrb.mxu0 %v15352_v19  ;;  %v15493_v18 = vpop.f32.mrf.mxu0  ;;  %v15508_v4 = vsub.f32 %v7092_v17, %v15488_v31  ;;  %10056 = vpow2.f32 %v4960_v34 }
 0x72e   : > { %19042 = vst [vmem:[#allocation96_spill] sm:$0xff] %v15486_v48  ;;  %v15495_v63 = vpop.f32.mrf.mxu1  ;;  %8042 = vmatpush.xpose.msrb.mxu1 %v15276_v3  ;;  %v4980_v13 = vsel %vm4925_vm2, %v15486_v48, 0.0  ;;  %6898 = vmatmul.f32.gmra.mxu3 %v15072_v42  ;;  %v5515_v48 = vadd.f32 %v15109_v41, %v5436_v7  ;;  %v19048_v42 = vand.u32 4294901760, %v15467_v33  ;;  %v5589_v41 = vsel %vm4925_vm2, %v15034_v14, -inf }
 0x72f   : > { %19044 = vst [vmem:[#allocation101_spill] sm:$0xff] %v15493_v18  ;;  %6845 = vmatmul.f32.gmra.mxu2 %v15114_v30  ;;  %v4940_v23 = vpop.xlane.xlu2 %4939  ;;  %4981 = vadd.xlane.f32.xlu2 %v4980_v13  ;;  %v7094_v18 = vsel %vm4422_vm1, %v19047_v1, 0 }
 0x730   : > { %19045 = vst [vmem:[#allocation107_spill] sm:$0xff] %v15495_v63  ;;  %v19046_v63 = vld [vmem:[#allocation44_spill] sm:$0xff]  ;;  %7173 = vmatmul.f32.gmra.mxu0 %v7172_v54  ;;  %v4946_v53 = vpop.xlane.xlu0 %4945  ;;  %v4954_v17 = vsub.f32 %v14935_v59, %v4940_v23  ;;  %v4968_v54 = vmul.f32 1.442695, %v4955_v27  ;;  %v15539_v59 = vand.u32 4294901760, %v7094_v18 }
 0x731   : > { %v5371_v21 = vadd.f32 %v14927_v26, %v19046_v63  ;;  %7270 = vmatmul.f32.gmra.mxu1 %v15392_v43  ;;  %v15516_v29 = vpop.f32.mrf.mxu3  ;;  %v7179_v26 = vsub.f32 %v15467_v33, %v19048_v42  ;;  %v15529_v63 = vadd.f32 %v15145_v16, %v5515_v48  ;;  %v4956_v13 = vsub.f32 %v14944_v20, %v4946_v53 }
 0x732   : > { %v15514_v9 = vpop.f32.mrf.mxu2  ;;  %v15521_v52 = vpop.eup %10054  ;;  %8044 = vmatpush.xpose.msrb.mxu1 %v15310_v28  ;;  %v4966_v23 = vmul.f32 1.442695, %v4954_v17  ;;  %v18238_v20 = vand.u32 4294901760, %v15508_v4  ;;  %10058 = vpow2.f32 %v4968_v54  ;;  %v19050_v17 = vand.u32 4294901760, %v15211_v25 }
 0x733   : > { %v5442_v10 = vadd.f32 %v14970_v6, %v5371_v21  ;;  %v4983_v7 = vsel %vm4925_vm2, %v15521_v52, 0.0  ;;  %v7180_v16 = vand.u32 4294901760, %v7179_v26  ;;  %v4970_v27 = vmul.f32 1.442695, %v4956_v13  ;;  %v15552_v1 = vpop.eup %10056 }
 0x734   : > { %5590 = vmax.xlane.f32.xlu1 %v5589_v41  ;;  %4984 = vadd.xlane.f32.xlu0 %v4983_v7  ;;  %v5598_v53 = vsel %vm4925_vm2, %v15529_v63, -inf  ;;  %10060 = vpow2.f32 %v4966_v23  ;;  %v4977_v41 = vsel %vm4925_vm2, %v15552_v1, 0.0 }
 0x735   : > { %v5519_v6 = vadd.f32 %v15143_v51, %v5442_v10  ;;  %v15535_v34 = vpop.f32.mrf.mxu0  ;;  %v19049_v51 = vand.u32 4294901760, %v15197_v32  ;;  %v15558_v10 = vsub.f32 %v7094_v18, %v15539_v59  ;;  %10062 = vpow2.f32 %v4970_v27 }
 0x736   : > { %v15537_v21 = vpop.f32.mrf.mxu1  ;;  %8046 = vmatpush.xpose.msrb.mxu1 %v15326_v39  ;;  %6902 = vmatmul.f32.gmra.mxu3 %v15114_v30  ;;  %v7187_v30 = vsub.f32 %v15508_v4, %v18238_v20  ;;  %v19052_v27 = vand.u32 4294901760, %v15232_v36 }
 0x737   : > { %7324 = vmatmul.f32.vlgmr.msra.gmra.mxu2 %v15288_v40  ;;  %v15545_v48 = vadd.f32 %v15171_v57, %v5519_v6  ;;  %5599 = vmax.xlane.f32.xlu2 %v5598_v53  ;;  %v4949_v42 = vpop.xlane.xlu2 %4948  ;;  %v18237_v6 = vand.u32 4294901760, %v15558_v10 }
 0x738   : > { %8107 = vmatpush.xpose.msra.mxu2 %v19049_v51  ;;  %7181 = vmatmul.f32.gmra.mxu0 %v7180_v16  ;;  %v4957_v32 = vsub.f32 %v14983_v22, %v4949_v42  ;;  %v15570_v18 = vpop.eup %10058  ;;  %v5381_v22 = vadd.f32 %v15010_v56, %v14959_v24  ;;  %v7188_v25 = vand.u32 4294901760, %v7187_v30  ;;  %v19051_v16 = vand.u32 4294901760, %v15288_v40 }
 0x739   : > { %7274 = vmatmul.f32.gmra.mxu1 %v15429_v5  ;;  %v15555_v26 = vpop.f32.mrf.mxu3  ;;  %v5601_v54 = vsel %vm4925_vm2, %v15545_v48, -inf  ;;  %v4989_v24 = vsel %vm4925_vm2, %v15570_v18, 0.0  ;;  %v5376_v42 = vadd.f32 %v14968_v55, %v14916_v50  ;;  %v19054_v55 = vld [vmem:[#allocation71_spill] sm:$0xff] }
 0x73a   : > { %v6482_v57 = vpop.f32.mrf.mxu2  ;;  %v4972_v23 = vmul.f32 1.442695, %v4957_v32  ;;  %v15584_v51 = vpop.eup %10060  ;;  %v5454_v53 = vadd.f32 %v15045_v35, %v5381_v22  ;;  %v7195_v35 = vsub.f32 %v15558_v10, %v18237_v6  ;;  %v19090_v6 = vld [vmem:[#allocation73_spill] sm:$0xff] }
 0x73b   : > { %v15590_v56 = vpop.eup %10062  ;;  %v4986_v50 = vsel %vm4925_vm2, %v15584_v51, 0.0 }
 0x73c   : > { %8111 = vmatpush.xpose.msra.mxu2 %v19050_v17  ;;  %4978 = vadd.xlane.f32.xlu1 %v4977_v41  ;;  %v5527_v30 = vadd.f32 %v15200_v8, %v5454_v53  ;;  %10064 = vpow2.f32 %v4972_v23  ;;  %v19053_v17 = vand.u32 4294901760, %v15260_v60  ;;  %v4992_v8 = vsel %vm4925_vm2, %v15590_v56, 0.0 }
 0x73d   : > { %5602 = vmax.xlane.f32.xlu0 %v5601_v54  ;;  %v15572_v13 = vpop.f32.mrf.mxu0  ;;  %v19057_v54 = vld [vmem:[#allocation70_spill] sm:$0xff]  ;;  %v8430_v60 = vsel %vm4422_vm1, %v15416_v15, 0  ;;  %v19065_v15 = vand.u32 4294901760, %v15324_v44 }
 0x73e   : > { %v15574_v7 = vpop.f32.mrf.mxu1  ;;  %7390 = vmatmul.f32.vlgmr.msra.gmra.mxu3 %v19051_v16  ;;  %v15607_v41 = vadd.f32 %v19054_v55, %v5527_v30  ;;  %v19062_v30 = vld [vmem:[#allocation52_spill] sm:$0xff]  ;;  %v19066_v55 = vand.u32 4294901760, %v15291_v0 }
 0x73f   : > { %7329 = vmatmul.f32.gmra.mxu2 %v15324_v44  ;;  %8178 = vmatpush.xpose.msra.mxu3 %v15181_v37  ;;  %v5448_v37 = vadd.f32 %v15012_v2, %v5376_v42  ;;  %v19058_v2 = vld [vmem:[#allocation66_spill] sm:$0xff]  ;;  %v19061_v42 = vld [vmem:[#allocation19_spill] sm:$0xff] }
 0x740   : > { %8115 = vmatpush.xpose.msra.mxu2 %v19052_v27  ;;  %7189 = vmatmul.f32.gmra.mxu0 %v7188_v25  ;;  %19055 = vst [vmem:[#allocation44_spill] sm:$0xff] %v15607_v41  ;;  %v19059_v27 = vld [vmem:[#allocation20_spill] sm:$0xff]  ;;  %v19070_v44 = vld [vmem:[#allocation35_spill] sm:$0xff] }
 0x741   : > { %7278 = vmatmul.f32.gmra.mxu1 %v15454_v45  ;;  %4990 = vadd.xlane.f32.xlu2 %v4989_v24  ;;  %v6599_v40 = vpop.f32.mrf.mxu3  ;;  %v5523_v25 = vadd.f32 %v19058_v2, %v5448_v37  ;;  %v8428_v53 = vsel %vm4422_vm1, %v19059_v27, 0  ;;  %v19060_v24 = vld [vmem:[#allocation29_spill] sm:$0xff]  ;;  %v19064_v37 = vld [vmem:[#allocation92_spill] sm:$0xff]  ;;  %v5607_v2 = vsel %vm4925_vm2, %v15607_v41, -inf }
 0x742   : > { %v6490_v36 = vpop.f32.mrf.mxu2  ;;  %v15596_v32 = vadd.f32 %v6599_v40, %v6482_v57  ;;  %v19056_v57 = vld [vmem:[#allocation50_spill] sm:$0xff]  ;;  %v5940_v40 = vadd.f32 %v19061_v42, %v19060_v24 }
 0x743   : > { %8180 = vmatpush.xpose.msra.mxu3 %v15194_v38  ;;  %v5948_v22 = vadd.f32 %v19057_v54, %v19056_v57  ;;  %v7196_v38 = vand.u32 4294901760, %v7195_v35  ;;  %v19068_v57 = vld [vmem:[#allocation48_spill] sm:$0xff]  ;;  %v15636_v54 = vand.u32 4294901760, %v8430_v60 }
 0x744   : > { %8119 = vmatpush.xpose.msra.mxu2 %v19053_v17  ;;  %4987 = vadd.xlane.f32.xlu1 %v4986_v50  ;;  %v15627_v17 = vadd.f32 %v19062_v30, %v5523_v25  ;;  %v15641_v25 = vpop.eup %10064  ;;  %v15646_v30 = vand.u32 4294901760, %v8428_v53 }
 0x745   : > { %v15617_v23 = vpop.f32.mrf.mxu0  ;;  %4993 = vadd.xlane.f32.xlu0 %v4992_v8  ;;  %v6016_v50 = vadd.f32 %v19064_v37, %v5948_v22  ;;  %v19067_v8 = vld [vmem:[#allocation42_spill] sm:$0xff]  ;;  %v19069_v22 = vld [vmem:[#allocation80_spill] sm:$0xff]  ;;  %v19071_v37 = vld [vmem:[#allocation21_spill] sm:$0xff] }
 0x746   : > { %v15619_v16 = vpop.f32.mrf.mxu1  ;;  %19063 = vst [vmem:[#allocation82_spill] sm:$0xff] %v15627_v17  ;;  %7396 = vmatmul.f32.gmra.mxu3 %v19065_v15  ;;  %v5944_v35 = vadd.f32 %v19068_v57, %v19067_v8  ;;  %v6006_v27 = vadd.f32 %v19069_v22, %v5940_v40  ;;  %v19074_v8 = vld [vmem:[#allocation86_spill] sm:$0xff]  ;;  %v15660_v22 = vsub.f32 %v8430_v60, %v15636_v54 }
 0x747   : > { %7334 = vmatmul.f32.gmra.mxu2 %v15383_v11  ;;  %8182 = vmatpush.xpose.msra.mxu3 %v15213_v47  ;;  %v6084_v24 = vadd.f32 %v19070_v44, %v6016_v50  ;;  %v19075_v50 = vand.u32 4294901760, %v15304_v46  ;;  %v19076_v44 = vld [vmem:[#allocation88_spill] sm:$0xff] }
 0x748   : > { %8123 = vmatpush.xpose.msra.mxu2 %v19066_v55  ;;  %7197 = vmatmul.f32.gmra.mxu0 %v7196_v38  ;;  %v6011_v15 = vadd.f32 %v19071_v37, %v5944_v35  ;;  %v19073_v38 = vld [vmem:[#allocation103_spill] sm:$0xff]  ;;  %v6072_v57 = vadd.f32 %v19074_v8, %v6006_v27  ;;  %v19081_v8 = vld [vmem:[#allocation61_spill] sm:$0xff] }
 0x749   : > { %7282 = vmatmul.f32.gmra.mxu1 %v15488_v31  ;;  %5608 = vmax.xlane.f32.xlu2 %v5607_v2  ;;  %v6603_v42 = vpop.f32.mrf.mxu3  ;;  %v8426_v55 = vsel %vm4422_vm1, %v19073_v38, 0  ;;  %v6167_v40 = vadd.f32 %v15425_v58, %v6084_v24  ;;  %v5604_v2 = vsel %vm4925_vm2, %v15627_v17, -inf  ;;  %v19077_v27 = vld [vmem:[#allocation67_spill] sm:$0xff]  ;;  %v19079_v24 = vld [vmem:[#allocation90_spill] sm:$0xff] }
 0x74a   : > { %v6498_v0 = vpop.f32.mrf.mxu2  ;;  %v15649_v47 = vadd.f32 %v6603_v42, %v6490_v36  ;;  %v6078_v35 = vadd.f32 %v19076_v44, %v6011_v15  ;;  %v4995_v36 = vsel %vm4925_vm2, %v15641_v25, 0.0  ;;  %v19078_v42 = vld [vmem:[#allocation98_spill] sm:$0xff]  ;;  %v6159_v46 = vadd.f32 %v19079_v24, %v6072_v57  ;;  %v19083_v44 = vld [vmem:[#allocation76_spill] sm:$0xff] }
 0x74b   : > { %8184 = vmatpush.xpose.msra.mxu3 %v15242_v12  ;;  %v5960_v58 = vadd.f32 %v19078_v42, %v19077_v27  ;;  %v15670_v37 = vadd.f32 %v15459_v61, %v6167_v40  ;;  %v15677_v15 = vsub.f32 %v8428_v53, %v15646_v30  ;;  %v15679_v12 = vand.u32 4294901760, %v8426_v55  ;;  %v19084_v27 = vld [vmem:[#allocation51_spill] sm:$0xff] }
 0x74c   : > { %19072 = vst [vmem:[#allocation71_spill] sm:$0xff] %v15649_v47  ;;  %8127 = vmatpush.xpose.msra.mxu2 %v19075_v50  ;;  %5605 = vmax.xlane.f32.xlu1 %v5604_v2  ;;  %v6163_v50 = vadd.f32 %v19081_v8, %v6078_v35  ;;  %v19082_v2 = vld [vmem:[#allocation54_spill] sm:$0xff]  ;;  %v15686_v61 = vadd.f32 %v19084_v27, %v6159_v46  ;;  %v19086_v40 = vld [vmem:[#allocation55_spill] sm:$0xff]  ;;  %v19087_v24 = vand.u32 4294901760, %v15383_v11  ;;  %v19088_v53 = vand.u32 4294901760, %v15336_v62  ;;  %v19093_v46 = vld [vmem:[#allocation28_spill] sm:$0xff] }
 0x74d   : > { %19080 = vst [vmem:[#allocation50_spill] sm:$0xff] %v15670_v37  ;;  %v15674_v60 = vpop.f32.mrf.mxu0  ;;  %4996 = vadd.xlane.f32.xlu0 %v4995_v36  ;;  %v5952_v57 = vadd.f32 %v19083_v44, %v19082_v2  ;;  %v6031_v42 = vadd.f32 %v19086_v40, %v5960_v58  ;;  %v19089_v36 = vld [vmem:[#allocation77_spill] sm:$0xff]  ;;  %v19091_v8 = vld [vmem:[#allocation95_spill] sm:$0xff]  ;;  %v19092_v2 = vld [vmem:[#allocation94_spill] sm:$0xff] }
 0x74e   : > { %v15672_v38 = vpop.f32.mrf.mxu1  ;;  %19085 = vst [vmem:[#allocation70_spill] sm:$0xff] %v15686_v61  ;;  %7402 = vmatmul.f32.gmra.mxu3 %v19087_v24  ;;  %v5956_v20 = vadd.f32 %v19090_v6, %v19089_v36  ;;  %v15697_v41 = vadd.f32 %v19091_v8, %v6163_v50  ;;  %v19094_v44 = vld [vmem:[#allocation33_spill] sm:$0xff]  ;;  %v19095_v11 = vld [vmem:[#allocation62_spill] sm:$0xff]  ;;  %v6252_v6 = vsel %vm4925_vm2, %v15670_v37, -inf  ;;  %v15710_v24 = vsub.f32 %v8426_v55, %v15679_v12  ;;  %v19098_v8 = vld [vmem:[#allocation100_spill] sm:$0xff] }
 0x74f   : > { %7339 = vmatmul.f32.gmra.mxu2 %v15414_v49  ;;  %8186 = vmatpush.xpose.msra.mxu3 %v19092_v2  ;;  %v8424_v58 = vsel %vm4422_vm1, %v19094_v44, 0  ;;  %v6021_v27 = vadd.f32 %v19095_v11, %v5952_v57  ;;  %v19096_v40 = vld [vmem:[#allocation105_spill] sm:$0xff]  ;;  %v19099_v44 = vld [vmem:[#allocation60_spill] sm:$0xff]  ;;  %v19101_v37 = vand.u32 4294901760, %v15352_v19  ;;  %v6246_v55 = vsel %vm4925_vm2, %v15686_v61, -inf  ;;  %v19115_v61 = vld [vmem:[#allocation79_spill] sm:$0xff] }
 0x750   : > { %8131 = vmatpush.xpose.msra.mxu2 %v19088_v53  ;;  %7477 = vmatmul.f32.vlgmr.msra.gmra.mxu0 %v19093_v46  ;;  %v6102_v62 = vadd.f32 %v19096_v40, %v6031_v42  ;;  %v19097_v53 = vld [vmem:[#allocation36_spill] sm:$0xff]  ;;  %v6026_v2 = vadd.f32 %v19098_v8, %v5956_v20  ;;  %v18242_v42 = vand.u32 4294901760, %v15677_v15  ;;  %v15724_v47 = vand.u32 4294901760, %v8424_v58 }
 0x751   : > { %7286 = vmatmul.f32.gmra.mxu1 %v15539_v59  ;;  %8441 = vmatpush.xpose.msra.mxu0 %v15636_v54  ;;  %v8422_v36 = vsel %vm4422_vm1, %v19097_v53, 0  ;;  %v6607_v57 = vpop.f32.mrf.mxu3  ;;  %v6090_v11 = vadd.f32 %v19099_v44, %v6021_v27  ;;  %v19102_v20 = vand.u32 4294901760, %v15660_v22  ;;  %v19103_v53 = vld [vmem:[#allocation64_spill] sm:$0xff]  ;;  %v19108_v44 = vld [vmem:[#allocation91_spill] sm:$0xff] }
 0x752   : > { %v6506_v50 = vpop.f32.mrf.mxu2  ;;  %6253 = vmax.xlane.f32.xlu2 %v6252_v6  ;;  %v6179_v40 = vadd.f32 %v15535_v34, %v6102_v62  ;;  %v15718_v35 = vadd.f32 %v6607_v57, %v6498_v0  ;;  %v6096_v8 = vadd.f32 %v19103_v53, %v6026_v2  ;;  %v6249_v34 = vsel %vm4925_vm2, %v15697_v41, -inf  ;;  %v19104_v0 = vld [vmem:[#allocation74_spill] sm:$0xff]  ;;  %v19107_v2 = vld [vmem:[#allocation101_spill] sm:$0xff] }
 0x753   : > { %v8532_v6 = vsub.f32 %v15660_v22, %v19102_v20  ;;  %8188 = vmatpush.xpose.msra.mxu3 %v15276_v3  ;;  %v6171_v19 = vadd.f32 %v19104_v0, %v6090_v11  ;;  %v15742_v57 = vand.u32 4294901760, %v8422_v36  ;;  %v8538_v11 = vsub.f32 %v15677_v15, %v18242_v42  ;;  %v19111_v20 = vld [vmem:[#allocation83_spill] sm:$0xff] }
 0x754   : > { %19100 = vst [vmem:[#allocation66_spill] sm:$0xff] %v15718_v35  ;;  %8135 = vmatpush.xpose.msra.mxu2 %v19101_v37  ;;  %6247 = vmax.xlane.f32.xlu1 %v6246_v55  ;;  %v15735_v37 = vadd.f32 %v15574_v7, %v6179_v40  ;;  %v6175_v3 = vadd.f32 %v19107_v2, %v6096_v8  ;;  %v19109_v55 = vld [vmem:[#allocation41_spill] sm:$0xff]  ;;  %v19110_v40 = vld [vmem:[#allocation63_spill] sm:$0xff] }
 0x755   : > { %8443 = vmatpush.xpose.msra.mxu0 %v15646_v30  ;;  %v15738_v27 = vpop.f32.mrf.mxu0  ;;  %6250 = vmax.xlane.f32.xlu0 %v6249_v34  ;;  %v8420_v7 = vsel %vm4422_vm1, %v19109_v55, 0  ;;  %v5964_v53 = vadd.f32 %v19111_v20, %v19110_v40  ;;  %v19112_v0 = vld [vmem:[#allocation107_spill] sm:$0xff]  ;;  %v19114_v34 = vand.u32 4294901760, %v15414_v49  ;;  %v15760_v2 = vsub.f32 %v8424_v58, %v15724_v47  ;;  %v5588_v55 = vpop.xlane.xlu2 %5587  ;;  %v19117_v40 = vld [vmem:[#allocation85_spill] sm:$0xff]  ;;  %v19118_v20 = vld [vmem:[#allocation78_spill] sm:$0xff] }
 0x756   : > { %19105 = vst [vmem:[#allocation20_spill] sm:$0xff] %v15735_v37  ;;  %v15740_v62 = vpop.f32.mrf.mxu1  ;;  %v15754_v35 = vadd.f32 %v19112_v0, %v6171_v19  ;;  %v15765_v17 = vadd.f32 %v15537_v21, %v6175_v3  ;;  %v8533_v19 = vand.u32 4294901760, %v8532_v6  ;;  %v6261_v58 = vsel %vm4925_vm2, %v15735_v37, -inf }
 0x757   : > { %19106 = vst [vmem:[#allocation29_spill] sm:$0xff] %v15738_v27  ;;  %7344 = vmatmul.f32.gmra.mxu2 %v19108_v44  ;;  %7408 = vmatmul.f32.gmra.mxu3 %v19114_v34  ;;  %v19116_v27 = vld [vmem:[#allocation18_spill] sm:$0xff]  ;;  %v6036_v49 = vadd.f32 %v19118_v20, %v5964_v53  ;;  %v15777_v21 = vsub.f32 %v8422_v36, %v15742_v57  ;;  %v19120_v36 = vand.u32 4294901760, %v15710_v24 }
 0x758   : > { %19113 = vst [vmem:[#allocation19_spill] sm:$0xff] %v15754_v35  ;;  %v5968_v42 = vadd.f32 %v19116_v27, %v19115_v61  ;;  %8190 = vmatpush.xpose.msra.mxu3 %v15310_v28  ;;  %7481 = vmatmul.f32.gmra.mxu0 %v19117_v40  ;;  %v15774_v61 = vand.u32 4294901760, %v8420_v7  ;;  %v8539_v27 = vand.u32 4294901760, %v8538_v11  ;;  %v6255_v20 = vsel %vm4925_vm2, %v15754_v35, -inf  ;;  %v19121_v11 = vld [vmem:[#allocation24_spill] sm:$0xff] }
 0x759   : > { %7534 = vmatmul.f32.vlgmr.msra.gmra.mxu1 %v19093_v46  ;;  %8445 = vmatpush.xpose.msra.mxu0 %v15679_v12  ;;  %v6611_v6 = vpop.f32.mrf.mxu3  ;;  %v6108_v3 = vadd.f32 %v15516_v29, %v6036_v49  ;;  %v19119_v46 = vld [vmem:[#allocation56_spill] sm:$0xff]  ;;  %v18246_v29 = vand.u32 4294901760, %v15760_v2  ;;  %v19123_v49 = vld [vmem:[#allocation38_spill] sm:$0xff] }
 0x75a   : > { %v6514_v0 = vpop.f32.mrf.mxu2  ;;  %v6041_v28 = vadd.f32 %v15514_v9, %v5968_v42  ;;  %8534 = vmatpush.xpose.msra.mxu1 %v8533_v19  ;;  %6262 = vmax.xlane.f32.xlu2 %v6261_v58  ;;  %v5610_v53 = vsub.f32 %v19119_v46, %v5588_v55  ;;  %v6612_v34 = vadd.f32 %v6611_v6, %v6506_v50  ;;  %v6258_v42 = vsel %vm4925_vm2, %v15765_v17, -inf  ;;  %v19124_v6 = vld [vmem:[#allocation32_spill] sm:$0xff] }
 0x75b   : > { %v8544_v9 = vsub.f32 %v15710_v24, %v19120_v36  ;;  %v8418_v50 = vsel %vm4422_vm1, %v19121_v11, 0  ;;  %v6183_v55 = vadd.f32 %v15572_v13, %v6108_v3  ;;  %v15801_v19 = vsub.f32 %v8420_v7, %v15774_v61 }
 0x75c   : > { %v6114_v8 = vadd.f32 %v15555_v26, %v6041_v28  ;;  %8192 = vmatpush.xpose.msra.mxu3 %v15326_v39  ;;  %6256 = vmax.xlane.f32.xlu1 %v6255_v20  ;;  %v8416_v58 = vsel %vm4422_vm1, %v19123_v49, 0  ;;  %v7740_v13 = vsel %vm4422_vm1, %v19124_v6, 0  ;;  %v5618_v3 = vmul.f32 1.442695, %v5610_v53 }
 0x75d   : > { %8447 = vmatpush.xpose.msra.mxu0 %v15724_v47  ;;  %v15796_v26 = vpop.f32.mrf.mxu0  ;;  %6259 = vmax.xlane.f32.xlu0 %v6258_v42  ;;  %v15810_v46 = vadd.f32 %v15619_v16, %v6183_v55  ;;  %v19126_v20 = vand.u32 4294901760, %v19108_v44  ;;  %v18244_v7 = vand.u32 4294901760, %v15777_v21  ;;  %v15815_v36 = vand.u32 4294901760, %v8418_v50 }
 0x75e   : > { %19122 = vst [vmem:[#allocation52_spill] sm:$0xff] %v15796_v26  ;;  %v15798_v39 = vpop.f32.mrf.mxu1  ;;  %v6187_v28 = vadd.f32 %v15617_v23, %v6114_v8  ;;  %8540 = vmatpush.xpose.msra.mxu1 %v8539_v27  ;;  %v19128_v23 = vld [vmem:[#allocation89_spill] sm:$0xff]  ;;  %v8545_v8 = vand.u32 4294901760, %v8544_v9  ;;  %v8550_v27 = vsub.f32 %v15760_v2, %v18246_v29  ;;  %v15826_v44 = vand.u32 4294901760, %v8416_v58 }
 0x75f   : > { %7349 = vmatmul.f32.gmra.mxu2 %v15467_v33  ;;  %19125 = vst [vmem:[#allocation92_spill] sm:$0xff] %v15810_v46  ;;  %7414 = vmatmul.f32.gmra.mxu3 %v19126_v20  ;;  %v18245_v11 = vand.u32 4294901760, %v15801_v19  ;;  %10066 = vpow2.f32 %v5618_v3  ;;  %v6264_v9 = vsel %vm4925_vm2, %v15810_v46, -inf  ;;  %v15836_v49 = vsub.f32 %v8418_v50, %v15815_v36  ;;  %v19131_v50 = vld [vmem:[#allocation58_spill] sm:$0xff] }
 0x760   : > { %v15818_v42 = vadd.f32 %v15672_v38, %v6187_v28  ;;  %7485 = vmatmul.f32.gmra.mxu0 %v19128_v23  ;;  %v15829_v38 = vand.u32 4294901760, %v7740_v13  ;;  %v8556_v28 = vsub.f32 %v15777_v21, %v18244_v7 }
 0x761   : > { %7538 = vmatmul.f32.gmra.mxu1 %v19117_v40  ;;  %8449 = vmatpush.xpose.msra.mxu0 %v15742_v57  ;;  %v6615_v53 = vpop.f32.mrf.mxu3  ;;  %v8551_v40 = vand.u32 4294901760, %v8550_v27  ;;  %v19132_v27 = vand.u32 4294901760, %v15467_v33 }
 0x762   : > { %19127 = vst [vmem:[#allocation42_spill] sm:$0xff] %v15818_v42  ;;  %v6522_v16 = vpop.f32.mrf.mxu2  ;;  %8546 = vmatpush.xpose.msra.mxu1 %v8545_v8  ;;  %v15831_v55 = vadd.f32 %v6615_v53, %v6514_v0  ;;  %v6267_v6 = vsel %vm4925_vm2, %v15818_v42, -inf  ;;  %v7742_v8 = vsel %vm4422_vm1, %v19131_v50, 0  ;;  %v8562_v53 = vsub.f32 %v15801_v19, %v18245_v11  ;;  %v19165_v42 = vld [vmem:[#allocation45_spill] sm:$0xff] }
 0x763   : > { %v15858_v7 = vsub.f32 %v7740_v13, %v15829_v38 }
 0x764   : > { %19129 = vst [vmem:[#allocation48_spill] sm:$0xff] %v15831_v55  ;;  %6265 = vmax.xlane.f32.xlu1 %v6264_v9  ;;  %v15855_v9 = vsub.f32 %v8416_v58, %v15826_v44  ;;  %v15868_v58 = vand.u32 4294901760, %v7742_v8  ;;  %v8563_v13 = vand.u32 4294901760, %v8562_v53  ;;  %v19136_v53 = vand.u32 4294901760, %v15508_v4 }
 0x765   : > { %8451 = vmatpush.xpose.msra.mxu0 %v15774_v61  ;;  %v6680_v3 = vpop.f32.mrf.mxu0  ;;  %6268 = vmax.xlane.f32.xlu0 %v6267_v6  ;;  %v15862_v6 = vpop.eup %10066 }
 0x766   : > { %v15844_v0 = vpop.f32.mrf.mxu1  ;;  %8552 = vmatpush.xpose.msra.mxu1 %v8551_v40  ;;  %v6681_v20 = vadd.f32 %v6680_v3, %v6612_v34  ;;  %v8557_v34 = vand.u32 4294901760, %v8556_v28  ;;  %v18247_v40 = vand.u32 4294901760, %v15836_v49  ;;  %19133 = vst [vmem:[#allocation35_spill] sm:$0xff] %v15862_v6 }
 0x767   : > { %19130 = vst [vmem:[#allocation80_spill] sm:$0xff] %v15844_v0  ;;  %7354 = vmatmul.f32.gmra.mxu2 %v15508_v4  ;;  %7420 = vmatmul.f32.gmra.mxu3 %v19132_v27  ;;  %v18249_v27 = vand.u32 4294901760, %v15858_v7 }
 0x768   : > { %7489 = vmatmul.f32.gmra.mxu0 %v15392_v43  ;;  %v8568_v28 = vsub.f32 %v15836_v49, %v18247_v40 }
 0x769   : > { %7542 = vmatmul.f32.gmra.mxu1 %v19128_v23  ;;  %8453 = vmatpush.xpose.msra.mxu0 %v15815_v36  ;;  %v6619_v3 = vpop.f32.mrf.mxu3  ;;  %v5634_v23 = vsel %vm4925_vm2, %v15862_v6, 0.0  ;;  %v7799_v40 = vsub.f32 %v15858_v7, %v18249_v27 }
 0x76a   : > { %v15866_v33 = vpop.f32.mrf.mxu2  ;;  %8558 = vmatpush.xpose.msra.mxu1 %v8557_v34  ;;  %v15870_v50 = vadd.f32 %v6619_v3, %v6522_v16  ;;  %v15888_v3 = vsub.f32 %v7742_v8, %v15868_v58  ;;  %v8569_v11 = vand.u32 4294901760, %v8568_v28 }
 0x76c   : > { %19134 = vst [vmem:[#allocation21_spill] sm:$0xff] %v15870_v50  ;;  %v18251_v46 = vand.u32 4294901760, %v15888_v3 }
 0x76d   : > { %8455 = vmatpush.xpose.msra.mxu0 %v15826_v44  ;;  %v15880_v34 = vpop.f32.mrf.mxu0  ;;  %5635 = vadd.xlane.f32.xlu0 %v5634_v23  ;;  %v19137_v23 = vand.u32 4294901760, %v15855_v9 }
 0x76e   : > { %19135 = vst [vmem:[#allocation103_spill] sm:$0xff] %v15880_v34  ;;  %v6749_v29 = vpop.f32.mrf.mxu1  ;;  %8564 = vmatpush.xpose.msra.mxu1 %v8563_v13  ;;  %v5594_v34 = vpop.xlane.xlu0 %5593 }
 0x76f   : > { %v15882_v16 = vadd.f32 %v6749_v29, %v6681_v20  ;;  %7359 = vmatmul.f32.gmra.mxu2 %v15558_v10  ;;  %7426 = vmatmul.f32.gmra.mxu3 %v19136_v53  ;;  %v8574_v29 = vsub.f32 %v15855_v9, %v19137_v23  ;;  %v19138_v20 = vld [vmem:[#allocation59_spill] sm:$0xff]  ;;  %v7800_v53 = vand.u32 4294901760, %v7799_v40  ;;  %v19141_v23 = vand.u32 4294901760, %v15558_v10  ;;  %v19142_v40 = vld [vmem:[#allocation30_spill] sm:$0xff] }
 0x770   : > { %7493 = vmatmul.f32.gmra.mxu0 %v15429_v5  ;;  %v7744_v13 = vsel %vm4422_vm1, %v19138_v20, 0 }
 0x771   : > { %7546 = vmatmul.f32.gmra.mxu1 %v15392_v43  ;;  %v15900_v8 = vpop.f32.mrf.mxu3  ;;  %v15902_v6 = vand.u32 4294901760, %v7744_v13  ;;  %v8575_v27 = vand.u32 4294901760, %v8574_v29  ;;  %v7746_v29 = vsel %vm4422_vm1, %v19142_v40, 0 }
 0x772   : > { %v6538_v4 = vpop.f32.mrf.mxu2  ;;  %8570 = vmatpush.xpose.msra.mxu1 %v8569_v11  ;;  %v7807_v11 = vsub.f32 %v15888_v3, %v18251_v46 }
 0x773   : > { %v15913_v43 = vsub.f32 %v7744_v13, %v15902_v6  ;;  %v15927_v13 = vand.u32 4294901760, %v7746_v29 }
 0x775   : > { %v15905_v28 = vpop.f32.mrf.mxu0 }
 0x776   : > { %19139 = vst [vmem:[#allocation86_spill] sm:$0xff] %v15905_v28  ;;  %v15907_v50 = vpop.f32.mrf.mxu1  ;;  %8576 = vmatpush.xpose.msra.mxu1 %v8575_v27 }
 0x777   : > { %19140 = vst [vmem:[#allocation88_spill] sm:$0xff] %v15907_v50  ;;  %7801 = vmatmul.f32.vlgmr.msrb.gmra.mxu2 %v7800_v53  ;;  %7432 = vmatmul.f32.gmra.mxu3 %v19141_v23  ;;  %v7808_v53 = vand.u32 4294901760, %v7807_v11  ;;  %v18253_v23 = vand.u32 4294901760, %v15913_v43  ;;  %v19145_v11 = vld [vmem:[#allocation87_spill] sm:$0xff] }
 0x778   : > { %8620 = vmatpush.xpose.msrb.mxu2 %v15660_v22  ;;  %7497 = vmatmul.f32.gmra.mxu0 %v15454_v45  ;;  %v7748_v40 = vsel %vm4422_vm1, %v19145_v11, 0  ;;  %v19148_v11 = vld [vmem:[#allocation40_spill] sm:$0xff] }
 0x779   : > { %7550 = vmatmul.f32.gmra.mxu1 %v15429_v5  ;;  %v6627_v10 = vpop.f32.mrf.mxu3  ;;  %v15937_v5 = vsub.f32 %v7746_v29, %v15927_v13  ;;  %v15952_v29 = vand.u32 4294901760, %v7748_v40 }
 0x77a   : > { %v15922_v27 = vpop.f32.mrf.mxu2  ;;  %v15924_v20 = vadd.f32 %v6627_v10, %v6538_v4  ;;  %v7815_v4 = vsub.f32 %v15913_v43, %v18253_v23 }
 0x77c   : > { %19143 = vst [vmem:[#allocation67_spill] sm:$0xff] %v15924_v20  ;;  %8623 = vmatpush.xpose.msrb.mxu2 %v15677_v15  ;;  %v18255_v20 = vand.u32 4294901760, %v15937_v5 }
 0x77d   : > { %v15930_v28 = vpop.f32.mrf.mxu0 }
 0x77e   : > { %v15932_v46 = vpop.f32.mrf.mxu1 }
 0x77f   : > { %19144 = vst [vmem:[#allocation98_spill] sm:$0xff] %v15932_v46  ;;  %7809 = vmatmul.f32.gmra.mxu2 %v7808_v53  ;;  %7918 = vmatmul.f32.vlgmr.msrb.gmra.mxu3 %v15829_v38  ;;  %v7816_v46 = vand.u32 4294901760, %v7815_v4  ;;  %v7823_v4 = vsub.f32 %v15937_v5, %v18255_v20 }
 0x780   : > { %8626 = vmatpush.xpose.msrb.mxu2 %v15710_v24  ;;  %8692 = vmatpush.xpose.msrb.mxu3 %v15636_v54 }
 0x781   : > { %7501 = vmatmul.f32.gmra.mxu0 %v15488_v31  ;;  %7554 = vmatmul.f32.gmra.mxu1 %v15454_v45  ;;  %v15949_v53 = vpop.f32.mrf.mxu3  ;;  %v15963_v45 = vsub.f32 %v7748_v40, %v15952_v29  ;;  %v7824_v26 = vand.u32 4294901760, %v7823_v4 }
 0x782   : > { %v15947_v10 = vpop.f32.mrf.mxu2 }
 0x783   : > { %v18256_v37 = vand.u32 4294901760, %v15963_v45 }
 0x784   : > { %8629 = vmatpush.xpose.msrb.mxu2 %v15760_v2  ;;  %8694 = vmatpush.xpose.msrb.mxu3 %v15646_v30 }
 0x785   : > { %v15956_v35 = vpop.f32.mrf.mxu0  ;;  %v7831_v4 = vsub.f32 %v15963_v45, %v18256_v37 }
 0x786   : > { %19146 = vst [vmem:[#allocation90_spill] sm:$0xff] %v15956_v35  ;;  %v15958_v23 = vpop.f32.mrf.mxu1  ;;  %v7750_v35 = vsel %vm4422_vm1, %v19148_v11, 0  ;;  %v19152_v11 = vld [vmem:[#allocation97_spill] sm:$0xff] }
 0x787   : > { %19147 = vst [vmem:[#allocation61_spill] sm:$0xff] %v15958_v23  ;;  %7817 = vmatmul.f32.gmra.mxu2 %v7816_v46  ;;  %7922 = vmatmul.f32.gmra.mxu3 %v15868_v58  ;;  %v15978_v40 = vand.u32 4294901760, %v7750_v35  ;;  %v7832_v23 = vand.u32 4294901760, %v7831_v4 }
 0x788   : > { %8632 = vmatpush.xpose.msrb.mxu2 %v15777_v21  ;;  %8696 = vmatpush.xpose.msrb.mxu3 %v15679_v12 }
 0x789   : > { %7505 = vmatmul.f32.gmra.mxu0 %v15539_v59  ;;  %7558 = vmatmul.f32.gmra.mxu1 %v15488_v31  ;;  %v15975_v0 = vpop.f32.mrf.mxu3  ;;  %v15989_v31 = vsub.f32 %v7750_v35, %v15978_v40 }
 0x78a   : > { %v15973_v46 = vpop.f32.mrf.mxu2 }
 0x78b   : > { %19149 = vst [vmem:[#allocation54_spill] sm:$0xff] %v15973_v46  ;;  %v7752_v46 = vsel %vm4422_vm1, %v19152_v11, 0  ;;  %v18257_v37 = vand.u32 4294901760, %v15989_v31  ;;  %v19155_v11 = vand.u32 4294901760, %v15677_v15 }
 0x78c   : > { %8635 = vmatpush.xpose.msrb.mxu2 %v15801_v19  ;;  %8698 = vmatpush.xpose.msrb.mxu3 %v15724_v47 }
 0x78d   : > { %v15982_v50 = vpop.f32.mrf.mxu0  ;;  %v7839_v4 = vsub.f32 %v15989_v31, %v18257_v37 }
 0x78e   : > { %19150 = vst [vmem:[#allocation76_spill] sm:$0xff] %v15982_v50  ;;  %v15984_v20 = vpop.f32.mrf.mxu1  ;;  %v16006_v50 = vand.u32 4294901760, %v7752_v46 }
 0x78f   : > { %19151 = vst [vmem:[#allocation51_spill] sm:$0xff] %v15984_v20  ;;  %7825 = vmatmul.f32.gmra.mxu2 %v7824_v26  ;;  %7926 = vmatmul.f32.gmra.mxu3 %v15902_v6  ;;  %v19153_v26 = vand.u32 4294901760, %v15660_v22  ;;  %v7840_v37 = vand.u32 4294901760, %v7839_v4 }
 0x790   : > { %8638 = vmatpush.xpose.msrb.mxu2 %v15836_v49  ;;  %8700 = vmatpush.xpose.msrb.mxu3 %v15742_v57 }
 0x791   : > { %7984 = vmatmul.f32.vlgmr.msrb.gmra.mxu0 %v15858_v7  ;;  %7562 = vmatmul.f32.gmra.mxu1 %v15539_v59  ;;  %v16003_v35 = vpop.f32.mrf.mxu3 }
 0x792   : > { %8767 = vmatpush.xpose.msrb.mxu0 %v19153_v26  ;;  %v16001_v20 = vpop.f32.mrf.mxu2  ;;  %19154 = vst [vmem:[#allocation55_spill] sm:$0xff] %v16003_v35  ;;  %v16016_v26 = vsub.f32 %v7752_v46, %v16006_v50  ;;  %v19157_v35 = vld [vmem:[#allocation102_spill] sm:$0xff] }
 0x793   : > { %v7754_v15 = vsel %vm4422_vm1, %v19157_v35, 0  ;;  %v19162_v35 = vand.u32 4294901760, %v15760_v2 }
 0x794   : > { %8641 = vmatpush.xpose.msrb.mxu2 %v15855_v9  ;;  %8702 = vmatpush.xpose.msrb.mxu3 %v15774_v61  ;;  %v16034_v55 = vand.u32 4294901760, %v7754_v15  ;;  %v19166_v2 = vand.u32 4294901760, %v16016_v26 }
 0x795   : > { %v7150_v59 = vpop.f32.mrf.mxu0 }
 0x796   : > { %8771 = vmatpush.xpose.msrb.mxu0 %v19155_v11  ;;  %v16012_v22 = vpop.f32.mrf.mxu1  ;;  %v19158_v11 = vand.u32 4294901760, %v15858_v7  ;;  %19161 = vst [vmem:[#allocation95_spill] sm:$0xff] %v16034_v55  ;;  %v16049_v4 = vsub.f32 %v7754_v15, %v16034_v55 }
 0x797   : > { %19156 = vst [vmem:[#allocation77_spill] sm:$0xff] %v16012_v22  ;;  %7833 = vmatmul.f32.gmra.mxu2 %v7832_v23  ;;  %7930 = vmatmul.f32.gmra.mxu3 %v15927_v13  ;;  %v19159_v23 = vand.u32 4294901760, %v15710_v24 }
 0x798   : > { %8704 = vmatpush.xpose.msrb.mxu3 %v15815_v36 }
 0x799   : > { %7989 = vmatmul.f32.gmra.mxu0 %v15888_v3  ;;  %8050 = vmatmul.f32.vlgmr.msrb.gmra.mxu1 %v19158_v11  ;;  %v16032_v46 = vpop.f32.mrf.mxu3  ;;  %v16043_v11 = vpop.xlane.xlu0 %5596 }
 0x79a   : > { %8775 = vmatpush.xpose.msrb.mxu0 %v19159_v23  ;;  %v16029_v22 = vpop.f32.mrf.mxu2  ;;  %8838 = vmatpush.xpose.msrb.mxu1 %v15636_v54 }
 0x79b   : > { %19160 = vst [vmem:[#allocation73_spill] sm:$0xff] %v16029_v22  ;;  %v5612_v22 = vsub.f32 %v19165_v42, %v5594_v34 }
 0x79c   : > { %8706 = vmatpush.xpose.msrb.mxu3 %v15826_v44 }
 0x79d   : > { %v16040_v7 = vpop.f32.mrf.mxu0  ;;  %v5622_v34 = vmul.f32 1.442695, %v5612_v22 }
 0x79e   : > { %8779 = vmatpush.xpose.msrb.mxu0 %v19162_v35  ;;  %19163 = vst [vmem:[#allocation94_spill] sm:$0xff] %v16040_v7  ;;  %8840 = vmatpush.xpose.msrb.mxu1 %v15646_v30  ;;  %v7263_v24 = vpop.f32.mrf.mxu1  ;;  %v7847_v30 = vsub.f32 %v16016_v26, %v19166_v2  ;;  %v19171_v7 = vand.u32 4294901760, %v15801_v19 }
 0x79f   : > { %7841 = vmatmul.f32.gmra.mxu2 %v7840_v37  ;;  %v16045_v54 = vadd.f32 %v7263_v24, %v7150_v59  ;;  %7934 = vmatmul.f32.gmra.mxu3 %v15952_v29  ;;  %v4976_v23 = vpop.xlane.xlu1 %4975  ;;  %v19167_v37 = vand.u32 4294901760, %v15888_v3  ;;  %v19168_v59 = vand.u32 4294901760, %v15777_v21 }
 0x7a0   : > { %10068 = vrcp.f32 %v4976_v23  ;;  %v7848_v24 = vand.u32 4294901760, %v7847_v30  ;;  %v18259_v23 = vand.u32 4294901760, %v16049_v4  ;;  %v19176_v30 = vand.u32 4294901760, %v15836_v49 }
 0x7a1   : > { %19164 = vst [vmem:[#allocation28_spill] sm:$0xff] %v16045_v54  ;;  %7994 = vmatmul.f32.gmra.mxu0 %v15913_v43  ;;  %8056 = vmatmul.f32.gmra.mxu1 %v19167_v37  ;;  %v16063_v15 = vpop.f32.mrf.mxu3  ;;  %10070 = vpow2.f32 %v5622_v34 }
 0x7a2   : > { %8783 = vmatpush.xpose.msrb.mxu0 %v19168_v59  ;;  %v16060_v35 = vpop.f32.mrf.mxu2  ;;  %8842 = vmatpush.xpose.msrb.mxu1 %v15679_v12  ;;  %19170 = vst [vmem:[#allocation62_spill] sm:$0xff] %v16063_v15  ;;  %v4982_v42 = vpop.xlane.xlu2 %4981  ;;  %v19174_v59 = vld [vmem:[#allocation106_spill] sm:$0xff] }
 0x7a3   : > { %19169 = vst [vmem:[#allocation33_spill] sm:$0xff] %v16060_v35  ;;  %10072 = vrcp.f32 %v4982_v42  ;;  %v19190_v35 = vld [vmem:[#allocation96_spill] sm:$0xff] }
 0x7a5   : > { %v16068_v2 = vpop.f32.mrf.mxu0 }
 0x7a6   : > { %8787 = vmatpush.xpose.msrb.mxu0 %v19171_v7  ;;  %19172 = vst [vmem:[#allocation105_spill] sm:$0xff] %v16068_v2  ;;  %v10069_v3 = vpop.eup %10068  ;;  %8844 = vmatpush.xpose.msrb.mxu1 %v15724_v47  ;;  %v16071_v21 = vpop.f32.mrf.mxu1  ;;  %v7855_v7 = vsub.f32 %v16049_v4, %v18259_v23  ;;  %v19175_v47 = vand.u32 4294901760, %v15913_v43 }
 0x7a7   : > { %19173 = vst [vmem:[#allocation36_spill] sm:$0xff] %v16071_v21  ;;  %7849 = vmatmul.f32.gmra.mxu2 %v7848_v24  ;;  %7938 = vmatmul.f32.gmra.mxu3 %v15978_v40  ;;  %v5591_v12 = vpop.xlane.xlu1 %5590  ;;  %v4985_v37 = vpop.xlane.xlu0 %4984  ;;  %v5006_v22 = vmul.f32 %v10069_v3, %v19174_v59  ;;  %v19177_v3 = vld [vmem:[#allocation34_spill] sm:$0xff]  ;;  %v19179_v59 = vld [vmem:[#allocation25_spill] sm:$0xff] }
 0x7a8   : > { %v5611_v19 = vsub.f32 %v15034_v14, %v5591_v12  ;;  %v9088_v34 = vsel %vm4422_vm1, %v19177_v3, 0  ;;  %10074 = vrcp.f32 %v4985_v37  ;;  %v9090_v42 = vsel %vm4422_vm1, %v19179_v59, 0 }
 0x7a9   : > { %7999 = vmatmul.f32.gmra.mxu0 %v15937_v5  ;;  %8062 = vmatmul.f32.gmra.mxu1 %v19175_v47  ;;  %v5014_v21 = vand.u32 2147483647, %v5006_v22  ;;  %v16089_v14 = vpop.f32.mrf.mxu3  ;;  %v7856_v49 = vand.u32 4294901760, %v7855_v7  ;;  %v16097_v22 = vand.u32 4294901760, %v9088_v34  ;;  %v19181_v3 = vand.u32 4294901760, %v15855_v9 }
 0x7aa   : > { %8791 = vmatpush.xpose.msrb.mxu0 %v19176_v30  ;;  %v16084_v24 = vpop.f32.mrf.mxu2  ;;  %8846 = vmatpush.xpose.msrb.mxu1 %v15742_v57  ;;  %19178 = vst [vmem:[#allocation100_spill] sm:$0xff] %v16089_v14  ;;  %v5620_v12 = vmul.f32 1.442695, %v5611_v19  ;;  %v5600_v43 = vpop.xlane.xlu2 %5599  ;;  %v19180_v30 = vld [vmem:[#allocation47_spill] sm:$0xff]  ;;  %v16107_v59 = vand.u32 4294901760, %v9090_v42 }
 0x7ab   : > { %v16094_v47 = vsel %vm4925_vm2, %v5014_v21, 0.0  ;;  %v9086_v57 = vsel %vm4422_vm1, %v19180_v30, 0  ;;  %v16105_v19 = vpop.eup %10070  ;;  %v19184_v21 = vld [vmem:[#allocation37_spill] sm:$0xff] }
 0x7ac   : > { %10076 = vpow2.f32 %v5620_v12  ;;  %5023 = vadd.xlane.f32.xlu1 %v16094_v47  ;;  %19183 = vst [vmem:[#allocation64_spill] sm:$0xff] %v16105_v19  ;;  %v5613_v12 = vsub.f32 %v19184_v21, %v16043_v11  ;;  %v10073_v23 = vpop.eup %10072  ;;  %v16115_v2 = vand.u32 4294901760, %v9086_v57  ;;  %v19186_v11 = vand.u32 4294901760, %v15937_v5 }
 0x7ad   : > { %v16103_v37 = vpop.f32.mrf.mxu0  ;;  %v16128_v21 = vsub.f32 %v9090_v42, %v16107_v59  ;;  %v5614_v5 = vsub.f32 %v15529_v63, %v5600_v43  ;;  %v5008_v42 = vmul.f32 %v10073_v23, %v19190_v35  ;;  %v19194_v35 = vld [vmem:[#allocation43_spill] sm:$0xff] }
 0x7ae   : > { %8795 = vmatpush.xpose.msrb.mxu0 %v19181_v3  ;;  %19182 = vst [vmem:[#allocation60_spill] sm:$0xff] %v16103_v37  ;;  %8848 = vmatpush.xpose.msrb.mxu1 %v15774_v61  ;;  %v16112_v7 = vpop.f32.mrf.mxu1  ;;  %v10075_v3 = vpop.eup %10074  ;;  %v16119_v37 = vsub.f32 %v9088_v34, %v16097_v22  ;;  %v5640_v34 = vsel %vm4925_vm2, %v16105_v19, 0.0 }
 0x7af   : > { %19185 = vst [vmem:[#allocation74_spill] sm:$0xff] %v16112_v7  ;;  %7857 = vmatmul.f32.gmra.mxu2 %v7856_v49  ;;  %7942 = vmatmul.f32.gmra.mxu3 %v16006_v50  ;;  %v4979_v30 = vpop.xlane.xlu1 %4978  ;;  %v5624_v7 = vmul.f32 1.442695, %v5613_v12  ;;  %v16142_v12 = vsub.f32 %v9086_v57, %v16115_v2  ;;  %v5626_v57 = vmul.f32 1.442695, %v5614_v5  ;;  %v19195_v5 = vld [vmem:[#allocation49_spill] sm:$0xff] }
 0x7b0   : > { %v5603_v9 = vpop.xlane.xlu0 %5602  ;;  %10078 = vrcp.f32 %v4979_v30  ;;  %v9082_v63 = vsel %vm4422_vm1, %v19195_v5, 0  ;;  %v19201_v5 = vld [vmem:[#allocation65_spill] sm:$0xff] }
 0x7b1   : > { %8004 = vmatmul.f32.gmra.mxu0 %v15963_v45  ;;  %8068 = vmatmul.f32.gmra.mxu1 %v19186_v11  ;;  %v16131_v54 = vpop.f32.mrf.mxu3  ;;  %v5615_v14 = vsub.f32 %v15545_v48, %v5603_v9  ;;  %v5009_v11 = vmul.f32 %v10075_v3, %v15521_v52 }
 0x7b2   : > { %v16123_v61 = vpop.f32.mrf.mxu2  ;;  %v16125_v49 = vpop.eup %10076  ;;  %8850 = vmatpush.xpose.msrb.mxu1 %v15815_v36  ;;  %19189 = vst [vmem:[#allocation41_spill] sm:$0xff] %v16131_v54 }
 0x7b3   : > { %19187 = vst [vmem:[#allocation101_spill] sm:$0xff] %v16123_v61  ;;  %v5637_v30 = vsel %vm4925_vm2, %v16125_v49, 0.0  ;;  %v19191_v61 = vld [vmem:[#allocation72_spill] sm:$0xff]  ;;  %v5628_v43 = vmul.f32 1.442695, %v5615_v14 }
 0x7b4   : > { %19188 = vst [vmem:[#allocation91_spill] sm:$0xff] %v16125_v49  ;;  %v4991_v36 = vpop.xlane.xlu2 %4990  ;;  %5641 = vadd.xlane.f32.xlu1 %v5640_v34  ;;  %5638 = vadd.xlane.f32.xlu0 %v5637_v30  ;;  %v9084_v48 = vsel %vm4422_vm1, %v19191_v61, 0  ;;  %v5017_v61 = vand.u32 2147483647, %v5009_v11  ;;  %v5016_v34 = vand.u32 2147483647, %v5008_v42 }
 0x7b5   : > { %10080 = vrcp.f32 %v4991_v36  ;;  %v16146_v9 = vpop.f32.mrf.mxu0  ;;  %v16156_v30 = vand.u32 4294901760, %v9084_v48  ;;  %v19196_v11 = vand.u32 4294901760, %v15963_v45  ;;  %v8400_v45 = vsel %vm4422_vm1, %v19201_v5, 0 }
 0x7b6   : > { %19192 = vst [vmem:[#allocation63_spill] sm:$0xff] %v16146_v9  ;;  %8852 = vmatpush.xpose.msrb.mxu1 %v15826_v44  ;;  %v16150_v52 = vpop.f32.mrf.mxu1  ;;  %v10079_v23 = vpop.eup %10078  ;;  %10082 = vpow2.f32 %v5624_v7  ;;  %v16163_v7 = vsel %vm4422_vm1, %v19194_v35, 0  ;;  %v19200_v35 = vand.u32 4294901760, %v16119_v37 }
 0x7b7   : > { %19193 = vst [vmem:[#allocation83_spill] sm:$0xff] %v16150_v52  ;;  %8137 = vmatmul.f32.vlgmr.msra.gmra.mxu2 %v15829_v38  ;;  %7946 = vmatmul.f32.gmra.mxu3 %v16034_v55  ;;  %v4988_v3 = vpop.xlane.xlu1 %4987  ;;  %v5007_v14 = vmul.f32 %v10079_v23, %v15552_v1  ;;  %v16202_v19 = vand.u32 4294901760, %v16163_v7  ;;  %v19206_v55 = vld [vmem:[#allocation75_spill] sm:$0xff] }
 0x7b8   : > { %9101 = vmatpush.xpose.msra.mxu2 %v16107_v59  ;;  %10084 = vrcp.f32 %v4988_v3  ;;  %v4994_v44 = vpop.xlane.xlu0 %4993  ;;  %v19198_v3 = vand.u32 4294901760, %v16128_v21  ;;  %v9198_v36 = vsub.f32 %v16119_v37, %v19200_v35  ;;  %v19202_v35 = vand.u32 4294901760, %v16142_v12 }
 0x7b9   : > { %8009 = vmatmul.f32.gmra.mxu0 %v15989_v31  ;;  %8074 = vmatmul.f32.gmra.mxu1 %v19196_v11  ;;  %10086 = vrcp.f32 %v4994_v44  ;;  %v16174_v1 = vpop.f32.mrf.mxu3  ;;  %v5015_v23 = vand.u32 2147483647, %v5007_v14  ;;  %v5031_v44 = vsel %vm4925_vm2, %v5017_v61, 0.0  ;;  %v5028_v11 = vsel %vm4925_vm2, %v5016_v34, 0.0 }
 0x7ba   : > { %v16169_v42 = vpop.f32.mrf.mxu2  ;;  %v9192_v52 = vsub.f32 %v16128_v21, %v19198_v3  ;;  %10088 = vpow2.f32 %v5628_v43  ;;  %19199 = vst [vmem:[#allocation79_spill] sm:$0xff] %v16174_v1  ;;  %v16185_v43 = vsub.f32 %v9084_v48, %v16156_v30  ;;  %v16187_v3 = vand.u32 4294901760, %v9082_v63 }
 0x7bb   : > { %19197 = vst [vmem:[#allocation107_spill] sm:$0xff] %v16169_v42  ;;  %v10081_v9 = vpop.eup %10080  ;;  %10090 = vpow2.f32 %v5626_v57  ;;  %v5025_v14 = vsel %vm4925_vm2, %v5015_v23, 0.0  ;;  %v16193_v5 = vsub.f32 %v16142_v12, %v19202_v35  ;;  %v16204_v23 = vand.u32 4294901760, %v8400_v45 }
 0x7bc   : > { %9103 = vmatpush.xpose.msra.mxu2 %v16097_v22  ;;  %5032 = vadd.xlane.f32.xlu1 %v5031_v44  ;;  %v16195_v57 = vpop.eup %10082  ;;  %v5054_v61 = vadd.f32 %v5025_v14, %v16094_v47  ;;  %v5011_v48 = vmul.f32 %v10081_v9, %v15570_v18  ;;  %v9193_v35 = vand.u32 4294901760, %v9192_v52  ;;  %v9199_v47 = vand.u32 4294901760, %v9198_v36 }
 0x7bd   : > { %5029 = vadd.xlane.f32.xlu0 %v5028_v11  ;;  %19203 = vst [vmem:[#allocation18_spill] sm:$0xff] %v16195_v57  ;;  %v16197_v49 = vpop.f32.mrf.mxu0  ;;  %5026 = vadd.xlane.f32.xlu2 %v5025_v14  ;;  %v16217_v15 = vsub.f32 %v9082_v63, %v16187_v3  ;;  %v19209_v36 = vand.u32 4294901760, %v15989_v31 }
 0x7be   : > { %19204 = vst [vmem:[#allocation85_spill] sm:$0xff] %v16197_v49  ;;  %v10085_v34 = vpop.eup %10084  ;;  %v16206_v1 = vpop.f32.mrf.mxu1  ;;  %v9080_v49 = vsel %vm4422_vm1, %v19206_v55, 0  ;;  %v5055_v18 = vadd.f32 %v5054_v61, %v5028_v11 }
 0x7bf   : > { %19205 = vst [vmem:[#allocation78_spill] sm:$0xff] %v16206_v1  ;;  %8141 = vmatmul.f32.gmra.mxu2 %v15868_v58  ;;  %v10087_v42 = vpop.eup %10086  ;;  %8194 = vmatmul.f32.vlgmr.msra.gmra.mxu3 %v15829_v38  ;;  %v5010_v9 = vmul.f32 %v10085_v34, %v15584_v51  ;;  %v9205_v1 = vand.u32 4294901760, %v16193_v5  ;;  %v6666_v51 = vadd.f32 %v15674_v60, %v15596_v32  ;;  %v5019_v34 = vand.u32 2147483647, %v5011_v48  ;;  %v19210_v5 = vld [vmem:[#allocation31_spill] sm:$0xff] }
 0x7c0   : > { %9105 = vmatpush.xpose.msra.mxu2 %v16115_v2  ;;  %v16214_v14 = vpop.eup %10088  ;;  %9194 = vmatpush.xpose.msra.mxu3 %v9193_v35  ;;  %v4997_v52 = vpop.xlane.xlu0 %4996  ;;  %v5012_v38 = vmul.f32 %v10087_v42, %v15590_v56  ;;  %v5056_v61 = vadd.f32 %v5055_v18, %v5031_v44  ;;  %v16232_v35 = vsub.f32 %v8400_v45, %v16204_v23  ;;  %v9078_v55 = vsel %vm4422_vm1, %v19210_v5, 0 }
 0x7c1   : > { %19207 = vst [vmem:[#allocation56_spill] sm:$0xff] %v16214_v14  ;;  %8014 = vmatmul.f32.gmra.mxu0 %v16016_v26  ;;  %v16223_v54 = vpop.eup %10090  ;;  %8080 = vmatmul.f32.gmra.mxu1 %v19209_v36  ;;  %v5018_v11 = vand.u32 2147483647, %v5010_v9  ;;  %v16236_v56 = vand.u32 4294901760, %v9080_v49  ;;  %v16238_v42 = vpop.f32.mrf.mxu3  ;;  %10092 = vrcp.f32 %v4997_v52  ;;  %v6732_v32 = vadd.f32 %v15740_v62, %v6666_v51 }
 0x7c2   : > { %19208 = vst [vmem:[#allocation24_spill] sm:$0xff] %v16223_v54  ;;  %v16229_v63 = vpop.f32.mrf.mxu2  ;;  %v5649_v60 = vsel %vm4925_vm2, %v16214_v14, 0.0  ;;  %v5020_v44 = vand.u32 2147483647, %v5012_v38  ;;  %v5643_v45 = vsel %vm4925_vm2, %v16195_v57, 0.0  ;;  %v5646_v48 = vsel %vm4925_vm2, %v16223_v54, 0.0  ;;  %v5606_v14 = vpop.xlane.xlu1 %5605 }
 0x7c3   : > { %v5034_v31 = vsel %vm4925_vm2, %v5018_v11, 0.0  ;;  %v18266_v18 = vand.u32 4294901760, %v16217_v15  ;;  %v16250_v62 = vand.u32 4294901760, %v9078_v55  ;;  %v6819_v52 = vadd.f32 %v15922_v27, %v6732_v32  ;;  %v16283_v11 = vpop.xlane.xlu2 %5608 }
 0x7c4   : > { %9107 = vmatpush.xpose.msra.mxu2 %v16156_v30  ;;  %9200 = vmatpush.xpose.msra.mxu3 %v9199_v47  ;;  %v5057_v9 = vadd.f32 %v5056_v61, %v5034_v31  ;;  %v19212_v47 = vand.u32 4294901760, %v16185_v43  ;;  %v16259_v36 = vsel %vm4925_vm2, %v5019_v34, 0.0  ;;  %v16263_v5 = vsub.f32 %v9080_v49, %v16236_v56  ;;  %v19213_v61 = vld [vmem:[#allocation22_spill] sm:$0xff] }
 0x7c5   : > { %5650 = vadd.xlane.f32.xlu1 %v5649_v60  ;;  %v16253_v51 = vpop.f32.mrf.mxu0  ;;  %5644 = vadd.xlane.f32.xlu2 %v5643_v45  ;;  %v9076_v60 = vsel %vm4422_vm1, %v19213_v61, 0  ;;  %v16272_v45 = vadd.f32 %v15949_v53, %v6819_v52  ;;  %v5040_v34 = vsel %vm4925_vm2, %v5020_v44, 0.0  ;;  %v16290_v44 = vsub.f32 %v9078_v55, %v16250_v62  ;;  %v19220_v55 = vld [vmem:[#allocation82_spill] sm:$0xff] }
 0x7c6   : > { %19211 = vst [vmem:[#allocation38_spill] sm:$0xff] %v16253_v51  ;;  %5647 = vadd.xlane.f32.xlu0 %v5646_v48  ;;  %v9210_v38 = vsub.f32 %v16185_v43, %v19212_v47  ;;  %v16267_v27 = vpop.f32.mrf.mxu1  ;;  %v5058_v32 = vadd.f32 %v5057_v9, %v16259_v36  ;;  %v16279_v48 = vsub.f32 %v16163_v7, %v16202_v19  ;;  %v19216_v47 = vld [vmem:[#allocation57_spill] sm:$0xff]  ;;  %v16292_v52 = vand.u32 4294901760, %v9076_v60 }
 0x7c7   : > { %19214 = vst [vmem:[#allocation32_spill] sm:$0xff] %v16267_v27  ;;  %8145 = vmatmul.f32.gmra.mxu2 %v15902_v6  ;;  %8198 = vmatmul.f32.gmra.mxu3 %v15868_v58  ;;  %v10093_v49 = vpop.eup %10092  ;;  %v8404_v61 = vsel %vm4422_vm1, %v19216_v47, 0  ;;  %v9216_v58 = vsub.f32 %v16217_v15, %v18266_v18  ;;  %v19217_v7 = vand.u32 4294901760, %v16016_v26  ;;  %v19219_v57 = vand.u32 4294901760, %v16232_v35 }
 0x7c8   : > { %19215 = vst [vmem:[#allocation89_spill] sm:$0xff] %v16272_v45  ;;  %9109 = vmatpush.xpose.msra.mxu2 %v16187_v3  ;;  %9206 = vmatpush.xpose.msra.mxu3 %v9205_v1  ;;  %v6251_v53 = vpop.xlane.xlu0 %6250  ;;  %v5059_v9 = vadd.f32 %v5058_v32, %v5040_v34  ;;  %v5013_v51 = vmul.f32 %v10093_v49, %v15641_v25  ;;  %v9211_v32 = vand.u32 4294901760, %v9210_v38 }
 0x7c9   : > { %8019 = vmatmul.f32.gmra.mxu0 %v16049_v4  ;;  %8086 = vmatmul.f32.gmra.mxu1 %v19217_v7  ;;  %v6271_v1 = vsub.f32 %v15697_v41, %v6251_v53  ;;  %v8459_v54 = vsub.f32 %v16232_v35, %v19219_v57  ;;  %v16303_v18 = vpop.f32.mrf.mxu3  ;;  %v6906_v7 = vsel %vm4925_vm2, %v16272_v45, -inf  ;;  %v16309_v41 = vand.u32 4294901760, %v8404_v61 }
 0x7ca   : > { %v16296_v47 = vpop.f32.mrf.mxu2  ;;  %v5021_v27 = vand.u32 2147483647, %v5013_v51  ;;  %v9217_v25 = vand.u32 4294901760, %v9216_v58  ;;  %v18269_v57 = vand.u32 4294901760, %v16279_v48  ;;  %v16313_v49 = vsub.f32 %v9076_v60, %v16292_v52 }
 0x7cb   : > { %19218 = vst [vmem:[#allocation58_spill] sm:$0xff] %v16296_v47  ;;  %v6280_v26 = vmul.f32 1.442695, %v6271_v1  ;;  %v18271_v53 = vand.u32 4294901760, %v16290_v44  ;;  %v8460_v51 = vand.u32 4294901760, %v8459_v54  ;;  %v5616_v45 = vsub.f32 %v19220_v55, %v5606_v14  ;;  %v19224_v14 = vld [vmem:[#allocation26_spill] sm:$0xff] }
 0x7cc   : > { %9111 = vmatpush.xpose.msra.mxu2 %v16236_v56  ;;  %9212 = vmatpush.xpose.msra.mxu3 %v9211_v32  ;;  %v5043_v1 = vsel %vm4925_vm2, %v5021_v27, 0.0  ;;  %v19222_v58 = vand.u32 4294901760, %v16263_v5  ;;  %v8467_v54 = vsub.f32 %v16279_v48, %v18269_v57  ;;  %v8406_v27 = vsel %vm4422_vm1, %v19224_v14, 0  ;;  %v19229_v57 = vld [vmem:[#allocation71_spill] sm:$0xff] }
 0x7cd   : > { %6907 = vmax.xlane.f32.xlu1 %v6906_v7  ;;  %10094 = vpow2.f32 %v6280_v26  ;;  %v16315_v38 = vpop.f32.mrf.mxu0  ;;  %5035 = vadd.xlane.f32.xlu2 %v5034_v31  ;;  %v16326_v26 = vadd.f32 %v5059_v9, %v5043_v1  ;;  %v19225_v9 = vand.u32 4294901760, %v16049_v4  ;;  %v9228_v55 = vsub.f32 %v16290_v44, %v18271_v53  ;;  %v19231_v7 = vld [vmem:[#allocation50_spill] sm:$0xff] }
 0x7ce   : > { %5041 = vadd.xlane.f32.xlu0 %v5040_v34  ;;  %v16320_v32 = vpop.f32.mrf.mxu1  ;;  %v9222_v60 = vsub.f32 %v16263_v5, %v19222_v58  ;;  %v16336_v34 = vsub.f32 %v8404_v61, %v16309_v41  ;;  %v8468_v53 = vand.u32 4294901760, %v8467_v54  ;;  %v19233_v54 = vld [vmem:[#allocation44_spill] sm:$0xff] }
 0x7cf   : > { %19221 = vst [vmem:[#allocation59_spill] sm:$0xff] %v16320_v32  ;;  %8149 = vmatmul.f32.gmra.mxu2 %v15927_v13  ;;  %8202 = vmatmul.f32.gmra.mxu3 %v15902_v6  ;;  %v19230_v32 = vld [vmem:[#allocation29_spill] sm:$0xff] }
 0x7d0   : > { %19223 = vst [vmem:[#allocation30_spill] sm:$0xff] %v16326_v26  ;;  %9113 = vmatpush.xpose.msra.mxu2 %v16250_v62  ;;  %9218 = vmatpush.xpose.msra.mxu3 %v9217_v25  ;;  %v6260_v31 = vpop.xlane.xlu0 %6259  ;;  %v5630_v25 = vmul.f32 1.442695, %v5616_v45  ;;  %v9223_v14 = vand.u32 4294901760, %v9222_v60  ;;  %v6671_v26 = vadd.f32 %v19230_v32, %v19229_v57  ;;  %v6831_v32 = vadd.f32 %v16001_v20, %v15882_v16  ;;  %v19235_v20 = vld [vmem:[#allocation46_spill] sm:$0xff] }
 0x7d1   : > { %8461 = vmatmul.f32.vlgmr.msra.gmra.mxu0 %v8460_v51  ;;  %8092 = vmatmul.f32.gmra.mxu1 %v19225_v9  ;;  %v6254_v51 = vpop.xlane.xlu2 %6253  ;;  %v16347_v58 = vpop.f32.mrf.mxu3  ;;  %v6274_v4 = vsub.f32 %v15765_v17, %v6260_v31  ;;  %v16353_v9 = vand.u32 4294901760, %v8406_v27  ;;  %v19232_v17 = vand.u32 4294901760, %v16313_v49 }
 0x7d2   : > { %9280 = vmatpush.xpose.msra.mxu0 %v16128_v21  ;;  %v16341_v6 = vpop.f32.mrf.mxu2  ;;  %19227 = vst [vmem:[#allocation40_spill] sm:$0xff] %v16347_v58  ;;  %v6272_v47 = vsub.f32 %v19231_v7, %v6254_v51  ;;  %v9229_v58 = vand.u32 4294901760, %v9228_v55  ;;  %v6738_v57 = vadd.f32 %v15798_v39, %v6671_v26  ;;  %v5617_v7 = vsub.f32 %v19233_v54, %v16283_v11 }
 0x7d3   : > { %19226 = vst [vmem:[#allocation87_spill] sm:$0xff] %v16341_v6  ;;  %v16349_v61 = vpop.eup %10094  ;;  %v9234_v31 = vsub.f32 %v16313_v49, %v19232_v17  ;;  %v18273_v6 = vand.u32 4294901760, %v16336_v34  ;;  %10096 = vpow2.f32 %v5630_v25  ;;  %v6286_v55 = vmul.f32 1.442695, %v6274_v4 }
 0x7d4   : > { %19228 = vst [vmem:[#allocation97_spill] sm:$0xff] %v16349_v61  ;;  %9115 = vmatpush.xpose.msra.mxu2 %v16292_v52  ;;  %9224 = vmatpush.xpose.msra.mxu3 %v9223_v14  ;;  %v6297_v45 = vsel %vm4925_vm2, %v16349_v61, 0.0  ;;  %v6823_v14 = vadd.f32 %v15947_v10, %v6738_v57  ;;  %v16379_v39 = vadd.f32 %v16032_v46, %v6831_v32  ;;  %v8408_v11 = vsel %vm4422_vm1, %v19235_v20, 0 }
 0x7d5   : > { %v16361_v60 = vpop.f32.mrf.mxu0  ;;  %6298 = vadd.xlane.f32.xlu1 %v6297_v45  ;;  %5038 = vadd.xlane.f32.xlu2 %v16259_v36  ;;  %v16382_v16 = vsub.f32 %v8406_v27, %v16353_v9  ;;  %v6282_v26 = vmul.f32 1.442695, %v6272_v47  ;;  %v5632_v46 = vmul.f32 1.442695, %v5617_v7  ;;  %v6248_v47 = vpop.xlane.xlu1 %6247  ;;  %10098 = vpow2.f32 %v6286_v55  ;;  %v19238_v45 = vld [vmem:[#allocation70_spill] sm:$0xff] }
 0x7d6   : > { %9283 = vmatpush.xpose.msra.mxu0 %v16119_v37  ;;  %v16372_v51 = vpop.f32.mrf.mxu1  ;;  %5044 = vadd.xlane.f32.xlu0 %v5043_v1  ;;  %19234 = vst [vmem:[#allocation102_spill] sm:$0xff] %v16379_v39  ;;  %v16391_v10 = vadd.f32 %v15975_v0, %v6823_v14  ;;  %v8475_v1 = vsub.f32 %v16336_v34, %v18273_v6  ;;  %v6915_v25 = vsel %vm4925_vm2, %v16379_v39, -inf  ;;  %v16403_v0 = vand.u32 4294901760, %v8408_v11 }
 0x7d7   : > { %8153 = vmatmul.f32.gmra.mxu2 %v15952_v29  ;;  %8206 = vmatmul.f32.gmra.mxu3 %v15927_v13  ;;  %10100 = vpow2.f32 %v6282_v26  ;;  %v18272_v4 = vand.u32 4294901760, %v16382_v16  ;;  %v6270_v17 = vsub.f32 %v19238_v45, %v6248_v47  ;;  %v6624_v7 = vadd.f32 %v15900_v8, %v15866_v33  ;;  %v19243_v47 = vld [vmem:[#allocation42_spill] sm:$0xff] }
 0x7d8   : > { %9230 = vmatpush.xpose.msra.mxu3 %v9229_v58  ;;  %19236 = vst [vmem:[#allocation45_spill] sm:$0xff] %v16391_v10  ;;  %10102 = vpow2.f32 %v5632_v46  ;;  %v8476_v57 = vand.u32 4294901760, %v8475_v1  ;;  %v6909_v32 = vsel %vm4925_vm2, %v16391_v10, -inf  ;;  %v6269_v55 = vpop.xlane.xlu0 %6268  ;;  %v16424_v20 = vsub.f32 %v8408_v11, %v16403_v0  ;;  %v19240_v46 = vld [vmem:[#allocation39_spill] sm:$0xff] }
 0x7d9   : > { %8469 = vmatmul.f32.gmra.mxu0 %v8468_v53  ;;  %8578 = vmatmul.f32.vlgmr.msra.gmra.mxu1 %v16204_v23  ;;  %v9235_v53 = vand.u32 4294901760, %v9234_v31  ;;  %v16399_v27 = vpop.eup %10096  ;;  %v8483_v26 = vsub.f32 %v16382_v16, %v18272_v4  ;;  %v8410_v33 = vsel %vm4422_vm1, %v19240_v46, 0  ;;  %v6696_v8 = vadd.f32 %v15930_v28, %v6624_v7  ;;  %v19247_v4 = vld [vmem:[#allocation61_spill] sm:$0xff]  ;;  %v6263_v39 = vpop.xlane.xlu2 %6262 }
 0x7da   : > { %9286 = vmatpush.xpose.msra.mxu0 %v16142_v12  ;;  %v16388_v13 = vpop.f32.mrf.mxu2  ;;  %9352 = vmatpush.xpose.msra.mxu1 %v16107_v59  ;;  %v16394_v36 = vpop.f32.mrf.mxu3  ;;  %19237 = vst [vmem:[#allocation106_spill] sm:$0xff] %v16399_v27  ;;  %v5652_v54 = vsel %vm4925_vm2, %v16399_v27, 0.0  ;;  %v19263_v27 = vld [vmem:[#allocation19_spill] sm:$0xff] }
 0x7db   : > { %v16421_v14 = vpop.eup %10098  ;;  %v6768_v6 = vadd.f32 %v19247_v4, %v6696_v8  ;;  %v8484_v46 = vand.u32 4294901760, %v8483_v26 }
 0x7dc   : > { %9236 = vmatpush.xpose.msra.mxu3 %v9235_v53  ;;  %19239 = vst [vmem:[#allocation34_spill] sm:$0xff] %v16421_v14  ;;  %v6278_v53 = vmul.f32 1.442695, %v6270_v17  ;;  %v6306_v28 = vsel %vm4925_vm2, %v16421_v14, 0.0  ;;  %v16449_v17 = vand.u32 4294901760, %v8410_v33 }
 0x7dd   : > { %v16406_v58 = vpop.f32.mrf.mxu0  ;;  %6916 = vmax.xlane.f32.xlu1 %v6915_v25  ;;  %5653 = vadd.xlane.f32.xlu2 %v5652_v54  ;;  %v16439_v1 = vpop.eup %10100  ;;  %v6277_v25 = vsub.f32 %v19243_v47, %v6269_v55  ;;  %v18278_v55 = vand.u32 4294901760, %v16424_v20  ;;  %v19248_v47 = vld [vmem:[#allocation88_spill] sm:$0xff] }
 0x7de   : > { %9289 = vmatpush.xpose.msra.mxu0 %v16185_v43  ;;  %9354 = vmatpush.xpose.msra.mxu1 %v16097_v22  ;;  %v16411_v31 = vpop.f32.mrf.mxu1  ;;  %19242 = vst [vmem:[#allocation47_spill] sm:$0xff] %v16439_v1  ;;  %v16442_v45 = vpop.eup %10102  ;;  %10104 = vpow2.f32 %v6278_v53  ;;  %v6300_v8 = vsel %vm4925_vm2, %v16439_v1, 0.0  ;;  %v19251_v53 = vld [vmem:[#allocation41_spill] sm:$0xff] }
 0x7df   : > { %8157 = vmatmul.f32.gmra.mxu2 %v15978_v40  ;;  %8210 = vmatmul.f32.gmra.mxu3 %v15952_v29  ;;  %19244 = vst [vmem:[#allocation37_spill] sm:$0xff] %v16442_v45  ;;  %v6292_v26 = vmul.f32 1.442695, %v6277_v25 }
 0x7e0   : > { %6910 = vmax.xlane.f32.xlu0 %v6909_v32  ;;  %v19246_v32 = vld [vmem:[#allocation103_spill] sm:$0xff] }
 0x7e1   : > { %8477 = vmatmul.f32.gmra.mxu0 %v8476_v57  ;;  %8582 = vmatmul.f32.gmra.mxu1 %v16202_v19  ;;  %v19245_v57 = vld [vmem:[#allocation48_spill] sm:$0xff]  ;;  %10106 = vpow2.f32 %v6292_v26  ;;  %v19261_v26 = vld [vmem:[#allocation95_spill] sm:$0xff] }
 0x7e2   : > { %9292 = vmatpush.xpose.msra.mxu0 %v16217_v15  ;;  %v16428_v29 = vpop.f32.mrf.mxu2  ;;  %9356 = vmatpush.xpose.msra.mxu1 %v16115_v2  ;;  %v16437_v11 = vpop.f32.mrf.mxu3  ;;  %v6686_v54 = vadd.f32 %v19246_v32, %v19245_v57  ;;  %v6843_v57 = vadd.f32 %v16084_v24, %v6768_v6  ;;  %v19249_v32 = vld [vmem:[#allocation20_spill] sm:$0xff]  ;;  %v19250_v24 = vld [vmem:[#allocation73_spill] sm:$0xff] }
 0x7e3   : > { %19241 = vst [vmem:[#allocation25_spill] sm:$0xff] %v16437_v11  ;;  %v6275_v14 = vsub.f32 %v19249_v32, %v6263_v39  ;;  %v16476_v39 = vsub.f32 %v8410_v33, %v16449_v17  ;;  %v6257_v33 = vpop.xlane.xlu1 %6256  ;;  %v19265_v11 = vld [vmem:[#allocation77_spill] sm:$0xff] }
 0x7e4   : > { %v6756_v61 = vadd.f32 %v19248_v47, %v6686_v54  ;;  %v5655_v54 = vsel %vm4925_vm2, %v16442_v45, 0.0  ;;  %v6273_v10 = vsub.f32 %v19263_v27, %v6257_v33 }
 0x7e5   : > { %v16452_v7 = vpop.f32.mrf.mxu0  ;;  %6307 = vadd.xlane.f32.xlu1 %v6306_v28  ;;  %v16469_v28 = vadd.f32 %v19251_v53, %v6843_v57  ;;  %5656 = vadd.xlane.f32.xlu2 %v5655_v54  ;;  %v19256_v57 = vld [vmem:[#allocation69_spill] sm:$0xff]  ;;  %v6288_v32 = vmul.f32 1.442695, %v6275_v14  ;;  %v16489_v54 = vpop.eup %10104  ;;  %v19259_v53 = vld [vmem:[#allocation52_spill] sm:$0xff] }
 0x7e6   : > { %9295 = vmatpush.xpose.msra.mxu0 %v16263_v5  ;;  %9358 = vmatpush.xpose.msra.mxu1 %v16156_v30  ;;  %v16458_v4 = vpop.f32.mrf.mxu1  ;;  %v6835_v6 = vadd.f32 %v19250_v24, %v6756_v61  ;;  %19257 = vst [vmem:[#allocation49_spill] sm:$0xff] %v16489_v54 }
 0x7e7   : > { %8161 = vmatmul.f32.gmra.mxu2 %v16006_v50  ;;  %8214 = vmatmul.f32.gmra.mxu3 %v15978_v40  ;;  %19252 = vst [vmem:[#allocation96_spill] sm:$0xff] %v16469_v28  ;;  %v19253_v40 = vld [vmem:[#allocation62_spill] sm:$0xff]  ;;  %v6924_v24 = vsel %vm4925_vm2, %v16469_v28, -inf  ;;  %10108 = vpow2.f32 %v6288_v32 }
 0x7e8   : > { %6301 = vadd.xlane.f32.xlu0 %v6300_v8  ;;  %v16479_v25 = vadd.f32 %v19253_v40, %v6835_v6  ;;  %v8412_v8 = vsel %vm4422_vm1, %v19256_v57, 0  ;;  %v19258_v6 = vld [vmem:[#allocation66_spill] sm:$0xff] }
 0x7e9   : > { %8485 = vmatmul.f32.gmra.mxu0 %v8484_v46  ;;  %8586 = vmatmul.f32.gmra.mxu1 %v16309_v41  ;;  %v8491_v46 = vsub.f32 %v16424_v20, %v18278_v55  ;;  %v6676_v40 = vadd.f32 %v19259_v53, %v19258_v6  ;;  %v16498_v55 = vand.u32 4294901760, %v8412_v8  ;;  %v19262_v6 = vld [vmem:[#allocation80_spill] sm:$0xff] }
 0x7ea   : > { %9298 = vmatpush.xpose.msra.mxu0 %v16290_v44  ;;  %v16473_v47 = vpop.f32.mrf.mxu2  ;;  %19254 = vst [vmem:[#allocation72_spill] sm:$0xff] %v16479_v25  ;;  %9360 = vmatpush.xpose.msra.mxu1 %v16187_v3  ;;  %v16482_v61 = vpop.f32.mrf.mxu3  ;;  %v6918_v28 = vsel %vm4925_vm2, %v16479_v25, -inf  ;;  %v19267_v25 = vld [vmem:[#allocation54_spill] sm:$0xff] }
 0x7eb   : > { %19255 = vst [vmem:[#allocation43_spill] sm:$0xff] %v16482_v61  ;;  %v8492_v57 = vand.u32 4294901760, %v8491_v46  ;;  %v6744_v53 = vadd.f32 %v19262_v6, %v6676_v40  ;;  %v16514_v46 = vpop.eup %10106  ;;  %v16521_v27 = vsub.f32 %v8412_v8, %v16498_v55  ;;  %v19271_v40 = vld [vmem:[#allocation68_spill] sm:$0xff] }
 0x7ec   : > { %19266 = vst [vmem:[#allocation75_spill] sm:$0xff] %v16514_v46 }
 0x7ed   : > { %v16496_v45 = vpop.f32.mrf.mxu0  ;;  %6925 = vmax.xlane.f32.xlu1 %v6924_v24  ;;  %v6294_v24 = vsel %vm4925_vm2, %v16489_v54, 0.0  ;;  %v6827_v1 = vadd.f32 %v19267_v25, %v6744_v53  ;;  %v8414_v25 = vsel %vm4422_vm1, %v19271_v40, 0  ;;  %v6284_v53 = vmul.f32 1.442695, %v6273_v10  ;;  %v19276_v40 = vld [vmem:[#allocation90_spill] sm:$0xff]  ;;  %v19279_v10 = vld [vmem:[#allocation51_spill] sm:$0xff] }
 0x7ee   : > { %9301 = vmatpush.xpose.msra.mxu0 %v16313_v49  ;;  %19260 = vst [vmem:[#allocation65_spill] sm:$0xff] %v16496_v45  ;;  %9362 = vmatpush.xpose.msra.mxu1 %v16236_v56  ;;  %v16501_v14 = vpop.f32.mrf.mxu1  ;;  %v19264_v45 = vld [vmem:[#allocation76_spill] sm:$0xff] }
 0x7ef   : > { %8165 = vmatmul.f32.gmra.mxu2 %v19261_v26  ;;  %8218 = vmatmul.f32.gmra.mxu3 %v16006_v50  ;;  %v7260_v61 = vadd.f32 %v19265_v11, %v19264_v45  ;;  %v19269_v50 = vld [vmem:[#allocation107_spill] sm:$0xff]  ;;  %v19270_v11 = vand.u32 4294901760, %v16476_v39  ;;  %10110 = vpow2.f32 %v6284_v53 }
 0x7f0   : > { %6919 = vmax.xlane.f32.xlu0 %v6918_v28  ;;  %6295 = vadd.xlane.f32.xlu2 %v6294_v24  ;;  %v16538_v24 = vpop.eup %10108 }
 0x7f1   : > { %8493 = vmatmul.f32.gmra.mxu0 %v8492_v57  ;;  %8590 = vmatmul.f32.gmra.mxu1 %v16353_v9  ;;  %v7326_v33 = vadd.f32 %v19269_v50, %v7260_v61  ;;  %v8499_v45 = vsub.f32 %v16476_v39, %v19270_v11  ;;  %v19272_v57 = vld [vmem:[#allocation55_spill] sm:$0xff]  ;;  %v6315_v61 = vsel %vm4925_vm2, %v16514_v46, 0.0  ;;  %19274 = vst [vmem:[#allocation57_spill] sm:$0xff] %v16538_v24  ;;  %v5636_v50 = vpop.xlane.xlu0 %5635 }
 0x7f2   : > { %v16518_v32 = vpop.f32.mrf.mxu2  ;;  %9364 = vmatpush.xpose.msra.mxu1 %v16250_v62  ;;  %v16525_v28 = vpop.f32.mrf.mxu3  ;;  %v16533_v6 = vadd.f32 %v19272_v57, %v6827_v1  ;;  %10112 = vrcp.f32 %v5636_v50 }
 0x7f3   : > { %19268 = vst [vmem:[#allocation31_spill] sm:$0xff] %v16518_v32  ;;  %v7392_v8 = vadd.f32 %v16238_v42, %v7326_v33  ;;  %v16542_v32 = vand.u32 4294901760, %v8414_v25  ;;  %v8500_v42 = vand.u32 4294901760, %v8499_v45  ;;  %v19275_v33 = vld [vmem:[#allocation67_spill] sm:$0xff]  ;;  %v6309_v45 = vsel %vm4925_vm2, %v16538_v24, 0.0  ;;  %v19285_v24 = vld [vmem:[#allocation21_spill] sm:$0xff] }
 0x7f4   : > { %19273 = vst [vmem:[#allocation22_spill] sm:$0xff] %v16533_v6  ;;  %v6701_v57 = vadd.f32 %v19276_v40, %v19275_v33  ;;  %v19283_v40 = vand.u32 4294901760, %v16119_v37 }
 0x7f5   : > { %v16540_v54 = vpop.f32.mrf.mxu0  ;;  %6316 = vadd.xlane.f32.xlu1 %v6315_v61  ;;  %v7479_v11 = vadd.f32 %v16315_v38, %v7392_v8  ;;  %v19277_v61 = vand.u32 4294901760, %v16128_v21  ;;  %v6912_v38 = vsel %vm4925_vm2, %v16533_v6, -inf  ;;  %v16565_v21 = vsub.f32 %v8414_v25, %v16542_v32 }
 0x7f6   : > { %9366 = vmatpush.xpose.msra.mxu1 %v16292_v52  ;;  %v16546_v1 = vpop.f32.mrf.mxu1  ;;  %v6774_v33 = vadd.f32 %v19279_v10, %v6701_v57  ;;  %v16577_v57 = vpop.eup %10110 }
 0x7f7   : > { %8644 = vmatmul.f32.vlgmr.msrb.gmra.mxu2 %v16232_v35  ;;  %8222 = vmatmul.f32.gmra.mxu3 %v19261_v26  ;;  %v16558_v8 = vadd.f32 %v16372_v51, %v7479_v11  ;;  %v19281_v51 = vand.u32 4294901760, %v16521_v27  ;;  %v19282_v11 = vld [vmem:[#allocation101_spill] sm:$0xff] }
 0x7f8   : > { %9427 = vmatpush.xpose.msrb.mxu2 %v19277_v61  ;;  %6913 = vmax.xlane.f32.xlu2 %v6912_v38  ;;  %v6266_v61 = vpop.xlane.xlu1 %6265  ;;  %v19284_v38 = vld [vmem:[#allocation79_spill] sm:$0xff]  ;;  %v10113_v46 = vpop.eup %10112 }
 0x7f9   : > { %19278 = vst [vmem:[#allocation82_spill] sm:$0xff] %v16558_v8  ;;  %8501 = vmatmul.f32.gmra.mxu0 %v8500_v42  ;;  %8594 = vmatmul.f32.gmra.mxu1 %v16403_v0  ;;  %v8507_v50 = vsub.f32 %v16521_v27, %v19281_v51  ;;  %v6847_v42 = vadd.f32 %v19282_v11, %v6774_v33  ;;  %v7566_v10 = vsel %vm4925_vm2, %v16558_v8, -inf  ;;  %v19286_v51 = vld [vmem:[#allocation86_spill] sm:$0xff]  ;;  %v18289_v11 = vand.u32 4294901760, %v16565_v21 }
 0x7fa   : > { %6310 = vadd.xlane.f32.xlu0 %v6309_v45  ;;  %v7802_v26 = vpop.f32.mrf.mxu2  ;;  %v16567_v53 = vpop.f32.mrf.mxu3  ;;  %v6691_v6 = vadd.f32 %v19286_v51, %v19285_v24  ;;  %v6303_v24 = vsel %vm4925_vm2, %v16577_v57, 0.0  ;;  %v19292_v51 = vld [vmem:[#allocation33_spill] sm:$0xff] }
 0x7fb   : > { %19280 = vst [vmem:[#allocation26_spill] sm:$0xff] %v16567_v53  ;;  %v16580_v25 = vadd.f32 %v19284_v38, %v6847_v42  ;;  %v8508_v37 = vand.u32 4294901760, %v8507_v50  ;;  %v19288_v53 = vand.u32 4294901760, %v16232_v35  ;;  %v19289_v42 = vand.u32 4294901760, %v16142_v12  ;;  %v19291_v35 = vld [vmem:[#allocation35_spill] sm:$0xff] }
 0x7fc   : > { %9431 = vmatpush.xpose.msrb.mxu2 %v19283_v40  ;;  %v19287_v40 = vld [vmem:[#allocation92_spill] sm:$0xff] }
 0x7fd   : > { %7567 = vmax.xlane.f32.xlu1 %v7566_v10  ;;  %v6276_v8 = vsub.f32 %v19287_v40, %v6266_v61  ;;  %v19290_v10 = vld [vmem:[#allocation98_spill] sm:$0xff]  ;;  %v6927_v50 = vsel %vm4925_vm2, %v16580_v25, -inf }
 0x7fe   : > { %v16582_v45 = vpop.f32.mrf.mxu0  ;;  %v16586_v33 = vpop.f32.mrf.mxu1  ;;  %v6762_v38 = vadd.f32 %v19290_v10, %v6691_v6  ;;  %v19294_v10 = vld [vmem:[#allocation100_spill] sm:$0xff] }
 0x7ff   : > { %8649 = vmatmul.f32.gmra.mxu2 %v16279_v48  ;;  %8710 = vmatmul.f32.vlgmr.msrb.gmra.mxu3 %v19288_v53  ;;  %v5666_v53 = vmul.f32 %v10113_v46, %v19291_v35  ;;  %v6290_v6 = vmul.f32 1.442695, %v6276_v8 }
 0x800   : > { %9435 = vmatpush.xpose.msrb.mxu2 %v19289_v42  ;;  %9498 = vmatpush.xpose.msrb.mxu3 %v16107_v59  ;;  %v6839_v12 = vadd.f32 %v19292_v51, %v6762_v38  ;;  %v8515_v59 = vsub.f32 %v16565_v21, %v18289_v11  ;;  %v19293_v42 = vand.u32 4294901760, %v16185_v43  ;;  %v19295_v51 = vld [vmem:[#allocation28_spill] sm:$0xff]  ;;  %v19296_v43 = vand.u32 4294901760, %v16279_v48 }
 0x801   : > { %8509 = vmatmul.f32.gmra.mxu0 %v8508_v37  ;;  %8598 = vmatmul.f32.gmra.mxu1 %v16449_v17  ;;  %v5674_v38 = vand.u32 2147483647, %v5666_v53  ;;  %v7331_v8 = vadd.f32 %v16229_v63, %v19295_v51  ;;  %10114 = vpow2.f32 %v6290_v6 }
 0x802   : > { %6304 = vadd.xlane.f32.xlu2 %v6303_v24  ;;  %v7810_v61 = vpop.f32.mrf.mxu2  ;;  %6928 = vmax.xlane.f32.xlu0 %v6927_v50  ;;  %v7919_v40 = vpop.f32.mrf.mxu3  ;;  %v16612_v24 = vadd.f32 %v19294_v10, %v6839_v12  ;;  %v8516_v35 = vand.u32 4294901760, %v8515_v59 }
 0x803   : > { %v16607_v37 = vadd.f32 %v7919_v40, %v7802_v26  ;;  %v19297_v26 = vand.u32 4294901760, %v16217_v15  ;;  %v7398_v53 = vadd.f32 %v16303_v18, %v7331_v8  ;;  %v16632_v63 = vsel %vm4925_vm2, %v5674_v38, 0.0 }
 0x804   : > { %9439 = vmatpush.xpose.msrb.mxu2 %v19293_v42  ;;  %9500 = vmatpush.xpose.msrb.mxu3 %v16097_v22  ;;  %v6921_v22 = vsel %vm4925_vm2, %v16612_v24, -inf  ;;  %v19298_v40 = vand.u32 4294901760, %v16263_v5  ;;  %v19302_v38 = vand.u32 4294901760, %v16382_v16 }
 0x805   : > { %v7483_v48 = vadd.f32 %v16361_v60, %v7398_v53  ;;  %v19299_v60 = vand.u32 4294901760, %v16336_v34 }
 0x806   : > { %v16615_v46 = vpop.f32.mrf.mxu0  ;;  %v16617_v50 = vpop.f32.mrf.mxu1 }
 0x807   : > { %8654 = vmatmul.f32.gmra.mxu2 %v16336_v34  ;;  %8716 = vmatmul.f32.gmra.mxu3 %v19296_v43  ;;  %v16643_v18 = vpop.eup %10114  ;;  %v16646_v59 = vadd.f32 %v16411_v31, %v7483_v48  ;;  %v19306_v43 = vld [vmem:[#allocation93_spill] sm:$0xff] }
 0x808   : > { %9443 = vmatpush.xpose.msrb.mxu2 %v19297_v26  ;;  %9502 = vmatpush.xpose.msrb.mxu3 %v16115_v2 }
 0x809   : > { %8517 = vmatmul.f32.gmra.mxu0 %v8516_v35  ;;  %8602 = vmatmul.f32.gmra.mxu1 %v16498_v55  ;;  %v7569_v5 = vsel %vm4925_vm2, %v16646_v59, -inf }
 0x80a   : > { %6922 = vmax.xlane.f32.xlu2 %v6921_v22  ;;  %v16634_v12 = vpop.f32.mrf.mxu2  ;;  %5683 = vadd.xlane.f32.xlu0 %v16632_v63  ;;  %v7923_v15 = vpop.f32.mrf.mxu3 }
 0x80b   : > { %v16638_v2 = vadd.f32 %v7923_v15, %v7810_v61  ;;  %v19300_v61 = vand.u32 4294901760, %v16290_v44  ;;  %v19301_v44 = vand.u32 4294901760, %v16313_v49 }
 0x80c   : > { %9447 = vmatpush.xpose.msrb.mxu2 %v19298_v40  ;;  %9504 = vmatpush.xpose.msrb.mxu3 %v16156_v30  ;;  %v6312_v30 = vsel %vm4925_vm2, %v16643_v18, 0.0  ;;  %v19309_v40 = vand.u32 4294901760, %v16476_v39 }
 0x80e   : > { %v16648_v6 = vpop.f32.mrf.mxu0  ;;  %v16650_v42 = vpop.f32.mrf.mxu1 }
 0x80f   : > { %8659 = vmatmul.f32.gmra.mxu2 %v16382_v16  ;;  %8722 = vmatmul.f32.gmra.mxu3 %v19299_v60  ;;  %v19304_v16 = vand.u32 4294901760, %v16424_v20 }
 0x810   : > { %9451 = vmatpush.xpose.msrb.mxu2 %v19300_v61  ;;  %9506 = vmatpush.xpose.msrb.mxu3 %v16187_v3  ;;  %v19310_v61 = vld [vmem:[#allocation81_spill] sm:$0xff] }
 0x811   : > { %8797 = vmatmul.f32.vlgmr.msrb.gmra.mxu0 %v16204_v23  ;;  %8606 = vmatmul.f32.gmra.mxu1 %v16542_v32 }
 0x812   : > { %6313 = vadd.xlane.f32.xlu2 %v6312_v30  ;;  %v7826_v31 = vpop.f32.mrf.mxu2  ;;  %7570 = vmax.xlane.f32.xlu0 %v7569_v5  ;;  %v16664_v34 = vpop.f32.mrf.mxu3  ;;  %v9062_v30 = vsel %vm4422_vm1, %v19310_v61, 0  ;;  %v19319_v61 = vld [vmem:[#allocation64_spill] sm:$0xff] }
 0x814   : > { %9455 = vmatpush.xpose.msrb.mxu2 %v19301_v44  ;;  %9508 = vmatpush.xpose.msrb.mxu3 %v16236_v56 }
 0x816   : > { %v16669_v3 = vpop.f32.mrf.mxu0  ;;  %v16671_v10 = vpop.f32.mrf.mxu1 }
 0x817   : > { %8664 = vmatmul.f32.gmra.mxu2 %v16424_v20  ;;  %8728 = vmatmul.f32.gmra.mxu3 %v19302_v38 }
 0x818   : > { %9510 = vmatpush.xpose.msrb.mxu3 %v16250_v62 }
 0x819   : > { %8801 = vmatmul.f32.gmra.mxu0 %v16202_v19  ;;  %8854 = vmatmul.f32.vlgmr.msrb.gmra.mxu1 %v16204_v23  ;;  %v9060_v23 = vsel %vm4422_vm1, %v19306_v43, 0 }
 0x81a   : > { %v7834_v35 = vpop.f32.mrf.mxu2  ;;  %v7931_v49 = vpop.f32.mrf.mxu3  ;;  %v16695_v22 = vand.u32 4294901760, %v9060_v23 }
 0x81b   : > { %v16679_v51 = vadd.f32 %v7931_v49, %v7826_v31 }
 0x81c   : > { %9512 = vmatpush.xpose.msrb.mxu3 %v16292_v52  ;;  %v16705_v20 = vsub.f32 %v9060_v23, %v16695_v22  ;;  %v19314_v23 = vld [vmem:[#allocation105_spill] sm:$0xff] }
 0x81d   : > { %19303 = vst [vmem:[#allocation71_spill] sm:$0xff] %v16679_v51 }
 0x81e   : > { %v16682_v56 = vpop.f32.mrf.mxu0  ;;  %v16684_v8 = vpop.f32.mrf.mxu1  ;;  %v18290_v44 = vand.u32 4294901760, %v16705_v20 }
 0x81f   : > { %8669 = vmatmul.f32.gmra.mxu2 %v16476_v39  ;;  %8734 = vmatmul.f32.gmra.mxu3 %v19304_v16  ;;  %v16689_v62 = vpop.xlane.xlu1 %5023 }
 0x820   : > { %19305 = vst [vmem:[#allocation29_spill] sm:$0xff] %v16689_v62  ;;  %v19320_v62 = vld [vmem:[#allocation94_spill] sm:$0xff] }
 0x821   : > { %8805 = vmatmul.f32.gmra.mxu0 %v16309_v41  ;;  %8858 = vmatmul.f32.gmra.mxu1 %v16202_v19 }
 0x822   : > { %v7842_v26 = vpop.f32.mrf.mxu2  ;;  %v7935_v52 = vpop.f32.mrf.mxu3 }
 0x823   : > { %v16697_v53 = vadd.f32 %v7935_v52, %v7834_v35  ;;  %v16716_v35 = vand.u32 4294901760, %v9062_v30  ;;  %v19315_v52 = vld [vmem:[#allocation74_spill] sm:$0xff] }
 0x825   : > { %19307 = vst [vmem:[#allocation50_spill] sm:$0xff] %v16697_v53  ;;  %v16736_v11 = vsub.f32 %v9062_v30, %v16716_v35  ;;  %v19326_v30 = vld [vmem:[#allocation58_spill] sm:$0xff] }
 0x826   : > { %v16699_v15 = vpop.f32.mrf.mxu0  ;;  %v16701_v48 = vpop.f32.mrf.mxu1 }
 0x827   : > { %19308 = vst [vmem:[#allocation44_spill] sm:$0xff] %v16699_v15  ;;  %8674 = vmatmul.f32.gmra.mxu2 %v16521_v27  ;;  %8740 = vmatmul.f32.gmra.mxu3 %v19309_v40  ;;  %v5642_v60 = vpop.xlane.xlu1 %5641  ;;  %v5639_v19 = vpop.xlane.xlu0 %5638  ;;  %v7272_v40 = vadd.f32 %v19315_v52, %v19314_v23  ;;  %v19323_v23 = vld [vmem:[#allocation91_spill] sm:$0xff] }
 0x828   : > { %10116 = vrcp.f32 %v5642_v60  ;;  %v19325_v15 = vld [vmem:[#allocation87_spill] sm:$0xff] }
 0x829   : > { %8809 = vmatmul.f32.gmra.mxu0 %v16353_v9  ;;  %8862 = vmatmul.f32.gmra.mxu1 %v16309_v41  ;;  %10118 = vrcp.f32 %v5639_v19  ;;  %v9119_v41 = vsub.f32 %v16705_v20, %v18290_v44  ;;  %v7341_v51 = vadd.f32 %v19325_v15, %v7272_v40  ;;  %v18291_v15 = vand.u32 4294901760, %v16736_v11 }
 0x82a   : > { %v7850_v5 = vpop.f32.mrf.mxu2  ;;  %v7939_v31 = vpop.f32.mrf.mxu3 }
 0x82b   : > { %v16714_v38 = vadd.f32 %v7939_v31, %v7842_v26  ;;  %v19316_v26 = vand.u32 4294901760, %v16521_v27  ;;  %v19324_v27 = vld [vmem:[#allocation53_spill] sm:$0xff] }
 0x82d   : > { %19311 = vst [vmem:[#allocation46_spill] sm:$0xff] %v16714_v38  ;;  %v19321_v38 = vld [vmem:[#allocation36_spill] sm:$0xff] }
 0x82e   : > { %v16718_v39 = vpop.f32.mrf.mxu0  ;;  %v10117_v49 = vpop.eup %10116 }
 0x82f   : > { %19312 = vst [vmem:[#allocation70_spill] sm:$0xff] %v16718_v39  ;;  %v16720_v16 = vpop.f32.mrf.mxu1  ;;  %8679 = vmatmul.f32.gmra.mxu2 %v16565_v21  ;;  %v10119_v43 = vpop.eup %10118  ;;  %8746 = vmatmul.f32.gmra.mxu3 %v19316_v26  ;;  %v5668_v31 = vmul.f32 %v10117_v49, %v19319_v61  ;;  %v9064_v26 = vsel %vm4422_vm1, %v19324_v27, 0  ;;  %v19328_v27 = vld [vmem:[#allocation40_spill] sm:$0xff] }
 0x830   : > { %19313 = vst [vmem:[#allocation39_spill] sm:$0xff] %v16720_v16  ;;  %v16730_v60 = vpop.xlane.xlu1 %5032  ;;  %v16732_v19 = vpop.xlane.xlu0 %5029  ;;  %v7268_v16 = vadd.f32 %v19321_v38, %v19320_v62  ;;  %v5667_v52 = vmul.f32 %v10119_v43, %v19323_v23  ;;  %v9120_v62 = vand.u32 4294901760, %v9119_v41  ;;  %v7410_v38 = vadd.f32 %v16394_v36, %v7341_v51 }
 0x831   : > { %19317 = vst [vmem:[#allocation42_spill] sm:$0xff] %v16730_v60  ;;  %8813 = vmatmul.f32.gmra.mxu0 %v16403_v0  ;;  %v16741_v44 = vpop.xlane.xlu2 %5026  ;;  %8866 = vmatmul.f32.gmra.mxu1 %v16353_v9  ;;  %v5676_v61 = vand.u32 2147483647, %v5668_v31  ;;  %v16753_v23 = vand.u32 4294901760, %v9064_v26 }
 0x832   : > { %19318 = vst [vmem:[#allocation48_spill] sm:$0xff] %v16732_v19  ;;  %v7858_v49 = vpop.f32.mrf.mxu2  ;;  %v7336_v19 = vadd.f32 %v19326_v30, %v7268_v16  ;;  %v7943_v39 = vpop.f32.mrf.mxu3  ;;  %v5675_v53 = vand.u32 2147483647, %v5667_v52  ;;  %v7491_v16 = vadd.f32 %v16452_v7, %v7410_v38 }
 0x833   : > { %19322 = vst [vmem:[#allocation103_spill] sm:$0xff] %v16741_v44  ;;  %v16750_v60 = vadd.f32 %v7943_v39, %v7850_v5  ;;  %v5688_v43 = vsel %vm4925_vm2, %v5676_v61, 0.0  ;;  %v19331_v5 = vld [vmem:[#allocation23_spill] sm:$0xff] }
 0x834   : > { %v7404_v44 = vadd.f32 %v19328_v27, %v7336_v19  ;;  %5689 = vadd.xlane.f32.xlu1 %v5688_v43  ;;  %v5685_v9 = vsel %vm4925_vm2, %v5675_v53, 0.0  ;;  %v9066_v39 = vsel %vm4422_vm1, %v19331_v5, 0  ;;  %v16768_v19 = vadd.f32 %v16501_v14, %v7491_v16 }
 0x835   : > { %19327 = vst [vmem:[#allocation61_spill] sm:$0xff] %v16750_v60  ;;  %v5714_v41 = vadd.f32 %v5685_v9, %v16632_v63  ;;  %5686 = vadd.xlane.f32.xlu2 %v5685_v9  ;;  %v19332_v53 = vand.u32 4294901760, %v16565_v21  ;;  %v16775_v63 = vsub.f32 %v9064_v26, %v16753_v23  ;;  %v9127_v14 = vsub.f32 %v16736_v11, %v18291_v15 }
 0x836   : > { %v16759_v40 = vpop.f32.mrf.mxu0  ;;  %v7487_v36 = vadd.f32 %v16406_v58, %v7404_v44  ;;  %v16787_v61 = vand.u32 4294901760, %v9066_v39  ;;  %v7575_v30 = vsel %vm4925_vm2, %v16768_v19, -inf }
 0x837   : > { %19329 = vst [vmem:[#allocation88_spill] sm:$0xff] %v16759_v40  ;;  %v16763_v51 = vpop.f32.mrf.mxu1  ;;  %9121 = vmatmul.f32.vlgmr.msra.gmra.mxu2 %v9120_v62  ;;  %8752 = vmatmul.f32.gmra.mxu3 %v19332_v53  ;;  %v16772_v31 = vadd.f32 %v5714_v41, %v5688_v43  ;;  %v9128_v62 = vand.u32 4294901760, %v9127_v14  ;;  %v18292_v43 = vand.u32 4294901760, %v16775_v63  ;;  %v19337_v41 = vld [vmem:[#allocation85_spill] sm:$0xff]  ;;  %v19339_v53 = vld [vmem:[#allocation56_spill] sm:$0xff]  ;;  %v19348_v40 = vld [vmem:[#allocation18_spill] sm:$0xff] }
 0x838   : > { %19330 = vst [vmem:[#allocation20_spill] sm:$0xff] %v16763_v51  ;;  %v5651_v7 = vpop.xlane.xlu1 %5650  ;;  %v16778_v58 = vadd.f32 %v16458_v4, %v7487_v36  ;;  %v16799_v9 = vsub.f32 %v9066_v39, %v16787_v61  ;;  %v19338_v36 = vld [vmem:[#allocation32_spill] sm:$0xff]  ;;  %v19376_v51 = vld [vmem:[#allocation89_spill] sm:$0xff] }
 0x839   : > { %8817 = vmatmul.f32.gmra.mxu0 %v16449_v17  ;;  %10120 = vrcp.f32 %v5651_v7  ;;  %v5648_v44 = vpop.xlane.xlu0 %5647  ;;  %v5645_v52 = vpop.xlane.xlu2 %5644  ;;  %8870 = vmatmul.f32.gmra.mxu1 %v16403_v0  ;;  %v7284_v5 = vadd.f32 %v19338_v36, %v19337_v41  ;;  %v9135_v41 = vsub.f32 %v16775_v63, %v18292_v43  ;;  %v19345_v36 = vld [vmem:[#allocation24_spill] sm:$0xff] }
 0x83a   : > { %19333 = vst [vmem:[#allocation73_spill] sm:$0xff] %v16778_v58  ;;  %v16785_v21 = vpop.f32.mrf.mxu2  ;;  %10122 = vrcp.f32 %v5648_v44  ;;  %v7947_v26 = vpop.f32.mrf.mxu3  ;;  %v7572_v38 = vsel %vm4925_vm2, %v16778_v58, -inf  ;;  %v18294_v43 = vand.u32 4294901760, %v16799_v9 }
 0x83b   : > { %10124 = vrcp.f32 %v5645_v52  ;;  %v16789_v4 = vadd.f32 %v7947_v26, %v7858_v49  ;;  %v19340_v52 = vld [vmem:[#allocation104_spill] sm:$0xff]  ;;  %v19341_v26 = vld [vmem:[#allocation63_spill] sm:$0xff] }
 0x83c   : > { %7576 = vmax.xlane.f32.xlu1 %v7575_v30  ;;  %v9068_v14 = vsel %vm4422_vm1, %v19340_v52, 0  ;;  %v19342_v30 = vld [vmem:[#allocation78_spill] sm:$0xff]  ;;  %v7356_v52 = vadd.f32 %v16473_v47, %v7284_v5 }
 0x83d   : > { %19334 = vst [vmem:[#allocation41_spill] sm:$0xff] %v16789_v4  ;;  %7573 = vmax.xlane.f32.xlu2 %v7572_v38  ;;  %v7280_v38 = vadd.f32 %v19342_v30, %v19341_v26  ;;  %v19372_v4 = vld [vmem:[#allocation106_spill] sm:$0xff] }
 0x83e   : > { %v16796_v0 = vpop.f32.mrf.mxu0 }
 0x83f   : > { %19335 = vst [vmem:[#allocation62_spill] sm:$0xff] %v16796_v0  ;;  %v10121_v27 = vpop.eup %10120  ;;  %v16801_v16 = vpop.f32.mrf.mxu1  ;;  %9129 = vmatmul.f32.gmra.mxu2 %v9128_v62  ;;  %9238 = vmatmul.f32.vlgmr.msra.gmra.mxu3 %v16695_v22 }
 0x840   : > { %19336 = vst [vmem:[#allocation69_spill] sm:$0xff] %v16801_v16  ;;  %v10123_v49 = vpop.eup %10122  ;;  %v5671_v7 = vmul.f32 %v10121_v27, %v19339_v53  ;;  %v19346_v27 = vld [vmem:[#allocation60_spill] sm:$0xff]  ;;  %v19347_v53 = vld [vmem:[#allocation83_spill] sm:$0xff] }
 0x841   : > { %v10125_v44 = vpop.eup %10124  ;;  %8821 = vmatmul.f32.gmra.mxu0 %v16498_v55  ;;  %v16812_v39 = vpop.xlane.xlu0 %5041  ;;  %v5670_v15 = vmul.f32 %v10123_v49, %v19345_v36  ;;  %v7276_v16 = vadd.f32 %v19347_v53, %v19346_v27  ;;  %8874 = vmatmul.f32.gmra.mxu1 %v16449_v17  ;;  %v7428_v36 = vadd.f32 %v16525_v28, %v7356_v52  ;;  %v16834_v17 = vand.u32 4294901760, %v9068_v14  ;;  %v19349_v27 = vld [vmem:[#allocation43_spill] sm:$0xff] }
 0x842   : > { %19343 = vst [vmem:[#allocation66_spill] sm:$0xff] %v16812_v39  ;;  %v16814_v62 = vpop.xlane.xlu2 %5035  ;;  %v16824_v26 = vpop.f32.mrf.mxu2  ;;  %v5679_v30 = vand.u32 2147483647, %v5671_v7  ;;  %v5669_v39 = vmul.f32 %v10125_v44, %v19348_v40  ;;  %v9136_v53 = vand.u32 4294901760, %v9135_v41  ;;  %v19350_v40 = vld [vmem:[#allocation25_spill] sm:$0xff] }
 0x843   : > { %19344 = vst [vmem:[#allocation52_spill] sm:$0xff] %v16814_v62  ;;  %v7351_v62 = vadd.f32 %v16428_v29, %v7280_v38  ;;  %v16828_v0 = vpop.f32.mrf.mxu3  ;;  %v5678_v60 = vand.u32 2147483647, %v5670_v15  ;;  %v7346_v49 = vadd.f32 %v16388_v13, %v7276_v16  ;;  %v7503_v15 = vadd.f32 %v16582_v45, %v7428_v36 }
 0x844   : > { %v5697_v47 = vsel %vm4925_vm2, %v5679_v30, 0.0  ;;  %v5677_v5 = vand.u32 2147483647, %v5669_v39  ;;  %v16853_v45 = vsub.f32 %v9068_v14, %v16834_v17  ;;  %v19356_v30 = vld [vmem:[#allocation99_spill] sm:$0xff] }
 0x845   : > { %v7422_v7 = vadd.f32 %v19349_v27, %v7351_v62  ;;  %5698 = vadd.xlane.f32.xlu1 %v5697_v47  ;;  %v5694_v29 = vsel %vm4925_vm2, %v5678_v60, 0.0  ;;  %v7416_v44 = vadd.f32 %v19350_v40, %v7346_v49  ;;  %v19353_v62 = vld [vmem:[#allocation65_spill] sm:$0xff]  ;;  %v16849_v60 = vadd.f32 %v16617_v50, %v7503_v15 }
 0x846   : > { %v16840_v38 = vpop.f32.mrf.mxu0  ;;  %5695 = vadd.xlane.f32.xlu2 %v5694_v29  ;;  %v5691_v13 = vsel %vm4925_vm2, %v5677_v5, 0.0  ;;  %v9070_v49 = vsel %vm4422_vm1, %v19356_v30, 0  ;;  %v18293_v40 = vand.u32 4294901760, %v16853_v45  ;;  %v19363_v30 = vld [vmem:[#allocation45_spill] sm:$0xff] }
 0x847   : > { %19351 = vst [vmem:[#allocation95_spill] sm:$0xff] %v16840_v38  ;;  %v7499_v28 = vadd.f32 %v16540_v54, %v7422_v7  ;;  %v16844_v16 = vpop.f32.mrf.mxu1  ;;  %9137 = vmatmul.f32.gmra.mxu2 %v9136_v53  ;;  %5692 = vadd.xlane.f32.xlu0 %v5691_v13  ;;  %v5716_v39 = vadd.f32 %v16772_v31, %v5691_v13  ;;  %v16878_v7 = vpop.xlane.xlu1 %6907  ;;  %v7584_v53 = vsel %vm4925_vm2, %v16849_v60, -inf }
 0x848   : > { %19352 = vst [vmem:[#allocation80_spill] sm:$0xff] %v16844_v16  ;;  %v7495_v41 = vadd.f32 %v19353_v62, %v7416_v44  ;;  %9242 = vmatmul.f32.gmra.mxu3 %v16716_v35  ;;  %v9143_v31 = vsub.f32 %v16799_v9, %v18294_v43 }
 0x849   : > { %19354 = vst [vmem:[#allocation19_spill] sm:$0xff] %v16849_v60  ;;  %v16856_v52 = vadd.f32 %v16586_v33, %v7499_v28  ;;  %8825 = vmatmul.f32.gmra.mxu0 %v16542_v32  ;;  %v5717_v54 = vadd.f32 %v5716_v39, %v5694_v29  ;;  %8878 = vmatmul.f32.gmra.mxu1 %v16498_v55  ;;  %v16870_v36 = vpop.xlane.xlu0 %5044  ;;  %v16882_v29 = vand.u32 4294901760, %v9070_v49  ;;  %v19361_v39 = vld [vmem:[#allocation84_spill] sm:$0xff] }
 0x84a   : > { %v16865_v50 = vadd.f32 %v16546_v1, %v7495_v41  ;;  %v16868_v14 = vpop.f32.mrf.mxu2  ;;  %19358 = vst [vmem:[#allocation54_spill] sm:$0xff] %v16870_v36  ;;  %v16874_v5 = vpop.xlane.xlu2 %5038  ;;  %v9144_v1 = vand.u32 4294901760, %v9143_v31  ;;  %v9151_v28 = vsub.f32 %v16853_v45, %v18293_v40  ;;  %v9072_v62 = vsel %vm4422_vm1, %v19361_v39, 0  ;;  %v19365_v36 = vld [vmem:[#allocation27_spill] sm:$0xff] }
 0x84b   : > { %19355 = vst [vmem:[#allocation76_spill] sm:$0xff] %v16856_v52  ;;  %v16872_v33 = vpop.f32.mrf.mxu3  ;;  %v16876_v27 = vadd.f32 %v5717_v54, %v5697_v47  ;;  %v7581_v55 = vsel %vm4925_vm2, %v16856_v52, -inf  ;;  %v16893_v13 = vsub.f32 %v9070_v49, %v16882_v29 }
 0x84c   : > { %19357 = vst [vmem:[#allocation77_spill] sm:$0xff] %v16865_v50  ;;  %v7578_v47 = vsel %vm4925_vm2, %v16865_v50, -inf  ;;  %v19373_v50 = vld [vmem:[#allocation31_spill] sm:$0xff] }
 0x84d   : > { %19359 = vst [vmem:[#allocation107_spill] sm:$0xff] %v16874_v5  ;;  %7585 = vmax.xlane.f32.xlu1 %v7584_v53 }
 0x84e   : > { %v8462_v44 = vpop.f32.mrf.mxu0  ;;  %7582 = vmax.xlane.f32.xlu2 %v7581_v55  ;;  %v9152_v55 = vand.u32 4294901760, %v9151_v28 }
 0x84f   : > { %v16889_v15 = vpop.f32.mrf.mxu1  ;;  %9145 = vmatmul.f32.gmra.mxu2 %v9144_v1  ;;  %7579 = vmax.xlane.f32.xlu0 %v7578_v47  ;;  %v16907_v1 = vand.u32 4294901760, %v9072_v62  ;;  %v18295_v47 = vand.u32 4294901760, %v16893_v13  ;;  %v6299_v40 = vpop.xlane.xlu1 %6298 }
 0x850   : > { %19360 = vst [vmem:[#allocation68_spill] sm:$0xff] %v16889_v15  ;;  %9246 = vmatmul.f32.gmra.mxu3 %v16753_v23 }
 0x851   : > { %9304 = vmatmul.f32.vlgmr.msra.gmra.mxu0 %v16705_v20  ;;  %8882 = vmatmul.f32.gmra.mxu1 %v16542_v32  ;;  %v9159_v28 = vsub.f32 %v16893_v13, %v18295_v47 }
 0x852   : > { %v16902_v41 = vpop.f32.mrf.mxu2  ;;  %v5654_v49 = vpop.xlane.xlu2 %5653 }
 0x853   : > { %19362 = vst [vmem:[#allocation55_spill] sm:$0xff] %v16902_v41  ;;  %v16904_v54 = vpop.f32.mrf.mxu3  ;;  %v6911_v31 = vpop.xlane.xlu0 %6910  ;;  %10126 = vrcp.f32 %v5654_v49 }
 0x854   : > { %v6931_v53 = vsub.f32 %v19363_v30, %v6911_v31  ;;  %v9074_v31 = vsel %vm4422_vm1, %v19365_v36, 0  ;;  %v16916_v30 = vsub.f32 %v9072_v62, %v16907_v1 }
 0x855   : > { %v16931_v15 = vand.u32 4294901760, %v9074_v31 }
 0x856   : > { %v6940_v43 = vmul.f32 1.442695, %v6931_v53  ;;  %v8470_v5 = vpop.f32.mrf.mxu0  ;;  %v19366_v53 = vld [vmem:[#allocation30_spill] sm:$0xff] }
 0x857   : > { %v8579_v39 = vpop.f32.mrf.mxu1  ;;  %9153 = vmatmul.f32.gmra.mxu2 %v9152_v55  ;;  %v5061_v49 = vrot.slane %v19366_v53, 4 }
 0x858   : > { %10128 = vpow2.f32 %v6940_v43  ;;  %v16910_v32 = vadd.f32 %v8579_v39, %v8462_v44  ;;  %9250 = vmatmul.f32.gmra.mxu3 %v16787_v61  ;;  %v19367_v43 = vand.u32 4294901760, %v16705_v20  ;;  %v19369_v39 = vld [vmem:[#allocation38_spill] sm:$0xff]  ;;  %v9160_v20 = vand.u32 4294901760, %v9159_v28 }
 0x859   : > { %9309 = vmatmul.f32.gmra.mxu0 %v16736_v11  ;;  %v10127_v55 = vpop.eup %10126  ;;  %v5062_v41 = vadd.f32 %v5061_v49, %v19366_v53 }
 0x85a   : > { %19364 = vst [vmem:[#allocation67_spill] sm:$0xff] %v16910_v32  ;;  %9370 = vmatmul.f32.vlgmr.msra.gmra.mxu1 %v19367_v43  ;;  %v16925_v44 = vpop.f32.mrf.mxu2  ;;  %v19370_v32 = vld [vmem:[#allocation59_spill] sm:$0xff]  ;;  %v5657_v38 = vpop.xlane.xlu2 %5656  ;;  %v5672_v47 = vmul.f32 %v10127_v55, %v19372_v4  ;;  %v18300_v43 = vand.u32 4294901760, %v16916_v30 }
 0x85b   : > { %19368 = vst [vmem:[#allocation90_spill] sm:$0xff] %v16925_v44  ;;  %v7288_v36 = vadd.f32 %v19370_v32, %v19369_v39  ;;  %v16929_v16 = vpop.f32.mrf.mxu3  ;;  %v6302_v62 = vpop.xlane.xlu0 %6301 }
 0x85c   : > { %19371 = vst [vmem:[#allocation51_spill] sm:$0xff] %v16929_v16  ;;  %10130 = vrcp.f32 %v6302_v62  ;;  %v5680_v39 = vand.u32 2147483647, %v5672_v47  ;;  %v19375_v16 = vld [vmem:[#allocation26_spill] sm:$0xff]  ;;  %v6930_v62 = vsub.f32 %v19376_v51, %v16878_v7  ;;  %v9167_v7 = vsub.f32 %v16916_v30, %v18300_v43 }
 0x85d   : > { %v7361_v52 = vadd.f32 %v19373_v50, %v7288_v36  ;;  %10132 = vrcp.f32 %v5657_v38  ;;  %v16945_v38 = vsub.f32 %v9074_v31, %v16931_v15  ;;  %v16947_v50 = vpop.xlane.xlu1 %6916  ;;  %v5063_v31 = vrot.slane %v5062_v41, 2  ;;  %v19382_v36 = vld [vmem:[#allocation72_spill] sm:$0xff] }
 0x85e   : > { %v16936_v60 = vpop.eup %10128  ;;  %v8478_v32 = vpop.f32.mrf.mxu0  ;;  %10134 = vrcp.f32 %v6299_v40 }
 0x85f   : > { %19374 = vst [vmem:[#allocation101_spill] sm:$0xff] %v16936_v60  ;;  %v7434_v44 = vadd.f32 %v19375_v16, %v7361_v52  ;;  %v8583_v58 = vpop.f32.mrf.mxu1  ;;  %9161 = vmatmul.f32.gmra.mxu2 %v9160_v20  ;;  %v6957_v4 = vsel %vm4925_vm2, %v16936_v60, 0.0  ;;  %v5700_v16 = vsel %vm4925_vm2, %v5680_v39, 0.0 }
 0x860   : > { %v16949_v28 = vadd.f32 %v8583_v58, %v8470_v5  ;;  %9254 = vmatmul.f32.gmra.mxu3 %v16834_v17  ;;  %6958 = vadd.xlane.f32.xlu1 %v6957_v4  ;;  %v5719_v52 = vadd.f32 %v16876_v27, %v5700_v16  ;;  %v19378_v58 = vand.u32 4294901760, %v16736_v11  ;;  %v19381_v27 = vld [vmem:[#allocation47_spill] sm:$0xff]  ;;  %v19383_v4 = vld [vmem:[#allocation37_spill] sm:$0xff] }
 0x861   : > { %v7507_v51 = vadd.f32 %v16615_v46, %v7434_v44  ;;  %9314 = vmatmul.f32.gmra.mxu0 %v16775_v63  ;;  %5701 = vadd.xlane.f32.xlu0 %v5700_v16  ;;  %v6938_v46 = vmul.f32 1.442695, %v6930_v62 }
 0x862   : > { %19377 = vst [vmem:[#allocation79_spill] sm:$0xff] %v16949_v28  ;;  %v10131_v40 = vpop.eup %10130  ;;  %9376 = vmatmul.f32.gmra.mxu1 %v19378_v58  ;;  %v16961_v5 = vpop.f32.mrf.mxu2  ;;  %v9168_v58 = vand.u32 4294901760, %v9167_v7  ;;  %v18302_v28 = vand.u32 4294901760, %v16945_v38 }
 0x863   : > { %19379 = vst [vmem:[#allocation21_spill] sm:$0xff] %v16961_v5  ;;  %v10133_v47 = vpop.eup %10132  ;;  %v16964_v53 = vadd.f32 %v16650_v42, %v7507_v51  ;;  %v16966_v49 = vpop.f32.mrf.mxu3  ;;  %v6328_v55 = vmul.f32 %v10131_v40, %v19381_v27  ;;  %v5064_v51 = vadd.f32 %v5063_v31, %v5062_v41  ;;  %v19385_v27 = vld [vmem:[#allocation97_spill] sm:$0xff] }
 0x864   : > { %v6920_v44 = vpop.xlane.xlu0 %6919  ;;  %v6296_v39 = vpop.xlane.xlu2 %6295  ;;  %v5673_v16 = vmul.f32 %v10133_v47, %v19383_v4  ;;  %v19388_v4 = vld [vmem:[#allocation49_spill] sm:$0xff] }
 0x865   : > { %19380 = vst [vmem:[#allocation86_spill] sm:$0xff] %v16964_v53  ;;  %v6934_v20 = vsub.f32 %v19382_v36, %v6920_v44  ;;  %v10135_v11 = vpop.eup %10134  ;;  %10136 = vrcp.f32 %v6296_v39  ;;  %v6336_v43 = vand.u32 2147483647, %v6328_v55  ;;  %v7587_v44 = vsel %vm4925_vm2, %v16964_v53, -inf  ;;  %v6308_v31 = vpop.xlane.xlu1 %6307 }
 0x866   : > { %v5681_v42 = vand.u32 2147483647, %v5673_v16  ;;  %10138 = vpow2.f32 %v6938_v46  ;;  %v8486_v62 = vpop.f32.mrf.mxu0  ;;  %v6327_v55 = vmul.f32 %v10135_v11, %v19385_v27  ;;  %v5065_v46 = vrot.slane %v5064_v51, 1 }
 0x867   : > { %v6946_v60 = vmul.f32 1.442695, %v6934_v20  ;;  %v8587_v5 = vpop.f32.mrf.mxu1  ;;  %9169 = vmatmul.f32.gmra.mxu2 %v9168_v58  ;;  %v6348_v40 = vsel %vm4925_vm2, %v6336_v43, 0.0  ;;  %v9175_v43 = vsub.f32 %v16945_v38, %v18302_v28 }
 0x868   : > { %v16975_v47 = vadd.f32 %v8587_v5, %v8478_v32  ;;  %9258 = vmatmul.f32.gmra.mxu3 %v16882_v29  ;;  %6349 = vadd.xlane.f32.xlu1 %v6348_v40  ;;  %v5703_v7 = vsel %vm4925_vm2, %v5681_v42, 0.0  ;;  %v5066_v28 = vadd.f32 %v5065_v46, %v5064_v51  ;;  %v19390_v51 = vld [vmem:[#allocation102_spill] sm:$0xff] }
 0x869   : > { %10140 = vpow2.f32 %v6946_v60  ;;  %9319 = vmatmul.f32.gmra.mxu0 %v16799_v9  ;;  %7588 = vmax.xlane.f32.xlu0 %v7587_v44  ;;  %v5720_v41 = vadd.f32 %v5719_v52, %v5703_v7  ;;  %v19386_v60 = vand.u32 4294901760, %v16775_v63  ;;  %v6335_v52 = vand.u32 2147483647, %v6327_v55  ;;  %v19389_v44 = vld [vmem:[#allocation22_spill] sm:$0xff] }
 0x86a   : > { %19384 = vst [vmem:[#allocation92_spill] sm:$0xff] %v16975_v47  ;;  %5704 = vadd.xlane.f32.xlu2 %v5703_v7  ;;  %v16986_v32 = vpop.f32.mrf.mxu2  ;;  %v9176_v63 = vand.u32 4294901760, %v9175_v43  ;;  %v6933_v46 = vsub.f32 %v19390_v51, %v16947_v50 }
 0x86b   : > { %9382 = vmatmul.f32.gmra.mxu1 %v19386_v60  ;;  %19387 = vst [vmem:[#allocation98_spill] sm:$0xff] %v16986_v32  ;;  %v10137_v5 = vpop.eup %10136  ;;  %v5721_v36 = vrot.slane %v5720_v41, 4  ;;  %v16988_v20 = vpop.f32.mrf.mxu3 }
 0x86c   : > { %v6914_v39 = vpop.xlane.xlu2 %6913  ;;  %v6326_v16 = vmul.f32 %v10137_v5, %v19388_v4  ;;  %v16991_v11 = vpop.eup %10138 }
 0x86d   : > { %v5722_v58 = vadd.f32 %v5721_v36, %v5720_v41  ;;  %v6311_v42 = vpop.xlane.xlu0 %6310  ;;  %v6932_v27 = vsub.f32 %v19389_v44, %v6914_v39  ;;  %v6954_v41 = vsel %vm4925_vm2, %v16991_v11, 0.0  ;;  %v6345_v36 = vsel %vm4925_vm2, %v6335_v52, 0.0  ;;  %v6926_v50 = vpop.xlane.xlu1 %6925 }
 0x86e   : > { %10142 = vrcp.f32 %v6311_v42  ;;  %v6334_v7 = vand.u32 2147483647, %v6326_v16  ;;  %v8494_v4 = vpop.f32.mrf.mxu0 }
 0x86f   : > { %v16994_v60 = vpop.eup %10140  ;;  %v5723_v53 = vrot.slane %v5722_v58, 2  ;;  %v6942_v47 = vmul.f32 1.442695, %v6932_v27  ;;  %v8591_v32 = vpop.f32.mrf.mxu1  ;;  %9177 = vmatmul.f32.gmra.mxu2 %v9176_v63 }
 0x870   : > { %v6966_v5 = vsel %vm4925_vm2, %v16994_v60, 0.0  ;;  %v16998_v55 = vadd.f32 %v8591_v32, %v8486_v62  ;;  %9262 = vmatmul.f32.gmra.mxu3 %v16907_v1  ;;  %v6342_v43 = vsel %vm4925_vm2, %v6334_v7, 0.0  ;;  %v19391_v32 = vand.u32 4294901760, %v16799_v9  ;;  %v19392_v7 = vld [vmem:[#allocation57_spill] sm:$0xff] }
 0x871   : > { %6967 = vadd.xlane.f32.xlu1 %v6966_v5  ;;  %v5724_v39 = vadd.f32 %v5723_v53, %v5722_v58  ;;  %10144 = vpow2.f32 %v6942_v47  ;;  %9324 = vmatmul.f32.gmra.mxu0 %v16853_v45  ;;  %v6374_v62 = vadd.f32 %v6345_v36, %v6342_v43  ;;  %v5067_v53 = vmax.f32 %v5066_v28, 0.0 }
 0x872   : > { %6343 = vadd.xlane.f32.xlu0 %v6342_v43  ;;  %6955 = vadd.xlane.f32.xlu2 %v6954_v41  ;;  %v17010_v16 = vpop.f32.mrf.mxu2  ;;  %10146 = vrcp.f32 %v6308_v31  ;;  %v6944_v47 = vmul.f32 1.442695, %v6933_v46 }
 0x873   : > { %9388 = vmatmul.f32.gmra.mxu1 %v19391_v32  ;;  %v5725_v42 = vrot.slane %v5724_v39, 1  ;;  %v17012_v44 = vpop.f32.mrf.mxu3  ;;  %v6375_v52 = vadd.f32 %v6374_v62, %v6348_v40 }
 0x874   : > { %v10143_v27 = vpop.eup %10142 }
 0x875   : > { %v5726_v58 = vadd.f32 %v5725_v42, %v5724_v39  ;;  %v6305_v63 = vpop.xlane.xlu2 %6304  ;;  %v6331_v5 = vmul.f32 %v10143_v27, %v19392_v7  ;;  %v6929_v43 = vpop.xlane.xlu0 %6928 }
 0x876   : > { %v6937_v41 = vsub.f32 %v16580_v25, %v6929_v43  ;;  %10148 = vrcp.f32 %v6305_v63  ;;  %v19394_v25 = vand.u32 4294901760, %v16853_v45  ;;  %v6317_v7 = vpop.xlane.xlu1 %6316 }
 0x877   : > { %v17015_v51 = vpop.eup %10144  ;;  %v17017_v9 = vmax.f32 %v5067_v53, %v5726_v58  ;;  %v8595_v31 = vpop.f32.mrf.mxu1  ;;  %9457 = vmatmul.f32.vlgmr.msrb.gmra.mxu2 %v16695_v22  ;;  %v6339_v40 = vand.u32 2147483647, %v6331_v5  ;;  %10150 = vpow2.f32 %v6944_v47  ;;  %v19395_v53 = vld [vmem:[#allocation34_spill] sm:$0xff] }
 0x878   : > { %v17021_v62 = vadd.f32 %v8595_v31, %v8494_v4  ;;  %9266 = vmatmul.f32.gmra.mxu3 %v16931_v15  ;;  %v6960_v28 = vsel %vm4925_vm2, %v17015_v51, 0.0  ;;  %v10147_v46 = vpop.eup %10146  ;;  %v6952_v39 = vmul.f32 1.442695, %v6937_v41  ;;  %v17032_v4 = vpop.f32.mrf.mxu0 }
 0x879   : > { %19393 = vst [vmem:[#allocation35_spill] sm:$0xff] %v17017_v9  ;;  %9329 = vmatmul.f32.gmra.mxu0 %v16893_v13  ;;  %v6357_v32 = vsel %vm4925_vm2, %v6339_v40, 0.0  ;;  %v6330_v47 = vmul.f32 %v10147_v46, %v19395_v53 }
 0x87a   : > { %6961 = vadd.xlane.f32.xlu0 %v6960_v28  ;;  %6358 = vadd.xlane.f32.xlu1 %v6357_v32  ;;  %v17030_v42 = vpop.f32.mrf.mxu2  ;;  %10152 = vpow2.f32 %v6952_v39  ;;  %v19396_v39 = vld [vmem:[#allocation96_spill] sm:$0xff] }
 0x87b   : > { %9394 = vmatmul.f32.gmra.mxu1 %v19394_v25  ;;  %6346 = vadd.xlane.f32.xlu2 %v6345_v36  ;;  %v17034_v27 = vpop.f32.mrf.mxu3  ;;  %v6338_v28 = vand.u32 2147483647, %v6330_v47  ;;  %v6936_v25 = vsub.f32 %v19396_v39, %v6926_v50  ;;  %10154 = vrcp.f32 %v6317_v7 }
 0x87c   : > { %v10149_v58 = vpop.eup %10148 }
 0x87d   : > { %v6923_v63 = vpop.xlane.xlu2 %6922  ;;  %v17037_v5 = vpop.xlane.xlu0 %5683  ;;  %v6329_v45 = vmul.f32 %v10149_v58, %v16577_v57  ;;  %v19397_v57 = vand.u32 4294901760, %v16893_v13  ;;  %v6950_v13 = vmul.f32 1.442695, %v6936_v25 }
 0x87e   : > { %v6935_v43 = vsub.f32 %v16612_v24, %v6923_v63  ;;  %v17041_v41 = vpop.eup %10150  ;;  %v6354_v63 = vsel %vm4925_vm2, %v6338_v28, 0.0 }
 0x87f   : > { %v17043_v31 = vpop.f32.mrf.mxu1  ;;  %9461 = vmatmul.f32.gmra.mxu2 %v16716_v35  ;;  %v6337_v40 = vand.u32 2147483647, %v6329_v45  ;;  %v6963_v53 = vsel %vm4925_vm2, %v17041_v41, 0.0 }
 0x880   : > { %v6948_v36 = vmul.f32 1.442695, %v6935_v43  ;;  %9514 = vmatmul.f32.vlgmr.msrb.gmra.mxu3 %v16695_v22  ;;  %v17047_v46 = vpop.eup %10152  ;;  %v8510_v7 = vpop.f32.mrf.mxu0 }
 0x881   : > { %9334 = vmatmul.f32.gmra.mxu0 %v16916_v30  ;;  %v6975_v24 = vsel %vm4925_vm2, %v17047_v46, 0.0  ;;  %v6351_v22 = vsel %vm4925_vm2, %v6337_v40, 0.0  ;;  %v10155_v39 = vpop.eup %10154 }
 0x882   : > { %10156 = vpow2.f32 %v6948_v36  ;;  %v17058_v47 = vpop.f32.mrf.mxu2  ;;  %6976 = vadd.xlane.f32.xlu1 %v6975_v24  ;;  %v6376_v50 = vadd.f32 %v6375_v52, %v6351_v22  ;;  %6352 = vadd.xlane.f32.xlu0 %v6351_v22  ;;  %v19398_v22 = vand.u32 4294901760, %v16916_v30 }
 0x883   : > { %9400 = vmatmul.f32.gmra.mxu1 %v19397_v57  ;;  %6964 = vadd.xlane.f32.xlu2 %v6963_v53  ;;  %v17060_v58 = vpop.f32.mrf.mxu3 }
 0x884   : > { %v6377_v45 = vadd.f32 %v6376_v50, %v6354_v63  ;;  %v19399_v50 = vld [vmem:[#allocation75_spill] sm:$0xff] }
 0x885   : > { %v6314_v43 = vpop.xlane.xlu2 %6313  ;;  %v7571_v36 = vpop.xlane.xlu0 %7570 }
 0x886   : > { %10158 = vrcp.f32 %v6314_v43  ;;  %v7591_v57 = vsub.f32 %v16646_v59, %v7571_v36  ;;  %v6378_v24 = vadd.f32 %v6377_v45, %v6357_v32  ;;  %v7568_v45 = vpop.xlane.xlu1 %7567 }
 0x887   : > { %v8603_v40 = vpop.f32.mrf.mxu1  ;;  %9465 = vmatmul.f32.gmra.mxu2 %v16753_v23  ;;  %10160 = vpow2.f32 %v6950_v13  ;;  %v7928_v13 = vadd.f32 %v16664_v34, %v16634_v12  ;;  %v7986_v12 = vadd.f32 %v16648_v6, %v16607_v37 }
 0x888   : > { %v17065_v53 = vpop.eup %10156  ;;  %v17067_v52 = vadd.f32 %v8603_v40, %v8510_v7  ;;  %9518 = vmatmul.f32.gmra.mxu3 %v16716_v35  ;;  %v7600_v28 = vmul.f32 1.442695, %v7591_v57  ;;  %v6333_v7 = vmul.f32 %v10155_v39, %v19399_v50  ;;  %v8518_v30 = vpop.f32.mrf.mxu0 }
 0x889   : > { %9339 = vmatmul.f32.gmra.mxu0 %v16945_v38  ;;  %v6969_v25 = vsel %vm4925_vm2, %v17065_v53, 0.0  ;;  %v8052_v37 = vadd.f32 %v16671_v10, %v7986_v12 }
 0x88a   : > { %v17075_v59 = vpop.f32.mrf.mxu2  ;;  %10162 = vpow2.f32 %v7600_v28  ;;  %6970 = vadd.xlane.f32.xlu0 %v6969_v25  ;;  %v7996_v28 = vadd.f32 %v16682_v56, %v7928_v13 }
 0x88b   : > { %9406 = vmatmul.f32.gmra.mxu1 %v19398_v22  ;;  %6355 = vadd.xlane.f32.xlu2 %v6354_v63  ;;  %v17077_v32 = vpop.f32.mrf.mxu3  ;;  %v6341_v63 = vand.u32 2147483647, %v6333_v7 }
 0x88c   : > { %v10159_v43 = vpop.eup %10158  ;;  %v8064_v50 = vadd.f32 %v16701_v48, %v7996_v28 }
 0x88d   : > { %v6332_v35 = vmul.f32 %v10159_v43, %v16643_v18  ;;  %v17083_v36 = vpop.eup %10160  ;;  %v19401_v18 = vld [vmem:[#allocation82_spill] sm:$0xff]  ;;  %v19402_v43 = vand.u32 4294901760, %v16945_v38  ;;  %v6363_v48 = vsel %vm4925_vm2, %v6341_v63, 0.0 }
 0x88e   : > { %v7590_v34 = vsub.f32 %v19401_v18, %v7568_v45  ;;  %v8147_v38 = vadd.f32 %v16868_v14, %v8064_v50  ;;  %v8139_v45 = vadd.f32 %v16785_v21, %v8052_v37 }
 0x88f   : > { %v8607_v57 = vpop.f32.mrf.mxu1  ;;  %9469 = vmatmul.f32.gmra.mxu2 %v16787_v61  ;;  %v6340_v40 = vand.u32 2147483647, %v6332_v35 }
 0x890   : > { %v17087_v22 = vadd.f32 %v8607_v57, %v8518_v30  ;;  %9522 = vmatmul.f32.gmra.mxu3 %v16753_v23  ;;  %v17090_v39 = vpop.eup %10162  ;;  %v6972_v23 = vsel %vm4925_vm2, %v17083_v36, 0.0  ;;  %v7598_v30 = vmul.f32 1.442695, %v7590_v34  ;;  %v17112_v57 = vadd.f32 %v16904_v54, %v8147_v38 }
 0x891   : > { %19400 = vst [vmem:[#allocation33_spill] sm:$0xff] %v17090_v39  ;;  %v6360_v25 = vsel %vm4925_vm2, %v6340_v40, 0.0  ;;  %v7617_v56 = vsel %vm4925_vm2, %v17090_v39, 0.0  ;;  %v17115_v40 = vadd.f32 %v16828_v0, %v8139_v45  ;;  %v19425_v39 = vld [vmem:[#allocation77_spill] sm:$0xff] }
 0x892   : > { %v6379_v7 = vadd.f32 %v6378_v24, %v6360_v25  ;;  %v17103_v35 = vpop.f32.mrf.mxu2  ;;  %7618 = vadd.xlane.f32.xlu1 %v7617_v56  ;;  %6361 = vadd.xlane.f32.xlu0 %v6360_v25  ;;  %10164 = vpow2.f32 %v7598_v30  ;;  %v8232_v14 = vsel %vm4925_vm2, %v17112_v57, -inf }
 0x893   : > { %9412 = vmatmul.f32.gmra.mxu1 %v19402_v43  ;;  %6973 = vadd.xlane.f32.xlu2 %v6972_v23  ;;  %v17106_v6 = vpop.f32.mrf.mxu3  ;;  %19403 = vst [vmem:[#allocation100_spill] sm:$0xff] %v17115_v40  ;;  %v8226_v21 = vsel %vm4925_vm2, %v17115_v40, -inf }
 0x894   : > { %v6380_v13 = vadd.f32 %v6379_v7, %v6363_v48 }
 0x896   : > { %v6381_v24 = vrot.slane %v6380_v13, 4 }
 0x897   : > { %9473 = vmatmul.f32.gmra.mxu2 %v16834_v17  ;;  %v17195_v50 = vpop.f32.mrf.mxu1 }
 0x898   : > { %9526 = vmatmul.f32.gmra.mxu3 %v16787_v61  ;;  %v6382_v10 = vadd.f32 %v6381_v24, %v6380_v13  ;;  %v17127_v18 = vpop.eup %10164  ;;  %v7991_v61 = vadd.f32 %v16669_v3, %v16638_v2  ;;  %v19407_v13 = vld [vmem:[#allocation73_spill] sm:$0xff] }
 0x899   : > { %19404 = vst [vmem:[#allocation28_spill] sm:$0xff] %v17127_v18  ;;  %v7614_v43 = vsel %vm4925_vm2, %v17127_v18, 0.0 }
 0x89a   : > { %v6383_v63 = vrot.slane %v6382_v10, 2  ;;  %v17121_v28 = vpop.f32.mrf.mxu2  ;;  %8233 = vmax.xlane.f32.xlu1 %v8232_v14  ;;  %8227 = vmax.xlane.f32.xlu0 %v8226_v21  ;;  %v8058_v25 = vadd.f32 %v16684_v8, %v7991_v61 }
 0x89b   : > { %6364 = vadd.xlane.f32.xlu2 %v6363_v48  ;;  %v17125_v54 = vpop.f32.mrf.mxu3 }
 0x89c   : > { %v6384_v0 = vadd.f32 %v6383_v63, %v6382_v10  ;;  %v8143_v7 = vadd.f32 %v16824_v26, %v8058_v25  ;;  %v19408_v63 = vld [vmem:[#allocation42_spill] sm:$0xff] }
 0x89e   : > { %v6385_v12 = vrot.slane %v6384_v0, 1  ;;  %v17146_v2 = vadd.f32 %v16872_v33, %v8143_v7  ;;  %v19412_v7 = vld [vmem:[#allocation71_spill] sm:$0xff] }
 0x89f   : > { %9477 = vmatmul.f32.gmra.mxu2 %v16882_v29 }
 0x8a0   : > { %v17132_v34 = vadd.f32 %v6385_v12, %v6384_v0  ;;  %9530 = vmatmul.f32.gmra.mxu3 %v16834_v17  ;;  %19406 = vst [vmem:[#allocation81_spill] sm:$0xff] %v17146_v2  ;;  %v8229_v17 = vsel %vm4925_vm2, %v17146_v2, -inf  ;;  %v19410_v0 = vld [vmem:[#allocation70_spill] sm:$0xff] }
 0x8a2   : > { %19405 = vst [vmem:[#allocation93_spill] sm:$0xff] %v17132_v34  ;;  %v17140_v56 = vpop.f32.mrf.mxu2  ;;  %v19421_v34 = vld [vmem:[#allocation51_spill] sm:$0xff] }
 0x8a3   : > { %7615 = vadd.xlane.f32.xlu2 %v7614_v43  ;;  %v17142_v23 = vpop.f32.mrf.mxu3 }
 0x8a7   : > { %9481 = vmatmul.f32.gmra.mxu2 %v16907_v1  ;;  %v17150_v3 = vpop.xlane.xlu1 %5689 }
 0x8a8   : > { %9534 = vmatmul.f32.gmra.mxu3 %v16882_v29  ;;  %v17152_v8 = vpop.xlane.xlu2 %5686 }
 0x8aa   : > { %v17156_v37 = vpop.f32.mrf.mxu2 }
 0x8ab   : > { %8230 = vmax.xlane.f32.xlu2 %v8229_v17  ;;  %v17158_v48 = vpop.f32.mrf.mxu3  ;;  %v19413_v17 = vld [vmem:[#allocation44_spill] sm:$0xff] }
 0x8af   : > { %9485 = vmatmul.f32.gmra.mxu2 %v16931_v15  ;;  %v7577_v26 = vpop.xlane.xlu1 %7576 }
 0x8b0   : > { %9538 = vmatmul.f32.gmra.mxu3 %v16907_v1  ;;  %v7593_v33 = vsub.f32 %v16768_v19, %v7577_v26  ;;  %v7574_v29 = vpop.xlane.xlu2 %7573  ;;  %v5049_v1 = vmax.f32 %v19408_v63, 0.0  ;;  %v19409_v19 = vld [vmem:[#allocation50_spill] sm:$0xff]  ;;  %v8001_v26 = vadd.f32 %v19413_v17, %v19412_v7  ;;  %v19417_v63 = vld [vmem:[#allocation39_spill] sm:$0xff] }
 0x8b1   : > { %v7592_v45 = vsub.f32 %v19407_v13, %v7574_v29  ;;  %v8006_v12 = vadd.f32 %v19410_v0, %v19409_v19  ;;  %v19416_v13 = vld [vmem:[#allocation20_spill] sm:$0xff]  ;;  %v19418_v7 = vld [vmem:[#allocation90_spill] sm:$0xff] }
 0x8b2   : > { %v17163_v38 = vpop.f32.mrf.mxu2  ;;  %v7604_v24 = vmul.f32 1.442695, %v7593_v33  ;;  %v8070_v19 = vadd.f32 %v19417_v63, %v8001_v26 }
 0x8b3   : > { %v17166_v30 = vpop.f32.mrf.mxu3  ;;  %v7602_v10 = vmul.f32 1.442695, %v7592_v45  ;;  %v8076_v45 = vadd.f32 %v19416_v13, %v8006_v12 }
 0x8b4   : > { %10166 = vpow2.f32 %v7604_v24  ;;  %v17187_v24 = vpop.f32.mrf.mxu0 }
 0x8b5   : > { %10168 = vpow2.f32 %v7602_v10  ;;  %v8155_v17 = vadd.f32 %v19418_v7, %v8076_v45 }
 0x8b7   : > { %v17199_v12 = vadd.f32 %v16966_v49, %v8155_v17 }
 0x8b8   : > { %9542 = vmatmul.f32.gmra.mxu3 %v16931_v15  ;;  %v17169_v14 = vpop.xlane.xlu1 %5698 }
 0x8b9   : > { %v17172_v21 = vpop.xlane.xlu2 %5695  ;;  %19420 = vst [vmem:[#allocation94_spill] sm:$0xff] %v17199_v12  ;;  %v8238_v49 = vsel %vm4925_vm2, %v17199_v12, -inf }
 0x8ba   : > { %v9122_v61 = vpop.f32.mrf.mxu2  ;;  %v5693_v25 = vpop.xlane.xlu0 %5692 }
 0x8bb   : > { %v17176_v43 = vpop.eup %10166  ;;  %v17180_v33 = vpop.f32.mrf.mxu3  ;;  %v17182_v29 = vmax.f32 %v5049_v1, %v5693_v25  ;;  %v19419_v1 = vld [vmem:[#allocation55_spill] sm:$0xff] }
 0x8bc   : > { %19411 = vst [vmem:[#allocation105_spill] sm:$0xff] %v17176_v43  ;;  %v17184_v15 = vpop.eup %10168  ;;  %v7623_v10 = vsel %vm4925_vm2, %v17176_v43, 0.0  ;;  %v8151_v25 = vadd.f32 %v19419_v1, %v8070_v19  ;;  %v19423_v43 = vld [vmem:[#allocation19_spill] sm:$0xff]  ;;  %v17213_v17 = vpop.f32.mrf.mxu0 }
 0x8bd   : > { %19414 = vst [vmem:[#allocation74_spill] sm:$0xff] %v17180_v33  ;;  %7624 = vadd.xlane.f32.xlu2 %v7623_v10  ;;  %v7620_v0 = vsel %vm4925_vm2, %v17184_v15, 0.0 }
 0x8be   : > { %19415 = vst [vmem:[#allocation64_spill] sm:$0xff] %v17184_v15  ;;  %7621 = vadd.xlane.f32.xlu0 %v7620_v0  ;;  %v17202_v9 = vadd.f32 %v19421_v34, %v8151_v25  ;;  %v19424_v15 = vld [vmem:[#allocation76_spill] sm:$0xff]  ;;  %v19430_v25 = vld [vmem:[#allocation61_spill] sm:$0xff] }
 0x8c0   : > { %v7586_v13 = vpop.xlane.xlu1 %7585  ;;  %19422 = vst [vmem:[#allocation36_spill] sm:$0xff] %v17202_v9 }
 0x8c1   : > { %v7596_v26 = vsub.f32 %v19423_v43, %v7586_v13  ;;  %v7583_v10 = vpop.xlane.xlu2 %7582  ;;  %v8235_v43 = vsel %vm4925_vm2, %v17202_v9, -inf  ;;  %v19431_v13 = vld [vmem:[#allocation62_spill] sm:$0xff] }
 0x8c2   : > { %v9130_v63 = vpop.f32.mrf.mxu2  ;;  %v7580_v2 = vpop.xlane.xlu0 %7579  ;;  %v7595_v18 = vsub.f32 %v19424_v15, %v7583_v10 }
 0x8c3   : > { %v9239_v45 = vpop.f32.mrf.mxu3  ;;  %v7610_v7 = vmul.f32 1.442695, %v7596_v26  ;;  %v7594_v0 = vsub.f32 %v19425_v39, %v7580_v2  ;;  %v17215_v15 = vpop.f32.mrf.mxu1  ;;  %v19427_v39 = vld [vmem:[#allocation41_spill] sm:$0xff]  ;;  %v19428_v2 = vld [vmem:[#allocation95_spill] sm:$0xff]  ;;  %v8016_v26 = vadd.f32 %v19431_v13, %v19430_v25 }
 0x8c4   : > { %v17207_v33 = vadd.f32 %v9239_v45, %v9122_v61  ;;  %v7608_v19 = vmul.f32 1.442695, %v7595_v18  ;;  %v8021_v61 = vadd.f32 %v19428_v2, %v19427_v39  ;;  %v19438_v2 = vld [vmem:[#allocation80_spill] sm:$0xff]  ;;  %v19439_v13 = vld [vmem:[#allocation69_spill] sm:$0xff] }
 0x8c5   : > { %10170 = vpow2.f32 %v7610_v7  ;;  %v7606_v34 = vmul.f32 1.442695, %v7594_v0  ;;  %8239 = vmax.xlane.f32.xlu2 %v8238_v49  ;;  %v19433_v7 = vld [vmem:[#allocation46_spill] sm:$0xff]  ;;  %v19434_v0 = vld [vmem:[#allocation88_spill] sm:$0xff]  ;;  %v8088_v9 = vadd.f32 %v19438_v2, %v8016_v26 }
 0x8c6   : > { %19426 = vst [vmem:[#allocation91_spill] sm:$0xff] %v17207_v33  ;;  %10172 = vpow2.f32 %v7608_v19  ;;  %8236 = vmax.xlane.f32.xlu0 %v8235_v43  ;;  %v8011_v49 = vadd.f32 %v19434_v0, %v19433_v7  ;;  %v19435_v19 = vld [vmem:[#allocation68_spill] sm:$0xff]  ;;  %v19441_v7 = vld [vmem:[#allocation21_spill] sm:$0xff] }
 0x8c7   : > { %10174 = vpow2.f32 %v7606_v34  ;;  %v8094_v43 = vadd.f32 %v19435_v19, %v8021_v61 }
 0x8c8   : > { %v8082_v12 = vadd.f32 %v19439_v13, %v8011_v49 }
 0x8c9   : > { %v8167_v40 = vadd.f32 %v17010_v16, %v8094_v43 }
 0x8ca   : > { %v9138_v18 = vpop.f32.mrf.mxu2  ;;  %v8159_v0 = vadd.f32 %v19441_v7, %v8082_v12 }
 0x8cb   : > { %v17219_v1 = vpop.eup %10170  ;;  %v9243_v10 = vpop.f32.mrf.mxu3  ;;  %v17244_v19 = vadd.f32 %v17034_v27, %v8167_v40  ;;  %v19445_v40 = vld [vmem:[#allocation48_spill] sm:$0xff] }
 0x8cc   : > { %19429 = vst [vmem:[#allocation53_spill] sm:$0xff] %v17219_v1  ;;  %v17223_v45 = vpop.eup %10172  ;;  %v17228_v34 = vadd.f32 %v9243_v10, %v9130_v63  ;;  %v7632_v33 = vsel %vm4925_vm2, %v17219_v1, 0.0  ;;  %v19440_v63 = vld [vmem:[#allocation98_spill] sm:$0xff]  ;;  %v17250_v49 = vadd.f32 %v16988_v20, %v8159_v0  ;;  %v8863_v16 = vpop.f32.mrf.mxu1  ;;  %v5048_v12 = vmax.f32 %v19445_v40, 0.0  ;;  %v19447_v0 = vld [vmem:[#allocation101_spill] sm:$0xff]  ;;  %v19449_v40 = vld [vmem:[#allocation92_spill] sm:$0xff] }
 0x8cd   : > { %19432 = vst [vmem:[#allocation87_spill] sm:$0xff] %v17223_v45  ;;  %v17232_v39 = vpop.eup %10174  ;;  %7633 = vadd.xlane.f32.xlu2 %v7632_v33  ;;  %v7629_v25 = vsel %vm4925_vm2, %v17223_v45, 0.0  ;;  %v8163_v10 = vadd.f32 %v19440_v63, %v8088_v9  ;;  %v8806_v33 = vpop.f32.mrf.mxu0  ;;  %v8247_v27 = vsel %vm4925_vm2, %v17244_v19, -inf  ;;  %v8656_v1 = vadd.f32 %v17075_v59, %v19449_v40 }
 0x8ce   : > { %19436 = vst [vmem:[#allocation58_spill] sm:$0xff] %v17228_v34  ;;  %v7626_v61 = vsel %vm4925_vm2, %v17232_v39, 0.0  ;;  %7630 = vadd.xlane.f32.xlu0 %v7629_v25  ;;  %v8241_v20 = vsel %vm4925_vm2, %v17250_v49, -inf  ;;  %v17266_v63 = vmax.f32 %v5048_v12, %v17150_v3  ;;  %v19450_v12 = vld [vmem:[#allocation86_spill] sm:$0xff] }
 0x8cf   : > { %19437 = vst [vmem:[#allocation40_spill] sm:$0xff] %v17232_v39  ;;  %7627 = vadd.xlane.f32.xlu1 %v7626_v61  ;;  %v17247_v26 = vadd.f32 %v17012_v44, %v8163_v10 }
 0x8d0   : > { %19443 = vst [vmem:[#allocation85_spill] sm:$0xff] %v17250_v49 }
 0x8d1   : > { %19442 = vst [vmem:[#allocation23_spill] sm:$0xff] %v17247_v26  ;;  %v8244_v44 = vsel %vm4925_vm2, %v17247_v26, -inf }
 0x8d2   : > { %v9146_v43 = vpop.f32.mrf.mxu2 }
 0x8d3   : > { %v9247_v2 = vpop.f32.mrf.mxu3  ;;  %v6959_v13 = vpop.xlane.xlu1 %6958 }
 0x8d4   : > { %v17252_v25 = vadd.f32 %v9247_v2, %v9138_v18  ;;  %10176 = vrcp.f32 %v6959_v13  ;;  %v17254_v9 = vpop.xlane.xlu0 %5701  ;;  %v19448_v13 = vld [vmem:[#allocation54_spill] sm:$0xff] }
 0x8d5   : > { %8248 = vmax.xlane.f32.xlu2 %v8247_v27  ;;  %v17263_v18 = vpop.f32.mrf.mxu0  ;;  %v5053_v27 = vmax.f32 %v19448_v13, 0.0 }
 0x8d6   : > { %19444 = vst [vmem:[#allocation32_spill] sm:$0xff] %v17252_v25  ;;  %8245 = vmax.xlane.f32.xlu0 %v8244_v44  ;;  %v17272_v25 = vpop.f32.mrf.mxu1 }
 0x8d7   : > { %8242 = vmax.xlane.f32.xlu1 %v8241_v20 }
 0x8da   : > { %v10177_v61 = vpop.eup %10176  ;;  %v9154_v3 = vpop.f32.mrf.mxu2 }
 0x8db   : > { %v9251_v10 = vpop.f32.mrf.mxu3  ;;  %v17268_v7 = vpop.xlane.xlu1 %6349  ;;  %v6987_v2 = vmul.f32 %v10177_v61, %v19447_v0  ;;  %v8724_v61 = vadd.f32 %v17106_v6, %v8656_v1 }
 0x8dc   : > { %19446 = vst [vmem:[#allocation56_spill] sm:$0xff] %v17268_v7  ;;  %v17274_v34 = vadd.f32 %v9251_v10, %v9146_v43  ;;  %v7589_v20 = vpop.xlane.xlu0 %7588  ;;  %v19451_v10 = vld [vmem:[#allocation29_spill] sm:$0xff] }
 0x8dd   : > { %v7597_v45 = vsub.f32 %v19450_v12, %v7589_v20  ;;  %v5705_v49 = vpop.xlane.xlu2 %5704  ;;  %v6995_v39 = vand.u32 2147483647, %v6987_v2  ;;  %v5046_v13 = vmax.f32 %v19451_v10, 0.0  ;;  %v8807_v44 = vadd.f32 %v8806_v33, %v8724_v61  ;;  %v17291_v2 = vpop.f32.mrf.mxu0 }
 0x8de   : > { %v17281_v26 = vmax.f32 %v5053_v27, %v5705_v49 }
 0x8df   : > { %v7612_v0 = vmul.f32 1.442695, %v7597_v45  ;;  %v7005_v43 = vsel %vm4925_vm2, %v6995_v39, 0.0  ;;  %v17287_v7 = vmax.f32 %v5046_v13, %v17037_v5  ;;  %v17289_v59 = vadd.f32 %v8863_v16, %v8807_v44  ;;  %v19452_v39 = vld [vmem:[#allocation67_spill] sm:$0xff]  ;;  %v17301_v5 = vpop.f32.mrf.mxu1 }
 0x8e0   : > { %7006 = vadd.xlane.f32.xlu2 %v7005_v43  ;;  %v8646_v33 = vadd.f32 %v17030_v42, %v19452_v39  ;;  %v8600_v42 = vadd.f32 %v17043_v31, %v17032_v4 }
 0x8e1   : > { %10178 = vpow2.f32 %v7612_v0  ;;  %v8892_v44 = vsel %vm4925_vm2, %v17289_v59, -inf  ;;  %v19453_v0 = vld [vmem:[#allocation107_spill] sm:$0xff] }
 0x8e2   : > { %v9162_v27 = vpop.f32.mrf.mxu2  ;;  %v5051_v10 = vmax.f32 %v19453_v0, 0.0 }
 0x8e3   : > { %v9255_v20 = vpop.f32.mrf.mxu3 }
 0x8e4   : > { %v6968_v40 = vpop.xlane.xlu1 %6967  ;;  %v17293_v49 = vadd.f32 %v9255_v20, %v9154_v3  ;;  %v8712_v3 = vadd.f32 %v17060_v58, %v8646_v33  ;;  %v19454_v20 = vld [vmem:[#allocation103_spill] sm:$0xff]  ;;  %v8671_v33 = vadd.f32 %v17140_v56, %v8600_v42 }
 0x8e5   : > { %10180 = vrcp.f32 %v6968_v40  ;;  %v17295_v6 = vpop.xlane.xlu0 %6343  ;;  %v6956_v45 = vpop.xlane.xlu2 %6955  ;;  %v5047_v40 = vmax.f32 %v19454_v20, 0.0 }
 0x8e6   : > { %10182 = vrcp.f32 %v6956_v45  ;;  %v8799_v13 = vadd.f32 %v17187_v24, %v8712_v3  ;;  %v19455_v3 = vld [vmem:[#allocation79_spill] sm:$0xff] }
 0x8e7   : > { %v17303_v16 = vpop.eup %10178  ;;  %v17326_v4 = vmax.f32 %v5047_v40, %v17152_v8 }
 0x8e8   : > { %v7635_v12 = vsel %vm4925_vm2, %v17303_v16, 0.0  ;;  %8893 = vmax.xlane.f32.xlu2 %v8892_v44  ;;  %v17317_v58 = vadd.f32 %v17195_v50, %v8799_v13  ;;  %v17321_v44 = vmax.f32 %v5051_v10, %v17169_v14  ;;  %v8651_v50 = vadd.f32 %v17058_v47, %v19455_v3  ;;  %v8875_v13 = vpop.f32.mrf.mxu1 }
 0x8e9   : > { %7636 = vadd.xlane.f32.xlu1 %v7635_v12 }
 0x8ea   : > { %v8718_v47 = vadd.f32 %v17077_v32, %v8651_v50  ;;  %v17347_v20 = vpop.f32.mrf.mxu2  ;;  %v8661_v32 = vadd.f32 %v17103_v35, %v16998_v55 }
 0x8eb   : > { %v10181_v61 = vpop.eup %10180  ;;  %v9259_v45 = vpop.f32.mrf.mxu3 }
 0x8ec   : > { %v6990_v39 = vmul.f32 %v10181_v61, %v16994_v60  ;;  %v10183_v1 = vpop.eup %10182  ;;  %v17323_v12 = vadd.f32 %v9259_v45, %v9162_v27  ;;  %v8818_v61 = vpop.f32.mrf.mxu0  ;;  %v8742_v27 = vadd.f32 %v17158_v48, %v8671_v33 }
 0x8ed   : > { %v6962_v0 = vpop.xlane.xlu0 %6961  ;;  %v17328_v31 = vpop.xlane.xlu1 %6358  ;;  %v6986_v60 = vmul.f32 %v10183_v1, %v16991_v11  ;;  %v8886_v11 = vsel %vm4925_vm2, %v17317_v58, -inf }
 0x8ee   : > { %10184 = vrcp.f32 %v6962_v0  ;;  %v6998_v24 = vand.u32 2147483647, %v6990_v39  ;;  %v17335_v14 = vpop.xlane.xlu2 %6346  ;;  %v8819_v1 = vadd.f32 %v8818_v61, %v8742_v27  ;;  %v8803_v39 = vadd.f32 %v17213_v17, %v8718_v47 }
 0x8ef   : > { %v6994_v42 = vand.u32 2147483647, %v6986_v60  ;;  %v8730_v27 = vadd.f32 %v17125_v54, %v8661_v32 }
 0x8f0   : > { %v17341_v10 = vsel %vm4925_vm2, %v6998_v24, 0.0  ;;  %v17351_v33 = vadd.f32 %v8875_v13, %v8819_v1  ;;  %v17357_v60 = vadd.f32 %v17215_v15, %v8803_v39  ;;  %v19456_v13 = vld [vmem:[#allocation52_spill] sm:$0xff] }
 0x8f1   : > { %7015 = vadd.xlane.f32.xlu2 %v17341_v10  ;;  %8887 = vmax.xlane.f32.xlu1 %v8886_v11  ;;  %v7002_v48 = vsel %vm4925_vm2, %v6994_v42, 0.0  ;;  %v8811_v42 = vadd.f32 %v17263_v18, %v8730_v27  ;;  %v5050_v11 = vmax.f32 %v19456_v13, 0.0 }
 0x8f2   : > { %7003 = vadd.xlane.f32.xlu0 %v7002_v48  ;;  %v7034_v40 = vadd.f32 %v7005_v43, %v7002_v48  ;;  %v8901_v17 = vsel %vm4925_vm2, %v17351_v33, -inf  ;;  %v8889_v35 = vsel %vm4925_vm2, %v17357_v60, -inf  ;;  %v9178_v47 = vpop.f32.mrf.mxu2 }
 0x8f3   : > { %v17353_v0 = vpop.f32.mrf.mxu3  ;;  %v17374_v54 = vadd.f32 %v17272_v25, %v8811_v42  ;;  %v17379_v39 = vmax.f32 %v5050_v11, %v17172_v21  ;;  %v8666_v21 = vadd.f32 %v17121_v28, %v17021_v62 }
 0x8f4   : > { %v10185_v45 = vpop.eup %10184 }
 0x8f5   : > { %v6988_v24 = vmul.f32 %v10185_v45, %v17015_v51  ;;  %v6977_v3 = vpop.xlane.xlu1 %6976  ;;  %v17361_v43 = vpop.xlane.xlu0 %6352 }
 0x8f6   : > { %v6965_v50 = vpop.xlane.xlu2 %6964  ;;  %10186 = vrcp.f32 %v6977_v3 }
 0x8f7   : > { %v6996_v61 = vand.u32 2147483647, %v6988_v24  ;;  %10188 = vrcp.f32 %v6965_v50 }
 0x8f9   : > { %8902 = vmax.xlane.f32.xlu2 %v8901_v17  ;;  %v7008_v15 = vsel %vm4925_vm2, %v6996_v61, 0.0  ;;  %v8895_v61 = vsel %vm4925_vm2, %v17374_v54, -inf }
 0x8fa   : > { %7009 = vadd.xlane.f32.xlu1 %v7008_v15  ;;  %v7035_v55 = vadd.f32 %v7034_v40, %v7008_v15  ;;  %8890 = vmax.xlane.f32.xlu0 %v8889_v35  ;;  %v19457_v35 = vld [vmem:[#allocation66_spill] sm:$0xff] }
 0x8fb   : > { %v9267_v1 = vpop.f32.mrf.mxu3  ;;  %v5052_v42 = vmax.f32 %v19457_v35, 0.0  ;;  %v8681_v35 = vadd.f32 %v17163_v38, %v17087_v22 }
 0x8fc   : > { %v17376_v48 = vadd.f32 %v9267_v1, %v9178_v47  ;;  %v10187_v45 = vpop.eup %10186 }
 0x8fd   : > { %v10189_v40 = vpop.eup %10188  ;;  %v6993_v32 = vmul.f32 %v10187_v45, %v17047_v46  ;;  %v6971_v18 = vpop.xlane.xlu0 %6970  ;;  %v8736_v46 = vadd.f32 %v17142_v23, %v8666_v21  ;;  %v17397_v47 = vmax.f32 %v5052_v42, %v17254_v9  ;;  %v8676_v9 = vadd.f32 %v17156_v37, %v17067_v52 }
 0x8fe   : > { %v17381_v24 = vpop.xlane.xlu2 %6355  ;;  %v6989_v50 = vmul.f32 %v10189_v40, %v17041_v41  ;;  %10190 = vrcp.f32 %v6971_v18  ;;  %v8879_v18 = vpop.f32.mrf.mxu1 }
 0x8ff   : > { %v7001_v25 = vand.u32 2147483647, %v6993_v32  ;;  %v8815_v13 = vadd.f32 %v17291_v2, %v8736_v46  ;;  %v8822_v32 = vpop.f32.mrf.mxu0 }
 0x900   : > { %v6997_v17 = vand.u32 2147483647, %v6989_v50  ;;  %v8748_v50 = vadd.f32 %v17166_v30, %v8676_v9  ;;  %v19475_v30 = vld [vmem:[#allocation23_spill] sm:$0xff] }
 0x901   : > { %v7023_v27 = vsel %vm4925_vm2, %v7001_v25, 0.0  ;;  %v17401_v45 = vadd.f32 %v17301_v5, %v8815_v13 }
 0x902   : > { %8896 = vmax.xlane.f32.xlu1 %v8895_v61  ;;  %7024 = vadd.xlane.f32.xlu2 %v7023_v27  ;;  %v7011_v15 = vsel %vm4925_vm2, %v6997_v17, 0.0 }
 0x903   : > { %7012 = vadd.xlane.f32.xlu0 %v7011_v15  ;;  %v7036_v41 = vadd.f32 %v7035_v55, %v7011_v15  ;;  %v8898_v5 = vsel %vm4925_vm2, %v17401_v45, -inf }
 0x904   : > { %v10191_v11 = vpop.eup %10190 }
 0x905   : > { %v7619_v62 = vpop.xlane.xlu1 %7618  ;;  %v7037_v1 = vadd.f32 %v7036_v41, %v17341_v10  ;;  %v17403_v23 = vpop.xlane.xlu0 %6361  ;;  %v6991_v40 = vmul.f32 %v10191_v11, %v17065_v53  ;;  %v8823_v53 = vadd.f32 %v8822_v32, %v8748_v50  ;;  %v19458_v11 = vld [vmem:[#allocation100_spill] sm:$0xff] }
 0x906   : > { %v6974_v28 = vpop.xlane.xlu2 %6973  ;;  %v8883_v9 = vpop.f32.mrf.mxu1 }
 0x907   : > { %10192 = vrcp.f32 %v6974_v28  ;;  %v6999_v2 = vand.u32 2147483647, %v6991_v40  ;;  %v17416_v46 = vadd.f32 %v8879_v18, %v8823_v53  ;;  %v8826_v13 = vpop.f32.mrf.mxu0 }
 0x908   : > { %10194 = vrcp.f32 %v7619_v62 }
 0x909   : > { %v7017_v10 = vsel %vm4925_vm2, %v6999_v2, 0.0 }
 0x90a   : > { %7018 = vadd.xlane.f32.xlu1 %v7017_v10  ;;  %v7038_v25 = vadd.f32 %v7037_v1, %v7017_v10  ;;  %v19459_v1 = vld [vmem:[#allocation74_spill] sm:$0xff] }
 0x90b   : > { %8899 = vmax.xlane.f32.xlu0 %v8898_v5  ;;  %v8754_v40 = vadd.f32 %v19459_v1, %v8681_v35 }
 0x90d   : > { %v10193_v61 = vpop.eup %10192  ;;  %v8234_v21 = vpop.xlane.xlu1 %8233  ;;  %v8827_v2 = vadd.f32 %v8826_v13, %v8754_v40 }
 0x90e   : > { %v17414_v17 = vpop.xlane.xlu2 %6364  ;;  %v8252_v52 = vsub.f32 %v17112_v57, %v8234_v21  ;;  %v8228_v37 = vpop.xlane.xlu0 %8227  ;;  %v6992_v15 = vmul.f32 %v10193_v61, %v17083_v36  ;;  %v8904_v57 = vsel %vm4925_vm2, %v17416_v46, -inf  ;;  %v19461_v21 = vld [vmem:[#allocation33_spill] sm:$0xff] }
 0x90f   : > { %v8250_v28 = vsub.f32 %v19458_v11, %v8228_v37  ;;  %v10195_v18 = vpop.eup %10194  ;;  %v17429_v50 = vadd.f32 %v8883_v9, %v8827_v2  ;;  %v19463_v11 = vld [vmem:[#allocation81_spill] sm:$0xff] }
 0x910   : > { %v8262_v42 = vmul.f32 1.442695, %v8252_v52  ;;  %v7000_v41 = vand.u32 2147483647, %v6992_v15  ;;  %v7647_v52 = vmul.f32 %v10195_v18, %v19461_v21  ;;  %v19466_v18 = vld [vmem:[#allocation93_spill] sm:$0xff] }
 0x911   : > { %v8258_v22 = vmul.f32 1.442695, %v8250_v28  ;;  %19460 = vst [vmem:[#allocation104_spill] sm:$0xff] %v17429_v50 }
 0x912   : > { %10196 = vpow2.f32 %v8262_v42  ;;  %v7020_v32 = vsel %vm4925_vm2, %v7000_v41, 0.0  ;;  %8905 = vmax.xlane.f32.xlu1 %v8904_v57  ;;  %v19462_v42 = vld [vmem:[#allocation28_spill] sm:$0xff]  ;;  %v7655_v13 = vand.u32 2147483647, %v7647_v52 }
 0x913   : > { %7021 = vadd.xlane.f32.xlu0 %v7020_v32  ;;  %v7039_v36 = vadd.f32 %v7038_v25, %v7020_v32  ;;  %v8907_v25 = vsel %vm4925_vm2, %v17429_v50, -inf }
 0x914   : > { %v7665_v2 = vsel %vm4925_vm2, %v7655_v13, 0.0  ;;  %v17458_v13 = vpop.f32.mrf.mxu2 }
 0x915   : > { %v7040_v38 = vadd.f32 %v7039_v36, %v7023_v27 }
 0x916   : > { %v7616_v62 = vpop.xlane.xlu2 %7615 }
 0x917   : > { %10198 = vrcp.f32 %v7616_v62  ;;  %v7041_v10 = vrot.slane %v7040_v38, 4  ;;  %v19465_v62 = vld [vmem:[#allocation35_spill] sm:$0xff] }
 0x918   : > { %v17431_v5 = vpop.eup %10196  ;;  %10200 = vpow2.f32 %v8258_v22 }
 0x919   : > { %v7042_v53 = vadd.f32 %v7041_v10, %v7040_v38  ;;  %v8280_v61 = vsel %vm4925_vm2, %v17431_v5, 0.0  ;;  %v19467_v10 = vmax.f32 %v19465_v62, %v19466_v18 }
 0x91a   : > { %8281 = vadd.xlane.f32.xlu1 %v8280_v61 }
 0x91b   : > { %v7043_v37 = vrot.slane %v7042_v53, 2  ;;  %8908 = vmax.xlane.f32.xlu0 %v8907_v25 }
 0x91d   : > { %v10199_v27 = vpop.eup %10198  ;;  %v7044_v15 = vadd.f32 %v7043_v37, %v7042_v53  ;;  %v9305_v37 = vpop.f32.mrf.mxu0 }
 0x91e   : > { %v8231_v35 = vpop.xlane.xlu2 %8230  ;;  %v7646_v41 = vmul.f32 %v10199_v27, %v19462_v42  ;;  %v17440_v1 = vpop.eup %10200  ;;  %v19469_v42 = vld [vmem:[#allocation94_spill] sm:$0xff] }
 0x91f   : > { %v8251_v28 = vsub.f32 %v19463_v11, %v8231_v35  ;;  %19464 = vst [vmem:[#allocation63_spill] sm:$0xff] %v17440_v1  ;;  %v7045_v40 = vrot.slane %v7044_v15, 1  ;;  %v8274_v22 = vsel %vm4925_vm2, %v17440_v1, 0.0  ;;  %v17455_v27 = vpop.f32.mrf.mxu1  ;;  %v19470_v11 = vld [vmem:[#allocation36_spill] sm:$0xff] }
 0x920   : > { %v7654_v57 = vand.u32 2147483647, %v7646_v41 }
 0x921   : > { %v8260_v32 = vmul.f32 1.442695, %v8251_v28  ;;  %v7046_v9 = vadd.f32 %v7045_v40, %v7044_v15 }
 0x922   : > { %v7662_v36 = vsel %vm4925_vm2, %v7654_v57, 0.0 }
 0x923   : > { %10202 = vpow2.f32 %v8260_v32  ;;  %v7694_v38 = vadd.f32 %v7665_v2, %v7662_v36  ;;  %v17449_v53 = vmax.f32 %v19467_v10, %v7046_v9  ;;  %8275 = vadd.xlane.f32.xlu0 %v8274_v22  ;;  %v17461_v32 = vpop.f32.mrf.mxu3 }
 0x925   : > { %v17464_v22 = vpop.f32.mrf.mxu0 }
 0x927   : > { %v17466_v10 = vpop.f32.mrf.mxu1 }
 0x929   : > { %v17451_v61 = vpop.eup %10202 }
 0x92a   : > { %19468 = vst [vmem:[#allocation78_spill] sm:$0xff] %v17451_v61  ;;  %v8277_v21 = vsel %vm4925_vm2, %v17451_v61, 0.0 }
 0x92b   : > { %8278 = vadd.xlane.f32.xlu2 %v8277_v21  ;;  %7663 = vadd.xlane.f32.xlu0 %v7662_v36  ;;  %v19471_v36 = vld [vmem:[#allocation64_spill] sm:$0xff] }
 0x92d   : > { %v17484_v55 = vpop.f32.mrf.mxu0 }
 0x930   : > { %v7625_v52 = vpop.xlane.xlu2 %7624 }
 0x931   : > { %v7622_v25 = vpop.xlane.xlu0 %7621 }
 0x932   : > { %10204 = vrcp.f32 %v7622_v25 }
 0x933   : > { %7666 = vadd.xlane.f32.xlu2 %v7665_v2  ;;  %10206 = vrcp.f32 %v7625_v52 }
 0x938   : > { %v8240_v15 = vpop.xlane.xlu2 %8239  ;;  %v10205_v40 = vpop.eup %10204 }
 0x939   : > { %v8237_v35 = vpop.xlane.xlu0 %8236  ;;  %v8254_v41 = vsub.f32 %v19469_v42, %v8240_v15  ;;  %v7648_v2 = vmul.f32 %v10205_v40, %v19471_v36  ;;  %v10207_v18 = vpop.eup %10206 }
 0x93a   : > { %v8253_v28 = vsub.f32 %v19470_v11, %v8237_v35  ;;  %v17472_v42 = vpop.f32.mrf.mxu2  ;;  %v19474_v11 = vld [vmem:[#allocation105_spill] sm:$0xff] }
 0x93b   : > { %v8266_v57 = vmul.f32 1.442695, %v8254_v41  ;;  %v7656_v15 = vand.u32 2147483647, %v7648_v2 }
 0x93c   : > { %v8264_v9 = vmul.f32 1.442695, %v8253_v28  ;;  %v7649_v28 = vmul.f32 %v10207_v18, %v19474_v11 }
 0x93d   : > { %10208 = vpow2.f32 %v8266_v57  ;;  %v17479_v57 = vpop.f32.mrf.mxu3 }
 0x93e   : > { %10210 = vpow2.f32 %v8264_v9  ;;  %v17482_v9 = vsel %vm4925_vm2, %v7656_v15, 0.0  ;;  %v7657_v2 = vand.u32 2147483647, %v7649_v28 }
 0x93f   : > { %v7695_v18 = vadd.f32 %v7694_v38, %v17482_v9 }
 0x940   : > { %v7634_v62 = vpop.xlane.xlu2 %7633  ;;  %v17494_v1 = vsel %vm4925_vm2, %v7657_v2, 0.0  ;;  %v9320_v2 = vpop.f32.mrf.mxu0 }
 0x941   : > { %v7631_v21 = vpop.xlane.xlu0 %7630 }
 0x942   : > { %v7628_v25 = vpop.xlane.xlu1 %7627  ;;  %v17497_v38 = vpop.f32.mrf.mxu2 }
 0x943   : > { %v17468_v35 = vpop.eup %10208  ;;  %10212 = vrcp.f32 %v7628_v25 }
 0x944   : > { %19472 = vst [vmem:[#allocation24_spill] sm:$0xff] %v17468_v35  ;;  %v17470_v52 = vpop.eup %10210  ;;  %v8286_v41 = vsel %vm4925_vm2, %v17468_v35, 0.0  ;;  %v17490_v35 = vpop.f32.mrf.mxu1 }
 0x945   : > { %19473 = vst [vmem:[#allocation60_spill] sm:$0xff] %v17470_v52  ;;  %v8283_v40 = vsel %vm4925_vm2, %v17470_v52, 0.0  ;;  %8287 = vadd.xlane.f32.xlu2 %v8286_v41  ;;  %v19476_v41 = vld [vmem:[#allocation40_spill] sm:$0xff] }
 0x946   : > { %8284 = vadd.xlane.f32.xlu0 %v8283_v40  ;;  %v19477_v40 = vld [vmem:[#allocation85_spill] sm:$0xff] }
 0x948   : > { %v8249_v36 = vpop.xlane.xlu2 %8248 }
 0x949   : > { %v10213_v25 = vpop.eup %10212  ;;  %v8246_v56 = vpop.xlane.xlu0 %8245  ;;  %v8257_v51 = vsub.f32 %v17244_v19, %v8249_v36  ;;  %v7696_v19 = vadd.f32 %v7695_v18, %v17494_v1 }
 0x94a   : > { %v8243_v11 = vpop.xlane.xlu1 %8242  ;;  %v8256_v3 = vsub.f32 %v19475_v30, %v8246_v56  ;;  %v7650_v8 = vmul.f32 %v10213_v25, %v19476_v41  ;;  %v17503_v36 = vpop.f32.mrf.mxu3 }
 0x94b   : > { %v8255_v15 = vsub.f32 %v19477_v40, %v8243_v11  ;;  %v8272_v52 = vmul.f32 1.442695, %v8257_v51 }
 0x94c   : > { %v8270_v61 = vmul.f32 1.442695, %v8256_v3  ;;  %v7658_v28 = vand.u32 2147483647, %v7650_v8  ;;  %v19478_v8 = vld [vmem:[#allocation91_spill] sm:$0xff] }
 0x94d   : > { %v8268_v50 = vmul.f32 1.442695, %v8255_v15  ;;  %10214 = vpow2.f32 %v8272_v52  ;;  %v9306_v51 = vadd.f32 %v9305_v37, %v19478_v8  ;;  %v9470_v15 = vpop.f32.mrf.mxu2 }
 0x94e   : > { %10216 = vpow2.f32 %v8270_v61  ;;  %v17500_v56 = vsel %vm4925_vm2, %v7658_v28, 0.0  ;;  %v19481_v61 = vmax.f32 %v17326_v4, %v17335_v14 }
 0x94f   : > { %10218 = vpow2.f32 %v8268_v50  ;;  %v7697_v30 = vadd.f32 %v7696_v19, %v17500_v56  ;;  %v9372_v18 = vadd.f32 %v17455_v27, %v9306_v51  ;;  %v19484_v19 = vld [vmem:[#allocation87_spill] sm:$0xff] }
 0x950   : > { %10220 = vrcp.f32 %v7631_v21  ;;  %v9389_v21 = vpop.f32.mrf.mxu1 }
 0x951   : > { %10222 = vrcp.f32 %v7634_v62  ;;  %v9459_v40 = vadd.f32 %v17458_v13, %v9372_v18  ;;  %v17532_v18 = vpop.f32.mrf.mxu0 }
 0x952   : > { %v9527_v28 = vpop.f32.mrf.mxu3 }
 0x953   : > { %v17506_v3 = vpop.eup %10214  ;;  %v7007_v52 = vpop.xlane.xlu2 %7006  ;;  %v17526_v14 = vadd.f32 %v17461_v32, %v9459_v40 }
 0x954   : > { %19479 = vst [vmem:[#allocation83_spill] sm:$0xff] %v17506_v3  ;;  %v17508_v25 = vpop.eup %10216  ;;  %v17514_v11 = vmax.f32 %v19481_v61, %v7007_v52  ;;  %v8295_v50 = vsel %vm4925_vm2, %v17506_v3, 0.0 }
 0x955   : > { %19480 = vst [vmem:[#allocation18_spill] sm:$0xff] %v17508_v25  ;;  %v17518_v41 = vpop.eup %10218  ;;  %v8292_v37 = vsel %vm4925_vm2, %v17508_v25, 0.0  ;;  %8296 = vadd.xlane.f32.xlu2 %v8295_v50  ;;  %v9546_v13 = vsel %vm4925_vm2, %v17526_v14, -inf }
 0x956   : > { %19482 = vst [vmem:[#allocation43_spill] sm:$0xff] %v17518_v41  ;;  %v8289_v27 = vsel %vm4925_vm2, %v17518_v41, 0.0  ;;  %8293 = vadd.xlane.f32.xlu0 %v8292_v37  ;;  %v10221_v4 = vpop.eup %10220  ;;  %v19485_v37 = vld [vmem:[#allocation53_spill] sm:$0xff] }
 0x957   : > { %8290 = vadd.xlane.f32.xlu1 %v8289_v27  ;;  %19483 = vst [vmem:[#allocation25_spill] sm:$0xff] %v17526_v14  ;;  %v7651_v8 = vmul.f32 %v10221_v4, %v19484_v19  ;;  %v10223_v62 = vpop.eup %10222  ;;  %v17537_v4 = vpop.f32.mrf.mxu2 }
 0x958   : > { %v7652_v32 = vmul.f32 %v10223_v62, %v19485_v37  ;;  %v17535_v27 = vpop.f32.mrf.mxu1  ;;  %v19487_v62 = vmax.f32 %v17379_v39, %v17381_v24 }
 0x959   : > { %v7659_v40 = vand.u32 2147483647, %v7651_v8  ;;  %v17563_v24 = vpop.f32.mrf.mxu0 }
 0x95a   : > { %v7660_v19 = vand.u32 2147483647, %v7652_v32  ;;  %v17543_v25 = vpop.f32.mrf.mxu3 }
 0x95b   : > { %v8894_v51 = vpop.xlane.xlu2 %8893  ;;  %v17540_v3 = vsel %vm4925_vm2, %v7659_v40, 0.0 }
 0x95c   : > { %v7637_v52 = vpop.xlane.xlu1 %7636  ;;  %v8912_v61 = vsub.f32 %v17289_v59, %v8894_v51  ;;  %19486 = vst [vmem:[#allocation65_spill] sm:$0xff] %v17540_v3  ;;  %v7698_v41 = vadd.f32 %v7697_v30, %v17540_v3  ;;  %v19488_v30 = vmax.f32 %v17287_v7, %v17295_v6  ;;  %v17561_v3 = vsel %vm4925_vm2, %v7660_v19, 0.0 }
 0x95d   : > { %10224 = vrcp.f32 %v7637_v52  ;;  %9547 = vmax.xlane.f32.xlu2 %v9546_v13  ;;  %v9321_v13 = vadd.f32 %v9320_v2, %v17274_v34 }
 0x95e   : > { %v8922_v50 = vmul.f32 1.442695, %v8912_v61 }
 0x95f   : > { %v9390_v39 = vadd.f32 %v9389_v21, %v9321_v13 }
 0x960   : > { %10226 = vpow2.f32 %v8922_v50  ;;  %v17571_v7 = vpop.f32.mrf.mxu1 }
 0x961   : > { %v9471_v6 = vadd.f32 %v9470_v15, %v9390_v39  ;;  %v19491_v15 = vld [vmem:[#allocation58_spill] sm:$0xff] }
 0x962   : > { %v17586_v39 = vpop.f32.mrf.mxu3 }
 0x963   : > { %v10225_v59 = vpop.eup %10224 }
 0x964   : > { %v7016_v51 = vpop.xlane.xlu2 %7015  ;;  %v8888_v52 = vpop.xlane.xlu1 %8887  ;;  %v7653_v61 = vmul.f32 %v10225_v59, %v17303_v16  ;;  %v17574_v59 = vadd.f32 %v9527_v28, %v9471_v6 }
 0x965   : > { %v17548_v8 = vmax.f32 %v19487_v62, %v7016_v51  ;;  %v8910_v50 = vsub.f32 %v17317_v58, %v8888_v52  ;;  %v7004_v37 = vpop.xlane.xlu0 %7003  ;;  %v7699_v58 = vadd.f32 %v7698_v41, %v17561_v3  ;;  %v17576_v52 = vpop.f32.mrf.mxu2  ;;  %v19489_v41 = vld [vmem:[#allocation56_spill] sm:$0xff] }
 0x966   : > { %v17553_v32 = vpop.eup %10226  ;;  %v17558_v40 = vmax.f32 %v19488_v30, %v7004_v37  ;;  %v7661_v14 = vand.u32 2147483647, %v7653_v61  ;;  %v19490_v13 = vmax.f32 %v17266_v63, %v19489_v41  ;;  %v9311_v30 = vadd.f32 %v17464_v22, %v19491_v15  ;;  %v9335_v22 = vpop.f32.mrf.mxu0 }
 0x967   : > { %v8918_v16 = vmul.f32 1.442695, %v8910_v50  ;;  %v8940_v34 = vsel %vm4925_vm2, %v17553_v32, 0.0 }
 0x968   : > { %8941 = vadd.xlane.f32.xlu2 %v8940_v34  ;;  %v17569_v2 = vsel %vm4925_vm2, %v7661_v14, 0.0  ;;  %v9378_v63 = vadd.f32 %v17466_v10, %v9311_v30 }
 0x969   : > { %10228 = vpow2.f32 %v8918_v16  ;;  %v7700_v19 = vadd.f32 %v7699_v58, %v17569_v2 }
 0x96b   : > { %v7701_v51 = vrot.slane %v7700_v19, 4 }
 0x96c   : > { %v8903_v21 = vpop.xlane.xlu2 %8902 }
 0x96d   : > { %v7010_v62 = vpop.xlane.xlu1 %7009  ;;  %v8915_v61 = vsub.f32 %v17351_v33, %v8903_v21  ;;  %v8891_v50 = vpop.xlane.xlu0 %8890  ;;  %v7702_v37 = vadd.f32 %v7701_v51, %v7700_v19  ;;  %v9555_v33 = vsel %vm4925_vm2, %v17574_v59, -inf  ;;  %v9463_v51 = vadd.f32 %v17472_v42, %v9378_v63 }
 0x96e   : > { %v17582_v14 = vmax.f32 %v19490_v13, %v7010_v62  ;;  %v8911_v28 = vsub.f32 %v17357_v60, %v8891_v50  ;;  %v9264_v60 = vadd.f32 %v17353_v0, %v17347_v20  ;;  %v9407_v62 = vpop.f32.mrf.mxu1  ;;  %v9482_v0 = vpop.f32.mrf.mxu2 }
 0x96f   : > { %v8928_v16 = vmul.f32 1.442695, %v8915_v61  ;;  %v17589_v34 = vpop.eup %10228  ;;  %v7703_v58 = vrot.slane %v7702_v37, 2  ;;  %v17600_v10 = vadd.f32 %v17479_v57, %v9463_v51 }
 0x970   : > { %v8920_v6 = vmul.f32 1.442695, %v8911_v28  ;;  %v8934_v19 = vsel %vm4925_vm2, %v17589_v34, 0.0  ;;  %9556 = vmax.xlane.f32.xlu2 %v9555_v33  ;;  %v9336_v41 = vadd.f32 %v9335_v22, %v9264_v60 }
 0x971   : > { %10230 = vpow2.f32 %v8928_v16  ;;  %8935 = vadd.xlane.f32.xlu1 %v8934_v19  ;;  %v7704_v21 = vadd.f32 %v7703_v58, %v7702_v37  ;;  %v19492_v37 = vld [vmem:[#allocation32_spill] sm:$0xff]  ;;  %v19493_v58 = vmax.f32 %v17281_v26, %v17414_v17  ;;  %v9539_v19 = vpop.f32.mrf.mxu3 }
 0x972   : > { %10232 = vpow2.f32 %v8920_v6  ;;  %v9316_v28 = vadd.f32 %v17484_v55, %v19492_v37  ;;  %v9408_v20 = vadd.f32 %v9407_v62, %v9336_v41  ;;  %v19494_v55 = vmax.f32 %v17182_v29, %v17361_v43 }
 0x973   : > { %v7705_v61 = vrot.slane %v7704_v21, 1  ;;  %v9326_v43 = vadd.f32 %v17532_v18, %v17293_v49 }
 0x974   : > { %v9384_v26 = vadd.f32 %v17490_v35, %v9316_v28  ;;  %v9483_v17 = vadd.f32 %v9482_v0, %v9408_v20  ;;  %v19496_v0 = vmax.f32 %v17397_v47, %v17403_v23  ;;  %v9340_v23 = vpop.f32.mrf.mxu0 }
 0x975   : > { %v8897_v13 = vpop.xlane.xlu1 %8896  ;;  %v17603_v15 = vadd.f32 %v7705_v61, %v7704_v21  ;;  %v7025_v42 = vpop.xlane.xlu2 %7024  ;;  %v9549_v21 = vsel %vm4925_vm2, %v17600_v10, -inf }
 0x976   : > { %v8913_v50 = vsub.f32 %v17374_v54, %v8897_v13  ;;  %v7013_v33 = vpop.xlane.xlu0 %7012  ;;  %v17612_v57 = vmax.f32 %v19493_v58, %v7025_v42  ;;  %v9467_v51 = vadd.f32 %v17497_v38, %v9384_v26  ;;  %v17631_v62 = vadd.f32 %v9539_v19, %v9483_v17 }
 0x977   : > { %v17605_v30 = vpop.eup %10230  ;;  %v7707_v63 = vmax.f32 %v17449_v53, %v17603_v15  ;;  %v17623_v22 = vmax.f32 %v19494_v55, %v7013_v33  ;;  %v19495_v38 = vmax.f32 %v17321_v44, %v17328_v31  ;;  %v9486_v55 = vpop.f32.mrf.mxu2 }
 0x978   : > { %v8924_v16 = vmul.f32 1.442695, %v8913_v50  ;;  %v8949_v54 = vsel %vm4925_vm2, %v17605_v30, 0.0  ;;  %v17618_v6 = vpop.eup %10232  ;;  %v17634_v29 = vadd.f32 %v17503_v36, %v9467_v51  ;;  %v9564_v13 = vsel %vm4925_vm2, %v17631_v62, -inf }
 0x979   : > { %8950 = vadd.xlane.f32.xlu2 %v8949_v54  ;;  %9550 = vmax.xlane.f32.xlu1 %v9549_v21  ;;  %v8937_v60 = vsel %vm4925_vm2, %v17618_v6, 0.0  ;;  %v9396_v50 = vadd.f32 %v17535_v27, %v9326_v43 }
 0x97a   : > { %10234 = vpow2.f32 %v8924_v16  ;;  %8938 = vadd.xlane.f32.xlu0 %v8937_v60  ;;  %v9552_v49 = vsel %vm4925_vm2, %v17634_v29, -inf }
 0x97b   : > { %v9475_v18 = vadd.f32 %v17537_v4, %v9396_v50  ;;  %v9331_v4 = vadd.f32 %v17563_v24, %v17323_v12  ;;  %v9413_v12 = vpop.f32.mrf.mxu1  ;;  %v9341_v24 = vadd.f32 %v9340_v23, %v17376_v48 }
 0x97d   : > { %v7019_v35 = vpop.xlane.xlu1 %7018  ;;  %v17655_v27 = vadd.f32 %v17543_v25, %v9475_v18  ;;  %v9402_v58 = vadd.f32 %v17571_v7, %v9331_v4  ;;  %v9414_v21 = vadd.f32 %v9413_v12, %v9341_v24  ;;  %v19498_v18 = vld [vmem:[#allocation63_spill] sm:$0xff]  ;;  %v19501_v24 = vld [vmem:[#allocation60_spill] sm:$0xff] }
 0x97e   : > { %v8900_v41 = vpop.xlane.xlu0 %8899  ;;  %v17646_v37 = vmax.f32 %v19495_v38, %v7019_v35  ;;  %v19497_v35 = vld [vmem:[#allocation104_spill] sm:$0xff] }
 0x97f   : > { %v8914_v36 = vsub.f32 %v17401_v45, %v8900_v41  ;;  %v9558_v16 = vsel %vm4925_vm2, %v17655_v27, -inf  ;;  %v9479_v47 = vadd.f32 %v17576_v52, %v9402_v58  ;;  %v9487_v17 = vadd.f32 %v9486_v55, %v9414_v21 }
 0x980   : > { %v17638_v61 = vpop.eup %10234 }
 0x981   : > { %v8943_v28 = vsel %vm4925_vm2, %v17638_v61, 0.0  ;;  %9565 = vmax.xlane.f32.xlu2 %v9564_v13  ;;  %v8926_v20 = vmul.f32 1.442695, %v8914_v36  ;;  %v17675_v54 = vadd.f32 %v17586_v39, %v9479_v47  ;;  %v9543_v39 = vpop.f32.mrf.mxu3  ;;  %v19500_v47 = vld [vmem:[#allocation65_spill] sm:$0xff] }
 0x982   : > { %8944 = vadd.xlane.f32.xlu1 %v8943_v28  ;;  %9553 = vmax.xlane.f32.xlu0 %v9552_v49  ;;  %v17685_v51 = vadd.f32 %v9543_v39, %v9487_v17 }
 0x983   : > { %10236 = vpow2.f32 %v8926_v20  ;;  %v9561_v52 = vsel %vm4925_vm2, %v17675_v54, -inf }
 0x984   : > { %v9567_v13 = vsel %vm4925_vm2, %v17685_v51, -inf }
 0x985   : > { %v8906_v44 = vpop.xlane.xlu1 %8905 }
 0x986   : > { %v7022_v31 = vpop.xlane.xlu0 %7021  ;;  %v8916_v45 = vsub.f32 %v17416_v46, %v8906_v44 }
 0x987   : > { %v17661_v42 = vmax.f32 %v19496_v0, %v7022_v31 }
 0x988   : > { %v8930_v33 = vmul.f32 1.442695, %v8916_v45  ;;  %v19499_v45 = vld [vmem:[#allocation78_spill] sm:$0xff] }
 0x989   : > { %7675 = vadd.xlane.f32.xlu2 %v17500_v56  ;;  %v17668_v25 = vpop.eup %10236 }
 0x98a   : > { %9559 = vmax.xlane.f32.xlu1 %v9558_v16  ;;  %v8946_v46 = vsel %vm4925_vm2, %v17668_v25, 0.0  ;;  %10238 = vpow2.f32 %v8930_v33 }
 0x98b   : > { %8947 = vadd.xlane.f32.xlu0 %v8946_v46 }
 0x98d   : > { %v8282_v56 = vpop.xlane.xlu1 %8281 }
 0x98e   : > { %v8909_v19 = vpop.xlane.xlu0 %8908  ;;  %10240 = vrcp.f32 %v8282_v56 }
 0x98f   : > { %v8917_v41 = vsub.f32 %v19497_v35, %v8909_v19 }
 0x990   : > { %v17679_v7 = vpop.eup %10238 }
 0x991   : > { %7684 = vadd.xlane.f32.xlu2 %v17569_v2  ;;  %v8952_v26 = vsel %vm4925_vm2, %v17679_v7, 0.0  ;;  %v8932_v38 = vmul.f32 1.442695, %v8917_v41 }
 0x992   : > { %8953 = vadd.xlane.f32.xlu1 %v8952_v26 }
 0x993   : > { %9562 = vmax.xlane.f32.xlu0 %v9561_v52 }
 0x994   : > { %v10241_v60 = vpop.eup %10240 }
 0x995   : > { %v8308_v48 = vmul.f32 %v10241_v60, %v17431_v5  ;;  %v19502_v60 = vld [vmem:[#allocation24_spill] sm:$0xff] }
 0x996   : > { %v8276_v2 = vpop.xlane.xlu0 %8275 }
 0x997   : > { %10242 = vrcp.f32 %v8276_v2  ;;  %v8316_v43 = vand.u32 2147483647, %v8308_v48 }
 0x999   : > { %v8328_v50 = vsel %vm4925_vm2, %v8316_v43, 0.0 }
 0x99a   : > { %9568 = vmax.xlane.f32.xlu1 %v9567_v13  ;;  %8329 = vadd.xlane.f32.xlu2 %v8328_v50 }
 0x99b   : > { %7672 = vadd.xlane.f32.xlu0 %v17494_v1 }
 0x99d   : > { %v10243_v28 = vpop.eup %10242 }
 0x99e   : > { %v8279_v36 = vpop.xlane.xlu2 %8278  ;;  %v17693_v49 = vpop.xlane.xlu0 %7663  ;;  %v8306_v20 = vmul.f32 %v10243_v28, %v19498_v18  ;;  %v19504_v18 = vld [vmem:[#allocation18_spill] sm:$0xff] }
 0x99f   : > { %10244 = vrcp.f32 %v8279_v36  ;;  %v7686_v5 = vmax.f32 %v17558_v40, %v17693_v49 }
 0x9a0   : > { %10246 = vpow2.f32 %v8932_v38  ;;  %v8314_v1 = vand.u32 2147483647, %v8306_v20  ;;  %v19503_v38 = vld [vmem:[#allocation25_spill] sm:$0xff] }
 0x9a2   : > { %7669 = vadd.xlane.f32.xlu1 %v17482_v9  ;;  %v8322_v58 = vsel %vm4925_vm2, %v8314_v1, 0.0 }
 0x9a3   : > { %7681 = vadd.xlane.f32.xlu0 %v17561_v3 }
 0x9a5   : > { %v10245_v44 = vpop.eup %10244 }
 0x9a6   : > { %v17700_v31 = vpop.xlane.xlu2 %7666  ;;  %v8307_v0 = vmul.f32 %v10245_v44, %v19499_v45  ;;  %v17705_v4 = vpop.eup %10246  ;;  %v19505_v44 = vld [vmem:[#allocation43_spill] sm:$0xff] }
 0x9a7   : > { %v7687_v16 = vmax.f32 %v17514_v11, %v17700_v31  ;;  %v8955_v9 = vsel %vm4925_vm2, %v17705_v4, 0.0  ;;  %v19506_v45 = vld [vmem:[#allocation83_spill] sm:$0xff] }
 0x9a8   : > { %v8315_v33 = vand.u32 2147483647, %v8307_v0 }
 0x9aa   : > { %v8325_v46 = vsel %vm4925_vm2, %v8315_v33, 0.0  ;;  %7678 = vadd.xlane.f32.xlu1 %v19500_v47 }
 0x9ab   : > { %v8354_v3 = vadd.f32 %v8325_v46, %v8322_v58  ;;  %8956 = vadd.xlane.f32.xlu0 %v8955_v9 }
 0x9ad   : > { %v8355_v23 = vadd.f32 %v8354_v3, %v8328_v50 }
 0x9b2   : > { %8323 = vadd.xlane.f32.xlu1 %v8322_v58 }
 0x9b3   : > { %8326 = vadd.xlane.f32.xlu0 %v8325_v46 }
 0x9b8   : > { %v8288_v19 = vpop.xlane.xlu2 %8287 }
 0x9b9   : > { %v8285_v56 = vpop.xlane.xlu0 %8284 }
 0x9ba   : > { %10248 = vrcp.f32 %v8285_v56 }
 0x9bb   : > { %10250 = vrcp.f32 %v8288_v19 }
 0x9c0   : > { %v10249_v12 = vpop.eup %10248 }
 0x9c1   : > { %v8309_v55 = vmul.f32 %v10249_v12, %v19501_v24  ;;  %v10251_v26 = vpop.eup %10250 }
 0x9c2   : > { %v8310_v2 = vmul.f32 %v10251_v26, %v19502_v60 }
 0x9c3   : > { %v8317_v17 = vand.u32 2147483647, %v8309_v55 }
 0x9c4   : > { %v8318_v13 = vand.u32 2147483647, %v8310_v2 }
 0x9c5   : > { %v17715_v48 = vsel %vm4925_vm2, %v8317_v17, 0.0 }
 0x9c6   : > { %v8356_v28 = vadd.f32 %v8355_v23, %v17715_v48  ;;  %v17723_v46 = vsel %vm4925_vm2, %v8318_v13, 0.0 }
 0x9c8   : > { %v8297_v21 = vpop.xlane.xlu2 %8296  ;;  %v8357_v3 = vadd.f32 %v8356_v28, %v17723_v46 }
 0x9c9   : > { %v8294_v52 = vpop.xlane.xlu0 %8293  ;;  %10252 = vrcp.f32 %v8297_v21 }
 0x9ca   : > { %v8291_v39 = vpop.xlane.xlu1 %8290  ;;  %10254 = vrcp.f32 %v8294_v52 }
 0x9cb   : > { %10256 = vrcp.f32 %v8291_v39 }
 0x9cf   : > { %v10253_v43 = vpop.eup %10252 }
 0x9d0   : > { %v10255_v35 = vpop.eup %10254  ;;  %v9548_v41 = vpop.xlane.xlu2 %9547  ;;  %v8313_v0 = vmul.f32 %v10253_v43, %v19506_v45 }
 0x9d1   : > { %v10257_v50 = vpop.eup %10256  ;;  %v9570_v36 = vsub.f32 %v19503_v38, %v9548_v41  ;;  %v8312_v20 = vmul.f32 %v10255_v35, %v19504_v18 }
 0x9d2   : > { %v8311_v1 = vmul.f32 %v10257_v50, %v19505_v44  ;;  %v8321_v56 = vand.u32 2147483647, %v8313_v0 }
 0x9d3   : > { %v9578_v33 = vmul.f32 1.442695, %v9570_v36  ;;  %v8320_v9 = vand.u32 2147483647, %v8312_v20 }
 0x9d4   : > { %v8319_v58 = vand.u32 2147483647, %v8311_v1  ;;  %v17735_v24 = vsel %vm4925_vm2, %v8321_v56, 0.0 }
 0x9d5   : > { %10258 = vpow2.f32 %v9578_v33  ;;  %v17731_v19 = vsel %vm4925_vm2, %v8320_v9, 0.0 }
 0x9d6   : > { %v17727_v47 = vsel %vm4925_vm2, %v8319_v58, 0.0 }
 0x9d7   : > { %v8358_v23 = vadd.f32 %v8357_v3, %v17727_v47 }
 0x9d9   : > { %v8359_v12 = vadd.f32 %v8358_v23, %v17731_v19 }
 0x9db   : > { %v17737_v55 = vpop.eup %10258  ;;  %v8942_v21 = vpop.xlane.xlu2 %8941  ;;  %v8360_v26 = vadd.f32 %v8359_v12, %v17735_v24 }
 0x9dc   : > { %v9594_v52 = vsel %vm4925_vm2, %v17737_v55, 0.0 }
 0x9dd   : > { %9595 = vadd.xlane.f32.xlu2 %v9594_v52  ;;  %v8361_v39 = vrot.slane %v8360_v26, 4 }
 0x9df   : > { %v8362_v17 = vadd.f32 %v8361_v39, %v8360_v26 }
 0x9e1   : > { %v8363_v60 = vrot.slane %v8362_v17, 2 }
 0x9e3   : > { %v9557_v2 = vpop.xlane.xlu2 %9556  ;;  %v8364_v43 = vadd.f32 %v8363_v60, %v8362_v17 }
 0x9e4   : > { %v8936_v35 = vpop.xlane.xlu1 %8935  ;;  %v9573_v41 = vsub.f32 %v17574_v59, %v9557_v2 }
 0x9e5   : > { %v8365_v13 = vrot.slane %v8364_v43, 1  ;;  %10260 = vrcp.f32 %v8936_v35 }
 0x9e6   : > { %v9584_v50 = vmul.f32 1.442695, %v9573_v41 }
 0x9e7   : > { %v8366_v38 = vadd.f32 %v8365_v13, %v8364_v43 }
 0x9e8   : > { %10262 = vpow2.f32 %v9584_v50 }
 0x9e9   : > { %v17746_v36 = vmax.f32 %v7707_v63, %v8366_v38  ;;  %10264 = vrcp.f32 %v8942_v21 }
 0x9eb   : > { %v10261_v20 = vpop.eup %10260 }
 0x9ec   : > { %v8951_v28 = vpop.xlane.xlu2 %8950  ;;  %v9551_v18 = vpop.xlane.xlu1 %9550  ;;  %v8966_v53 = vmul.f32 %v10261_v20, %v17589_v34 }
 0x9ed   : > { %v9571_v44 = vsub.f32 %v17600_v10, %v9551_v18  ;;  %v8939_v1 = vpop.xlane.xlu0 %8938 }
 0x9ee   : > { %v17749_v45 = vpop.eup %10262  ;;  %10266 = vrcp.f32 %v8939_v1  ;;  %v8974_v56 = vand.u32 2147483647, %v8966_v53 }
 0x9ef   : > { %v9580_v59 = vmul.f32 1.442695, %v9571_v44  ;;  %v9603_v0 = vsel %vm4925_vm2, %v17749_v45, 0.0  ;;  %v10265_v33 = vpop.eup %10264 }
 0x9f0   : > { %9604 = vadd.xlane.f32.xlu2 %v9603_v0  ;;  %v8968_v63 = vmul.f32 %v10265_v33, %v17553_v32 }
 0x9f1   : > { %10268 = vpow2.f32 %v9580_v59 }
 0x9f2   : > { %v8976_v52 = vand.u32 2147483647, %v8968_v63 }
 0x9f4   : > { %v9566_v15 = vpop.xlane.xlu2 %9565  ;;  %v10267_v58 = vpop.eup %10266  ;;  %v17770_v2 = vsel %vm4925_vm2, %v8976_v52, 0.0 }
 0x9f5   : > { %v8945_v9 = vpop.xlane.xlu1 %8944  ;;  %v9576_v10 = vsub.f32 %v17631_v62, %v9566_v15  ;;  %v9554_v3 = vpop.xlane.xlu0 %9553  ;;  %v8967_v23 = vmul.f32 %v10267_v58, %v17618_v6  ;;  %v8982_v62 = vsel %vm4925_vm2, %v8974_v56, 0.0 }
 0x9f6   : > { %10270 = vrcp.f32 %v8945_v9  ;;  %v9572_v12 = vsub.f32 %v17634_v29, %v9554_v3 }
 0x9f7   : > { %v9590_v21 = vmul.f32 1.442695, %v9576_v10  ;;  %v17758_v26 = vpop.eup %10268  ;;  %v8975_v39 = vand.u32 2147483647, %v8967_v23 }
 0x9f8   : > { %v9582_v34 = vmul.f32 1.442695, %v9572_v12  ;;  %v9597_v32 = vsel %vm4925_vm2, %v17758_v26, 0.0 }
 0x9f9   : > { %10272 = vpow2.f32 %v9590_v21  ;;  %9598 = vadd.xlane.f32.xlu1 %v9597_v32  ;;  %v17764_v17 = vsel %vm4925_vm2, %v8975_v39, 0.0 }
 0x9fa   : > { %10274 = vpow2.f32 %v9582_v34  ;;  %v9014_v6 = vadd.f32 %v17764_v17, %v8982_v62 }
 0x9fb   : > { %10276 = vrcp.f32 %v8951_v28 }
 0x9fc   : > { %v10271_v29 = vpop.eup %10270  ;;  %v17767_v60 = vpop.xlane.xlu2 %7675  ;;  %v9015_v13 = vadd.f32 %v9014_v6, %v17770_v2 }
 0x9fd   : > { %v9560_v43 = vpop.xlane.xlu1 %9559  ;;  %v7690_v35 = vmax.f32 %v17548_v8, %v17767_v60  ;;  %v8969_v41 = vmul.f32 %v10271_v29, %v17638_v61 }
 0x9fe   : > { %v9574_v50 = vsub.f32 %v17655_v27, %v9560_v43  ;;  %v8948_v44 = vpop.xlane.xlu0 %8947 }
 0x9ff   : > { %v17777_v38 = vpop.eup %10272  ;;  %v8977_v18 = vand.u32 2147483647, %v8969_v41  ;;  %10278 = vrcp.f32 %v8948_v44 }
 0xa00   : > { %v9586_v20 = vmul.f32 1.442695, %v9574_v50  ;;  %v9612_v1 = vsel %vm4925_vm2, %v17777_v38, 0.0  ;;  %v17781_v59 = vpop.eup %10274 }
 0xa01   : > { %9613 = vadd.xlane.f32.xlu2 %v9612_v1  ;;  %v8991_v28 = vsel %vm4925_vm2, %v8977_v18, 0.0  ;;  %v9600_v61 = vsel %vm4925_vm2, %v17781_v59, 0.0  ;;  %v10277_v27 = vpop.eup %10276 }
 0xa02   : > { %10280 = vpow2.f32 %v9586_v20  ;;  %v9016_v0 = vadd.f32 %v9015_v13, %v8991_v28  ;;  %9601 = vadd.xlane.f32.xlu0 %v9600_v61  ;;  %v8971_v15 = vmul.f32 %v10277_v27, %v17605_v30 }
 0xa04   : > { %v17786_v33 = vpop.xlane.xlu2 %7684  ;;  %v8979_v12 = vand.u32 2147483647, %v8971_v15 }
 0xa05   : > { %v7693_v53 = vmax.f32 %v17612_v57, %v17786_v33  ;;  %v10279_v63 = vpop.eup %10278  ;;  %v8954_v9 = vpop.xlane.xlu1 %8953 }
 0xa06   : > { %v9563_v10 = vpop.xlane.xlu0 %9562  ;;  %v8970_v3 = vmul.f32 %v10279_v63, %v17668_v25  ;;  %10282 = vrcp.f32 %v8954_v9  ;;  %v8997_v34 = vsel %vm4925_vm2, %v8979_v12, 0.0 }
 0xa07   : > { %v9575_v56 = vsub.f32 %v17675_v54, %v9563_v10 }
 0xa08   : > { %v17791_v58 = vpop.eup %10280  ;;  %v8978_v21 = vand.u32 2147483647, %v8970_v3 }
 0xa09   : > { %v9606_v23 = vsel %vm4925_vm2, %v17791_v58, 0.0  ;;  %8338 = vadd.xlane.f32.xlu2 %v17727_v47  ;;  %v9588_v52 = vmul.f32 1.442695, %v9575_v56 }
 0xa0a   : > { %9607 = vadd.xlane.f32.xlu1 %v9606_v23  ;;  %v8994_v30 = vsel %vm4925_vm2, %v8978_v21, 0.0 }
 0xa0b   : > { %10284 = vpow2.f32 %v9588_v52  ;;  %v9017_v39 = vadd.f32 %v9016_v0, %v8994_v30 }
 0xa0c   : > { %v10283_v32 = vpop.eup %10282 }
 0xa0d   : > { %v9018_v25 = vadd.f32 %v9017_v39, %v8997_v34  ;;  %v9569_v6 = vpop.xlane.xlu1 %9568  ;;  %v8972_v54 = vmul.f32 %v10283_v32, %v17679_v7  ;;  %v8330_v61 = vpop.xlane.xlu2 %8329 }
 0xa0e   : > { %v17800_v29 = vpop.xlane.xlu0 %7672  ;;  %v9577_v43 = vsub.f32 %v17685_v51, %v9569_v6 }
 0xa0f   : > { %v7689_v47 = vmax.f32 %v17623_v22, %v17800_v29  ;;  %v8980_v41 = vand.u32 2147483647, %v8972_v54 }
 0xa10   : > { %v9592_v50 = vmul.f32 1.442695, %v9577_v43 }
 0xa11   : > { %8983 = vadd.xlane.f32.xlu2 %v8982_v62  ;;  %v17806_v13 = vpop.eup %10284  ;;  %v9000_v20 = vsel %vm4925_vm2, %v8980_v41, 0.0 }
 0xa12   : > { %v9609_v18 = vsel %vm4925_vm2, %v17806_v13, 0.0  ;;  %10286 = vpow2.f32 %v9592_v50  ;;  %v9019_v44 = vadd.f32 %v9018_v25, %v9000_v20 }
 0xa13   : > { %9610 = vadd.xlane.f32.xlu0 %v9609_v18 }
 0xa15   : > { %v7670_v1 = vpop.xlane.xlu1 %7669 }
 0xa16   : > { %v17811_v7 = vpop.xlane.xlu0 %7681  ;;  %v7688_v51 = vmax.f32 %v17582_v14, %v7670_v1 }
 0xa17   : > { %v7692_v62 = vmax.f32 %v17661_v42, %v17811_v7 }
 0xa18   : > { %v17816_v0 = vpop.eup %10286  ;;  %v17818_v27 = vmax.f32 %v7688_v51, %v8330_v61 }
 0xa19   : > { %8992 = vadd.xlane.f32.xlu2 %v8991_v28  ;;  %v9615_v15 = vsel %vm4925_vm2, %v17816_v0, 0.0 }
 0xa1a   : > { %9616 = vadd.xlane.f32.xlu1 %v9615_v15 }
 0xa1b   : > { %8335 = vadd.xlane.f32.xlu0 %v17723_v46 }
 0xa1d   : > { %v17823_v63 = vpop.xlane.xlu1 %7678 }
 0xa1e   : > { %v8957_v9 = vpop.xlane.xlu0 %8956  ;;  %v7691_v14 = vmax.f32 %v17646_v37, %v17823_v63 }
 0xa1f   : > { %10288 = vrcp.f32 %v8957_v9 }
 0xa21   : > { %9001 = vadd.xlane.f32.xlu2 %v9000_v20 }
 0xa22   : > { %8332 = vadd.xlane.f32.xlu1 %v17715_v48 }
 0xa23   : > { %8344 = vadd.xlane.f32.xlu0 %v17735_v24 }
 0xa25   : > { %v10289_v28 = vpop.eup %10288 }
 0xa26   : > { %v8973_v10 = vmul.f32 %v10289_v28, %v17705_v4  ;;  %v17843_v41 = vpop.xlane.xlu0 %8326 }
 0xa28   : > { %v8981_v3 = vand.u32 2147483647, %v8973_v10 }
 0xa2a   : > { %v9003_v56 = vsel %vm4925_vm2, %v8981_v3, 0.0  ;;  %8341 = vadd.xlane.f32.xlu1 %v17731_v19 }
 0xa2b   : > { %8989 = vadd.xlane.f32.xlu0 %v17770_v2  ;;  %v9020_v46 = vadd.f32 %v9019_v44, %v9003_v56 }
 0xa2d   : > { %v9021_v23 = vrot.slane %v9020_v46, 4 }
 0xa2f   : > { %v9022_v12 = vadd.f32 %v9021_v23, %v9020_v46 }
 0xa31   : > { %v9023_v21 = vrot.slane %v9022_v12, 2 }
 0xa32   : > { %8986 = vadd.xlane.f32.xlu1 %v17764_v17 }
 0xa33   : > { %8998 = vadd.xlane.f32.xlu0 %v8997_v34  ;;  %v9024_v48 = vadd.f32 %v9023_v21, %v9022_v12  ;;  %v17840_v34 = vpop.xlane.xlu1 %8323 }
 0xa35   : > { %v9025_v52 = vrot.slane %v9024_v48, 1 }
 0xa37   : > { %v17834_v24 = vadd.f32 %v9025_v52, %v9024_v48 }
 0xa39   : > { %v9027_v4 = vmax.f32 %v17746_v36, %v17834_v24 }
 0xa3a   : > { %8995 = vadd.xlane.f32.xlu1 %v8994_v30 }
 0xa42   : > { %9004 = vadd.xlane.f32.xlu1 %v9003_v56 }
 0xa50   : > { %v9596_v39 = vpop.xlane.xlu2 %9595 }
 0xa51   : > { %10290 = vrcp.f32 %v9596_v39 }
 0xa57   : > { %v10291_v19 = vpop.eup %10290 }
 0xa58   : > { %v9626_v2 = vmul.f32 %v10291_v19, %v17737_v55 }
 0xa5a   : > { %v9634_v32 = vand.u32 2147483647, %v9626_v2 }
 0xa5c   : > { %v9642_v25 = vsel %vm4925_vm2, %v9634_v32, 0.0 }
 0xa5d   : > { %9643 = vadd.xlane.f32.xlu0 %v9642_v25 }
 0xa63   : > { %v9605_v17 = vpop.xlane.xlu2 %9604 }
 0xa64   : > { %10292 = vrcp.f32 %v9605_v17 }
 0xa6a   : > { %v10293_v6 = vpop.eup %10292 }
 0xa6b   : > { %v9629_v54 = vmul.f32 %v10293_v6, %v17749_v45 }
 0xa6c   : > { %v9599_v43 = vpop.xlane.xlu1 %9598 }
 0xa6d   : > { %10294 = vrcp.f32 %v9599_v43  ;;  %v9637_v30 = vand.u32 2147483647, %v9629_v54 }
 0xa6f   : > { %v9651_v50 = vsel %vm4925_vm2, %v9637_v30, 0.0 }
 0xa70   : > { %9652 = vadd.xlane.f32.xlu0 %v9651_v50 }
 0xa73   : > { %v10295_v55 = vpop.eup %10294 }
 0xa74   : > { %v9614_v18 = vpop.xlane.xlu2 %9613  ;;  %v9627_v20 = vmul.f32 %v10295_v55, %v17758_v26 }
 0xa75   : > { %10296 = vrcp.f32 %v9614_v18  ;;  %v9602_v44 = vpop.xlane.xlu0 %9601 }
 0xa76   : > { %10298 = vrcp.f32 %v9602_v44  ;;  %v9635_v1 = vand.u32 2147483647, %v9627_v20 }
 0xa78   : > { %v9645_v51 = vsel %vm4925_vm2, %v9635_v1, 0.0 }
 0xa79   : > { %9646 = vadd.xlane.f32.xlu2 %v9645_v51 }
 0xa7b   : > { %v10297_v45 = vpop.eup %10296 }
 0xa7c   : > { %v9632_v61 = vmul.f32 %v10297_v45, %v17777_v38  ;;  %v10299_v15 = vpop.eup %10298 }
 0xa7d   : > { %v9608_v9 = vpop.xlane.xlu1 %9607  ;;  %v9628_v28 = vmul.f32 %v10299_v15, %v17781_v59  ;;  %v9674_v59 = vadd.f32 %v9645_v51, %v9642_v25 }
 0xa7e   : > { %10300 = vrcp.f32 %v9608_v9  ;;  %v9640_v10 = vand.u32 2147483647, %v9632_v61 }
 0xa7f   : > { %v9636_v3 = vand.u32 2147483647, %v9628_v28 }
 0xa80   : > { %v9660_v56 = vsel %vm4925_vm2, %v9640_v10, 0.0 }
 0xa81   : > { %9661 = vadd.xlane.f32.xlu0 %v9660_v56  ;;  %v9648_v26 = vsel %vm4925_vm2, %v9636_v3, 0.0 }
 0xa82   : > { %9649 = vadd.xlane.f32.xlu1 %v9648_v26  ;;  %v9675_v52 = vadd.f32 %v9674_v59, %v9648_v26 }
 0xa84   : > { %v10301_v46 = vpop.eup %10300  ;;  %v9676_v25 = vadd.f32 %v9675_v52, %v9651_v50 }
 0xa85   : > { %v9630_v23 = vmul.f32 %v10301_v46, %v17791_v58 }
 0xa86   : > { %v9611_v38 = vpop.xlane.xlu0 %9610 }
 0xa87   : > { %v9638_v12 = vand.u32 2147483647, %v9630_v23  ;;  %10302 = vrcp.f32 %v9611_v38 }
 0xa89   : > { %v9654_v21 = vsel %vm4925_vm2, %v9638_v12, 0.0 }
 0xa8a   : > { %9655 = vadd.xlane.f32.xlu2 %v9654_v21 }
 0xa8d   : > { %v10303_v48 = vpop.eup %10302  ;;  %v9617_v39 = vpop.xlane.xlu1 %9616 }
 0xa8e   : > { %v8336_v19 = vpop.xlane.xlu0 %8335  ;;  %v9631_v2 = vmul.f32 %v10303_v48, %v17806_v13  ;;  %10304 = vrcp.f32 %v9617_v39  ;;  %v9677_v13 = vadd.f32 %v9676_v25, %v9654_v21 }
 0xa8f   : > { %v17859_v58 = vmax.f32 %v7690_v35, %v8336_v19 }
 0xa90   : > { %v9639_v32 = vand.u32 2147483647, %v9631_v2 }
 0xa92   : > { %v9657_v17 = vsel %vm4925_vm2, %v9639_v32, 0.0 }
 0xa93   : > { %9658 = vadd.xlane.f32.xlu1 %v9657_v17 }
 0xa94   : > { %10455 = shalt.err (!%p10452_p11)
}
 0xa95   : > { %s10551_s23 = smov 384   ;;  %s10552_s30 = smov 24   ;;  %v10305_v8 = vpop.eup %10304  ;;  %v9678_v60 = vadd.f32 %v9677_v13, %v9657_v17  ;;  %vm9697_vm3 = vcmask 516096  }
 0xa96   : > { %9932 = dma.vmem_to_hbm [thread:$0]  (%p10678_p3), %s9722_s10, 6144, %s9724_s16, %s9700_s22, %s10551_s23, %s10551_s23, %s10552_s30   ;;  %v8345_v35 = vpop.xlane.xlu0 %8344  ;;  %v9633_v6 = vmul.f32 %v10305_v8, %v17816_v0 }
 0xa97   : > { %v17881_v54 = vmax.f32 %v7693_v53, %v8345_v35  ;;  %v9679_v30 = vadd.f32 %v9678_v60, %v9660_v56  ;;  %s9738_s10 = scalar_lea.hbm %s17971_s7, %s10614_s28  ;;  %s363_s16 = scalar_lea.vmem [#allocation11], %s10708_s21 }
 0xa98   : > { %v9641_v43 = vand.u32 2147483647, %v9633_v6  ;;  %s9740_s22 = sshll.u32 %s363_s16, 4  ;;  %s9742_s29 = sshll.u32 %s9738_s10, 4  ;;  %s9741_s22 = int_to_ptr.vmem [resolvable:$true] %s9740_s22  ;;  %s9743_s29 = int_to_ptr.hbm [resolvable:$true] %s9742_s29 }
 0xa99   : > { %s9710_s9 = scalar_lea.sflag [#allocation12], %s10708_s21  ;;  %s10470_s18 = sshra.s32 %s9743_s29, 4  ;;  %s10471_s18 = int_to_ptr.hbm [resolvable:$true] %s10470_s18 }
 0xa9a   : > { %v9663_v50 = vsel %vm4925_vm2, %v9641_v43, 0.0  ;;  %s10472_s11 = scalar_lea.hbm %s10471_s18, 1  ;;  %s10476_s1 = scalar_lea.hbm %s17971_s7, 2 }
 0xa9b   : > { %9664 = vadd.xlane.f32.xlu2 %v9663_v50  ;;  %v9680_v55 = vadd.f32 %v9679_v30, %v9663_v50  ;;  %p10473_p12 = scmp.ne.s32.totalorder %s10471_s18, %s10472_s11  ;;  %p10477_p5 = scmp.lt.s32.totalorder %s10471_s18, %s17971_s7 }
 0xa9c   : > { %p10478_p7 = scmp.lt.s32.totalorder %s10476_s1, %s10472_s11 }
 0xa9d   : > { %v9681_v18 = vrot.slane %v9680_v55, 4  ;;  %p10474_p13 = pnand %p10473_p12, %p10678_p3 }
 0xa9e   : > { %p10479_p1 = por %p10478_p7, %p10477_p5 }
 0xa9f   : > { %v9682_v20 = vadd.f32 %v9681_v18, %v9680_v55  ;;  %p10475_p0 = pneg %p10474_p13 }
 0xaa1   : > { %v9683_v44 = vrot.slane %v9682_v20, 2  ;;  %p10480_p4 = pnand %p10479_p1, %p10475_p0 }
 0xaa3   : > { %v9684_v1 = vadd.f32 %v9683_v44, %v9682_v20 }
 0xaa5   : > { %v9685_v0 = vrot.slane %v9684_v1, 1 }
 0xaa7   : > { %v9686_v57 = vadd.f32 %v9685_v0, %v9684_v1 }
 0xaa9   : > { %v9687_v33 = vmax.f32 %v9027_v4, %v9686_v57 }
 0xaab   : > { %9698 = vst.msk [vmem:[%s363_s16] sm:$0x1] %vm9697_vm3, %v9687_v33 }
 0xaac   : > { %10483 = shalt.err (!%p10480_p4)
}
 0xaad   : > { %9933 = dma.vmem_to_hbm [thread:$0]  (%p10678_p3), %s9741_s22, 16, %s9743_s29, %s9710_s9   ;;  %v8990_v36 = vpop.xlane.xlu0 %8989  ;;  %v8339_v53 = vpop.xlane.xlu2 %8338  ;;  %v8346_v45 = vmax.f32 %v7686_v5, %v17840_v34  ;;  %vm9688_vm4 = vcmask 7168   ;;  %v8347_v46 = vmax.f32 %v7687_v16, %v17843_v41 }
 0xaae   : > { %v8333_v24 = vpop.xlane.xlu1 %8332  ;;  %p364_p8 = scmp.lt.s32.totalorder %s10614_s28, 1  ;;  %v9008_v59 = vmax.f32 %v17818_v27, %v8990_v36  ;;  %v8351_v7 = vmax.f32 %v7691_v14, %v8339_v53 }
 0xaaf   : > { %v8349_v40 = vmax.f32 %v7689_v47, %v8333_v24 }
 0xab0   : > { %s19513_s28 = smov (!%p364_p8, %s10614_s28), 1 }
 0xab1   : > { %s9915_s21 = sshll.u32 %s19513_s28, 6 }
 0xab2   : > { %s17912_s13 = scalar_lea.vmem %s17970_s6, %s9915_s21 }
 0xab5   : > { %v8999_v4 = vpop.xlane.xlu0 %8998  ;;  %v8984_v51 = vpop.xlane.xlu2 %8983 }
 0xab6   : > { %v9006_v61 = vmax.f32 %v8346_v45, %v8984_v51  ;;  %v8342_v15 = vpop.xlane.xlu1 %8341 }
 0xab7   : > { %v8352_v29 = vmax.f32 %v7692_v62, %v8342_v15  ;;  %v9011_v62 = vmax.f32 %v8351_v7, %v8999_v4 }
 0xabd   : > { %v8993_v3 = vpop.xlane.xlu2 %8992 }
 0xabe   : > { %v8987_v10 = vpop.xlane.xlu1 %8986  ;;  %v9009_v49 = vmax.f32 %v8349_v40, %v8993_v3 }
 0xabf   : > { %v9007_v23 = vmax.f32 %v8347_v46, %v8987_v10 }
 0xac5   : > { %v9002_v56 = vpop.xlane.xlu2 %9001 }
 0xac6   : > { %v8996_v5 = vpop.xlane.xlu1 %8995  ;;  %v9012_v47 = vmax.f32 %v8352_v29, %v9002_v56 }
 0xac7   : > { %v9010_v31 = vmax.f32 %v17859_v58, %v8996_v5 }
 0xace   : > { %v9005_v38 = vpop.xlane.xlu1 %9004 }
 0xacf   : > { %v9013_v39 = vmax.f32 %v17881_v54, %v9005_v38 }
 0xad0   : > { %v9644_v9 = vpop.xlane.xlu0 %9643 }
 0xad1   : > { %v9666_v28 = vmax.f32 %v9006_v61, %v9644_v9 }
 0xad3   : > { %9689 = vst.msk [vmem:[%s17912_s13] sm:$0xff] %vm9688_vm4, %v9666_v28 }
 0xae3   : > { %v9653_v34 = vpop.xlane.xlu0 %9652 }
 0xae4   : > { %v9669_v26 = vmax.f32 %v9009_v49, %v9653_v34 }
 0xae6   : > { %9692 = vst.msk [vmem:[%s17912_s13 + $0x18] sm:$0xff] %vm9688_vm4, %v9669_v26 }
 0xaec   : > { %v9647_v12 = vpop.xlane.xlu2 %9646 }
 0xaed   : > { %v9667_v22 = vmax.f32 %v9007_v23, %v9647_v12 }
 0xaef   : > { %9690 = vst.msk [vmem:[%s17912_s13 + $0x8] sm:$0xff] %vm9688_vm4, %v9667_v22 }
 0xaf4   : > { %v9662_v21 = vpop.xlane.xlu0 %9661 }
 0xaf5   : > { %v9672_v48 = vmax.f32 %v9012_v47, %v9662_v21  ;;  %v9650_v52 = vpop.xlane.xlu1 %9649 }
 0xaf6   : > { %v9668_v11 = vmax.f32 %v9008_v59, %v9650_v52 }
 0xaf7   : > { %9695 = vst.msk [vmem:[%s17912_s13 + $0x30] sm:$0xff] %vm9688_vm4, %v9672_v48 }
 0xaf8   : > { %9691 = vst.msk [vmem:[%s17912_s13 + $0x10] sm:$0xff] %vm9688_vm4, %v9668_v11 }
 0xafd   : > { %v9656_v16 = vpop.xlane.xlu2 %9655 }
 0xafe   : > { %v9670_v42 = vmax.f32 %v9010_v31, %v9656_v16 }
 0xb00   : > { %9693 = vst.msk [vmem:[%s17912_s13 + $0x20] sm:$0xff] %vm9688_vm4, %v9670_v42 }
 0xb06   : > { %v9659_v27 = vpop.xlane.xlu1 %9658 }
 0xb07   : > { %v9671_v41 = vmax.f32 %v9011_v62, %v9659_v27 }
 0xb09   : > { %9694 = vst.msk [vmem:[%s17912_s13 + $0x28] sm:$0xff] %vm9688_vm4, %v9671_v41 }
 0xb0e   : > { %v9665_v19 = vpop.xlane.xlu2 %9664 }
 0xb0f   : > { %v9673_v2 = vmax.f32 %v9013_v39, %v9665_v19 }
 0xb11   : > { %9696 = vst.msk [vmem:[%s17912_s13 + $0x38] sm:$0xff] %vm9688_vm4, %v9673_v2 }
 0xb12 PF: > { %s9754_s28 = sand.u32 1, %s10522_s24   ;;  %p19507_p3 = scmp.ge.s32.totalorder %s10534_s27, 2 }
 0xb13   : > { %s9755_s10 = scalar_lea.sflag [#allocation4], %s9754_s28 }
 0xb14   : > { %p9951_p9 = pnand %p19507_p3, %p10628_p6 }
 0xb16   : > { %p9952_p10 = pneg %p9951_p9 }
 0xb18   : > { %10513 = dma.done.wait (%p9952_p10), %s9755_s10, 6144  }
 0xb19   : > { %10515 = vsyncadd (%p9952_p10), %s9755_s10, 4294961152  ;;  %s9773_s16 = scalar_lea.sflag [#allocation12], %s9754_s28 }
 0xb1a   : > { %10517 = dma.done.wait (%p9952_p10), %s9773_s16, 16  }
 0xb1b   : > { %10519 = vsyncadd (%p9952_p10), %s9773_s16, 4294967280  ;;  %p26_p2 = scmp.ge.s32.totalorder %s10665_s15, 4   ;;  %s19508_s24 = smov %s10526_s25 }
 0xb1c   : > { %s19509_s25 = smov %s10530_s26  ;;  %s19510_s26 = smov %s10674_s19 }
 0xb1d   : > { %s19511_s27 = smov %s10665_s15  ;;  %28 = sbr.rel (!%p26_p2) target bundleno = 11 (0xb), region = 126 }
 0xb22   :  { %9778 = vsyncpa [#allocation3], 1 }
 0xb23   :  { %9780 = vsyncpa [#allocation3 + $0x1], 1 }
 0xb24   :  { %9781 = vsyncpa [#allocation6], 1 }
 0xb25   :  { %9782 = vsyncpa [#allocation9], 1 }
 0xb26   :  { %9783 = vsyncpa [#allocation4], 1 }
 0xb27   :  { %9785 = vsyncpa [#allocation4 + $0x1], 1 }
 0xb28   :  { %9786 = vsyncpa [#allocation12], 1 }
 0xb29   :  { %9788 = vsyncpa [#allocation12 + $0x1], 1 }

</bundles_post_ra>
